<compile_context>
chip_gen: v7x
topology: tpu7x:2x2x1
jax: 0.10.0
libtpu: 0.0.40
codegen_flags: <defaults>
</compile_context>

<pallas_src>
import functools

import jax
import jax.numpy as jnp
from jax.experimental import pallas as pl
from jax.experimental.pallas import tpu as pltpu

# ------------------------------------------------------------------------- #
# Problem sizes (small, deterministic).                                      #
# ------------------------------------------------------------------------- #
CLIP_SIZE = 4          # frames per clip
NUM_CLIPS = 2          # batch of clips
CHANNELS = 3
SPATIAL = 16           # small stand-in for 224
NUM_FRAMES = NUM_CLIPS * CLIP_SIZE          # 8

TOOL_IN = 22000        # nn.Linear(22000, 512)
TOOL_HID = 512
TOOL_OUT = 512

# Lane-aligned padding of the 22000-dim reduction axis, tiled into 2 K-steps.
K_PAD = 22528          # 176 * 128
K_TILE = 11264         # 88 * 128 -> 2 K tiles (bf16 W1 tile 5.5 MiB, dbl-buf 11 MiB)
assert K_PAD % K_TILE == 0
NUM_K_TILES = K_PAD // K_TILE

# Split the hidden dim across a leading parallel grid axis (2 TCs on v7x).
HID_SPLIT = 2
HID_HALF = TOOL_HID // HID_SPLIT           # 256


# ------------------------------------------------------------------------- #
# Pallas kernel: per hidden-half  partial = ReLU(x @ W1_half + b1_half) @ W2_half
# Grid = (hidden_half [parallel], K-tile [arbitrary reduction]).
# ------------------------------------------------------------------------- #
def tool_proj_kernel(a_ref, w1_ref, b1_ref, w2_ref, o_ref, acc_ref):
    k = pl.program_id(1)

    @pl.when(k == 0)
    def _():
        # Fold the first-layer bias into the accumulator init.
        acc_ref[...] = jnp.zeros_like(acc_ref) + b1_ref[...]

    # First matmul, accumulated over K tiles (bf16 operands, f32 accumulation).
    acc_ref[...] += jnp.dot(
        a_ref[...], w1_ref[...], preferred_element_type=jnp.float32
    )

    @pl.when(k == pl.num_programs(1) - 1)
    def _():
        h = jnp.maximum(acc_ref[...], 0.0)                       # ReLU (VPU)
        part = jnp.dot(h, w2_ref[...], preferred_element_type=jnp.float32)
        o_ref[0, :, :] = part.astype(o_ref.dtype)


def tool_proj(features, w1_pad, b1, w2, b2):
    """features: (m, TOOL_IN) f32; w1_pad: (K_PAD, TOOL_HID) bf16 (pre-padded).

    Returns (m, TOOL_OUT) f32 = ReLU(features @ W1 + b1) @ W2 + b2.
    """
    m = features.shape[0]
    # Activations: pad K (zeros contribute nothing) and stream as bf16. This is
    # tiny (~0.36 MB) per call; the big W1 pad/cast is hoisted to make_params.
    feats_p = jnp.pad(features, ((0, 0), (0, K_PAD - TOOL_IN))).astype(jnp.bfloat16)

    flops = 2 * m * K_PAD * TOOL_HID + 2 * m * TOOL_HID * TOOL_OUT
    bytes_accessed = (
        K_PAD * TOOL_HID * 2              # W1 (bf16), streamed once total
        + HID_SPLIT * m * K_PAD * 2       # activations, re-read per hidden half
        + TOOL_HID * TOOL_OUT * 4         # W2 (f32)
        + TOOL_HID * 4                    # b1
        + HID_SPLIT * m * TOOL_OUT * 4    # partial outputs
    )

    partials = pl.pallas_call(
        tool_proj_kernel,
        out_shape=jax.ShapeDtypeStruct((HID_SPLIT, m, TOOL_OUT), jnp.float32),
        grid_spec=pltpu.PrefetchScalarGridSpec(
            num_scalar_prefetch=0,
            grid=(HID_SPLIT, NUM_K_TILES),
            in_specs=[
                # activation K-tile (same for both hidden halves)
                pl.BlockSpec((m, K_TILE), lambda h, k: (0, k)),
                # W1: K-tile rows x hidden-half columns
                pl.BlockSpec((K_TILE, HID_HALF), lambda h, k: (k, h)),
                # b1: hidden-half slice (resident across K)
                pl.BlockSpec((1, HID_HALF), lambda h, k: (0, h)),
                # W2: hidden-half rows, full output width (resident across K)
                pl.BlockSpec((HID_HALF, TOOL_OUT), lambda h, k: (h, 0)),
            ],
            # One partial (m, TOOL_OUT) slab per hidden half -> no write race.
            out_specs=pl.BlockSpec((1, m, TOOL_OUT), lambda h, k: (h, 0, 0)),
            scratch_shapes=[pltpu.VMEM((m, HID_HALF), jnp.float32)],
        ),
        compiler_params=pltpu.CompilerParams(
            dimension_semantics=("parallel", "arbitrary"),
            vmem_limit_bytes=32 * 1024 * 1024,
        ),
        cost_estimate=pl.CostEstimate(
            flops=flops, transcendentals=0, bytes_accessed=bytes_accessed
        ),
    )(feats_p, w1_pad, b1, w2)

    # Cross-half reduction of the second matmul + output bias (tiny VPU work,
    # fused into one small XLA op).
    return jnp.sum(partials, axis=0) + b2


# ------------------------------------------------------------------------- #
# Deterministic parameter construction (synthetic, no checkpoint load).      #
# ------------------------------------------------------------------------- #
def make_params():
    keys = jax.random.split(jax.random.PRNGKey(42), 5)
    # Stub "swin" backbone projection: per-frame pooled channels -> 22000 feats.
    backbone_w = jax.random.normal(keys[0], (CHANNELS, TOOL_IN), jnp.float32) * 0.02
    # tool_proj: Linear(22000, 512) -> ReLU -> Linear(512, 512)
    w1 = jax.random.normal(keys[1], (TOOL_IN, TOOL_HID), jnp.float32) * 0.01
    b1 = jax.random.normal(keys[2], (1, TOOL_HID), jnp.float32) * 0.01
    w2 = jax.random.normal(keys[3], (TOOL_HID, TOOL_OUT), jnp.float32) * 0.02
    b2 = jax.random.normal(keys[4], (1, TOOL_OUT), jnp.float32) * 0.01
    # Pad + cast W1 ONCE here: it is the dominant HBM stream of the kernel and
    # must not be re-padded (46 MB read + write) on every forward call.
    w1_pad = jnp.pad(w1, ((0, K_PAD - TOOL_IN), (0, 0))).astype(jnp.bfloat16)
    return dict(backbone_w=backbone_w, w1_pad=w1_pad, b1=b1, w2=w2, b2=b2)


# ------------------------------------------------------------------------- #
# Forward pass (mirrors SVTransformer.forward).                              #
# ------------------------------------------------------------------------- #
@functools.partial(jax.jit, static_argnames=("clip_size",))
def sv_transformer_forward(x, params, *, clip_size=CLIP_SIZE):
    # frames = x   (NCHW)
    frames = x
    # clips = x.view(-1, 3, clip_size, H, W)
    clips = x.reshape(-1, CHANNELS, clip_size, SPATIAL, SPATIAL)  # noqa: F841

    # TODO(synk): swin_transformer / video_swin_transformer builders are not
    # defined in the source module; stub spatial feature extraction here
    # (mean-pool over H,W then a fixed linear to the 22000-dim feature space).
    pooled = frames.mean(axis=(2, 3))                        # (num_frames, C)
    spatial_features = pooled @ params["backbone_w"]         # (num_frames, 22000)

    # Hot path: tool_proj as a fused Pallas kernel.
    projected = tool_proj(
        spatial_features, params["w1_pad"], params["b1"], params["w2"], params["b2"]
    )                                                        # (num_frames, 512)

    # TODO(synk): tool_transformer_encoder is never defined in __init__; skipped.
    # The PyTorch forward returns the input x unchanged.
    return x, projected


# ------------------------------------------------------------------------- #
if __name__ == "__main__":
    params = make_params()
    x = jax.random.normal(
        jax.random.PRNGKey(0),
        (NUM_FRAMES, CHANNELS, SPATIAL, SPATIAL),
        jnp.float32,
    )

    out_x, projected = sv_transformer_forward(x, params)
    jax.block_until_ready((out_x, projected))

    # Reference check for the Pallas MLP (match the kernel's bf16 rounding of
    # the activations and W1, everything else in f32).
    pooled = x.mean(axis=(2, 3))
    feats = pooled @ params["backbone_w"]
    feats_bf = feats.astype(jnp.bfloat16).astype(jnp.float32)
    w1_f = params["w1_pad"].astype(jnp.float32)[:TOOL_IN]
    ref = (
        jnp.maximum(feats_bf @ w1_f + params["b1"], 0.0) @ params["w2"]
        + params["b2"]
    )
    assert projected.shape == (NUM_FRAMES, TOOL_OUT)
    assert jnp.allclose(projected, ref, atol=2e-3, rtol=2e-2), float(
        jnp.max(jnp.abs(projected - ref))
    )
    # Forward returns the input unchanged, exactly like the PyTorch module.
    assert jnp.array_equal(out_x, x)

    print("KERNEL_OK")
</pallas_src>

<mosaic_0001>
module attributes {stable_mosaic.version = 11 : i64} {
  func.func @tool_proj_kernel(%arg0: i32, %arg1: i32, %arg2: memref<8x11264xbf16, #tpu.memory_space<vmem>>, %arg3: memref<11264x256xbf16, #tpu.memory_space<vmem>>, %arg4: memref<1x256xf32, #tpu.memory_space<vmem>>, %arg5: memref<256x512xf32, #tpu.memory_space<vmem>>, %arg6: memref<1x8x512xf32, #tpu.memory_space<vmem>>, %arg7: memref<8x256xf32, #tpu.memory_space<vmem>>) attributes {dimension_semantics = [#tpu.dimension_semantics<parallel>, #tpu.dimension_semantics<arbitrary>], iteration_bounds = array<i64: 2, 2>, scalar_prefetch = 0 : i64, scratch_operands = 1 : i64, tpu.core_type = #tpu.core_type<tc>, window_params = [{transform_indices = @transform_0, window_bounds = array<i64: 8, 11264>}, {transform_indices = @transform_1, window_bounds = array<i64: 11264, 256>}, {transform_indices = @transform_2, window_bounds = array<i64: 1, 256>}, {transform_indices = @transform_3, window_bounds = array<i64: 256, 512>}, {transform_indices = @transform_4, window_bounds = array<i64: 1, 8, 512>}]} {
    %c0_i32 = arith.constant 0 : i32
    %0 = arith.cmpi eq, %arg1, %c0_i32 : i32
    %1 = arith.extui %0 : i1 to i32
    %c0_i32_0 = arith.constant 0 : i32
    %2 = arith.cmpi ne, %1, %c0_i32_0 : i32
    scf.if %2 {
      %cst_9 = arith.constant 0.000000e+00 : f32
      %12 = vector.broadcast %cst_9 : f32 to vector<8x256xf32>
      %c0_10 = arith.constant 0 : index
      %c0_11 = arith.constant 0 : index
      %13 = vector.load %arg4[%c0_10, %c0_11] : memref<1x256xf32, #tpu.memory_space<vmem>>, vector<1x256xf32>
      %14 = vector.broadcast %13 : vector<1x256xf32> to vector<8x256xf32>
      %15 = arith.addf %12, %14 : vector<8x256xf32>
      %c0_12 = arith.constant 0 : index
      %c0_13 = arith.constant 0 : index
      %16 = vector.load %arg7[%c0_12, %c0_13] : memref<8x256xf32, #tpu.memory_space<vmem>>, vector<8x256xf32>
      tpu.vector_store %arg7[%c0_12, %c0_13], %15 {strides = array<i32>} : memref<8x256xf32, #tpu.memory_space<vmem>>, vector<8x256xf32>,
    } else {
    }
    %c0 = arith.constant 0 : index
    %c0_1 = arith.constant 0 : index
    %3 = vector.load %arg7[%c0, %c0_1] : memref<8x256xf32, #tpu.memory_space<vmem>>, vector<8x256xf32>
    %c0_2 = arith.constant 0 : index
    %c0_3 = arith.constant 0 : index
    %4 = vector.load %arg2[%c0_2, %c0_3] : memref<8x11264xbf16, #tpu.memory_space<vmem>>, vector<8x11264xbf16>
    %c0_4 = arith.constant 0 : index
    %c0_5 = arith.constant 0 : index
    %5 = vector.load %arg3[%c0_4, %c0_5] : memref<11264x256xbf16, #tpu.memory_space<vmem>>, vector<11264x256xbf16>
    %cst = arith.constant dense<0.000000e+00> : vector<8x256xf32>
    %6 = tpu.matmul %4, %5, %cst {dimension_numbers = #tpu.dot_dimension_numbers<[1], [0], [0], [1], [0, 0, 1, 1], [], []>} : vector<8x11264xbf16>, vector<11264x256xbf16>, vector<8x256xf32> -> vector<8x256xf32>
    %7 = arith.addf %3, %6 : vector<8x256xf32>
    %c0_6 = arith.constant 0 : index
    %c0_7 = arith.constant 0 : index
    %8 = vector.load %arg7[%c0_6, %c0_7] : memref<8x256xf32, #tpu.memory_space<vmem>>, vector<8x256xf32>
    tpu.vector_store %arg7[%c0_6, %c0_7], %7 {strides = array<i32>} : memref<8x256xf32, #tpu.memory_space<vmem>>, vector<8x256xf32>,
    %c1_i32 = arith.constant 1 : i32
    %9 = arith.cmpi eq, %arg1, %c1_i32 : i32
    %10 = arith.extui %9 : i1 to i32
    %c0_i32_8 = arith.constant 0 : i32
    %11 = arith.cmpi ne, %10, %c0_i32_8 : i32
    scf.if %11 {
      %c0_9 = arith.constant 0 : index
      %c0_10 = arith.constant 0 : index
      %12 = vector.load %arg7[%c0_9, %c0_10] : memref<8x256xf32, #tpu.memory_space<vmem>>, vector<8x256xf32>
      %cst_11 = arith.constant 0.000000e+00 : f32
      %13 = vector.broadcast %cst_11 : f32 to vector<8x256xf32>
      %14 = arith.maximumf %12, %13 : vector<8x256xf32>
      %c0_12 = arith.constant 0 : index
      %c0_13 = arith.constant 0 : index
      %15 = vector.load %arg5[%c0_12, %c0_13] : memref<256x512xf32, #tpu.memory_space<vmem>>, vector<256x512xf32>
      %cst_14 = arith.constant dense<0.000000e+00> : vector<8x512xf32>
      %16 = tpu.matmul %14, %15, %cst_14 {dimension_numbers = #tpu.dot_dimension_numbers<[1], [0], [0], [1], [0, 0, 1, 1], [], []>} : vector<8x256xf32>, vector<256x512xf32>, vector<8x512xf32> -> vector<8x512xf32>
      %c0_15 = arith.constant 0 : index
      %c0_16 = arith.constant 0 : index
      %c0_17 = arith.constant 0 : index
      %17 = vector.load %arg6[%c0_15, %c0_16, %c0_17] : memref<1x8x512xf32, #tpu.memory_space<vmem>>, vector<1x8x512xf32>
      %18 = vector.shape_cast %17 : vector<1x8x512xf32> to vector<8x512xf32>
      %19 = vector.shape_cast %16 : vector<8x512xf32> to vector<1x8x512xf32>
      tpu.vector_store %arg6[%c0_15, %c0_16, %c0_17], %19 {strides = array<i32>} : memref<1x8x512xf32, #tpu.memory_space<vmem>>, vector<1x8x512xf32>,
    } else {
    }
    return
  }
  func.func @transform_0(%arg0: i32, %arg1: i32) -> (i32, i32) {
    %c0_i32 = arith.constant 0 : i32
    %c0_i32_0 = arith.constant 0 : i32
    return %c0_i32, %arg1 : i32, i32
  }
  func.func @transform_1(%arg0: i32, %arg1: i32) -> (i32, i32) {
    %c0_i32 = arith.constant 0 : i32
    return %arg1, %arg0 : i32, i32
  }
  func.func @transform_2(%arg0: i32, %arg1: i32) -> (i32, i32) {
    %c0_i32 = arith.constant 0 : i32
    %c0_i32_0 = arith.constant 0 : i32
    return %c0_i32, %arg0 : i32, i32
  }
  func.func @transform_3(%arg0: i32, %arg1: i32) -> (i32, i32) {
    %c0_i32 = arith.constant 0 : i32
    %c0_i32_0 = arith.constant 0 : i32
    return %arg0, %c0_i32 : i32, i32
  }
  func.func @transform_4(%arg0: i32, %arg1: i32) -> (i32, i32, i32) {
    %c0_i32 = arith.constant 0 : i32
    %c0_i32_0 = arith.constant 0 : i32
    %c0_i32_1 = arith.constant 0 : i32
    return %arg0, %c0_i32, %c0_i32_0 : i32, i32, i32
  }
}

</mosaic_0001>

<bundles_post_ra>
// kernel: sv_transformer_forward.1
= control target key start
LH: loop header
LB: loop body
LE: loop exit
PB: predicated region body
PF: predicated region fallthrough
CT: control target
= control target key end

     0   :  { %s17822_s0 = inlined_call_operand.vmem [shape: bf16[8,22528], index: 0, kind: input, shape index: {}]   ;;  %s17823_s1 = inlined_call_operand.hbm [shape: bf16[22528,512], index: 1, kind: input, shape index: {}]   ;;  %s17824_s2 = inlined_call_operand.hbm [shape: f32[1,512], index: 2, kind: input, shape index: {}]   ;;  %s17825_s3 = inlined_call_operand.hbm [shape: f32[512,512], index: 3, kind: input, shape index: {}]   ;;  %s17826_s4 = inlined_call_operand.vmem [shape: f32[2,8,512], index: 4, kind: output, shape index: {}]  }
   0x1   :  { %17835 = sst [smem:[#allocation16_spill]] %s17824_s2 }
   0x2   :  { %9 = vsyncpa [#allocation4], 0 }
   0x3   :  { %11 = vsyncpa [#allocation4 + $0x1], 0 }
   0x4   :  { %12 = vsyncpa [#allocation6], 0 }
   0x5   :  { %14 = vsyncpa [#allocation6 + $0x1], 0  ;;  %s15569_s15 = smov 0   ;;  %s15571_s16 = smov 0  }
   0x6   :  { %s15573_s17 = smov 0   ;;  %s15575_s18 = smov 0  }
   0x7   :  { %s15577_s19 = smov 0   ;;  %s15579_s20 = smov 0  }
   0x8   :  { %s15581_s21 = smov 0   ;;  %s15583_s22 = smov 0  }
   0x9   :  { %s15585_s23 = smov 0   ;;  %s15587_s24 = smov 0  }
   0xa   :  { %s15589_s25 = smov 0  }
   0xb LB: > { %17836 = sst [smem:[#allocation10_spill]] %s15502_s17  ;;  %s17827_s26 = sadd.s32 4294967295, %s15534_s25   ;;  %s15534_s25 = sphi %s15589_s25, %s20_s25   ;;  %s15530_s24 = sphi %s15587_s24, %s17871_s24   ;;  %s15526_s23 = sphi %s15585_s23, %s17870_s23   ;;  %s15522_s22 = sphi %s15583_s22, %s17869_s22   ;;  %s15518_s21 = sphi %s15581_s21, %s17868_s21   ;;  %s15514_s20 = sphi %s15579_s20, %s17861_s20   ;;  %s15510_s19 = sphi %s15577_s19, %s17867_s19   ;;  %s15506_s18 = sphi %s15575_s18, %s17866_s18   ;;  %s15502_s17 = sphi %s15573_s17, %s17859_s17   ;;  %s15498_s16 = sphi %s15571_s16, %s17865_s16   ;;  %s15494_s15 = sphi %s15569_s15, %s17864_s15  }
   0xc   : > { %17837 = sst [smem:[#allocation11_spill]] %s15514_s20  ;;  %s29_s27 = sadd.s32 1, %s15526_s23 }
   0xd   : > { %p30_p0 = scmp.ge.s32.totalorder %s29_s27, 2  ;;  %s32_s28 = sadd.s32 1, %s15530_s24 }
   0xe   : > { %s67_s29 = sadd.s32 1, %s15514_s20  ;;  %p74_p1 = scmp.ne.s32.totalorder %s15514_s20, %s15510_s19 }
   0xf   : > { %s17873_s27 = smov (%p30_p0, %s29_s27), 0  ;;  %s17875_s28 = smov (!%p30_p0, %s32_s28), %s15530_s24 }
  0x10   : > { %17838 = sst [smem:[#allocation12_spill]] %s17873_s27  ;;  %s62_s30 = ssub.s32 %s15526_s23, %s17873_s27 }
  0x11   : > { %p75_p2 = scmp.eq.s32.totalorder %s15534_s25, 0  ;;  %p34_p3 = scmp.ge.s32.totalorder %s17875_s28, 2 }
  0x12   : > { %p80_p4 = scmp.ne.s32.totalorder %s15510_s19, %s15506_s18  ;;  %p15643_p6 = scmp.eq.s32.totalorder %s17827_s26, 0 }
  0x13   : > { %p15637_p5 = por %p75_p2, %p74_p1  ;;  %s17877_s28 = smov (%p34_p3, %s17875_s28), 0 }
  0x14   : > { %17841 = sst [smem:[#allocation13_spill]] %s17877_s28  ;;  %p15651_p7 = por %p15643_p6, %p80_p4 }
  0x15   : > { %s93_s8 = sadd.s32 1, %s15502_s17  ;;  %s63_s9 = ssub.s32 %s15530_s24, %s17877_s28 }
  0x16   : > { %s17842_s7 = scalar_select %p15651_p7, 1, 0 }
  0x17   : > { %p100_p8 = scmp.ne.s32.totalorder %s15502_s17, %s15498_s16  ;;  %s64_s10 = sor.u32 %s63_s9, %s62_s30 }
  0x18   : > { %p91_p9 = scmp.eq.s32.totalorder %s63_s9, 0  ;;  %p65_p10 = scmp.eq.s32.totalorder %s64_s10, 0 }
  0x19   : > { %p15662_p11 = por %p100_p8, %p75_p2  ;;  %p106_p12 = scmp.ne.s32.totalorder %s15498_s16, %s15494_s15 }
  0x1a   : > { %s15667_s12 = scalar_select %p91_p9, %s15502_s17, %s93_s8  }
  0x1b   : > { %s15670_s13 = scalar_select %p65_p10, %s15514_s20, %s67_s29  }
  0x1c   : > { %17844 = sst [smem:[#allocation14_spill]] %s15667_s12  ;;  %p13056_p13 = scmp.lt.s32.totalorder %s15534_s25, 4 }
  0x1d   : > { %17845 = sst [smem:[#allocation15_spill]] %s15670_s13  ;;  %s215_s14 = sand.u32 1, %s15534_s25  }
  0x1e   : > { %p15678_p0 = por %p106_p12, %p15643_p6  ;;  %p15684_p1 = pnand %p13056_p13, %p15637_p5 }
  0x1f   : > { %s217_s9 = sand.u32 1, %s15502_s17   ;;  %s12906_s8 = sshll.u32 %s15530_s24, 5 }
  0x20   : > { %s17846_s18 = scalar_select %p15678_p0, 1, 0 }
  0x21   : > { %s11392_s10 = sshll.u32 %s217_s9, 1  ;;  %s17848_s2 = sld [smem:[#allocation16_spill]] }
  0x22   : > { %s219_s15 = scalar_lea.vmem [#allocation5], %s11392_s10  ;;  %p15699_p2 = pnand %p13056_p13, %p15662_p11 }
  0x23   : > { %s227_s6 = sshll.u32 %s219_s15, 4  ;;  %s15703_s27 = sshll.u32 %s217_s9, 10  ;;  %s15695_s6 = int_to_ptr.vmem [resolvable:$true] %s227_s6 }
  0x24   : > { %s15706_s26 = scalar_lea.sflag [#allocation6], %s215_s14  ;;  %p17834_p5 = pneg %p15699_p2 }
  0x27   : > { %s15693_s29 = scalar_lea.hbm %s17848_s2, %s12906_s8  ;;  %s15355_s8 = scalar_lea.hbm %s17848_s2, 64 }
  0x28   : > { %s15350_s28 = scalar_lea.hbm %s15693_s29, 32  ;;  %p15356_p9 = scmp.lt.u32.totalorder %s15693_s29, %s17848_s2 }
  0x29   : > { %p15351_p4 = scmp.ne.s32.totalorder %s15693_s29, %s15350_s28  ;;  %p15357_p10 = scmp.lt.u32.totalorder %s15355_s8, %s15350_s28 }
  0x2a   : > { %p15359_p12 = scmp.lt.u32.totalorder %s15350_s28, %s15693_s29 }
  0x2b   : > { %p15353_p6 = pnand %p17834_p5, %p15351_p4  ;;  %p15358_p11 = por %p15357_p10, %p15356_p9 }
  0x2d   : > { %p15354_p8 = pneg %p15353_p6  ;;  %p15360_p13 = por %p15359_p12, %p15358_p11 }
  0x2f   : > { %p15361_p3 = pnand %p15360_p13, %p15354_p8 }
  0x31   : > { %15364 = shalt.err (!%p15361_p3)
}
  0x32   : > { %s15365_s14 = scalar_lea.vmem %s15695_s6, 32  ;;  %s15536_s9 = smov [#allocation5]  }
  0x33   : > { %p15366_p4 = scmp.ne.s32.totalorder %s15695_s6, %s15365_s14  ;;  %s15370_s11 = sshll.u32 %s15536_s9, 4  ;;  %s15371_s11 = int_to_ptr.vmem [resolvable:$false] %s15370_s11 }
  0x34   : > { %s15372_s13 = scalar_lea.vmem %s15371_s11, 64  ;;  %p15373_p7 = scmp.lt.s32.totalorder %s15695_s6, %s15371_s11 }
  0x35   : > { %p15368_p6 = pnand %p15366_p4, %p17834_p5  ;;  %p15374_p9 = scmp.lt.s32.totalorder %s15372_s13, %s15365_s14 }
  0x37   : > { %p15369_p0 = pneg %p15368_p6  ;;  %p15375_p10 = por %p15374_p9, %p15373_p7 }
  0x39   : > { %p15376_p11 = pnand %p15375_p10, %p15369_p0 }
  0x3b   : > { %15379 = shalt.err (!%p15376_p11)
}
  0x3c   : > { %13052 = dma.hbm_to_vmem [thread:$0]  (!%p15699_p2), %s15693_s29, 32, %s15695_s6, %s15706_s26  }
  0x3d   : > { %s238_s28 = scalar_lea.vmem [#allocation7], %s15703_s27  ;;  %p254_p3 = scmp.lt.s32.totalorder %s15534_s25, 5 }
  0x3e   : > { %s246_s10 = sshll.u32 %s238_s28, 4  ;;  %p17850_p7 = scmp.ge.s32.totalorder %s15534_s25, 1  ;;  %s15736_s10 = int_to_ptr.vmem [resolvable:$true] %s246_s10 }
  0x3f   : > { %s191_s15 = sand.u32 1, %s15514_s20   ;;  %s11389_s14 = sshll.u32 %s15530_s24, 1 }
  0x40   : > { %p15740_p0 = pnand %p17850_p7, %p254_p3  ;;  %s13038_s9 = smul.u32 11264, %s191_s15 }
  0x41   : > { %s12905_s11 = smul.u32 5632, %s15526_s23  ;;  %s15754_s17 = scalar_lea.sflag [#allocation4], %s191_s15 }
  0x42   : > { %s17851_s8 = scalar_select %p15740_p0, 1, 0 }
  0x43   : > { %s202_s13 = sadd.s32 %s12905_s11, %s11389_s14  ;;  %s195_s2 = scalar_lea.vmem [#allocation3], %s13038_s9 }
  0x44   : > { %s205_s12 = sshll.u32 %s195_s2, 4  ;;  %s11391_s29 = sshll.u32 %s202_s13, 6  ;;  %s15747_s12 = int_to_ptr.vmem [resolvable:$true] %s205_s12 }
  0x45   : > { %s15752_s28 = scalar_lea.hbm %s17823_s1, %s11391_s29  ;;  %p15382_p12 = pneg %p15684_p1 }
  0x46   : > { %s15380_s20 = scalar_lea.hbm %s15752_s28, 180224  ;;  %s15385_s9 = scalar_lea.hbm %s17823_s1, 720896 }
  0x47   : > { %p15381_p8 = scmp.ne.s32.totalorder %s15752_s28, %s15380_s20  ;;  %p15386_p6 = scmp.lt.u32.totalorder %s15752_s28, %s17823_s1 }
  0x48   : > { %p15387_p9 = scmp.lt.u32.totalorder %s15385_s9, %s15380_s20  ;;  %p15389_p11 = scmp.lt.u32.totalorder %s15380_s20, %s15752_s28 }
  0x49   : > { %p15383_p13 = pnand %p15382_p12, %p15381_p8 }
  0x4a   : > { %p15388_p10 = por %p15387_p9, %p15386_p6 }
  0x4b   : > { %p15384_p4 = pneg %p15383_p13 }
  0x4c   : > { %p15390_p3 = por %p15389_p11, %p15388_p10 }
  0x4e   : > { %p15391_p7 = pnand %p15390_p3, %p15384_p4 }
  0x50   : > { %15394 = shalt.err (!%p15391_p7)
}
  0x51   : > { %s15395_s15 = scalar_lea.vmem %s15747_s12, 180224  ;;  %s15537_s29 = smov [#allocation3]  }
  0x52   : > { %p15396_p8 = scmp.ne.s32.totalorder %s15747_s12, %s15395_s15  ;;  %s15400_s27 = sshll.u32 %s15537_s29, 4  ;;  %s15401_s27 = int_to_ptr.vmem [resolvable:$false] %s15400_s27 }
  0x53   : > { %s15402_s6 = scalar_lea.vmem %s15401_s27, 360448  ;;  %p15403_p0 = scmp.lt.s32.totalorder %s15747_s12, %s15401_s27 }
  0x54   : > { %p15398_p13 = pnand %p15396_p8, %p15382_p12  ;;  %p15404_p6 = scmp.lt.s32.totalorder %s15402_s6, %s15395_s15 }
  0x56   : > { %p15399_p5 = pneg %p15398_p13  ;;  %p15405_p9 = por %p15404_p6, %p15403_p0 }
  0x58   : > { %p15406_p10 = pnand %p15405_p9, %p15399_p5 }
  0x5a   : > { %15409 = shalt.err (!%p15406_p10)
}
  0x5b   : > { %s15538_s20 = smov 256   ;;  %s15539_s2 = smov 128  }
  0x5c   : > { %s15540_s14 = smov 8   ;;  %s12908_s9 = sshll.u32 %s15530_s24, 14 }
  0x5d   : > { %13049 = dma.hbm_to_vmem [thread:$0]  (!%p15684_p1), %s15752_s28, 180224, %s15747_s12, %s15754_s17, %s15538_s20, %s15539_s2, %s15540_s14  }
  0x5e   : > { %s15786_s29 = scalar_lea.hbm %s17825_s3, %s12908_s9  ;;  %p17852_p0 = pneg %p15699_p2 }
  0x5f   : > { %s15410_s15 = scalar_lea.hbm %s15786_s29, 16384  ;;  %s15415_s17 = scalar_lea.hbm %s17825_s3, 32768 }
  0x60   : > { %p15411_p5 = scmp.ne.s32.totalorder %s15786_s29, %s15410_s15  ;;  %p15416_p1 = scmp.lt.u32.totalorder %s15786_s29, %s17825_s3 }
  0x61   : > { %p15417_p11 = scmp.lt.u32.totalorder %s15415_s17, %s15410_s15  ;;  %p15419_p7 = scmp.lt.u32.totalorder %s15410_s15, %s15786_s29 }
  0x62   : > { %p15413_p12 = pnand %p15411_p5, %p17852_p0 }
  0x63   : > { %p15418_p3 = por %p15417_p11, %p15416_p1 }
  0x64   : > { %p15414_p4 = pneg %p15413_p12 }
  0x65   : > { %p15420_p8 = por %p15419_p7, %p15418_p3 }
  0x67   : > { %p15421_p13 = pnand %p15420_p8, %p15414_p4 }
  0x69   : > { %15424 = shalt.err (!%p15421_p13)
}
  0x6a   : > { %s15425_s28 = scalar_lea.vmem %s15736_s10, 16384  ;;  %p17853_p9 = pmov %p17852_p0 }
  0x6b   : > { %p15426_p6 = scmp.ne.s32.totalorder %s15736_s10, %s15425_s28  ;;  %s15541_s20 = smov [#allocation7]  }
  0x6c   : > { %s15430_s2 = sshll.u32 %s15541_s20, 4  ;;  %s15431_s2 = int_to_ptr.vmem [resolvable:$false] %s15430_s2 }
  0x6d   : > { %p15428_p10 = pnand %p15426_p6, %p17853_p9  ;;  %s15432_s14 = scalar_lea.vmem %s15431_s2, 32768 }
  0x6e   : > { %p15433_p0 = scmp.lt.s32.totalorder %s15736_s10, %s15431_s2  ;;  %p15434_p12 = scmp.lt.s32.totalorder %s15432_s14, %s15425_s28 }
  0x6f   : > { %p15429_p5 = pneg %p15428_p10 }
  0x70   : > { %p15435_p1 = por %p15434_p12, %p15433_p0 }
  0x72   : > { %p15436_p11 = pnand %p15435_p1, %p15429_p5 }
  0x74   : > { %15439 = shalt.err (!%p15436_p11)
}
  0x75   : > { %s15542_s9 = smov 512   ;;  %s15543_s11 = smov 32  }
  0x76   : > { %13055 = dma.hbm_to_vmem [thread:$0]  (!%p15699_p2), %s15786_s29, 16384, %s15736_s10, %s15706_s26, %s15542_s9, %s15542_s9, %s15543_s11  }
  0x77   : > { %p17854_p4 = scmp.ne.s32.totalorder %s17851_s8, 0 }
  0x78   : > { %s260_s13 = sand.u32 (!%p17854_p4), 1, %s15510_s19   ;;  %p17855_p3 = scmp.ne.s32.totalorder (!%p17854_p4), %s17842_s7, 0 }
  0x79   : > { %258 = sbr.rel (%p17854_p4) target bundleno = 2039 (0x7f7), region = 36  ;;  %s261_s27 = scalar_lea.sflag (!%p17854_p4), [#allocation4], %s260_s13 }
  0x7a   : > { %s13039_s15 = smul.u32 (!%p17854_p4), 11264, %s260_s13 }
  0x7c   : > { %s15815_s6 = scalar_lea.vmem (!%p17854_p4), [#allocation3], %s13039_s15 }
  0x80   : > { %15485 = dma.done.wait (%p17855_p3), %s261_s27, 180224  }
  0x81   : > { %15487 = vsyncadd (%p17855_p3), %s261_s27, 4294787072  ;;  %s17856_s17 = sadd.s32 4294967295, %s15534_s25   ;;  %s271_s26 = sand.u32 1, %s15498_s16  }
  0x82   : > { %s269_s5 = sand.u32 1, %s17856_s17   ;;  %s11400_s10 = sshll.u32 %s271_s26, 1 }
  0x83   : > { %s270_s8 = scalar_lea.sflag [#allocation6], %s269_s5  ;;  %s273_s29 = scalar_lea.vmem [#allocation5], %s11400_s10 }
  0x84   : > { %p17857_p2 = scmp.ne.s32.totalorder %s17846_s18, 0 }
  0x86   : > { %15489 = dma.done.wait (%p17857_p2), %s270_s8, 16416  }
  0x87   : > { %15491 = vsyncadd (%p17857_p2), %s270_s8, 4294950880  ;;  %s11401_s12 = sshll.u32 %s271_s26, 10  ;;  %s322_s7 = smul.u32 88, %s15518_s21 }
  0x88   : > { %p332_p7 = scmp.lt.s32.totalorder %s15522_s22, 1  ;;  %s15841_s13 = scalar_lea.vmem [#allocation7], %s11401_s12 }
  0x89   : > { %p323_p8 = scmp.lt.s32.totalorder %s322_s7, 175  ;;  %p11405_p13 = scmp.ne.s32.totalorder %s15518_s21, 0 }
  0x8a   : > { %s17879_s22 = smov (!%p332_p7, %s15522_s22), 1  ;;  %v343_v0 = vlaneseq (!%p11405_p13)  ;;  %v341_v2 = vld [vmem:[%s273_s29] sm:$0x3] (!%p11405_p13) }
  0x8b   : > { %s17881_s7 = smov (!%p323_p8, %s322_s7), 175  ;;  %s12909_s30 = sshll.u32 %s17879_s22, 5 }
  0x8c   : > { %s11402_s28 = sshll.u32 %s17881_s7, 2  ;;  %s15834_s14 = scalar_lea.vmem %s17826_s4, %s12909_s30  ;;  %v344_v1 = vshrl.u32 (!%p11405_p13), %v343_v0, 7 }
  0x8d   : > { %s15839_s18 = scalar_lea.vmem %s17822_s0, %s11402_s28  ;;  %340 = sbr.rel (%p11405_p13) target bundleno = 148 (0x94), region = 52 }
  0x8e   : > { %v345_v3 = vsub.s32 (!%p11405_p13), 0, %v344_v1  ;;  %v349_v4 = vsub.s32 (!%p11405_p13), 1, %v344_v1 }
  0x90   : > { %v346_v5 = vrot.slane (!%p11405_p13), %v341_v2, %v345_v3  ;;  %v350_v6 = vrot.slane (!%p11405_p13), %v341_v2, %v349_v4 }
  0x92   : > { %355 = vst [vmem:[#allocation2] sm:$0xff] (!%p11405_p13), %v346_v5  ;;  %356 = vst [vmem:[#allocation2 + $0x8] sm:$0xff] (!%p11405_p13), %v350_v6 }
  0x94 PF: > { %v13150_v7 = vld [vmem:[%s15815_s6 + $0x4] ss:$8 sps:$4 sm:$0xff]   ;;  %v13154_v9 = vld [vmem:[%s15815_s6] ss:$8 sps:$4 sm:$0xff]   ;;  %v13156_v11 = vld [vmem:[%s15815_s6 + $0x14] ss:$8 sps:$4 sm:$0xff]  }
  0x95   : > { %v13152_v8 = vld [vmem:[%s15815_s6 + $0x104] ss:$8 sps:$4 sm:$0xff]   ;;  %9159 = vmatprep.subr.bf16.mxu0 %v13150_v7  ;;  %v13155_v10 = vld [vmem:[%s15815_s6 + $0x100] ss:$8 sps:$4 sm:$0xff]   ;;  %v13158_v12 = vld [vmem:[%s15815_s6 + $0x114] ss:$8 sps:$4 sm:$0xff]  }
  0x96   : > { %9200 = vmatprep.subr.bf16.mxu1 %v13152_v8  ;;  %9160 = vmatpush1.bf16.msra.mxu0 %v13154_v9  ;;  %v13160_v13 = vld [vmem:[%s15815_s6 + $0x10] ss:$8 sps:$4 sm:$0xff]   ;;  %v13162_v15 = vld [vmem:[%s15815_s6 + $0x24] ss:$8 sps:$4 sm:$0xff]   ;;  %v13166_v17 = vld [vmem:[%s15815_s6 + $0x20] ss:$8 sps:$4 sm:$0xff]  }
  0x97   : > { %9201 = vmatpush1.bf16.msra.mxu1 %v13155_v10  ;;  %9161 = vmatprep.subr.bf16.mxu0 %v13156_v11  ;;  %v13161_v14 = vld [vmem:[%s15815_s6 + $0x110] ss:$8 sps:$4 sm:$0xff]   ;;  %v13164_v16 = vld [vmem:[%s15815_s6 + $0x124] ss:$8 sps:$4 sm:$0xff]   ;;  %v13167_v18 = vld [vmem:[%s15815_s6 + $0x120] ss:$8 sps:$4 sm:$0xff]  }
  0x98   : > { %9202 = vmatprep.subr.bf16.mxu1 %v13158_v12  ;;  %v13168_v19 = vld [vmem:[%s15815_s6 + $0x34] ss:$8 sps:$4 sm:$0xff]   ;;  %v13172_v21 = vld [vmem:[%s15815_s6 + $0x30] ss:$8 sps:$4 sm:$0xff]   ;;  %v13174_v23 = vld [vmem:[%s15815_s6 + $0x44] ss:$8 sps:$4 sm:$0xff]  }
  0x99   : > { %v13170_v20 = vld [vmem:[%s15815_s6 + $0x134] ss:$8 sps:$4 sm:$0xff]   ;;  %v13173_v22 = vld [vmem:[%s15815_s6 + $0x130] ss:$8 sps:$4 sm:$0xff]   ;;  %v13176_v24 = vld [vmem:[%s15815_s6 + $0x144] ss:$8 sps:$4 sm:$0xff]  }
  0x9a   : > { %9162 = vmatpush1.bf16.msra.mxu0 %v13160_v13  ;;  %v13178_v25 = vld [vmem:[%s15815_s6 + $0x40] ss:$8 sps:$4 sm:$0xff]   ;;  %v13180_v27 = vld [vmem:[%s15815_s6 + $0x54] ss:$8 sps:$4 sm:$0xff]   ;;  %v13184_v29 = vld [vmem:[%s15815_s6 + $0x50] ss:$8 sps:$4 sm:$0xff]  }
  0x9b   : > { %9203 = vmatpush1.bf16.msra.mxu1 %v13161_v14  ;;  %9163 = vmatprep.subr.bf16.mxu0 %v13162_v15  ;;  %v13179_v26 = vld [vmem:[%s15815_s6 + $0x140] ss:$8 sps:$4 sm:$0xff]   ;;  %v13182_v28 = vld [vmem:[%s15815_s6 + $0x154] ss:$8 sps:$4 sm:$0xff]   ;;  %v13185_v30 = vld [vmem:[%s15815_s6 + $0x150] ss:$8 sps:$4 sm:$0xff]  }
  0x9c   : > { %9204 = vmatprep.subr.bf16.mxu1 %v13164_v16  ;;  %v13186_v31 = vld [vmem:[%s15815_s6 + $0x64] ss:$8 sps:$4 sm:$0xff]   ;;  %v13190_v33 = vld [vmem:[%s15815_s6 + $0x60] ss:$8 sps:$4 sm:$0xff]   ;;  %v13192_v35 = vld [vmem:[%s15815_s6 + $0x74] ss:$8 sps:$4 sm:$0xff]  }
  0x9d   : > { %v13188_v32 = vld [vmem:[%s15815_s6 + $0x164] ss:$8 sps:$4 sm:$0xff]   ;;  %v13191_v34 = vld [vmem:[%s15815_s6 + $0x160] ss:$8 sps:$4 sm:$0xff]   ;;  %v13194_v36 = vld [vmem:[%s15815_s6 + $0x174] ss:$8 sps:$4 sm:$0xff]  }
  0x9e   : > { %9164 = vmatpush1.bf16.msra.mxu0 %v13166_v17  ;;  %v13196_v37 = vld [vmem:[%s15815_s6 + $0x70] ss:$8 sps:$4 sm:$0xff]   ;;  %v13198_v39 = vld [vmem:[%s15815_s6 + $0x84] ss:$8 sps:$4 sm:$0xff]   ;;  %v13202_v41 = vld [vmem:[%s15815_s6 + $0x80] ss:$8 sps:$4 sm:$0xff]  }
  0x9f   : > { %9205 = vmatpush1.bf16.msra.mxu1 %v13167_v18  ;;  %9165 = vmatprep.subr.bf16.mxu0 %v13168_v19  ;;  %v13197_v38 = vld [vmem:[%s15815_s6 + $0x170] ss:$8 sps:$4 sm:$0xff]   ;;  %v13200_v40 = vld [vmem:[%s15815_s6 + $0x184] ss:$8 sps:$4 sm:$0xff]   ;;  %v13203_v42 = vld [vmem:[%s15815_s6 + $0x180] ss:$8 sps:$4 sm:$0xff]  }
  0xa0   : > { %9206 = vmatprep.subr.bf16.mxu1 %v13170_v20  ;;  %v13204_v43 = vld [vmem:[%s15815_s6 + $0x94] ss:$8 sps:$4 sm:$0xff]   ;;  %v13208_v45 = vld [vmem:[%s15815_s6 + $0x90] ss:$8 sps:$4 sm:$0xff]   ;;  %v13210_v47 = vld [vmem:[%s15815_s6 + $0xa4] ss:$8 sps:$4 sm:$0xff]  }
  0xa1   : > { %v13206_v44 = vld [vmem:[%s15815_s6 + $0x194] ss:$8 sps:$4 sm:$0xff]   ;;  %v13209_v46 = vld [vmem:[%s15815_s6 + $0x190] ss:$8 sps:$4 sm:$0xff]   ;;  %v13212_v48 = vld [vmem:[%s15815_s6 + $0x1a4] ss:$8 sps:$4 sm:$0xff]  }
  0xa2   : > { %9166 = vmatpush1.bf16.msra.mxu0 %v13172_v21  ;;  %v13214_v49 = vld [vmem:[%s15815_s6 + $0xa0] ss:$8 sps:$4 sm:$0xff]   ;;  %v13216_v51 = vld [vmem:[%s15815_s6 + $0xb4] ss:$8 sps:$4 sm:$0xff]   ;;  %v13220_v56 = vld [vmem:[%s15815_s6 + $0xb0] ss:$8 sps:$4 sm:$0xff]  }
  0xa3   : > { %9207 = vmatpush1.bf16.msra.mxu1 %v13173_v22  ;;  %9167 = vmatprep.subr.bf16.mxu0 %v13174_v23  ;;  %v13215_v50 = vld [vmem:[%s15815_s6 + $0x1a0] ss:$8 sps:$4 sm:$0xff]   ;;  %v13218_v52 = vld [vmem:[%s15815_s6 + $0x1b4] ss:$8 sps:$4 sm:$0xff]   ;;  %v13221_v57 = vld [vmem:[%s15815_s6 + $0x1b0] ss:$8 sps:$4 sm:$0xff]  }
  0xa4   : > { %9208 = vmatprep.subr.bf16.mxu1 %v13176_v24  ;;  %v359_v53 = vld [vmem:[%s15839_s18] sm:$0xff]  ;;  %v360_v55 = vld [vmem:[%s15839_s18 + $0x8] sm:$0xff]  ;;  %v13222_v59 = vld [vmem:[%s15815_s6 + $0xc4] ss:$8 sps:$4 sm:$0xff]   ;;  %p12902_p6 = scmp.ne.s32.totalorder %s15518_s21, 1 }
  0xa5   : > { %v11407_v54 = vcombine.high %v359_v53, %v359_v53  ;;  %v11409_v58 = vcombine.high %v360_v55, %v360_v55  ;;  %v13224_v60 = vld [vmem:[%s15815_s6 + $0x1c4] ss:$8 sps:$4 sm:$0xff]   ;;  %v13226_v61 = vld [vmem:[%s15815_s6 + $0xc0] ss:$8 sps:$4 sm:$0xff]   ;;  %v13228_v63 = vld [vmem:[%s15815_s6 + $0xd4] ss:$8 sps:$4 sm:$0xff]   ;;  %v11406_v13 = vcombine.low %v359_v53, %v359_v53  ;;  %v11408_v14 = vcombine.low %v360_v55, %v360_v55 }
  0xa6   : > { %9168 = vmatpush1.bf16.msra.mxu0 %v13178_v25  ;;  %v13227_v62 = vld [vmem:[%s15815_s6 + $0x1c0] ss:$8 sps:$4 sm:$0xff]   ;;  %v13230_v0 = vld [vmem:[%s15815_s6 + $0x1d4] ss:$8 sps:$4 sm:$0xff]   ;;  %v13232_v1 = vld [vmem:[%s15815_s6 + $0xd0] ss:$8 sps:$4 sm:$0xff]  }
  0xa7   : > { %9209 = vmatpush1.bf16.msra.mxu1 %v13179_v26  ;;  %9169 = vmatprep.subr.bf16.mxu0 %v13180_v27  ;;  %v13233_v2 = vld [vmem:[%s15815_s6 + $0x1d0] ss:$8 sps:$4 sm:$0xff]   ;;  %v13234_v3 = vld [vmem:[%s15815_s6 + $0xe4] ss:$8 sps:$4 sm:$0xff]   ;;  %v13238_v5 = vld [vmem:[%s15815_s6 + $0xe0] ss:$8 sps:$4 sm:$0xff]  }
  0xa8   : > { %9210 = vmatprep.subr.bf16.mxu1 %v13182_v28  ;;  %9191 = vmatprep.mubr.bf16.mxu0 %v11407_v54  ;;  %v13236_v4 = vld [vmem:[%s15815_s6 + $0x1e4] ss:$8 sps:$4 sm:$0xff]   ;;  %v13239_v6 = vld [vmem:[%s15815_s6 + $0x1e0] ss:$8 sps:$4 sm:$0xff]   ;;  %v13240_v7 = vld [vmem:[%s15815_s6 + $0xf4] ss:$8 sps:$4 sm:$0xff]  }
  0xa9   : > { %9232 = vmatprep.mubr.bf16.mxu1 %v11409_v58  ;;  %v13242_v8 = vld [vmem:[%s15815_s6 + $0x1f4] ss:$8 sps:$4 sm:$0xff]   ;;  %v13244_v9 = vld [vmem:[%s15815_s6 + $0xf0] ss:$8 sps:$4 sm:$0xff]   ;;  %v13252_v11 = vld [vmem:[%s15815_s6 + $0x204] ss:$8 sps:$4 sm:$0xff]  }
  0xaa   : > { %9170 = vmatpush1.bf16.msra.mxu0 %v13184_v29  ;;  %v13245_v10 = vld [vmem:[%s15815_s6 + $0x1f0] ss:$8 sps:$4 sm:$0xff]   ;;  %v13255_v12 = vld [vmem:[%s15815_s6 + $0x304] ss:$8 sps:$4 sm:$0xff]   ;;  %v13250_v15 = vld [vmem:[%s15815_s6 + $0x200] ss:$8 sps:$4 sm:$0xff]  }
  0xab   : > { %9211 = vmatpush1.bf16.msra.mxu1 %v13185_v30  ;;  %9171 = vmatprep.subr.bf16.mxu0 %v13186_v31  ;;  %v13253_v16 = vld [vmem:[%s15815_s6 + $0x300] ss:$8 sps:$4 sm:$0xff]   ;;  %v13258_v17 = vld [vmem:[%s15815_s6 + $0x214] ss:$8 sps:$4 sm:$0xff]   ;;  %v13256_v19 = vld [vmem:[%s15815_s6 + $0x210] ss:$8 sps:$4 sm:$0xff]  }
  0xac   : > { %9212 = vmatprep.subr.bf16.mxu1 %v13188_v32  ;;  %v13261_v18 = vld [vmem:[%s15815_s6 + $0x314] ss:$8 sps:$4 sm:$0xff]   ;;  %v13259_v20 = vld [vmem:[%s15815_s6 + $0x310] ss:$8 sps:$4 sm:$0xff]   ;;  %v13264_v21 = vld [vmem:[%s15815_s6 + $0x224] ss:$8 sps:$4 sm:$0xff]  }
  0xad   : > { %v13267_v22 = vld [vmem:[%s15815_s6 + $0x324] ss:$8 sps:$4 sm:$0xff]   ;;  %v13262_v23 = vld [vmem:[%s15815_s6 + $0x220] ss:$8 sps:$4 sm:$0xff]   ;;  %v13270_v25 = vld [vmem:[%s15815_s6 + $0x234] ss:$8 sps:$4 sm:$0xff]  }
  0xae   : > { %9172 = vmatpush1.bf16.msra.mxu0 %v13190_v33  ;;  %v13265_v24 = vld [vmem:[%s15815_s6 + $0x320] ss:$8 sps:$4 sm:$0xff]   ;;  %v13273_v26 = vld [vmem:[%s15815_s6 + $0x334] ss:$8 sps:$4 sm:$0xff]   ;;  %v13268_v27 = vld [vmem:[%s15815_s6 + $0x230] ss:$8 sps:$4 sm:$0xff]  }
  0xaf   : > { %9213 = vmatpush1.bf16.msra.mxu1 %v13191_v34  ;;  %9173 = vmatprep.subr.bf16.mxu0 %v13192_v35  ;;  %v13271_v28 = vld [vmem:[%s15815_s6 + $0x330] ss:$8 sps:$4 sm:$0xff]   ;;  %v13276_v29 = vld [vmem:[%s15815_s6 + $0x244] ss:$8 sps:$4 sm:$0xff]   ;;  %v13274_v31 = vld [vmem:[%s15815_s6 + $0x240] ss:$8 sps:$4 sm:$0xff]  }
  0xb0   : > { %9214 = vmatprep.subr.bf16.mxu1 %v13194_v36  ;;  %v13279_v30 = vld [vmem:[%s15815_s6 + $0x344] ss:$8 sps:$4 sm:$0xff]   ;;  %v13277_v32 = vld [vmem:[%s15815_s6 + $0x340] ss:$8 sps:$4 sm:$0xff]   ;;  %v13282_v33 = vld [vmem:[%s15815_s6 + $0x254] ss:$8 sps:$4 sm:$0xff]  }
  0xb1   : > { %v13285_v34 = vld [vmem:[%s15815_s6 + $0x354] ss:$8 sps:$4 sm:$0xff]   ;;  %v13280_v35 = vld [vmem:[%s15815_s6 + $0x250] ss:$8 sps:$4 sm:$0xff]   ;;  %v13315_v58 = vld [vmem:[%s15815_s6 + $0x3a4] ss:$8 sps:$4 sm:$0xff]  }
  0xb2   : > { %9174 = vmatpush1.bf16.msra.mxu0 %v13196_v37  ;;  %v13283_v36 = vld [vmem:[%s15815_s6 + $0x350] ss:$8 sps:$4 sm:$0xff]   ;;  %v13288_v37 = vld [vmem:[%s15815_s6 + $0x264] ss:$8 sps:$4 sm:$0xff]   ;;  %v13306_v53 = vld [vmem:[%s15815_s6 + $0x294] ss:$8 sps:$4 sm:$0xff]  }
  0xb3   : > { %9215 = vmatpush1.bf16.msra.mxu1 %v13197_v38  ;;  %9175 = vmatprep.subr.bf16.mxu0 %v13198_v39  ;;  %v13291_v38 = vld [vmem:[%s15815_s6 + $0x364] ss:$8 sps:$4 sm:$0xff]   ;;  %v13309_v54 = vld [vmem:[%s15815_s6 + $0x394] ss:$8 sps:$4 sm:$0xff]   ;;  %v13304_v55 = vld [vmem:[%s15815_s6 + $0x290] ss:$8 sps:$4 sm:$0xff]  }
  0xb4   : > { %9216 = vmatprep.subr.bf16.mxu1 %v13200_v40  ;;  %v15937_v39 = vld [vmem:[%s15839_s18 + $0x10] sm:$0xff]  ;;  %v15940_v40 = vld [vmem:[%s15839_s18 + $0x18] sm:$0xff] }
  0xb6   : > { %9176 = vmatpush1.bf16.msra.mxu0 %v13202_v41  ;;  %v13286_v41 = vld [vmem:[%s15815_s6 + $0x260] ss:$8 sps:$4 sm:$0xff]  }
  0xb7   : > { %9217 = vmatpush1.bf16.msra.mxu1 %v13203_v42  ;;  %9177 = vmatprep.subr.bf16.mxu0 %v13204_v43  ;;  %v13289_v42 = vld [vmem:[%s15815_s6 + $0x360] ss:$8 sps:$4 sm:$0xff]   ;;  %v11411_v43 = vcombine.high %v15937_v39, %v15937_v39 }
  0xb8   : > { %9218 = vmatprep.subr.bf16.mxu1 %v13206_v44  ;;  %v11413_v44 = vcombine.high %v15940_v40, %v15940_v40 }
  0xba   : > { %9178 = vmatpush1.bf16.msra.mxu0 %v13208_v45  ;;  %v13294_v45 = vld [vmem:[%s15815_s6 + $0x274] ss:$8 sps:$4 sm:$0xff]  }
  0xbb   : > { %9219 = vmatpush1.bf16.msra.mxu1 %v13209_v46  ;;  %9179 = vmatprep.subr.bf16.mxu0 %v13210_v47  ;;  %v13297_v46 = vld [vmem:[%s15815_s6 + $0x374] ss:$8 sps:$4 sm:$0xff]   ;;  %v13292_v47 = vld [vmem:[%s15815_s6 + $0x270] ss:$8 sps:$4 sm:$0xff]  }
  0xbc   : > { %9220 = vmatprep.subr.bf16.mxu1 %v13212_v48  ;;  %v13295_v48 = vld [vmem:[%s15815_s6 + $0x370] ss:$8 sps:$4 sm:$0xff]  }
  0xbe   : > { %9180 = vmatpush1.bf16.msra.mxu0 %v13214_v49  ;;  %v13300_v49 = vld [vmem:[%s15815_s6 + $0x284] ss:$8 sps:$4 sm:$0xff]  }
  0xbf   : > { %9221 = vmatpush1.bf16.msra.mxu1 %v13215_v50  ;;  %9181 = vmatprep.subr.bf16.mxu0 %v13216_v51  ;;  %v13303_v50 = vld [vmem:[%s15815_s6 + $0x384] ss:$8 sps:$4 sm:$0xff]   ;;  %v13298_v51 = vld [vmem:[%s15815_s6 + $0x280] ss:$8 sps:$4 sm:$0xff]  }
  0xc0   : > { %9222 = vmatprep.subr.bf16.mxu1 %v13218_v52  ;;  %v13301_v52 = vld [vmem:[%s15815_s6 + $0x380] ss:$8 sps:$4 sm:$0xff]  }
  0xc2   : > { %9182 = vmatpush1.bf16.msra.mxu0 %v13220_v56  ;;  %v13307_v56 = vld [vmem:[%s15815_s6 + $0x390] ss:$8 sps:$4 sm:$0xff]  }
  0xc3   : > { %9223 = vmatpush1.bf16.msra.mxu1 %v13221_v57  ;;  %9183 = vmatprep.subr.bf16.mxu0 %v13222_v59  ;;  %v13312_v57 = vld [vmem:[%s15815_s6 + $0x2a4] ss:$8 sps:$4 sm:$0xff]   ;;  %v13310_v59 = vld [vmem:[%s15815_s6 + $0x2a0] ss:$8 sps:$4 sm:$0xff]  }
  0xc4   : > { %9224 = vmatprep.subr.bf16.mxu1 %v13224_v60  ;;  %v13313_v60 = vld [vmem:[%s15815_s6 + $0x3a0] ss:$8 sps:$4 sm:$0xff]  }
  0xc6   : > { %9184 = vmatpush1.bf16.msra.mxu0 %v13226_v61  ;;  %v13318_v61 = vld [vmem:[%s15815_s6 + $0x2b4] ss:$8 sps:$4 sm:$0xff]  }
  0xc7   : > { %9225 = vmatpush1.bf16.msra.mxu1 %v13227_v62  ;;  %9185 = vmatprep.subr.bf16.mxu0 %v13228_v63  ;;  %v13321_v62 = vld [vmem:[%s15815_s6 + $0x3b4] ss:$8 sps:$4 sm:$0xff]   ;;  %v13316_v63 = vld [vmem:[%s15815_s6 + $0x2b0] ss:$8 sps:$4 sm:$0xff]  }
  0xc8   : > { %9226 = vmatprep.subr.bf16.mxu1 %v13230_v0  ;;  %v13319_v0 = vld [vmem:[%s15815_s6 + $0x3b0] ss:$8 sps:$4 sm:$0xff]  }
  0xca   : > { %9186 = vmatpush1.bf16.msra.mxu0 %v13232_v1  ;;  %v13324_v1 = vld [vmem:[%s15815_s6 + $0x2c4] ss:$8 sps:$4 sm:$0xff]  }
  0xcb   : > { %9227 = vmatpush1.bf16.msra.mxu1 %v13233_v2  ;;  %9187 = vmatprep.subr.bf16.mxu0 %v13234_v3  ;;  %v13327_v2 = vld [vmem:[%s15815_s6 + $0x3c4] ss:$8 sps:$4 sm:$0xff]   ;;  %v13322_v3 = vld [vmem:[%s15815_s6 + $0x2c0] ss:$8 sps:$4 sm:$0xff]  }
  0xcc   : > { %9228 = vmatprep.subr.bf16.mxu1 %v13236_v4  ;;  %v13325_v4 = vld [vmem:[%s15815_s6 + $0x3c0] ss:$8 sps:$4 sm:$0xff]  }
  0xce   : > { %9188 = vmatpush1.bf16.msra.mxu0 %v13238_v5  ;;  %v13330_v5 = vld [vmem:[%s15815_s6 + $0x2d4] ss:$8 sps:$4 sm:$0xff]  }
  0xcf   : > { %9229 = vmatpush1.bf16.msra.mxu1 %v13239_v6  ;;  %9189 = vmatprep.subr.bf16.mxu0 %v13240_v7  ;;  %v13333_v6 = vld [vmem:[%s15815_s6 + $0x3d4] ss:$8 sps:$4 sm:$0xff]   ;;  %v13328_v7 = vld [vmem:[%s15815_s6 + $0x2d0] ss:$8 sps:$4 sm:$0xff]  }
  0xd0   : > { %9230 = vmatprep.subr.bf16.mxu1 %v13242_v8  ;;  %v13331_v8 = vld [vmem:[%s15815_s6 + $0x3d0] ss:$8 sps:$4 sm:$0xff]  }
  0xd2   : > { %9190 = vmatpush1.bf16.msra.mxu0 %v13244_v9  ;;  %v13336_v9 = vld [vmem:[%s15815_s6 + $0x2e4] ss:$8 sps:$4 sm:$0xff]  }
  0xd3   : > { %9231 = vmatpush1.bf16.msra.mxu1 %v13245_v10  ;;  %9241 = vmatprep.subr.bf16.mxu0 %v13252_v11  ;;  %v13339_v10 = vld [vmem:[%s15815_s6 + $0x3e4] ss:$8 sps:$4 sm:$0xff]   ;;  %v13334_v11 = vld [vmem:[%s15815_s6 + $0x2e0] ss:$8 sps:$4 sm:$0xff]  }
  0xd4   : > { %9282 = vmatprep.subr.bf16.mxu1 %v13255_v12  ;;  %v13337_v12 = vld [vmem:[%s15815_s6 + $0x3e0] ss:$8 sps:$4 sm:$0xff]  }
  0xd5   : > { %9192 = vmatmul.mubr.bf16.vlgmr.msra.gmra.mrb[0].mxu0 %v11406_v13  ;;  %v13342_v13 = vld [vmem:[%s15815_s6 + $0x2f4] ss:$8 sps:$4 sm:$0xff]  }
  0xd6   : > { %9233 = vmatmul.mubr.bf16.vlgmr.msra.gmra.mrb[0].mxu1 %v11408_v14  ;;  %9242 = vmatpush1.bf16.msra.mxu0 %v13250_v15  ;;  %v13345_v14 = vld [vmem:[%s15815_s6 + $0x3f4] ss:$8 sps:$4 sm:$0xff]   ;;  %v13340_v15 = vld [vmem:[%s15815_s6 + $0x2f0] ss:$8 sps:$4 sm:$0xff]  }
  0xd7   : > { %9283 = vmatpush1.bf16.msra.mxu1 %v13253_v16  ;;  %9243 = vmatprep.subr.bf16.mxu0 %v13258_v17  ;;  %v13343_v16 = vld [vmem:[%s15815_s6 + $0x3f0] ss:$8 sps:$4 sm:$0xff]   ;;  %v13352_v17 = vld [vmem:[%s15815_s6 + $0x404] ss:$8 sps:$4 sm:$0xff]  }
  0xd8   : > { %9284 = vmatprep.subr.bf16.mxu1 %v13261_v18  ;;  %9273 = vmatprep.mubr.bf16.mxu0 %v11411_v43  ;;  %v13355_v18 = vld [vmem:[%s15815_s6 + $0x504] ss:$8 sps:$4 sm:$0xff]   ;;  %v13382_v43 = vld [vmem:[%s15815_s6 + $0x454] ss:$8 sps:$4 sm:$0xff]  }
  0xd9   : > { %9314 = vmatprep.mubr.bf16.mxu1 %v11413_v44  ;;  %v13385_v44 = vld [vmem:[%s15815_s6 + $0x554] ss:$8 sps:$4 sm:$0xff]  }
  0xda   : > { %9244 = vmatpush1.bf16.msra.mxu0 %v13256_v19  ;;  %v11410_v19 = vcombine.low %v15937_v39, %v15937_v39  ;;  %v13376_v39 = vld [vmem:[%s15815_s6 + $0x444] ss:$8 sps:$4 sm:$0xff]  }
  0xdb   : > { %9285 = vmatpush1.bf16.msra.mxu1 %v13259_v20  ;;  %9245 = vmatprep.subr.bf16.mxu0 %v13264_v21  ;;  %v11412_v20 = vcombine.low %v15940_v40, %v15940_v40  ;;  %v13350_v21 = vld [vmem:[%s15815_s6 + $0x400] ss:$8 sps:$4 sm:$0xff]   ;;  %v13379_v40 = vld [vmem:[%s15815_s6 + $0x544] ss:$8 sps:$4 sm:$0xff]  }
  0xdc   : > { %9286 = vmatprep.subr.bf16.mxu1 %v13267_v22  ;;  %v13353_v22 = vld [vmem:[%s15815_s6 + $0x500] ss:$8 sps:$4 sm:$0xff]  }
  0xde   : > { %9246 = vmatpush1.bf16.msra.mxu0 %v13262_v23  ;;  %v13358_v23 = vld [vmem:[%s15815_s6 + $0x414] ss:$8 sps:$4 sm:$0xff]  }
  0xdf   : > { %9287 = vmatpush1.bf16.msra.mxu1 %v13265_v24  ;;  %9247 = vmatprep.subr.bf16.mxu0 %v13270_v25  ;;  %v13361_v24 = vld [vmem:[%s15815_s6 + $0x514] ss:$8 sps:$4 sm:$0xff]  }
  0xe0   : > { %9288 = vmatprep.subr.bf16.mxu1 %v13273_v26  ;;  %v15995_v25 = vld [vmem:[%s15839_s18 + $0x20] sm:$0xff]  ;;  %v15998_v26 = vld [vmem:[%s15839_s18 + $0x28] sm:$0xff] }
  0xe2   : > { %9248 = vmatpush1.bf16.msra.mxu0 %v13268_v27  ;;  %v11415_v27 = vcombine.high %v15995_v25, %v15995_v25 }
  0xe3   : > { %9289 = vmatpush1.bf16.msra.mxu1 %v13271_v28  ;;  %9249 = vmatprep.subr.bf16.mxu0 %v13276_v29  ;;  %v11417_v28 = vcombine.high %v15998_v26, %v15998_v26  ;;  %v13356_v29 = vld [vmem:[%s15815_s6 + $0x410] ss:$8 sps:$4 sm:$0xff]  }
  0xe4   : > { %9290 = vmatprep.subr.bf16.mxu1 %v13279_v30  ;;  %v13359_v30 = vld [vmem:[%s15815_s6 + $0x510] ss:$8 sps:$4 sm:$0xff]  }
  0xe6   : > { %9250 = vmatpush1.bf16.msra.mxu0 %v13274_v31  ;;  %v13364_v31 = vld [vmem:[%s15815_s6 + $0x424] ss:$8 sps:$4 sm:$0xff]  }
  0xe7   : > { %9291 = vmatpush1.bf16.msra.mxu1 %v13277_v32  ;;  %9251 = vmatprep.subr.bf16.mxu0 %v13282_v33  ;;  %v13367_v32 = vld [vmem:[%s15815_s6 + $0x524] ss:$8 sps:$4 sm:$0xff]   ;;  %v13362_v33 = vld [vmem:[%s15815_s6 + $0x420] ss:$8 sps:$4 sm:$0xff]  }
  0xe8   : > { %9292 = vmatprep.subr.bf16.mxu1 %v13285_v34  ;;  %v13365_v34 = vld [vmem:[%s15815_s6 + $0x520] ss:$8 sps:$4 sm:$0xff]  }
  0xea   : > { %9252 = vmatpush1.bf16.msra.mxu0 %v13280_v35  ;;  %v13370_v35 = vld [vmem:[%s15815_s6 + $0x434] ss:$8 sps:$4 sm:$0xff]  }
  0xeb   : > { %9293 = vmatpush1.bf16.msra.mxu1 %v13283_v36  ;;  %9253 = vmatprep.subr.bf16.mxu0 %v13288_v37  ;;  %v13373_v36 = vld [vmem:[%s15815_s6 + $0x534] ss:$8 sps:$4 sm:$0xff]   ;;  %v13368_v37 = vld [vmem:[%s15815_s6 + $0x430] ss:$8 sps:$4 sm:$0xff]  }
  0xec   : > { %9294 = vmatprep.subr.bf16.mxu1 %v13291_v38  ;;  %v13371_v38 = vld [vmem:[%s15815_s6 + $0x530] ss:$8 sps:$4 sm:$0xff]  }
  0xee   : > { %9254 = vmatpush1.bf16.msra.mxu0 %v13286_v41  ;;  %v13374_v41 = vld [vmem:[%s15815_s6 + $0x440] ss:$8 sps:$4 sm:$0xff]  }
  0xef   : > { %9295 = vmatpush1.bf16.msra.mxu1 %v13289_v42  ;;  %9255 = vmatprep.subr.bf16.mxu0 %v13294_v45  ;;  %v13377_v42 = vld [vmem:[%s15815_s6 + $0x540] ss:$8 sps:$4 sm:$0xff]   ;;  %v13380_v45 = vld [vmem:[%s15815_s6 + $0x450] ss:$8 sps:$4 sm:$0xff]  }
  0xf0   : > { %9296 = vmatprep.subr.bf16.mxu1 %v13297_v46  ;;  %v13383_v46 = vld [vmem:[%s15815_s6 + $0x550] ss:$8 sps:$4 sm:$0xff]  }
  0xf2   : > { %9256 = vmatpush1.bf16.msra.mxu0 %v13292_v47  ;;  %v13388_v47 = vld [vmem:[%s15815_s6 + $0x464] ss:$8 sps:$4 sm:$0xff]  }
  0xf3   : > { %9297 = vmatpush1.bf16.msra.mxu1 %v13295_v48  ;;  %9257 = vmatprep.subr.bf16.mxu0 %v13300_v49  ;;  %v13391_v48 = vld [vmem:[%s15815_s6 + $0x564] ss:$8 sps:$4 sm:$0xff]   ;;  %v13386_v49 = vld [vmem:[%s15815_s6 + $0x460] ss:$8 sps:$4 sm:$0xff]  }
  0xf4   : > { %9298 = vmatprep.subr.bf16.mxu1 %v13303_v50  ;;  %v13389_v50 = vld [vmem:[%s15815_s6 + $0x560] ss:$8 sps:$4 sm:$0xff]  }
  0xf6   : > { %9258 = vmatpush1.bf16.msra.mxu0 %v13298_v51  ;;  %v13394_v51 = vld [vmem:[%s15815_s6 + $0x474] ss:$8 sps:$4 sm:$0xff]  }
  0xf7   : > { %9299 = vmatpush1.bf16.msra.mxu1 %v13301_v52  ;;  %9259 = vmatprep.subr.bf16.mxu0 %v13306_v53  ;;  %v13397_v52 = vld [vmem:[%s15815_s6 + $0x574] ss:$8 sps:$4 sm:$0xff]   ;;  %v13392_v53 = vld [vmem:[%s15815_s6 + $0x470] ss:$8 sps:$4 sm:$0xff]  }
  0xf8   : > { %9300 = vmatprep.subr.bf16.mxu1 %v13309_v54  ;;  %v13395_v54 = vld [vmem:[%s15815_s6 + $0x570] ss:$8 sps:$4 sm:$0xff]  }
  0xfa   : > { %9260 = vmatpush1.bf16.msra.mxu0 %v13304_v55  ;;  %v13400_v55 = vld [vmem:[%s15815_s6 + $0x484] ss:$8 sps:$4 sm:$0xff]  }
  0xfb   : > { %9301 = vmatpush1.bf16.msra.mxu1 %v13307_v56  ;;  %9261 = vmatprep.subr.bf16.mxu0 %v13312_v57  ;;  %v13403_v56 = vld [vmem:[%s15815_s6 + $0x584] ss:$8 sps:$4 sm:$0xff]   ;;  %v13398_v57 = vld [vmem:[%s15815_s6 + $0x480] ss:$8 sps:$4 sm:$0xff]  }
  0xfc   : > { %9302 = vmatprep.subr.bf16.mxu1 %v13315_v58  ;;  %v13401_v58 = vld [vmem:[%s15815_s6 + $0x580] ss:$8 sps:$4 sm:$0xff]  }
  0xfe   : > { %9262 = vmatpush1.bf16.msra.mxu0 %v13310_v59  ;;  %v13406_v59 = vld [vmem:[%s15815_s6 + $0x494] ss:$8 sps:$4 sm:$0xff]  }
  0xff   : > { %9303 = vmatpush1.bf16.msra.mxu1 %v13313_v60  ;;  %9263 = vmatprep.subr.bf16.mxu0 %v13318_v61  ;;  %v13409_v60 = vld [vmem:[%s15815_s6 + $0x594] ss:$8 sps:$4 sm:$0xff]   ;;  %v13404_v61 = vld [vmem:[%s15815_s6 + $0x490] ss:$8 sps:$4 sm:$0xff]  }
 0x100   : > { %9304 = vmatprep.subr.bf16.mxu1 %v13321_v62  ;;  %v13407_v62 = vld [vmem:[%s15815_s6 + $0x590] ss:$8 sps:$4 sm:$0xff]  }
 0x102   : > { %9264 = vmatpush1.bf16.msra.mxu0 %v13316_v63  ;;  %v13412_v63 = vld [vmem:[%s15815_s6 + $0x4a4] ss:$8 sps:$4 sm:$0xff]  }
 0x103   : > { %9305 = vmatpush1.bf16.msra.mxu1 %v13319_v0  ;;  %9265 = vmatprep.subr.bf16.mxu0 %v13324_v1  ;;  %v13415_v0 = vld [vmem:[%s15815_s6 + $0x5a4] ss:$8 sps:$4 sm:$0xff]   ;;  %v13410_v1 = vld [vmem:[%s15815_s6 + $0x4a0] ss:$8 sps:$4 sm:$0xff]  }
 0x104   : > { %9306 = vmatprep.subr.bf16.mxu1 %v13327_v2  ;;  %v13413_v2 = vld [vmem:[%s15815_s6 + $0x5a0] ss:$8 sps:$4 sm:$0xff]  }
 0x106   : > { %9266 = vmatpush1.bf16.msra.mxu0 %v13322_v3  ;;  %v13418_v3 = vld [vmem:[%s15815_s6 + $0x4b4] ss:$8 sps:$4 sm:$0xff]  }
 0x107   : > { %9307 = vmatpush1.bf16.msra.mxu1 %v13325_v4  ;;  %9267 = vmatprep.subr.bf16.mxu0 %v13330_v5  ;;  %v13421_v4 = vld [vmem:[%s15815_s6 + $0x5b4] ss:$8 sps:$4 sm:$0xff]   ;;  %v13416_v5 = vld [vmem:[%s15815_s6 + $0x4b0] ss:$8 sps:$4 sm:$0xff]  }
 0x108   : > { %9308 = vmatprep.subr.bf16.mxu1 %v13333_v6  ;;  %v13419_v6 = vld [vmem:[%s15815_s6 + $0x5b0] ss:$8 sps:$4 sm:$0xff]  }
 0x10a   : > { %9268 = vmatpush1.bf16.msra.mxu0 %v13328_v7  ;;  %v13424_v7 = vld [vmem:[%s15815_s6 + $0x4c4] ss:$8 sps:$4 sm:$0xff]  }
 0x10b   : > { %9309 = vmatpush1.bf16.msra.mxu1 %v13331_v8  ;;  %9269 = vmatprep.subr.bf16.mxu0 %v13336_v9  ;;  %v13427_v8 = vld [vmem:[%s15815_s6 + $0x5c4] ss:$8 sps:$4 sm:$0xff]   ;;  %v13422_v9 = vld [vmem:[%s15815_s6 + $0x4c0] ss:$8 sps:$4 sm:$0xff]  }
 0x10c   : > { %9310 = vmatprep.subr.bf16.mxu1 %v13339_v10  ;;  %v13425_v10 = vld [vmem:[%s15815_s6 + $0x5c0] ss:$8 sps:$4 sm:$0xff]  }
 0x10e   : > { %9270 = vmatpush1.bf16.msra.mxu0 %v13334_v11  ;;  %v13430_v11 = vld [vmem:[%s15815_s6 + $0x4d4] ss:$8 sps:$4 sm:$0xff]  }
 0x10f   : > { %9311 = vmatpush1.bf16.msra.mxu1 %v13337_v12  ;;  %9271 = vmatprep.subr.bf16.mxu0 %v13342_v13  ;;  %v13433_v12 = vld [vmem:[%s15815_s6 + $0x5d4] ss:$8 sps:$4 sm:$0xff]   ;;  %v13428_v13 = vld [vmem:[%s15815_s6 + $0x4d0] ss:$8 sps:$4 sm:$0xff]  }
 0x110   : > { %9312 = vmatprep.subr.bf16.mxu1 %v13345_v14  ;;  %v13431_v14 = vld [vmem:[%s15815_s6 + $0x5d0] ss:$8 sps:$4 sm:$0xff]  }
 0x112   : > { %9272 = vmatpush1.bf16.msra.mxu0 %v13340_v15  ;;  %v13436_v15 = vld [vmem:[%s15815_s6 + $0x4e4] ss:$8 sps:$4 sm:$0xff]  }
 0x113   : > { %9313 = vmatpush1.bf16.msra.mxu1 %v13343_v16  ;;  %9323 = vmatprep.subr.bf16.mxu0 %v13352_v17  ;;  %v13439_v16 = vld [vmem:[%s15815_s6 + $0x5e4] ss:$8 sps:$4 sm:$0xff]   ;;  %v13434_v17 = vld [vmem:[%s15815_s6 + $0x4e0] ss:$8 sps:$4 sm:$0xff]  }
 0x114   : > { %9364 = vmatprep.subr.bf16.mxu1 %v13355_v18  ;;  %v13437_v18 = vld [vmem:[%s15815_s6 + $0x5e0] ss:$8 sps:$4 sm:$0xff]  }
 0x115   : > { %9274 = vmatmul.mubr.bf16.vlgmr.msra.gmra.mrb[4].mxu0 %v11410_v19  ;;  %v13442_v19 = vld [vmem:[%s15815_s6 + $0x4f4] ss:$8 sps:$4 sm:$0xff]  }
 0x116   : > { %9315 = vmatmul.mubr.bf16.vlgmr.msra.gmra.mrb[4].mxu1 %v11412_v20  ;;  %9324 = vmatpush1.bf16.msra.mxu0 %v13350_v21  ;;  %v13445_v20 = vld [vmem:[%s15815_s6 + $0x5f4] ss:$8 sps:$4 sm:$0xff]   ;;  %v13440_v21 = vld [vmem:[%s15815_s6 + $0x4f0] ss:$8 sps:$4 sm:$0xff]  }
 0x117   : > { %9365 = vmatpush1.bf16.msra.mxu1 %v13353_v22  ;;  %9325 = vmatprep.subr.bf16.mxu0 %v13358_v23  ;;  %v13443_v22 = vld [vmem:[%s15815_s6 + $0x5f0] ss:$8 sps:$4 sm:$0xff]   ;;  %v13452_v23 = vld [vmem:[%s15815_s6 + $0x604] ss:$8 sps:$4 sm:$0xff]  }
 0x118   : > { %9366 = vmatprep.subr.bf16.mxu1 %v13361_v24  ;;  %9355 = vmatprep.mubr.bf16.mxu0 %v11415_v27  ;;  %v13455_v24 = vld [vmem:[%s15815_s6 + $0x704] ss:$8 sps:$4 sm:$0xff]   ;;  %v13450_v27 = vld [vmem:[%s15815_s6 + $0x600] ss:$8 sps:$4 sm:$0xff]  }
 0x119   : > { %9396 = vmatprep.mubr.bf16.mxu1 %v11417_v28  ;;  %v13453_v28 = vld [vmem:[%s15815_s6 + $0x700] ss:$8 sps:$4 sm:$0xff]  }
 0x11a   : > { %9326 = vmatpush1.bf16.msra.mxu0 %v13356_v29  ;;  %v11414_v29 = vcombine.low %v15995_v25, %v15995_v25 }
 0x11b   : > { %9367 = vmatpush1.bf16.msra.mxu1 %v13359_v30  ;;  %9327 = vmatprep.subr.bf16.mxu0 %v13364_v31  ;;  %v11416_v30 = vcombine.low %v15998_v26, %v15998_v26  ;;  %v16071_v31 = vld [vmem:[%s15839_s18 + $0x30] sm:$0xff] }
 0x11c   : > { %9368 = vmatprep.subr.bf16.mxu1 %v13367_v32  ;;  %v16074_v32 = vld [vmem:[%s15839_s18 + $0x38] sm:$0xff]  ;;  %v11419_v25 = vcombine.high %v16071_v31, %v16071_v31 }
 0x11d   : > { %v11421_v26 = vcombine.high %v16074_v32, %v16074_v32 }
 0x11e   : > { %9328 = vmatpush1.bf16.msra.mxu0 %v13362_v33  ;;  %v13458_v33 = vld [vmem:[%s15815_s6 + $0x614] ss:$8 sps:$4 sm:$0xff]  }
 0x11f   : > { %9369 = vmatpush1.bf16.msra.mxu1 %v13365_v34  ;;  %9329 = vmatprep.subr.bf16.mxu0 %v13370_v35  ;;  %v13461_v34 = vld [vmem:[%s15815_s6 + $0x714] ss:$8 sps:$4 sm:$0xff]   ;;  %v13456_v35 = vld [vmem:[%s15815_s6 + $0x610] ss:$8 sps:$4 sm:$0xff]  }
 0x120   : > { %9370 = vmatprep.subr.bf16.mxu1 %v13373_v36  ;;  %v13459_v36 = vld [vmem:[%s15815_s6 + $0x710] ss:$8 sps:$4 sm:$0xff]  }
 0x122   : > { %9330 = vmatpush1.bf16.msra.mxu0 %v13368_v37  ;;  %v13464_v37 = vld [vmem:[%s15815_s6 + $0x624] ss:$8 sps:$4 sm:$0xff]  }
 0x123   : > { %9371 = vmatpush1.bf16.msra.mxu1 %v13371_v38  ;;  %9331 = vmatprep.subr.bf16.mxu0 %v13376_v39  ;;  %v13467_v38 = vld [vmem:[%s15815_s6 + $0x724] ss:$8 sps:$4 sm:$0xff]   ;;  %v13462_v39 = vld [vmem:[%s15815_s6 + $0x620] ss:$8 sps:$4 sm:$0xff]  }
 0x124   : > { %9372 = vmatprep.subr.bf16.mxu1 %v13379_v40  ;;  %v13465_v40 = vld [vmem:[%s15815_s6 + $0x720] ss:$8 sps:$4 sm:$0xff]  }
 0x126   : > { %9332 = vmatpush1.bf16.msra.mxu0 %v13374_v41  ;;  %v13470_v41 = vld [vmem:[%s15815_s6 + $0x634] ss:$8 sps:$4 sm:$0xff]  }
 0x127   : > { %9373 = vmatpush1.bf16.msra.mxu1 %v13377_v42  ;;  %9333 = vmatprep.subr.bf16.mxu0 %v13382_v43  ;;  %v13473_v42 = vld [vmem:[%s15815_s6 + $0x734] ss:$8 sps:$4 sm:$0xff]   ;;  %v13468_v43 = vld [vmem:[%s15815_s6 + $0x630] ss:$8 sps:$4 sm:$0xff]  }
 0x128   : > { %9374 = vmatprep.subr.bf16.mxu1 %v13385_v44  ;;  %v13471_v44 = vld [vmem:[%s15815_s6 + $0x730] ss:$8 sps:$4 sm:$0xff]  }
 0x12a   : > { %9334 = vmatpush1.bf16.msra.mxu0 %v13380_v45  ;;  %v13476_v45 = vld [vmem:[%s15815_s6 + $0x644] ss:$8 sps:$4 sm:$0xff]  }
 0x12b   : > { %9375 = vmatpush1.bf16.msra.mxu1 %v13383_v46  ;;  %9335 = vmatprep.subr.bf16.mxu0 %v13388_v47  ;;  %v13479_v46 = vld [vmem:[%s15815_s6 + $0x744] ss:$8 sps:$4 sm:$0xff]   ;;  %v13474_v47 = vld [vmem:[%s15815_s6 + $0x640] ss:$8 sps:$4 sm:$0xff]  }
 0x12c   : > { %9376 = vmatprep.subr.bf16.mxu1 %v13391_v48  ;;  %v13477_v48 = vld [vmem:[%s15815_s6 + $0x740] ss:$8 sps:$4 sm:$0xff]  }
 0x12e   : > { %9336 = vmatpush1.bf16.msra.mxu0 %v13386_v49  ;;  %v13482_v49 = vld [vmem:[%s15815_s6 + $0x654] ss:$8 sps:$4 sm:$0xff]  }
 0x12f   : > { %9377 = vmatpush1.bf16.msra.mxu1 %v13389_v50  ;;  %9337 = vmatprep.subr.bf16.mxu0 %v13394_v51  ;;  %v13485_v50 = vld [vmem:[%s15815_s6 + $0x754] ss:$8 sps:$4 sm:$0xff]   ;;  %v13480_v51 = vld [vmem:[%s15815_s6 + $0x650] ss:$8 sps:$4 sm:$0xff]  }
 0x130   : > { %9378 = vmatprep.subr.bf16.mxu1 %v13397_v52  ;;  %v13483_v52 = vld [vmem:[%s15815_s6 + $0x750] ss:$8 sps:$4 sm:$0xff]  }
 0x132   : > { %9338 = vmatpush1.bf16.msra.mxu0 %v13392_v53  ;;  %v13488_v53 = vld [vmem:[%s15815_s6 + $0x664] ss:$8 sps:$4 sm:$0xff]  }
 0x133   : > { %9379 = vmatpush1.bf16.msra.mxu1 %v13395_v54  ;;  %9339 = vmatprep.subr.bf16.mxu0 %v13400_v55  ;;  %v13491_v54 = vld [vmem:[%s15815_s6 + $0x764] ss:$8 sps:$4 sm:$0xff]   ;;  %v13486_v55 = vld [vmem:[%s15815_s6 + $0x660] ss:$8 sps:$4 sm:$0xff]  }
 0x134   : > { %9380 = vmatprep.subr.bf16.mxu1 %v13403_v56  ;;  %v13489_v56 = vld [vmem:[%s15815_s6 + $0x760] ss:$8 sps:$4 sm:$0xff]  }
 0x136   : > { %9340 = vmatpush1.bf16.msra.mxu0 %v13398_v57  ;;  %v13494_v57 = vld [vmem:[%s15815_s6 + $0x674] ss:$8 sps:$4 sm:$0xff]  }
 0x137   : > { %9381 = vmatpush1.bf16.msra.mxu1 %v13401_v58  ;;  %9341 = vmatprep.subr.bf16.mxu0 %v13406_v59  ;;  %v13497_v58 = vld [vmem:[%s15815_s6 + $0x774] ss:$8 sps:$4 sm:$0xff]   ;;  %v13492_v59 = vld [vmem:[%s15815_s6 + $0x670] ss:$8 sps:$4 sm:$0xff]  }
 0x138   : > { %9382 = vmatprep.subr.bf16.mxu1 %v13409_v60  ;;  %v13495_v60 = vld [vmem:[%s15815_s6 + $0x770] ss:$8 sps:$4 sm:$0xff]  }
 0x13a   : > { %9342 = vmatpush1.bf16.msra.mxu0 %v13404_v61  ;;  %v13500_v61 = vld [vmem:[%s15815_s6 + $0x684] ss:$8 sps:$4 sm:$0xff]  }
 0x13b   : > { %9383 = vmatpush1.bf16.msra.mxu1 %v13407_v62  ;;  %9343 = vmatprep.subr.bf16.mxu0 %v13412_v63  ;;  %v13503_v62 = vld [vmem:[%s15815_s6 + $0x784] ss:$8 sps:$4 sm:$0xff]   ;;  %v13498_v63 = vld [vmem:[%s15815_s6 + $0x680] ss:$8 sps:$4 sm:$0xff]  }
 0x13c   : > { %9384 = vmatprep.subr.bf16.mxu1 %v13415_v0  ;;  %v13501_v0 = vld [vmem:[%s15815_s6 + $0x780] ss:$8 sps:$4 sm:$0xff]  }
 0x13e   : > { %9344 = vmatpush1.bf16.msra.mxu0 %v13410_v1  ;;  %v13506_v1 = vld [vmem:[%s15815_s6 + $0x694] ss:$8 sps:$4 sm:$0xff]  }
 0x13f   : > { %9385 = vmatpush1.bf16.msra.mxu1 %v13413_v2  ;;  %9345 = vmatprep.subr.bf16.mxu0 %v13418_v3  ;;  %v13509_v2 = vld [vmem:[%s15815_s6 + $0x794] ss:$8 sps:$4 sm:$0xff]   ;;  %v13504_v3 = vld [vmem:[%s15815_s6 + $0x690] ss:$8 sps:$4 sm:$0xff]  }
 0x140   : > { %9386 = vmatprep.subr.bf16.mxu1 %v13421_v4  ;;  %v13507_v4 = vld [vmem:[%s15815_s6 + $0x790] ss:$8 sps:$4 sm:$0xff]  }
 0x142   : > { %9346 = vmatpush1.bf16.msra.mxu0 %v13416_v5  ;;  %v13512_v5 = vld [vmem:[%s15815_s6 + $0x6a4] ss:$8 sps:$4 sm:$0xff]  }
 0x143   : > { %9387 = vmatpush1.bf16.msra.mxu1 %v13419_v6  ;;  %9347 = vmatprep.subr.bf16.mxu0 %v13424_v7  ;;  %v13515_v6 = vld [vmem:[%s15815_s6 + $0x7a4] ss:$8 sps:$4 sm:$0xff]   ;;  %v13510_v7 = vld [vmem:[%s15815_s6 + $0x6a0] ss:$8 sps:$4 sm:$0xff]  }
 0x144   : > { %9388 = vmatprep.subr.bf16.mxu1 %v13427_v8  ;;  %v13513_v8 = vld [vmem:[%s15815_s6 + $0x7a0] ss:$8 sps:$4 sm:$0xff]  }
 0x146   : > { %9348 = vmatpush1.bf16.msra.mxu0 %v13422_v9  ;;  %v13518_v9 = vld [vmem:[%s15815_s6 + $0x6b4] ss:$8 sps:$4 sm:$0xff]  }
 0x147   : > { %9389 = vmatpush1.bf16.msra.mxu1 %v13425_v10  ;;  %9349 = vmatprep.subr.bf16.mxu0 %v13430_v11  ;;  %v13521_v10 = vld [vmem:[%s15815_s6 + $0x7b4] ss:$8 sps:$4 sm:$0xff]   ;;  %v13516_v11 = vld [vmem:[%s15815_s6 + $0x6b0] ss:$8 sps:$4 sm:$0xff]  }
 0x148   : > { %9390 = vmatprep.subr.bf16.mxu1 %v13433_v12  ;;  %v13519_v12 = vld [vmem:[%s15815_s6 + $0x7b0] ss:$8 sps:$4 sm:$0xff]  }
 0x14a   : > { %9350 = vmatpush1.bf16.msra.mxu0 %v13428_v13  ;;  %v13524_v13 = vld [vmem:[%s15815_s6 + $0x6c4] ss:$8 sps:$4 sm:$0xff]  }
 0x14b   : > { %9391 = vmatpush1.bf16.msra.mxu1 %v13431_v14  ;;  %9351 = vmatprep.subr.bf16.mxu0 %v13436_v15  ;;  %v13527_v14 = vld [vmem:[%s15815_s6 + $0x7c4] ss:$8 sps:$4 sm:$0xff]   ;;  %v13522_v15 = vld [vmem:[%s15815_s6 + $0x6c0] ss:$8 sps:$4 sm:$0xff]  }
 0x14c   : > { %9392 = vmatprep.subr.bf16.mxu1 %v13439_v16  ;;  %v13525_v16 = vld [vmem:[%s15815_s6 + $0x7c0] ss:$8 sps:$4 sm:$0xff]  }
 0x14e   : > { %9352 = vmatpush1.bf16.msra.mxu0 %v13434_v17  ;;  %v13530_v17 = vld [vmem:[%s15815_s6 + $0x6d4] ss:$8 sps:$4 sm:$0xff]  }
 0x14f   : > { %9393 = vmatpush1.bf16.msra.mxu1 %v13437_v18  ;;  %9353 = vmatprep.subr.bf16.mxu0 %v13442_v19  ;;  %v13533_v18 = vld [vmem:[%s15815_s6 + $0x7d4] ss:$8 sps:$4 sm:$0xff]   ;;  %v13528_v19 = vld [vmem:[%s15815_s6 + $0x6d0] ss:$8 sps:$4 sm:$0xff]  }
 0x150   : > { %9394 = vmatprep.subr.bf16.mxu1 %v13445_v20  ;;  %v13531_v20 = vld [vmem:[%s15815_s6 + $0x7d0] ss:$8 sps:$4 sm:$0xff]  }
 0x152   : > { %9354 = vmatpush1.bf16.msra.mxu0 %v13440_v21  ;;  %v13536_v21 = vld [vmem:[%s15815_s6 + $0x6e4] ss:$8 sps:$4 sm:$0xff]  }
 0x153   : > { %9395 = vmatpush1.bf16.msra.mxu1 %v13443_v22  ;;  %9405 = vmatprep.subr.bf16.mxu0 %v13452_v23  ;;  %v13539_v22 = vld [vmem:[%s15815_s6 + $0x7e4] ss:$8 sps:$4 sm:$0xff]   ;;  %v13534_v23 = vld [vmem:[%s15815_s6 + $0x6e0] ss:$8 sps:$4 sm:$0xff]  }
 0x154   : > { %9446 = vmatprep.subr.bf16.mxu1 %v13455_v24  ;;  %v13537_v24 = vld [vmem:[%s15815_s6 + $0x7e0] ss:$8 sps:$4 sm:$0xff]  }
 0x155   : > { %9356 = vmatmul.mubr.bf16.vlgmr.msra.gmra.mrb[8].mxu0 %v11414_v29  ;;  %v13540_v29 = vld [vmem:[%s15815_s6 + $0x6f0] ss:$8 sps:$4 sm:$0xff]  }
 0x156   : > { %9397 = vmatmul.mubr.bf16.vlgmr.msra.gmra.mrb[8].mxu1 %v11416_v30  ;;  %9406 = vmatpush1.bf16.msra.mxu0 %v13450_v27  ;;  %v13542_v27 = vld [vmem:[%s15815_s6 + $0x6f4] ss:$8 sps:$4 sm:$0xff]   ;;  %v13543_v30 = vld [vmem:[%s15815_s6 + $0x7f0] ss:$8 sps:$4 sm:$0xff]  }
 0x157   : > { %9447 = vmatpush1.bf16.msra.mxu1 %v13453_v28  ;;  %9407 = vmatprep.subr.bf16.mxu0 %v13458_v33  ;;  %v13545_v28 = vld [vmem:[%s15815_s6 + $0x7f4] ss:$8 sps:$4 sm:$0xff]   ;;  %v13552_v33 = vld [vmem:[%s15815_s6 + $0x804] ss:$8 sps:$4 sm:$0xff]  }
 0x158   : > { %9448 = vmatprep.subr.bf16.mxu1 %v13461_v34  ;;  %9437 = vmatprep.mubr.bf16.mxu0 %v11419_v25  ;;  %v13555_v34 = vld [vmem:[%s15815_s6 + $0x904] ss:$8 sps:$4 sm:$0xff]   ;;  %v16143_v25 = vld [vmem:[%s15839_s18 + $0x40] sm:$0xff] }
 0x159   : > { %9478 = vmatprep.mubr.bf16.mxu1 %v11421_v26  ;;  %v11418_v26 = vcombine.low %v16071_v31, %v16071_v31  ;;  %v11423_v31 = vcombine.high %v16143_v25, %v16143_v25 }
 0x15a   : > { %9408 = vmatpush1.bf16.msra.mxu0 %v13456_v35  ;;  %v11420_v35 = vcombine.low %v16074_v32, %v16074_v32 }
 0x15b   : > { %9449 = vmatpush1.bf16.msra.mxu1 %v13459_v36  ;;  %9409 = vmatprep.subr.bf16.mxu0 %v13464_v37  ;;  %v16150_v36 = vld [vmem:[%s15839_s18 + $0x48] sm:$0xff]  ;;  %v13550_v37 = vld [vmem:[%s15815_s6 + $0x800] ss:$8 sps:$4 sm:$0xff]  }
 0x15c   : > { %9450 = vmatprep.subr.bf16.mxu1 %v13467_v38  ;;  %v13553_v38 = vld [vmem:[%s15815_s6 + $0x900] ss:$8 sps:$4 sm:$0xff]   ;;  %v11425_v32 = vcombine.high %v16150_v36, %v16150_v36 }
 0x15e   : > { %9410 = vmatpush1.bf16.msra.mxu0 %v13462_v39  ;;  %v13558_v39 = vld [vmem:[%s15815_s6 + $0x814] ss:$8 sps:$4 sm:$0xff]  }
 0x15f   : > { %9451 = vmatpush1.bf16.msra.mxu1 %v13465_v40  ;;  %9411 = vmatprep.subr.bf16.mxu0 %v13470_v41  ;;  %v13561_v40 = vld [vmem:[%s15815_s6 + $0x914] ss:$8 sps:$4 sm:$0xff]   ;;  %v13556_v41 = vld [vmem:[%s15815_s6 + $0x810] ss:$8 sps:$4 sm:$0xff]  }
 0x160   : > { %9452 = vmatprep.subr.bf16.mxu1 %v13473_v42  ;;  %v13559_v42 = vld [vmem:[%s15815_s6 + $0x910] ss:$8 sps:$4 sm:$0xff]  }
 0x162   : > { %9412 = vmatpush1.bf16.msra.mxu0 %v13468_v43  ;;  %v13564_v43 = vld [vmem:[%s15815_s6 + $0x824] ss:$8 sps:$4 sm:$0xff]  }
 0x163   : > { %9453 = vmatpush1.bf16.msra.mxu1 %v13471_v44  ;;  %9413 = vmatprep.subr.bf16.mxu0 %v13476_v45  ;;  %v13567_v44 = vld [vmem:[%s15815_s6 + $0x924] ss:$8 sps:$4 sm:$0xff]   ;;  %v13562_v45 = vld [vmem:[%s15815_s6 + $0x820] ss:$8 sps:$4 sm:$0xff]  }
 0x164   : > { %9454 = vmatprep.subr.bf16.mxu1 %v13479_v46  ;;  %v13565_v46 = vld [vmem:[%s15815_s6 + $0x920] ss:$8 sps:$4 sm:$0xff]  }
 0x166   : > { %9414 = vmatpush1.bf16.msra.mxu0 %v13474_v47  ;;  %v13570_v47 = vld [vmem:[%s15815_s6 + $0x834] ss:$8 sps:$4 sm:$0xff]  }
 0x167   : > { %9455 = vmatpush1.bf16.msra.mxu1 %v13477_v48  ;;  %9415 = vmatprep.subr.bf16.mxu0 %v13482_v49  ;;  %v13573_v48 = vld [vmem:[%s15815_s6 + $0x934] ss:$8 sps:$4 sm:$0xff]   ;;  %v13568_v49 = vld [vmem:[%s15815_s6 + $0x830] ss:$8 sps:$4 sm:$0xff]  }
 0x168   : > { %9456 = vmatprep.subr.bf16.mxu1 %v13485_v50  ;;  %v13571_v50 = vld [vmem:[%s15815_s6 + $0x930] ss:$8 sps:$4 sm:$0xff]  }
 0x16a   : > { %9416 = vmatpush1.bf16.msra.mxu0 %v13480_v51  ;;  %v13576_v51 = vld [vmem:[%s15815_s6 + $0x844] ss:$8 sps:$4 sm:$0xff]  }
 0x16b   : > { %9457 = vmatpush1.bf16.msra.mxu1 %v13483_v52  ;;  %9417 = vmatprep.subr.bf16.mxu0 %v13488_v53  ;;  %v13579_v52 = vld [vmem:[%s15815_s6 + $0x944] ss:$8 sps:$4 sm:$0xff]   ;;  %v13574_v53 = vld [vmem:[%s15815_s6 + $0x840] ss:$8 sps:$4 sm:$0xff]  }
 0x16c   : > { %9458 = vmatprep.subr.bf16.mxu1 %v13491_v54  ;;  %v13577_v54 = vld [vmem:[%s15815_s6 + $0x940] ss:$8 sps:$4 sm:$0xff]  }
 0x16e   : > { %9418 = vmatpush1.bf16.msra.mxu0 %v13486_v55  ;;  %v13582_v55 = vld [vmem:[%s15815_s6 + $0x854] ss:$8 sps:$4 sm:$0xff]  }
 0x16f   : > { %9459 = vmatpush1.bf16.msra.mxu1 %v13489_v56  ;;  %9419 = vmatprep.subr.bf16.mxu0 %v13494_v57  ;;  %v13585_v56 = vld [vmem:[%s15815_s6 + $0x954] ss:$8 sps:$4 sm:$0xff]   ;;  %v13580_v57 = vld [vmem:[%s15815_s6 + $0x850] ss:$8 sps:$4 sm:$0xff]  }
 0x170   : > { %9460 = vmatprep.subr.bf16.mxu1 %v13497_v58  ;;  %v13583_v58 = vld [vmem:[%s15815_s6 + $0x950] ss:$8 sps:$4 sm:$0xff]  }
 0x172   : > { %9420 = vmatpush1.bf16.msra.mxu0 %v13492_v59  ;;  %v13588_v59 = vld [vmem:[%s15815_s6 + $0x864] ss:$8 sps:$4 sm:$0xff]  }
 0x173   : > { %9461 = vmatpush1.bf16.msra.mxu1 %v13495_v60  ;;  %9421 = vmatprep.subr.bf16.mxu0 %v13500_v61  ;;  %v13591_v60 = vld [vmem:[%s15815_s6 + $0x964] ss:$8 sps:$4 sm:$0xff]  }
 0x174   : > { %9462 = vmatprep.subr.bf16.mxu1 %v13503_v62 }
 0x176   : > { %9422 = vmatpush1.bf16.msra.mxu0 %v13498_v63  ;;  %v13586_v63 = vld [vmem:[%s15815_s6 + $0x860] ss:$8 sps:$4 sm:$0xff]  }
 0x177   : > { %9463 = vmatpush1.bf16.msra.mxu1 %v13501_v0  ;;  %9423 = vmatprep.subr.bf16.mxu0 %v13506_v1  ;;  %v13589_v0 = vld [vmem:[%s15815_s6 + $0x960] ss:$8 sps:$4 sm:$0xff]  }
 0x178   : > { %9464 = vmatprep.subr.bf16.mxu1 %v13509_v2 }
 0x17a   : > { %9424 = vmatpush1.bf16.msra.mxu0 %v13504_v3 }
 0x17b   : > { %9465 = vmatpush1.bf16.msra.mxu1 %v13507_v4  ;;  %9425 = vmatprep.subr.bf16.mxu0 %v13512_v5 }
 0x17c   : > { %9466 = vmatprep.subr.bf16.mxu1 %v13515_v6 }
 0x17e   : > { %9426 = vmatpush1.bf16.msra.mxu0 %v13510_v7 }
 0x17f   : > { %9467 = vmatpush1.bf16.msra.mxu1 %v13513_v8  ;;  %9427 = vmatprep.subr.bf16.mxu0 %v13518_v9  ;;  %v13594_v9 = vld [vmem:[%s15815_s6 + $0x874] ss:$8 sps:$4 sm:$0xff]  }
 0x180   : > { %9468 = vmatprep.subr.bf16.mxu1 %v13521_v10  ;;  %v13597_v10 = vld [vmem:[%s15815_s6 + $0x974] ss:$8 sps:$4 sm:$0xff]  }
 0x182   : > { %9428 = vmatpush1.bf16.msra.mxu0 %v13516_v11  ;;  %v13592_v11 = vld [vmem:[%s15815_s6 + $0x870] ss:$8 sps:$4 sm:$0xff]  }
 0x183   : > { %9469 = vmatpush1.bf16.msra.mxu1 %v13519_v12  ;;  %9429 = vmatprep.subr.bf16.mxu0 %v13524_v13  ;;  %v13595_v12 = vld [vmem:[%s15815_s6 + $0x970] ss:$8 sps:$4 sm:$0xff]   ;;  %v13600_v13 = vld [vmem:[%s15815_s6 + $0x884] ss:$8 sps:$4 sm:$0xff]  }
 0x184   : > { %9470 = vmatprep.subr.bf16.mxu1 %v13527_v14  ;;  %v13603_v14 = vld [vmem:[%s15815_s6 + $0x984] ss:$8 sps:$4 sm:$0xff]  }
 0x186   : > { %9430 = vmatpush1.bf16.msra.mxu0 %v13522_v15  ;;  %v13598_v15 = vld [vmem:[%s15815_s6 + $0x880] ss:$8 sps:$4 sm:$0xff]  }
 0x187   : > { %9471 = vmatpush1.bf16.msra.mxu1 %v13525_v16  ;;  %9431 = vmatprep.subr.bf16.mxu0 %v13530_v17  ;;  %v13601_v16 = vld [vmem:[%s15815_s6 + $0x980] ss:$8 sps:$4 sm:$0xff]   ;;  %v13606_v17 = vld [vmem:[%s15815_s6 + $0x894] ss:$8 sps:$4 sm:$0xff]  }
 0x188   : > { %9472 = vmatprep.subr.bf16.mxu1 %v13533_v18  ;;  %v13609_v18 = vld [vmem:[%s15815_s6 + $0x994] ss:$8 sps:$4 sm:$0xff]  }
 0x18a   : > { %9432 = vmatpush1.bf16.msra.mxu0 %v13528_v19  ;;  %v13604_v19 = vld [vmem:[%s15815_s6 + $0x890] ss:$8 sps:$4 sm:$0xff]  }
 0x18b   : > { %9473 = vmatpush1.bf16.msra.mxu1 %v13531_v20  ;;  %9433 = vmatprep.subr.bf16.mxu0 %v13536_v21  ;;  %v13607_v20 = vld [vmem:[%s15815_s6 + $0x990] ss:$8 sps:$4 sm:$0xff]   ;;  %v13612_v21 = vld [vmem:[%s15815_s6 + $0x8a4] ss:$8 sps:$4 sm:$0xff]  }
 0x18c   : > { %9474 = vmatprep.subr.bf16.mxu1 %v13539_v22  ;;  %v13615_v22 = vld [vmem:[%s15815_s6 + $0x9a4] ss:$8 sps:$4 sm:$0xff]  }
 0x18e   : > { %9434 = vmatpush1.bf16.msra.mxu0 %v13534_v23  ;;  %v13610_v23 = vld [vmem:[%s15815_s6 + $0x8a0] ss:$8 sps:$4 sm:$0xff]  }
 0x18f   : > { %9475 = vmatpush1.bf16.msra.mxu1 %v13537_v24  ;;  %9435 = vmatprep.subr.bf16.mxu0 %v13542_v27  ;;  %v13613_v24 = vld [vmem:[%s15815_s6 + $0x9a0] ss:$8 sps:$4 sm:$0xff]   ;;  %v13618_v27 = vld [vmem:[%s15815_s6 + $0x8b4] ss:$8 sps:$4 sm:$0xff]  }
 0x190   : > { %9476 = vmatprep.subr.bf16.mxu1 %v13545_v28  ;;  %v13621_v28 = vld [vmem:[%s15815_s6 + $0x9b4] ss:$8 sps:$4 sm:$0xff]  }
 0x192   : > { %9436 = vmatpush1.bf16.msra.mxu0 %v13540_v29  ;;  %v13616_v29 = vld [vmem:[%s15815_s6 + $0x8b0] ss:$8 sps:$4 sm:$0xff]  }
 0x193   : > { %9477 = vmatpush1.bf16.msra.mxu1 %v13543_v30  ;;  %9487 = vmatprep.subr.bf16.mxu0 %v13552_v33  ;;  %v13619_v30 = vld [vmem:[%s15815_s6 + $0x9b0] ss:$8 sps:$4 sm:$0xff]   ;;  %v13624_v33 = vld [vmem:[%s15815_s6 + $0x8c4] ss:$8 sps:$4 sm:$0xff]  }
 0x194   : > { %9528 = vmatprep.subr.bf16.mxu1 %v13555_v34  ;;  %v13627_v34 = vld [vmem:[%s15815_s6 + $0x9c4] ss:$8 sps:$4 sm:$0xff]  }
 0x195   : > { %9438 = vmatmul.mubr.bf16.vlgmr.msra.gmra.mrb[12].mxu0 %v11418_v26  ;;  %v13622_v26 = vld [vmem:[%s15815_s6 + $0x8c0] ss:$8 sps:$4 sm:$0xff]  }
 0x196   : > { %9479 = vmatmul.mubr.bf16.vlgmr.msra.gmra.mrb[12].mxu1 %v11420_v35  ;;  %9488 = vmatpush1.bf16.msra.mxu0 %v13550_v37  ;;  %v13625_v35 = vld [vmem:[%s15815_s6 + $0x9c0] ss:$8 sps:$4 sm:$0xff]   ;;  %v13630_v37 = vld [vmem:[%s15815_s6 + $0x8d4] ss:$8 sps:$4 sm:$0xff]  }
 0x197   : > { %9529 = vmatpush1.bf16.msra.mxu1 %v13553_v38  ;;  %9489 = vmatprep.subr.bf16.mxu0 %v13558_v39  ;;  %v13633_v38 = vld [vmem:[%s15815_s6 + $0x9d4] ss:$8 sps:$4 sm:$0xff]   ;;  %v13628_v39 = vld [vmem:[%s15815_s6 + $0x8d0] ss:$8 sps:$4 sm:$0xff]  }
 0x198   : > { %9530 = vmatprep.subr.bf16.mxu1 %v13561_v40  ;;  %9519 = vmatprep.mubr.bf16.mxu0 %v11423_v31  ;;  %v13631_v40 = vld [vmem:[%s15815_s6 + $0x9d0] ss:$8 sps:$4 sm:$0xff]   ;;  %v13636_v31 = vld [vmem:[%s15815_s6 + $0x8e4] ss:$8 sps:$4 sm:$0xff]  }
 0x199   : > { %9560 = vmatprep.mubr.bf16.mxu1 %v11425_v32  ;;  %v13639_v32 = vld [vmem:[%s15815_s6 + $0x9e4] ss:$8 sps:$4 sm:$0xff]  }
 0x19a   : > { %9490 = vmatpush1.bf16.msra.mxu0 %v13556_v41  ;;  %v13634_v41 = vld [vmem:[%s15815_s6 + $0x8e0] ss:$8 sps:$4 sm:$0xff]  }
 0x19b   : > { %9531 = vmatpush1.bf16.msra.mxu1 %v13559_v42  ;;  %9491 = vmatprep.subr.bf16.mxu0 %v13564_v43  ;;  %v13637_v42 = vld [vmem:[%s15815_s6 + $0x9e0] ss:$8 sps:$4 sm:$0xff]   ;;  %v13642_v43 = vld [vmem:[%s15815_s6 + $0x8f4] ss:$8 sps:$4 sm:$0xff]  }
 0x19c   : > { %9532 = vmatprep.subr.bf16.mxu1 %v13567_v44  ;;  %v13645_v44 = vld [vmem:[%s15815_s6 + $0x9f4] ss:$8 sps:$4 sm:$0xff]  }
 0x19e   : > { %9492 = vmatpush1.bf16.msra.mxu0 %v13562_v45  ;;  %v13640_v45 = vld [vmem:[%s15815_s6 + $0x8f0] ss:$8 sps:$4 sm:$0xff]  }
 0x19f   : > { %9533 = vmatpush1.bf16.msra.mxu1 %v13565_v46  ;;  %9493 = vmatprep.subr.bf16.mxu0 %v13570_v47  ;;  %v13643_v46 = vld [vmem:[%s15815_s6 + $0x9f0] ss:$8 sps:$4 sm:$0xff]   ;;  %v13652_v47 = vld [vmem:[%s15815_s6 + $0xa04] ss:$8 sps:$4 sm:$0xff]  }
 0x1a0   : > { %9534 = vmatprep.subr.bf16.mxu1 %v13573_v48  ;;  %v13655_v48 = vld [vmem:[%s15815_s6 + $0xb04] ss:$8 sps:$4 sm:$0xff]  }
 0x1a2   : > { %9494 = vmatpush1.bf16.msra.mxu0 %v13568_v49  ;;  %v13650_v49 = vld [vmem:[%s15815_s6 + $0xa00] ss:$8 sps:$4 sm:$0xff]  }
 0x1a3   : > { %9535 = vmatpush1.bf16.msra.mxu1 %v13571_v50  ;;  %9495 = vmatprep.subr.bf16.mxu0 %v13576_v51  ;;  %v13653_v50 = vld [vmem:[%s15815_s6 + $0xb00] ss:$8 sps:$4 sm:$0xff]   ;;  %v11422_v51 = vcombine.low %v16143_v25, %v16143_v25 }
 0x1a4   : > { %9536 = vmatprep.subr.bf16.mxu1 %v13579_v52  ;;  %v11424_v52 = vcombine.low %v16150_v36, %v16150_v36 }
 0x1a6   : > { %9496 = vmatpush1.bf16.msra.mxu0 %v13574_v53  ;;  %v16231_v53 = vld [vmem:[%s15839_s18 + $0x50] sm:$0xff] }
 0x1a7   : > { %9537 = vmatpush1.bf16.msra.mxu1 %v13577_v54  ;;  %9497 = vmatprep.subr.bf16.mxu0 %v13582_v55  ;;  %v16234_v54 = vld [vmem:[%s15839_s18 + $0x58] sm:$0xff]  ;;  %v13658_v55 = vld [vmem:[%s15815_s6 + $0xa14] ss:$8 sps:$4 sm:$0xff]   ;;  %v11427_v25 = vcombine.high %v16231_v53, %v16231_v53 }
 0x1a8   : > { %9538 = vmatprep.subr.bf16.mxu1 %v13585_v56  ;;  %v9193_v61 = vpop.f32.mrb[0].mxu0  ;;  %v13661_v56 = vld [vmem:[%s15815_s6 + $0xb14] ss:$8 sps:$4 sm:$0xff]   ;;  %v11429_v36 = vcombine.high %v16234_v54, %v16234_v54 }
 0x1a9   : > { %v9234_v62 = vpop.f32.mrb[0].mxu1  ;;  %v9195_v2 = vpop.f32.mrb[1].mxu0 }
 0x1aa   : > { %v16182_v1 = vadd.f32 %v9234_v62, %v9193_v61  ;;  %v9236_v3 = vpop.f32.mrb[1].mxu1  ;;  %v9197_v5 = vpop.f32.mrb[2].mxu0  ;;  %9498 = vmatpush1.bf16.msra.mxu0 %v13580_v57  ;;  %v13656_v57 = vld [vmem:[%s15815_s6 + $0xa10] ss:$8 sps:$4 sm:$0xff]   ;;  %v13662_v61 = vld [vmem:[%s15815_s6 + $0xa20] ss:$8 sps:$4 sm:$0xff]  }
 0x1ab   : > { %v16184_v4 = vadd.f32 %v9236_v3, %v9195_v2  ;;  %v9238_v6 = vpop.f32.mrb[2].mxu1  ;;  %9539 = vmatpush1.bf16.msra.mxu1 %v13583_v58  ;;  %v9198_v7 = vpop.f32.mrb[3].mxu0  ;;  %9499 = vmatprep.subr.bf16.mxu0 %v13588_v59  ;;  %v13659_v58 = vld [vmem:[%s15815_s6 + $0xb10] ss:$8 sps:$4 sm:$0xff]   ;;  %v13664_v59 = vld [vmem:[%s15815_s6 + $0xa24] ss:$8 sps:$4 sm:$0xff]  }
 0x1ac   : > { %v9239_v8 = vpop.f32.mrb[3].mxu1  ;;  %9540 = vmatprep.subr.bf16.mxu1 %v13591_v60  ;;  %v13667_v60 = vld [vmem:[%s15815_s6 + $0xb24] ss:$8 sps:$4 sm:$0xff]   ;;  %v13665_v62 = vld [vmem:[%s15815_s6 + $0xb20] ss:$8 sps:$4 sm:$0xff]  }
 0x1ad   : > { %v13668_v2 = vld [vmem:[%s15815_s6 + $0xa30] ss:$8 sps:$4 sm:$0xff]   ;;  %v13676_v5 = vld [vmem:[%s15815_s6 + $0xa44] ss:$8 sps:$4 sm:$0xff]   ;;  %v13674_v7 = vld [vmem:[%s15815_s6 + $0xa40] ss:$8 sps:$4 sm:$0xff]  }
 0x1ae   : > { %9500 = vmatpush1.bf16.msra.mxu0 %v13586_v63  ;;  %v13670_v63 = vld [vmem:[%s15815_s6 + $0xa34] ss:$8 sps:$4 sm:$0xff]   ;;  %v13671_v3 = vld [vmem:[%s15815_s6 + $0xb30] ss:$8 sps:$4 sm:$0xff]   ;;  %v13679_v6 = vld [vmem:[%s15815_s6 + $0xb44] ss:$8 sps:$4 sm:$0xff]  }
 0x1af   : > { %9541 = vmatpush1.bf16.msra.mxu1 %v13589_v0  ;;  %9501 = vmatprep.subr.bf16.mxu0 %v13594_v9  ;;  %v13673_v0 = vld [vmem:[%s15815_s6 + $0xb34] ss:$8 sps:$4 sm:$0xff]   ;;  %v13677_v8 = vld [vmem:[%s15815_s6 + $0xb40] ss:$8 sps:$4 sm:$0xff]  }
 0x1b0   : > { %9542 = vmatprep.subr.bf16.mxu1 %v13597_v10  ;;  %v13682_v9 = vld [vmem:[%s15815_s6 + $0xa54] ss:$8 sps:$4 sm:$0xff]  }
 0x1b1   : > { %v13685_v10 = vld [vmem:[%s15815_s6 + $0xb54] ss:$8 sps:$4 sm:$0xff]  }
 0x1b2   : > { %9502 = vmatpush1.bf16.msra.mxu0 %v13592_v11  ;;  %v13680_v11 = vld [vmem:[%s15815_s6 + $0xa50] ss:$8 sps:$4 sm:$0xff]  }
 0x1b3   : > { %9543 = vmatpush1.bf16.msra.mxu1 %v13595_v12  ;;  %9503 = vmatprep.subr.bf16.mxu0 %v13600_v13  ;;  %v13683_v12 = vld [vmem:[%s15815_s6 + $0xb50] ss:$8 sps:$4 sm:$0xff]   ;;  %v13688_v13 = vld [vmem:[%s15815_s6 + $0xa64] ss:$8 sps:$4 sm:$0xff]  }
 0x1b4   : > { %9544 = vmatprep.subr.bf16.mxu1 %v13603_v14  ;;  %v13691_v14 = vld [vmem:[%s15815_s6 + $0xb64] ss:$8 sps:$4 sm:$0xff]  }
 0x1b6   : > { %9504 = vmatpush1.bf16.msra.mxu0 %v13598_v15 }
 0x1b7   : > { %9545 = vmatpush1.bf16.msra.mxu1 %v13601_v16  ;;  %9505 = vmatprep.subr.bf16.mxu0 %v13606_v17  ;;  %v13686_v17 = vld [vmem:[%s15815_s6 + $0xa60] ss:$8 sps:$4 sm:$0xff]  }
 0x1b8   : > { %9546 = vmatprep.subr.bf16.mxu1 %v13609_v18  ;;  %v13689_v18 = vld [vmem:[%s15815_s6 + $0xb60] ss:$8 sps:$4 sm:$0xff]  }
 0x1ba   : > { %9506 = vmatpush1.bf16.msra.mxu0 %v13604_v19 }
 0x1bb   : > { %9547 = vmatpush1.bf16.msra.mxu1 %v13607_v20  ;;  %9507 = vmatprep.subr.bf16.mxu0 %v13612_v21 }
 0x1bc   : > { %9548 = vmatprep.subr.bf16.mxu1 %v13615_v22 }
 0x1be   : > { %9508 = vmatpush1.bf16.msra.mxu0 %v13610_v23 }
 0x1bf   : > { %9549 = vmatpush1.bf16.msra.mxu1 %v13613_v24  ;;  %9509 = vmatprep.subr.bf16.mxu0 %v13618_v27 }
 0x1c0   : > { %9550 = vmatprep.subr.bf16.mxu1 %v13621_v28 }
 0x1c2   : > { %9510 = vmatpush1.bf16.msra.mxu0 %v13616_v29 }
 0x1c3   : > { %9551 = vmatpush1.bf16.msra.mxu1 %v13619_v30  ;;  %9511 = vmatprep.subr.bf16.mxu0 %v13624_v33  ;;  %v13697_v30 = vld [vmem:[%s15815_s6 + $0xb74] ss:$8 sps:$4 sm:$0xff]  }
 0x1c4   : > { %9552 = vmatprep.subr.bf16.mxu1 %v13627_v34  ;;  %v13695_v34 = vld [vmem:[%s15815_s6 + $0xb70] ss:$8 sps:$4 sm:$0xff]  }
 0x1c6   : > { %9512 = vmatpush1.bf16.msra.mxu0 %v13622_v26  ;;  %v13700_v26 = vld [vmem:[%s15815_s6 + $0xa84] ss:$8 sps:$4 sm:$0xff]  }
 0x1c7   : > { %9553 = vmatpush1.bf16.msra.mxu1 %v13625_v35  ;;  %9513 = vmatprep.subr.bf16.mxu0 %v13630_v37  ;;  %v13703_v35 = vld [vmem:[%s15815_s6 + $0xb84] ss:$8 sps:$4 sm:$0xff]   ;;  %v13698_v37 = vld [vmem:[%s15815_s6 + $0xa80] ss:$8 sps:$4 sm:$0xff]  }
 0x1c8   : > { %9554 = vmatprep.subr.bf16.mxu1 %v13633_v38  ;;  %v13701_v38 = vld [vmem:[%s15815_s6 + $0xb80] ss:$8 sps:$4 sm:$0xff]  }
 0x1ca   : > { %9514 = vmatpush1.bf16.msra.mxu0 %v13628_v39  ;;  %v13706_v39 = vld [vmem:[%s15815_s6 + $0xa94] ss:$8 sps:$4 sm:$0xff]  }
 0x1cb   : > { %9555 = vmatpush1.bf16.msra.mxu1 %v13631_v40  ;;  %9515 = vmatprep.subr.bf16.mxu0 %v13636_v31  ;;  %v13709_v40 = vld [vmem:[%s15815_s6 + $0xb94] ss:$8 sps:$4 sm:$0xff]   ;;  %v13704_v31 = vld [vmem:[%s15815_s6 + $0xa90] ss:$8 sps:$4 sm:$0xff]  }
 0x1cc   : > { %9556 = vmatprep.subr.bf16.mxu1 %v13639_v32  ;;  %v13707_v32 = vld [vmem:[%s15815_s6 + $0xb90] ss:$8 sps:$4 sm:$0xff]  }
 0x1ce   : > { %9516 = vmatpush1.bf16.msra.mxu0 %v13634_v41  ;;  %v13712_v41 = vld [vmem:[%s15815_s6 + $0xaa4] ss:$8 sps:$4 sm:$0xff]  }
 0x1cf   : > { %9557 = vmatpush1.bf16.msra.mxu1 %v13637_v42  ;;  %9517 = vmatprep.subr.bf16.mxu0 %v13642_v43  ;;  %v13715_v42 = vld [vmem:[%s15815_s6 + $0xba4] ss:$8 sps:$4 sm:$0xff]   ;;  %v13710_v43 = vld [vmem:[%s15815_s6 + $0xaa0] ss:$8 sps:$4 sm:$0xff]  }
 0x1d0   : > { %9558 = vmatprep.subr.bf16.mxu1 %v13645_v44  ;;  %v13713_v44 = vld [vmem:[%s15815_s6 + $0xba0] ss:$8 sps:$4 sm:$0xff]  }
 0x1d2   : > { %9518 = vmatpush1.bf16.msra.mxu0 %v13640_v45  ;;  %v13718_v45 = vld [vmem:[%s15815_s6 + $0xab4] ss:$8 sps:$4 sm:$0xff]  }
 0x1d3   : > { %9559 = vmatpush1.bf16.msra.mxu1 %v13643_v46  ;;  %9569 = vmatprep.subr.bf16.mxu0 %v13652_v47  ;;  %v13721_v46 = vld [vmem:[%s15815_s6 + $0xbb4] ss:$8 sps:$4 sm:$0xff]   ;;  %v13716_v47 = vld [vmem:[%s15815_s6 + $0xab0] ss:$8 sps:$4 sm:$0xff]  }
 0x1d4   : > { %9610 = vmatprep.subr.bf16.mxu1 %v13655_v48  ;;  %v13719_v48 = vld [vmem:[%s15815_s6 + $0xbb0] ss:$8 sps:$4 sm:$0xff]  }
 0x1d5   : > { %9520 = vmatmul.mubr.bf16.vlgmr.msra.gmra.mrb[16].mxu0 %v11422_v51  ;;  %v13722_v51 = vld [vmem:[%s15815_s6 + $0xac0] ss:$8 sps:$4 sm:$0xff]  }
 0x1d6   : > { %9561 = vmatmul.mubr.bf16.vlgmr.msra.gmra.mrb[16].mxu1 %v11424_v52  ;;  %9570 = vmatpush1.bf16.msra.mxu0 %v13650_v49  ;;  %v13724_v49 = vld [vmem:[%s15815_s6 + $0xac4] ss:$8 sps:$4 sm:$0xff]   ;;  %v13725_v52 = vld [vmem:[%s15815_s6 + $0xbc0] ss:$8 sps:$4 sm:$0xff]  }
 0x1d7   : > { %9611 = vmatpush1.bf16.msra.mxu1 %v13653_v50  ;;  %9571 = vmatprep.subr.bf16.mxu0 %v13658_v55  ;;  %v13727_v50 = vld [vmem:[%s15815_s6 + $0xbc4] ss:$8 sps:$4 sm:$0xff]   ;;  %v13730_v55 = vld [vmem:[%s15815_s6 + $0xad4] ss:$8 sps:$4 sm:$0xff]  }
 0x1d8   : > { %9612 = vmatprep.subr.bf16.mxu1 %v13661_v56  ;;  %9601 = vmatprep.mubr.bf16.mxu0 %v11427_v25  ;;  %v13733_v56 = vld [vmem:[%s15815_s6 + $0xbd4] ss:$8 sps:$4 sm:$0xff]   ;;  %v13728_v25 = vld [vmem:[%s15815_s6 + $0xad0] ss:$8 sps:$4 sm:$0xff]  }
 0x1d9   : > { %9642 = vmatprep.mubr.bf16.mxu1 %v11429_v36  ;;  %v13731_v36 = vld [vmem:[%s15815_s6 + $0xbd0] ss:$8 sps:$4 sm:$0xff]  }
 0x1da   : > { %9572 = vmatpush1.bf16.msra.mxu0 %v13656_v57  ;;  %v13736_v57 = vld [vmem:[%s15815_s6 + $0xae4] ss:$8 sps:$4 sm:$0xff]  }
 0x1db   : > { %9613 = vmatpush1.bf16.msra.mxu1 %v13659_v58  ;;  %9573 = vmatprep.subr.bf16.mxu0 %v13664_v59  ;;  %v13739_v58 = vld [vmem:[%s15815_s6 + $0xbe4] ss:$8 sps:$4 sm:$0xff]   ;;  %v13734_v59 = vld [vmem:[%s15815_s6 + $0xae0] ss:$8 sps:$4 sm:$0xff]  }
 0x1dc   : > { %9614 = vmatprep.subr.bf16.mxu1 %v13667_v60  ;;  %v13737_v60 = vld [vmem:[%s15815_s6 + $0xbe0] ss:$8 sps:$4 sm:$0xff]  }
 0x1de   : > { %9574 = vmatpush1.bf16.msra.mxu0 %v13662_v61  ;;  %v13742_v61 = vld [vmem:[%s15815_s6 + $0xaf4] ss:$8 sps:$4 sm:$0xff]  }
 0x1df   : > { %9615 = vmatpush1.bf16.msra.mxu1 %v13665_v62  ;;  %9575 = vmatprep.subr.bf16.mxu0 %v13670_v63  ;;  %v13745_v62 = vld [vmem:[%s15815_s6 + $0xbf4] ss:$8 sps:$4 sm:$0xff]   ;;  %v13740_v63 = vld [vmem:[%s15815_s6 + $0xaf0] ss:$8 sps:$4 sm:$0xff]  }
 0x1e0   : > { %9616 = vmatprep.subr.bf16.mxu1 %v13673_v0  ;;  %v13743_v0 = vld [vmem:[%s15815_s6 + $0xbf0] ss:$8 sps:$4 sm:$0xff]  }
 0x1e2   : > { %9576 = vmatpush1.bf16.msra.mxu0 %v13668_v2  ;;  %v13752_v2 = vld [vmem:[%s15815_s6 + $0xc04] ss:$8 sps:$4 sm:$0xff]  }
 0x1e3   : > { %9617 = vmatpush1.bf16.msra.mxu1 %v13671_v3  ;;  %9577 = vmatprep.subr.bf16.mxu0 %v13676_v5  ;;  %v13755_v3 = vld [vmem:[%s15815_s6 + $0xd04] ss:$8 sps:$4 sm:$0xff]   ;;  %v13750_v5 = vld [vmem:[%s15815_s6 + $0xc00] ss:$8 sps:$4 sm:$0xff]  }
 0x1e4   : > { %9618 = vmatprep.subr.bf16.mxu1 %v13679_v6  ;;  %v13753_v6 = vld [vmem:[%s15815_s6 + $0xd00] ss:$8 sps:$4 sm:$0xff]  }
 0x1e6   : > { %9578 = vmatpush1.bf16.msra.mxu0 %v13674_v7  ;;  %v11426_v7 = vcombine.low %v16231_v53, %v16231_v53 }
 0x1e7   : > { %9619 = vmatpush1.bf16.msra.mxu1 %v13677_v8  ;;  %9579 = vmatprep.subr.bf16.mxu0 %v13682_v9  ;;  %v11428_v8 = vcombine.low %v16234_v54, %v16234_v54  ;;  %v16315_v9 = vld [vmem:[%s15839_s18 + $0x60] sm:$0xff] }
 0x1e8   : > { %9620 = vmatprep.subr.bf16.mxu1 %v13685_v10  ;;  %v9275_v15 = vpop.f32.mrb[4].mxu0  ;;  %v16318_v10 = vld [vmem:[%s15839_s18 + $0x68] sm:$0xff]  ;;  %v11431_v53 = vcombine.high %v16315_v9, %v16315_v9 }
 0x1e9   : > { %v9316_v16 = vpop.f32.mrb[4].mxu1  ;;  %v9276_v19 = vadd.f32 %v9275_v15, %v16182_v1  ;;  %v9277_v20 = vpop.f32.mrb[5].mxu0  ;;  %v13694_v1 = vld [vmem:[%s15815_s6 + $0xa74] ss:$8 sps:$4 sm:$0xff]   ;;  %v11433_v54 = vcombine.high %v16318_v10, %v16318_v10  ;;  %v13764_v15 = vld [vmem:[%s15815_s6 + $0xc24] ss:$8 sps:$4 sm:$0xff]  }
 0x1ea   : > { %v9318_v21 = vpop.f32.mrb[5].mxu1  ;;  %v9278_v22 = vadd.f32 %v9277_v20, %v16184_v4  ;;  %v9279_v23 = vpop.f32.mrb[6].mxu0  ;;  %9580 = vmatpush1.bf16.msra.mxu0 %v13680_v11  ;;  %v13692_v4 = vld [vmem:[%s15815_s6 + $0xa70] ss:$8 sps:$4 sm:$0xff]   ;;  %v13758_v11 = vld [vmem:[%s15815_s6 + $0xc14] ss:$8 sps:$4 sm:$0xff]  }
 0x1eb   : > { %v9320_v24 = vpop.f32.mrb[6].mxu1  ;;  %9621 = vmatpush1.bf16.msra.mxu1 %v13683_v12  ;;  %v16266_v27 = vadd.f32 %v9316_v16, %v9276_v19  ;;  %v9280_v28 = vpop.f32.mrb[7].mxu0  ;;  %9581 = vmatprep.subr.bf16.mxu0 %v13688_v13  ;;  %v13761_v12 = vld [vmem:[%s15815_s6 + $0xd14] ss:$8 sps:$4 sm:$0xff]   ;;  %v13756_v13 = vld [vmem:[%s15815_s6 + $0xc10] ss:$8 sps:$4 sm:$0xff]  }
 0x1ec   : > { %v9321_v29 = vpop.f32.mrb[7].mxu1  ;;  %9622 = vmatprep.subr.bf16.mxu1 %v13691_v14  ;;  %v16270_v33 = vadd.f32 %v9318_v21, %v9278_v22  ;;  %v13759_v14 = vld [vmem:[%s15815_s6 + $0xd10] ss:$8 sps:$4 sm:$0xff]   ;;  %v13767_v16 = vld [vmem:[%s15815_s6 + $0xd24] ss:$8 sps:$4 sm:$0xff]  }
 0x1ed   : > { %v13770_v19 = vld [vmem:[%s15815_s6 + $0xc34] ss:$8 sps:$4 sm:$0xff]   ;;  %v13768_v21 = vld [vmem:[%s15815_s6 + $0xc30] ss:$8 sps:$4 sm:$0xff]   ;;  %v13776_v23 = vld [vmem:[%s15815_s6 + $0xc44] ss:$8 sps:$4 sm:$0xff]  }
 0x1ee   : > { %9582 = vmatpush1.bf16.msra.mxu0 %v13686_v17  ;;  %v13762_v17 = vld [vmem:[%s15815_s6 + $0xc20] ss:$8 sps:$4 sm:$0xff]   ;;  %v13773_v20 = vld [vmem:[%s15815_s6 + $0xd34] ss:$8 sps:$4 sm:$0xff]   ;;  %v13771_v22 = vld [vmem:[%s15815_s6 + $0xd30] ss:$8 sps:$4 sm:$0xff]  }
 0x1ef   : > { %9623 = vmatpush1.bf16.msra.mxu1 %v13689_v18  ;;  %9583 = vmatprep.subr.bf16.mxu0 %v13694_v1  ;;  %v13765_v18 = vld [vmem:[%s15815_s6 + $0xd20] ss:$8 sps:$4 sm:$0xff]   ;;  %v13779_v24 = vld [vmem:[%s15815_s6 + $0xd44] ss:$8 sps:$4 sm:$0xff]   ;;  %v13782_v1 = vld [vmem:[%s15815_s6 + $0xc54] ss:$8 sps:$4 sm:$0xff]  }
 0x1f0   : > { %9624 = vmatprep.subr.bf16.mxu1 %v13697_v30  ;;  %v13774_v28 = vld [vmem:[%s15815_s6 + $0xc40] ss:$8 sps:$4 sm:$0xff]   ;;  %v13785_v30 = vld [vmem:[%s15815_s6 + $0xd54] ss:$8 sps:$4 sm:$0xff]  }
 0x1f1   : > { %v13777_v29 = vld [vmem:[%s15815_s6 + $0xd40] ss:$8 sps:$4 sm:$0xff]  }
 0x1f2   : > { %9584 = vmatpush1.bf16.msra.mxu0 %v13692_v4  ;;  %v13780_v4 = vld [vmem:[%s15815_s6 + $0xc50] ss:$8 sps:$4 sm:$0xff]  }
 0x1f3   : > { %9625 = vmatpush1.bf16.msra.mxu1 %v13695_v34  ;;  %9585 = vmatprep.subr.bf16.mxu0 %v13700_v26  ;;  %v13783_v34 = vld [vmem:[%s15815_s6 + $0xd50] ss:$8 sps:$4 sm:$0xff]   ;;  %v13788_v26 = vld [vmem:[%s15815_s6 + $0xc64] ss:$8 sps:$4 sm:$0xff]  }
 0x1f4   : > { %9626 = vmatprep.subr.bf16.mxu1 %v13703_v35  ;;  %v13791_v35 = vld [vmem:[%s15815_s6 + $0xd64] ss:$8 sps:$4 sm:$0xff]  }
 0x1f6   : > { %9586 = vmatpush1.bf16.msra.mxu0 %v13698_v37 }
 0x1f7   : > { %9627 = vmatpush1.bf16.msra.mxu1 %v13701_v38  ;;  %9587 = vmatprep.subr.bf16.mxu0 %v13706_v39  ;;  %v13786_v39 = vld [vmem:[%s15815_s6 + $0xc60] ss:$8 sps:$4 sm:$0xff]  }
 0x1f8   : > { %9628 = vmatprep.subr.bf16.mxu1 %v13709_v40  ;;  %v13789_v40 = vld [vmem:[%s15815_s6 + $0xd60] ss:$8 sps:$4 sm:$0xff]  }
 0x1fa   : > { %9588 = vmatpush1.bf16.msra.mxu0 %v13704_v31 }
 0x1fb   : > { %9629 = vmatpush1.bf16.msra.mxu1 %v13707_v32  ;;  %9589 = vmatprep.subr.bf16.mxu0 %v13712_v41 }
 0x1fc   : > { %9630 = vmatprep.subr.bf16.mxu1 %v13715_v42 }
 0x1fe   : > { %9590 = vmatpush1.bf16.msra.mxu0 %v13710_v43 }
 0x1ff   : > { %9631 = vmatpush1.bf16.msra.mxu1 %v13713_v44  ;;  %9591 = vmatprep.subr.bf16.mxu0 %v13718_v45 }
 0x200   : > { %9632 = vmatprep.subr.bf16.mxu1 %v13721_v46 }
 0x202   : > { %9592 = vmatpush1.bf16.msra.mxu0 %v13716_v47 }
 0x203   : > { %9633 = vmatpush1.bf16.msra.mxu1 %v13719_v48  ;;  %9593 = vmatprep.subr.bf16.mxu0 %v13724_v49  ;;  %v13797_v48 = vld [vmem:[%s15815_s6 + $0xd74] ss:$8 sps:$4 sm:$0xff]  }
 0x204   : > { %9634 = vmatprep.subr.bf16.mxu1 %v13727_v50  ;;  %v13795_v50 = vld [vmem:[%s15815_s6 + $0xd70] ss:$8 sps:$4 sm:$0xff]  }
 0x206   : > { %9594 = vmatpush1.bf16.msra.mxu0 %v13722_v51  ;;  %v13800_v51 = vld [vmem:[%s15815_s6 + $0xc84] ss:$8 sps:$4 sm:$0xff]  }
 0x207   : > { %9635 = vmatpush1.bf16.msra.mxu1 %v13725_v52  ;;  %9595 = vmatprep.subr.bf16.mxu0 %v13730_v55  ;;  %v13803_v52 = vld [vmem:[%s15815_s6 + $0xd84] ss:$8 sps:$4 sm:$0xff]   ;;  %v13798_v55 = vld [vmem:[%s15815_s6 + $0xc80] ss:$8 sps:$4 sm:$0xff]  }
 0x208   : > { %9636 = vmatprep.subr.bf16.mxu1 %v13733_v56  ;;  %v13801_v56 = vld [vmem:[%s15815_s6 + $0xd80] ss:$8 sps:$4 sm:$0xff]  }
 0x20a   : > { %9596 = vmatpush1.bf16.msra.mxu0 %v13728_v25  ;;  %v13806_v25 = vld [vmem:[%s15815_s6 + $0xc94] ss:$8 sps:$4 sm:$0xff]  }
 0x20b   : > { %9637 = vmatpush1.bf16.msra.mxu1 %v13731_v36  ;;  %9597 = vmatprep.subr.bf16.mxu0 %v13736_v57  ;;  %v13809_v36 = vld [vmem:[%s15815_s6 + $0xd94] ss:$8 sps:$4 sm:$0xff]   ;;  %v13804_v57 = vld [vmem:[%s15815_s6 + $0xc90] ss:$8 sps:$4 sm:$0xff]  }
 0x20c   : > { %9638 = vmatprep.subr.bf16.mxu1 %v13739_v58  ;;  %v13807_v58 = vld [vmem:[%s15815_s6 + $0xd90] ss:$8 sps:$4 sm:$0xff]  }
 0x20e   : > { %9598 = vmatpush1.bf16.msra.mxu0 %v13734_v59  ;;  %v13812_v59 = vld [vmem:[%s15815_s6 + $0xca4] ss:$8 sps:$4 sm:$0xff]  }
 0x20f   : > { %9639 = vmatpush1.bf16.msra.mxu1 %v13737_v60  ;;  %9599 = vmatprep.subr.bf16.mxu0 %v13742_v61  ;;  %v13815_v60 = vld [vmem:[%s15815_s6 + $0xda4] ss:$8 sps:$4 sm:$0xff]   ;;  %v13810_v61 = vld [vmem:[%s15815_s6 + $0xca0] ss:$8 sps:$4 sm:$0xff]  }
 0x210   : > { %9640 = vmatprep.subr.bf16.mxu1 %v13745_v62  ;;  %v13813_v62 = vld [vmem:[%s15815_s6 + $0xda0] ss:$8 sps:$4 sm:$0xff]  }
 0x212   : > { %9600 = vmatpush1.bf16.msra.mxu0 %v13740_v63  ;;  %v13818_v63 = vld [vmem:[%s15815_s6 + $0xcb4] ss:$8 sps:$4 sm:$0xff]  }
 0x213   : > { %9641 = vmatpush1.bf16.msra.mxu1 %v13743_v0  ;;  %9651 = vmatprep.subr.bf16.mxu0 %v13752_v2  ;;  %v13821_v0 = vld [vmem:[%s15815_s6 + $0xdb4] ss:$8 sps:$4 sm:$0xff]   ;;  %v13816_v2 = vld [vmem:[%s15815_s6 + $0xcb0] ss:$8 sps:$4 sm:$0xff]  }
 0x214   : > { %9692 = vmatprep.subr.bf16.mxu1 %v13755_v3  ;;  %v13819_v3 = vld [vmem:[%s15815_s6 + $0xdb0] ss:$8 sps:$4 sm:$0xff]  }
 0x215   : > { %9602 = vmatmul.mubr.bf16.vlgmr.msra.gmra.mrb[20].mxu0 %v11426_v7  ;;  %v13822_v7 = vld [vmem:[%s15815_s6 + $0xcc0] ss:$8 sps:$4 sm:$0xff]  }
 0x216   : > { %9643 = vmatmul.mubr.bf16.vlgmr.msra.gmra.mrb[20].mxu1 %v11428_v8  ;;  %9652 = vmatpush1.bf16.msra.mxu0 %v13750_v5  ;;  %v13824_v5 = vld [vmem:[%s15815_s6 + $0xcc4] ss:$8 sps:$4 sm:$0xff]   ;;  %v13825_v8 = vld [vmem:[%s15815_s6 + $0xdc0] ss:$8 sps:$4 sm:$0xff]  }
 0x217   : > { %9693 = vmatpush1.bf16.msra.mxu1 %v13753_v6  ;;  %9653 = vmatprep.subr.bf16.mxu0 %v13758_v11  ;;  %v13827_v6 = vld [vmem:[%s15815_s6 + $0xdc4] ss:$8 sps:$4 sm:$0xff]   ;;  %v13830_v11 = vld [vmem:[%s15815_s6 + $0xcd4] ss:$8 sps:$4 sm:$0xff]  }
 0x218   : > { %9694 = vmatprep.subr.bf16.mxu1 %v13761_v12  ;;  %9683 = vmatprep.mubr.bf16.mxu0 %v11431_v53  ;;  %v13833_v12 = vld [vmem:[%s15815_s6 + $0xdd4] ss:$8 sps:$4 sm:$0xff]   ;;  %v13828_v53 = vld [vmem:[%s15815_s6 + $0xcd0] ss:$8 sps:$4 sm:$0xff]  }
 0x219   : > { %9724 = vmatprep.mubr.bf16.mxu1 %v11433_v54  ;;  %v13831_v54 = vld [vmem:[%s15815_s6 + $0xdd0] ss:$8 sps:$4 sm:$0xff]  }
 0x21a   : > { %9654 = vmatpush1.bf16.msra.mxu0 %v13756_v13  ;;  %v13836_v13 = vld [vmem:[%s15815_s6 + $0xce4] ss:$8 sps:$4 sm:$0xff]  }
 0x21b   : > { %9695 = vmatpush1.bf16.msra.mxu1 %v13759_v14  ;;  %9655 = vmatprep.subr.bf16.mxu0 %v13764_v15  ;;  %v13839_v14 = vld [vmem:[%s15815_s6 + $0xde4] ss:$8 sps:$4 sm:$0xff]   ;;  %v13834_v15 = vld [vmem:[%s15815_s6 + $0xce0] ss:$8 sps:$4 sm:$0xff]  }
 0x21c   : > { %9696 = vmatprep.subr.bf16.mxu1 %v13767_v16  ;;  %v13837_v16 = vld [vmem:[%s15815_s6 + $0xde0] ss:$8 sps:$4 sm:$0xff]  }
 0x21e   : > { %9656 = vmatpush1.bf16.msra.mxu0 %v13762_v17  ;;  %v13842_v17 = vld [vmem:[%s15815_s6 + $0xcf4] ss:$8 sps:$4 sm:$0xff]  }
 0x21f   : > { %9697 = vmatpush1.bf16.msra.mxu1 %v13765_v18  ;;  %9657 = vmatprep.subr.bf16.mxu0 %v13770_v19  ;;  %v13845_v18 = vld [vmem:[%s15815_s6 + $0xdf4] ss:$8 sps:$4 sm:$0xff]   ;;  %v13840_v19 = vld [vmem:[%s15815_s6 + $0xcf0] ss:$8 sps:$4 sm:$0xff]  }
 0x220   : > { %9698 = vmatprep.subr.bf16.mxu1 %v13773_v20  ;;  %v13843_v20 = vld [vmem:[%s15815_s6 + $0xdf0] ss:$8 sps:$4 sm:$0xff]  }
 0x222   : > { %9658 = vmatpush1.bf16.msra.mxu0 %v13768_v21  ;;  %v13852_v21 = vld [vmem:[%s15815_s6 + $0xe04] ss:$8 sps:$4 sm:$0xff]  }
 0x223   : > { %9699 = vmatpush1.bf16.msra.mxu1 %v13771_v22  ;;  %9659 = vmatprep.subr.bf16.mxu0 %v13776_v23  ;;  %v13855_v22 = vld [vmem:[%s15815_s6 + $0xf04] ss:$8 sps:$4 sm:$0xff]   ;;  %v13850_v23 = vld [vmem:[%s15815_s6 + $0xe00] ss:$8 sps:$4 sm:$0xff]  }
 0x224   : > { %9700 = vmatprep.subr.bf16.mxu1 %v13779_v24  ;;  %v13853_v24 = vld [vmem:[%s15815_s6 + $0xf00] ss:$8 sps:$4 sm:$0xff]  }
 0x226   : > { %9660 = vmatpush1.bf16.msra.mxu0 %v13774_v28  ;;  %v11430_v28 = vcombine.low %v16315_v9, %v16315_v9 }
 0x227   : > { %9701 = vmatpush1.bf16.msra.mxu1 %v13777_v29  ;;  %9661 = vmatprep.subr.bf16.mxu0 %v13782_v1  ;;  %v11432_v29 = vcombine.low %v16318_v10, %v16318_v10  ;;  %v16399_v1 = vld [vmem:[%s15839_s18 + $0x70] sm:$0xff] }
 0x228   : > { %9702 = vmatprep.subr.bf16.mxu1 %v13785_v30  ;;  %v9357_v37 = vpop.f32.mrb[8].mxu0  ;;  %v16402_v30 = vld [vmem:[%s15839_s18 + $0x78] sm:$0xff]  ;;  %v11435_v9 = vcombine.high %v16399_v1, %v16399_v1 }
 0x229   : > { %v9398_v38 = vpop.f32.mrb[8].mxu1  ;;  %v9358_v31 = vadd.f32 %v9357_v37, %v16266_v27  ;;  %v9359_v32 = vpop.f32.mrb[9].mxu0  ;;  %v13794_v27 = vld [vmem:[%s15815_s6 + $0xc74] ss:$8 sps:$4 sm:$0xff]   ;;  %v11437_v10 = vcombine.high %v16402_v30, %v16402_v30  ;;  %v13864_v37 = vld [vmem:[%s15815_s6 + $0xe24] ss:$8 sps:$4 sm:$0xff]  }
 0x22a   : > { %v9400_v41 = vpop.f32.mrb[9].mxu1  ;;  %v9360_v42 = vadd.f32 %v9359_v32, %v16270_v33  ;;  %v9361_v43 = vpop.f32.mrb[10].mxu0  ;;  %9662 = vmatpush1.bf16.msra.mxu0 %v13780_v4  ;;  %v13792_v33 = vld [vmem:[%s15815_s6 + $0xc70] ss:$8 sps:$4 sm:$0xff]   ;;  %v13858_v4 = vld [vmem:[%s15815_s6 + $0xe14] ss:$8 sps:$4 sm:$0xff]  }
 0x22b   : > { %v9402_v44 = vpop.f32.mrb[10].mxu1  ;;  %9703 = vmatpush1.bf16.msra.mxu1 %v13783_v34  ;;  %v16350_v45 = vadd.f32 %v9398_v38, %v9358_v31  ;;  %v9362_v46 = vpop.f32.mrb[11].mxu0  ;;  %9663 = vmatprep.subr.bf16.mxu0 %v13788_v26  ;;  %v13861_v34 = vld [vmem:[%s15815_s6 + $0xf14] ss:$8 sps:$4 sm:$0xff]   ;;  %v13856_v26 = vld [vmem:[%s15815_s6 + $0xe10] ss:$8 sps:$4 sm:$0xff]  }
 0x22c   : > { %v9403_v47 = vpop.f32.mrb[11].mxu1  ;;  %9704 = vmatprep.subr.bf16.mxu1 %v13791_v35  ;;  %v16354_v49 = vadd.f32 %v9400_v41, %v9360_v42  ;;  %v13859_v35 = vld [vmem:[%s15815_s6 + $0xf10] ss:$8 sps:$4 sm:$0xff]   ;;  %v13867_v38 = vld [vmem:[%s15815_s6 + $0xf24] ss:$8 sps:$4 sm:$0xff]  }
 0x22d   : > { %v13870_v31 = vld [vmem:[%s15815_s6 + $0xe34] ss:$8 sps:$4 sm:$0xff]   ;;  %v13868_v41 = vld [vmem:[%s15815_s6 + $0xe30] ss:$8 sps:$4 sm:$0xff]   ;;  %v13876_v43 = vld [vmem:[%s15815_s6 + $0xe44] ss:$8 sps:$4 sm:$0xff]  }
 0x22e   : > { %9664 = vmatpush1.bf16.msra.mxu0 %v13786_v39  ;;  %v13862_v39 = vld [vmem:[%s15815_s6 + $0xe20] ss:$8 sps:$4 sm:$0xff]   ;;  %v13873_v32 = vld [vmem:[%s15815_s6 + $0xf34] ss:$8 sps:$4 sm:$0xff]   ;;  %v13871_v42 = vld [vmem:[%s15815_s6 + $0xf30] ss:$8 sps:$4 sm:$0xff]  }
 0x22f   : > { %9705 = vmatpush1.bf16.msra.mxu1 %v13789_v40  ;;  %9665 = vmatprep.subr.bf16.mxu0 %v13794_v27  ;;  %v13865_v40 = vld [vmem:[%s15815_s6 + $0xf20] ss:$8 sps:$4 sm:$0xff]   ;;  %v13879_v44 = vld [vmem:[%s15815_s6 + $0xf44] ss:$8 sps:$4 sm:$0xff]   ;;  %v13882_v27 = vld [vmem:[%s15815_s6 + $0xe54] ss:$8 sps:$4 sm:$0xff]  }
 0x230   : > { %9706 = vmatprep.subr.bf16.mxu1 %v13797_v48  ;;  %v13874_v46 = vld [vmem:[%s15815_s6 + $0xe40] ss:$8 sps:$4 sm:$0xff]   ;;  %v13885_v48 = vld [vmem:[%s15815_s6 + $0xf54] ss:$8 sps:$4 sm:$0xff]  }
 0x231   : > { %v13877_v47 = vld [vmem:[%s15815_s6 + $0xf40] ss:$8 sps:$4 sm:$0xff]  }
 0x232   : > { %9666 = vmatpush1.bf16.msra.mxu0 %v13792_v33  ;;  %v13880_v33 = vld [vmem:[%s15815_s6 + $0xe50] ss:$8 sps:$4 sm:$0xff]  }
 0x233   : > { %9707 = vmatpush1.bf16.msra.mxu1 %v13795_v50  ;;  %9667 = vmatprep.subr.bf16.mxu0 %v13800_v51  ;;  %v13883_v50 = vld [vmem:[%s15815_s6 + $0xf50] ss:$8 sps:$4 sm:$0xff]   ;;  %v13888_v51 = vld [vmem:[%s15815_s6 + $0xe64] ss:$8 sps:$4 sm:$0xff]  }
 0x234   : > { %9708 = vmatprep.subr.bf16.mxu1 %v13803_v52  ;;  %v13891_v52 = vld [vmem:[%s15815_s6 + $0xf64] ss:$8 sps:$4 sm:$0xff]  }
 0x236   : > { %9668 = vmatpush1.bf16.msra.mxu0 %v13798_v55 }
 0x237   : > { %9709 = vmatpush1.bf16.msra.mxu1 %v13801_v56  ;;  %9669 = vmatprep.subr.bf16.mxu0 %v13806_v25  ;;  %v13886_v25 = vld [vmem:[%s15815_s6 + $0xe60] ss:$8 sps:$4 sm:$0xff]  }
 0x238   : > { %9710 = vmatprep.subr.bf16.mxu1 %v13809_v36  ;;  %v13889_v36 = vld [vmem:[%s15815_s6 + $0xf60] ss:$8 sps:$4 sm:$0xff]  }
 0x23a   : > { %9670 = vmatpush1.bf16.msra.mxu0 %v13804_v57 }
 0x23b   : > { %9711 = vmatpush1.bf16.msra.mxu1 %v13807_v58  ;;  %9671 = vmatprep.subr.bf16.mxu0 %v13812_v59 }
 0x23c   : > { %9712 = vmatprep.subr.bf16.mxu1 %v13815_v60 }
 0x23e   : > { %9672 = vmatpush1.bf16.msra.mxu0 %v13810_v61 }
 0x23f   : > { %9713 = vmatpush1.bf16.msra.mxu1 %v13813_v62  ;;  %9673 = vmatprep.subr.bf16.mxu0 %v13818_v63 }
 0x240   : > { %9714 = vmatprep.subr.bf16.mxu1 %v13821_v0 }
 0x242   : > { %9674 = vmatpush1.bf16.msra.mxu0 %v13816_v2 }
 0x243   : > { %9715 = vmatpush1.bf16.msra.mxu1 %v13819_v3  ;;  %9675 = vmatprep.subr.bf16.mxu0 %v13824_v5  ;;  %v13897_v3 = vld [vmem:[%s15815_s6 + $0xf74] ss:$8 sps:$4 sm:$0xff]  }
 0x244   : > { %9716 = vmatprep.subr.bf16.mxu1 %v13827_v6  ;;  %v13895_v6 = vld [vmem:[%s15815_s6 + $0xf70] ss:$8 sps:$4 sm:$0xff]  }
 0x246   : > { %9676 = vmatpush1.bf16.msra.mxu0 %v13822_v7  ;;  %v13900_v7 = vld [vmem:[%s15815_s6 + $0xe84] ss:$8 sps:$4 sm:$0xff]  }
 0x247   : > { %9717 = vmatpush1.bf16.msra.mxu1 %v13825_v8  ;;  %9677 = vmatprep.subr.bf16.mxu0 %v13830_v11  ;;  %v13903_v8 = vld [vmem:[%s15815_s6 + $0xf84] ss:$8 sps:$4 sm:$0xff]   ;;  %v13898_v11 = vld [vmem:[%s15815_s6 + $0xe80] ss:$8 sps:$4 sm:$0xff]  }
 0x248   : > { %9718 = vmatprep.subr.bf16.mxu1 %v13833_v12  ;;  %v13901_v12 = vld [vmem:[%s15815_s6 + $0xf80] ss:$8 sps:$4 sm:$0xff]  }
 0x24a   : > { %9678 = vmatpush1.bf16.msra.mxu0 %v13828_v53  ;;  %v13906_v53 = vld [vmem:[%s15815_s6 + $0xe94] ss:$8 sps:$4 sm:$0xff]  }
 0x24b   : > { %9719 = vmatpush1.bf16.msra.mxu1 %v13831_v54  ;;  %9679 = vmatprep.subr.bf16.mxu0 %v13836_v13  ;;  %v13909_v54 = vld [vmem:[%s15815_s6 + $0xf94] ss:$8 sps:$4 sm:$0xff]   ;;  %v13904_v13 = vld [vmem:[%s15815_s6 + $0xe90] ss:$8 sps:$4 sm:$0xff]  }
 0x24c   : > { %9720 = vmatprep.subr.bf16.mxu1 %v13839_v14  ;;  %v13907_v14 = vld [vmem:[%s15815_s6 + $0xf90] ss:$8 sps:$4 sm:$0xff]  }
 0x24e   : > { %9680 = vmatpush1.bf16.msra.mxu0 %v13834_v15  ;;  %v13912_v15 = vld [vmem:[%s15815_s6 + $0xea4] ss:$8 sps:$4 sm:$0xff]  }
 0x24f   : > { %9721 = vmatpush1.bf16.msra.mxu1 %v13837_v16  ;;  %9681 = vmatprep.subr.bf16.mxu0 %v13842_v17  ;;  %v13915_v16 = vld [vmem:[%s15815_s6 + $0xfa4] ss:$8 sps:$4 sm:$0xff]   ;;  %v13910_v17 = vld [vmem:[%s15815_s6 + $0xea0] ss:$8 sps:$4 sm:$0xff]  }
 0x250   : > { %9722 = vmatprep.subr.bf16.mxu1 %v13845_v18  ;;  %v13913_v18 = vld [vmem:[%s15815_s6 + $0xfa0] ss:$8 sps:$4 sm:$0xff]  }
 0x252   : > { %9682 = vmatpush1.bf16.msra.mxu0 %v13840_v19  ;;  %v13918_v19 = vld [vmem:[%s15815_s6 + $0xeb4] ss:$8 sps:$4 sm:$0xff]  }
 0x253   : > { %9723 = vmatpush1.bf16.msra.mxu1 %v13843_v20  ;;  %9733 = vmatprep.subr.bf16.mxu0 %v13852_v21  ;;  %v13921_v20 = vld [vmem:[%s15815_s6 + $0xfb4] ss:$8 sps:$4 sm:$0xff]   ;;  %v13916_v21 = vld [vmem:[%s15815_s6 + $0xeb0] ss:$8 sps:$4 sm:$0xff]  }
 0x254   : > { %9774 = vmatprep.subr.bf16.mxu1 %v13855_v22  ;;  %v13919_v22 = vld [vmem:[%s15815_s6 + $0xfb0] ss:$8 sps:$4 sm:$0xff]  }
 0x255   : > { %9684 = vmatmul.mubr.bf16.vlgmr.msra.gmra.mrb[24].mxu0 %v11430_v28  ;;  %v13922_v28 = vld [vmem:[%s15815_s6 + $0xec0] ss:$8 sps:$4 sm:$0xff]  }
 0x256   : > { %9725 = vmatmul.mubr.bf16.vlgmr.msra.gmra.mrb[24].mxu1 %v11432_v29  ;;  %9734 = vmatpush1.bf16.msra.mxu0 %v13850_v23  ;;  %v13924_v23 = vld [vmem:[%s15815_s6 + $0xec4] ss:$8 sps:$4 sm:$0xff]   ;;  %v13925_v29 = vld [vmem:[%s15815_s6 + $0xfc0] ss:$8 sps:$4 sm:$0xff]  }
 0x257   : > { %9775 = vmatpush1.bf16.msra.mxu1 %v13853_v24  ;;  %9735 = vmatprep.subr.bf16.mxu0 %v13858_v4  ;;  %v13927_v24 = vld [vmem:[%s15815_s6 + $0xfc4] ss:$8 sps:$4 sm:$0xff]   ;;  %v13930_v4 = vld [vmem:[%s15815_s6 + $0xed4] ss:$8 sps:$4 sm:$0xff]  }
 0x258   : > { %9776 = vmatprep.subr.bf16.mxu1 %v13861_v34  ;;  %9765 = vmatprep.mubr.bf16.mxu0 %v11435_v9  ;;  %v13933_v34 = vld [vmem:[%s15815_s6 + $0xfd4] ss:$8 sps:$4 sm:$0xff]   ;;  %v13928_v9 = vld [vmem:[%s15815_s6 + $0xed0] ss:$8 sps:$4 sm:$0xff]  }
 0x259   : > { %9806 = vmatprep.mubr.bf16.mxu1 %v11437_v10  ;;  %v13931_v10 = vld [vmem:[%s15815_s6 + $0xfd0] ss:$8 sps:$4 sm:$0xff]  }
 0x25a   : > { %9736 = vmatpush1.bf16.msra.mxu0 %v13856_v26  ;;  %v13936_v26 = vld [vmem:[%s15815_s6 + $0xee4] ss:$8 sps:$4 sm:$0xff]  }
 0x25b   : > { %9777 = vmatpush1.bf16.msra.mxu1 %v13859_v35  ;;  %9737 = vmatprep.subr.bf16.mxu0 %v13864_v37  ;;  %v13939_v35 = vld [vmem:[%s15815_s6 + $0xfe4] ss:$8 sps:$4 sm:$0xff]   ;;  %v13934_v37 = vld [vmem:[%s15815_s6 + $0xee0] ss:$8 sps:$4 sm:$0xff]  }
 0x25c   : > { %9778 = vmatprep.subr.bf16.mxu1 %v13867_v38  ;;  %v13937_v38 = vld [vmem:[%s15815_s6 + $0xfe0] ss:$8 sps:$4 sm:$0xff]  }
 0x25e   : > { %9738 = vmatpush1.bf16.msra.mxu0 %v13862_v39  ;;  %v13942_v39 = vld [vmem:[%s15815_s6 + $0xef4] ss:$8 sps:$4 sm:$0xff]  }
 0x25f   : > { %9779 = vmatpush1.bf16.msra.mxu1 %v13865_v40  ;;  %9739 = vmatprep.subr.bf16.mxu0 %v13870_v31  ;;  %v13945_v40 = vld [vmem:[%s15815_s6 + $0xff4] ss:$8 sps:$4 sm:$0xff]   ;;  %v13940_v31 = vld [vmem:[%s15815_s6 + $0xef0] ss:$8 sps:$4 sm:$0xff]  }
 0x260   : > { %9780 = vmatprep.subr.bf16.mxu1 %v13873_v32  ;;  %v13943_v32 = vld [vmem:[%s15815_s6 + $0xff0] ss:$8 sps:$4 sm:$0xff]  }
 0x262   : > { %9740 = vmatpush1.bf16.msra.mxu0 %v13868_v41  ;;  %v13952_v41 = vld [vmem:[%s15815_s6 + $0x1004] ss:$8 sps:$4 sm:$0xff]  }
 0x263   : > { %9781 = vmatpush1.bf16.msra.mxu1 %v13871_v42  ;;  %9741 = vmatprep.subr.bf16.mxu0 %v13876_v43  ;;  %v13955_v42 = vld [vmem:[%s15815_s6 + $0x1104] ss:$8 sps:$4 sm:$0xff]   ;;  %v13950_v43 = vld [vmem:[%s15815_s6 + $0x1000] ss:$8 sps:$4 sm:$0xff]  }
 0x264   : > { %9782 = vmatprep.subr.bf16.mxu1 %v13879_v44  ;;  %v13953_v44 = vld [vmem:[%s15815_s6 + $0x1100] ss:$8 sps:$4 sm:$0xff]  }
 0x266   : > { %9742 = vmatpush1.bf16.msra.mxu0 %v13874_v46  ;;  %v11434_v46 = vcombine.low %v16399_v1, %v16399_v1 }
 0x267   : > { %9783 = vmatpush1.bf16.msra.mxu1 %v13877_v47  ;;  %9743 = vmatprep.subr.bf16.mxu0 %v13882_v27  ;;  %v11436_v47 = vcombine.low %v16402_v30, %v16402_v30  ;;  %v16483_v27 = vld [vmem:[%s15839_s18 + $0x80] sm:$0xff] }
 0x268   : > { %9784 = vmatprep.subr.bf16.mxu1 %v13885_v48  ;;  %v9439_v55 = vpop.f32.mrb[12].mxu0  ;;  %v16486_v48 = vld [vmem:[%s15839_s18 + $0x88] sm:$0xff]  ;;  %v11439_v1 = vcombine.high %v16483_v27, %v16483_v27 }
 0x269   : > { %v9480_v56 = vpop.f32.mrb[12].mxu1  ;;  %v9440_v57 = vadd.f32 %v9439_v55, %v16350_v45  ;;  %v9441_v58 = vpop.f32.mrb[13].mxu0  ;;  %v13894_v45 = vld [vmem:[%s15815_s6 + $0xe74] ss:$8 sps:$4 sm:$0xff]   ;;  %v11441_v30 = vcombine.high %v16486_v48, %v16486_v48  ;;  %v13964_v55 = vld [vmem:[%s15815_s6 + $0x1024] ss:$8 sps:$4 sm:$0xff]  }
 0x26a   : > { %v9482_v59 = vpop.f32.mrb[13].mxu1  ;;  %v9442_v60 = vadd.f32 %v9441_v58, %v16354_v49  ;;  %v9443_v61 = vpop.f32.mrb[14].mxu0  ;;  %9744 = vmatpush1.bf16.msra.mxu0 %v13880_v33  ;;  %v13892_v49 = vld [vmem:[%s15815_s6 + $0xe70] ss:$8 sps:$4 sm:$0xff]   ;;  %v13958_v33 = vld [vmem:[%s15815_s6 + $0x1014] ss:$8 sps:$4 sm:$0xff]  }
 0x26b   : > { %v9484_v62 = vpop.f32.mrb[14].mxu1  ;;  %9785 = vmatpush1.bf16.msra.mxu1 %v13883_v50  ;;  %v16434_v63 = vadd.f32 %v9480_v56, %v9440_v57  ;;  %v9444_v0 = vpop.f32.mrb[15].mxu0  ;;  %9745 = vmatprep.subr.bf16.mxu0 %v13888_v51  ;;  %v13961_v50 = vld [vmem:[%s15815_s6 + $0x1114] ss:$8 sps:$4 sm:$0xff]   ;;  %v13956_v51 = vld [vmem:[%s15815_s6 + $0x1010] ss:$8 sps:$4 sm:$0xff]  }
 0x26c   : > { %v9485_v2 = vpop.f32.mrb[15].mxu1  ;;  %9786 = vmatprep.subr.bf16.mxu1 %v13891_v52  ;;  %v16438_v5 = vadd.f32 %v9482_v59, %v9442_v60  ;;  %v13959_v52 = vld [vmem:[%s15815_s6 + $0x1110] ss:$8 sps:$4 sm:$0xff]   ;;  %v13967_v56 = vld [vmem:[%s15815_s6 + $0x1124] ss:$8 sps:$4 sm:$0xff]  }
 0x26d   : > { %v13970_v57 = vld [vmem:[%s15815_s6 + $0x1034] ss:$8 sps:$4 sm:$0xff]   ;;  %v13968_v59 = vld [vmem:[%s15815_s6 + $0x1030] ss:$8 sps:$4 sm:$0xff]   ;;  %v13976_v61 = vld [vmem:[%s15815_s6 + $0x1044] ss:$8 sps:$4 sm:$0xff]  }
 0x26e   : > { %9746 = vmatpush1.bf16.msra.mxu0 %v13886_v25  ;;  %v13962_v25 = vld [vmem:[%s15815_s6 + $0x1020] ss:$8 sps:$4 sm:$0xff]   ;;  %v13973_v58 = vld [vmem:[%s15815_s6 + $0x1134] ss:$8 sps:$4 sm:$0xff]   ;;  %v13971_v60 = vld [vmem:[%s15815_s6 + $0x1130] ss:$8 sps:$4 sm:$0xff]  }
 0x26f   : > { %9787 = vmatpush1.bf16.msra.mxu1 %v13889_v36  ;;  %9747 = vmatprep.subr.bf16.mxu0 %v13894_v45  ;;  %v13965_v36 = vld [vmem:[%s15815_s6 + $0x1120] ss:$8 sps:$4 sm:$0xff]   ;;  %v13979_v62 = vld [vmem:[%s15815_s6 + $0x1144] ss:$8 sps:$4 sm:$0xff]   ;;  %v13982_v45 = vld [vmem:[%s15815_s6 + $0x1054] ss:$8 sps:$4 sm:$0xff]  }
 0x270   : > { %9788 = vmatprep.subr.bf16.mxu1 %v13897_v3  ;;  %v13974_v0 = vld [vmem:[%s15815_s6 + $0x1040] ss:$8 sps:$4 sm:$0xff]   ;;  %v13985_v3 = vld [vmem:[%s15815_s6 + $0x1154] ss:$8 sps:$4 sm:$0xff]  }
 0x271   : > { %v13977_v2 = vld [vmem:[%s15815_s6 + $0x1140] ss:$8 sps:$4 sm:$0xff]  }
 0x272   : > { %9748 = vmatpush1.bf16.msra.mxu0 %v13892_v49  ;;  %v13980_v49 = vld [vmem:[%s15815_s6 + $0x1050] ss:$8 sps:$4 sm:$0xff]  }
 0x273   : > { %9789 = vmatpush1.bf16.msra.mxu1 %v13895_v6  ;;  %9749 = vmatprep.subr.bf16.mxu0 %v13900_v7  ;;  %v13983_v6 = vld [vmem:[%s15815_s6 + $0x1150] ss:$8 sps:$4 sm:$0xff]   ;;  %v13988_v7 = vld [vmem:[%s15815_s6 + $0x1064] ss:$8 sps:$4 sm:$0xff]  }
 0x274   : > { %9790 = vmatprep.subr.bf16.mxu1 %v13903_v8  ;;  %v13991_v8 = vld [vmem:[%s15815_s6 + $0x1164] ss:$8 sps:$4 sm:$0xff]  }
 0x276   : > { %9750 = vmatpush1.bf16.msra.mxu0 %v13898_v11 }
 0x277   : > { %9791 = vmatpush1.bf16.msra.mxu1 %v13901_v12  ;;  %9751 = vmatprep.subr.bf16.mxu0 %v13906_v53  ;;  %v13986_v53 = vld [vmem:[%s15815_s6 + $0x1060] ss:$8 sps:$4 sm:$0xff]  }
 0x278   : > { %9792 = vmatprep.subr.bf16.mxu1 %v13909_v54  ;;  %v13989_v54 = vld [vmem:[%s15815_s6 + $0x1160] ss:$8 sps:$4 sm:$0xff]  }
 0x27a   : > { %9752 = vmatpush1.bf16.msra.mxu0 %v13904_v13 }
 0x27b   : > { %9793 = vmatpush1.bf16.msra.mxu1 %v13907_v14  ;;  %9753 = vmatprep.subr.bf16.mxu0 %v13912_v15 }
 0x27c   : > { %9794 = vmatprep.subr.bf16.mxu1 %v13915_v16 }
 0x27e   : > { %9754 = vmatpush1.bf16.msra.mxu0 %v13910_v17 }
 0x27f   : > { %9795 = vmatpush1.bf16.msra.mxu1 %v13913_v18  ;;  %9755 = vmatprep.subr.bf16.mxu0 %v13918_v19 }
 0x280   : > { %9796 = vmatprep.subr.bf16.mxu1 %v13921_v20 }
 0x282   : > { %9756 = vmatpush1.bf16.msra.mxu0 %v13916_v21 }
 0x283   : > { %9797 = vmatpush1.bf16.msra.mxu1 %v13919_v22  ;;  %9757 = vmatprep.subr.bf16.mxu0 %v13924_v23  ;;  %v13997_v22 = vld [vmem:[%s15815_s6 + $0x1174] ss:$8 sps:$4 sm:$0xff]  }
 0x284   : > { %9798 = vmatprep.subr.bf16.mxu1 %v13927_v24  ;;  %v13995_v24 = vld [vmem:[%s15815_s6 + $0x1170] ss:$8 sps:$4 sm:$0xff]  }
 0x286   : > { %9758 = vmatpush1.bf16.msra.mxu0 %v13922_v28  ;;  %v14000_v28 = vld [vmem:[%s15815_s6 + $0x1084] ss:$8 sps:$4 sm:$0xff]  }
 0x287   : > { %9799 = vmatpush1.bf16.msra.mxu1 %v13925_v29  ;;  %9759 = vmatprep.subr.bf16.mxu0 %v13930_v4  ;;  %v14003_v29 = vld [vmem:[%s15815_s6 + $0x1184] ss:$8 sps:$4 sm:$0xff]   ;;  %v13998_v4 = vld [vmem:[%s15815_s6 + $0x1080] ss:$8 sps:$4 sm:$0xff]  }
 0x288   : > { %9800 = vmatprep.subr.bf16.mxu1 %v13933_v34  ;;  %v14001_v34 = vld [vmem:[%s15815_s6 + $0x1180] ss:$8 sps:$4 sm:$0xff]  }
 0x28a   : > { %9760 = vmatpush1.bf16.msra.mxu0 %v13928_v9  ;;  %v14006_v9 = vld [vmem:[%s15815_s6 + $0x1094] ss:$8 sps:$4 sm:$0xff]  }
 0x28b   : > { %9801 = vmatpush1.bf16.msra.mxu1 %v13931_v10  ;;  %9761 = vmatprep.subr.bf16.mxu0 %v13936_v26  ;;  %v14009_v10 = vld [vmem:[%s15815_s6 + $0x1194] ss:$8 sps:$4 sm:$0xff]   ;;  %v14004_v26 = vld [vmem:[%s15815_s6 + $0x1090] ss:$8 sps:$4 sm:$0xff]  }
 0x28c   : > { %9802 = vmatprep.subr.bf16.mxu1 %v13939_v35  ;;  %v14007_v35 = vld [vmem:[%s15815_s6 + $0x1190] ss:$8 sps:$4 sm:$0xff]  }
 0x28e   : > { %9762 = vmatpush1.bf16.msra.mxu0 %v13934_v37  ;;  %v14012_v37 = vld [vmem:[%s15815_s6 + $0x10a4] ss:$8 sps:$4 sm:$0xff]  }
 0x28f   : > { %9803 = vmatpush1.bf16.msra.mxu1 %v13937_v38  ;;  %9763 = vmatprep.subr.bf16.mxu0 %v13942_v39  ;;  %v14015_v38 = vld [vmem:[%s15815_s6 + $0x11a4] ss:$8 sps:$4 sm:$0xff]   ;;  %v14010_v39 = vld [vmem:[%s15815_s6 + $0x10a0] ss:$8 sps:$4 sm:$0xff]  }
 0x290   : > { %9804 = vmatprep.subr.bf16.mxu1 %v13945_v40  ;;  %v14013_v40 = vld [vmem:[%s15815_s6 + $0x11a0] ss:$8 sps:$4 sm:$0xff]  }
 0x292   : > { %9764 = vmatpush1.bf16.msra.mxu0 %v13940_v31  ;;  %v14018_v31 = vld [vmem:[%s15815_s6 + $0x10b4] ss:$8 sps:$4 sm:$0xff]  }
 0x293   : > { %9805 = vmatpush1.bf16.msra.mxu1 %v13943_v32  ;;  %9815 = vmatprep.subr.bf16.mxu0 %v13952_v41  ;;  %v14021_v32 = vld [vmem:[%s15815_s6 + $0x11b4] ss:$8 sps:$4 sm:$0xff]   ;;  %v14016_v41 = vld [vmem:[%s15815_s6 + $0x10b0] ss:$8 sps:$4 sm:$0xff]  }
 0x294   : > { %9856 = vmatprep.subr.bf16.mxu1 %v13955_v42  ;;  %v14019_v42 = vld [vmem:[%s15815_s6 + $0x11b0] ss:$8 sps:$4 sm:$0xff]  }
 0x295   : > { %9766 = vmatmul.mubr.bf16.vlgmr.msra.gmra.mrb[28].mxu0 %v11434_v46  ;;  %v14022_v46 = vld [vmem:[%s15815_s6 + $0x10c0] ss:$8 sps:$4 sm:$0xff]  }
 0x296   : > { %9807 = vmatmul.mubr.bf16.vlgmr.msra.gmra.mrb[28].mxu1 %v11436_v47  ;;  %9816 = vmatpush1.bf16.msra.mxu0 %v13950_v43  ;;  %v14024_v43 = vld [vmem:[%s15815_s6 + $0x10c4] ss:$8 sps:$4 sm:$0xff]   ;;  %v14025_v47 = vld [vmem:[%s15815_s6 + $0x11c0] ss:$8 sps:$4 sm:$0xff]  }
 0x297   : > { %9857 = vmatpush1.bf16.msra.mxu1 %v13953_v44  ;;  %9817 = vmatprep.subr.bf16.mxu0 %v13958_v33  ;;  %v14027_v44 = vld [vmem:[%s15815_s6 + $0x11c4] ss:$8 sps:$4 sm:$0xff]   ;;  %v14030_v33 = vld [vmem:[%s15815_s6 + $0x10d4] ss:$8 sps:$4 sm:$0xff]  }
 0x298   : > { %9858 = vmatprep.subr.bf16.mxu1 %v13961_v50  ;;  %9847 = vmatprep.mubr.bf16.mxu0 %v11439_v1  ;;  %v14033_v50 = vld [vmem:[%s15815_s6 + $0x11d4] ss:$8 sps:$4 sm:$0xff]   ;;  %v14028_v1 = vld [vmem:[%s15815_s6 + $0x10d0] ss:$8 sps:$4 sm:$0xff]  }
 0x299   : > { %9888 = vmatprep.mubr.bf16.mxu1 %v11441_v30  ;;  %v14031_v30 = vld [vmem:[%s15815_s6 + $0x11d0] ss:$8 sps:$4 sm:$0xff]  }
 0x29a   : > { %9818 = vmatpush1.bf16.msra.mxu0 %v13956_v51  ;;  %v14036_v51 = vld [vmem:[%s15815_s6 + $0x10e4] ss:$8 sps:$4 sm:$0xff]  }
 0x29b   : > { %9859 = vmatpush1.bf16.msra.mxu1 %v13959_v52  ;;  %9819 = vmatprep.subr.bf16.mxu0 %v13964_v55  ;;  %v14039_v52 = vld [vmem:[%s15815_s6 + $0x11e4] ss:$8 sps:$4 sm:$0xff]   ;;  %v14034_v55 = vld [vmem:[%s15815_s6 + $0x10e0] ss:$8 sps:$4 sm:$0xff]  }
 0x29c   : > { %9860 = vmatprep.subr.bf16.mxu1 %v13967_v56  ;;  %v14037_v56 = vld [vmem:[%s15815_s6 + $0x11e0] ss:$8 sps:$4 sm:$0xff]  }
 0x29e   : > { %9820 = vmatpush1.bf16.msra.mxu0 %v13962_v25  ;;  %v14042_v25 = vld [vmem:[%s15815_s6 + $0x10f4] ss:$8 sps:$4 sm:$0xff]  }
 0x29f   : > { %9861 = vmatpush1.bf16.msra.mxu1 %v13965_v36  ;;  %9821 = vmatprep.subr.bf16.mxu0 %v13970_v57  ;;  %v14045_v36 = vld [vmem:[%s15815_s6 + $0x11f4] ss:$8 sps:$4 sm:$0xff]   ;;  %v14040_v57 = vld [vmem:[%s15815_s6 + $0x10f0] ss:$8 sps:$4 sm:$0xff]  }
 0x2a0   : > { %9862 = vmatprep.subr.bf16.mxu1 %v13973_v58  ;;  %v14043_v58 = vld [vmem:[%s15815_s6 + $0x11f0] ss:$8 sps:$4 sm:$0xff]  }
 0x2a2   : > { %9822 = vmatpush1.bf16.msra.mxu0 %v13968_v59  ;;  %v14052_v59 = vld [vmem:[%s15815_s6 + $0x1204] ss:$8 sps:$4 sm:$0xff]  }
 0x2a3   : > { %9863 = vmatpush1.bf16.msra.mxu1 %v13971_v60  ;;  %9823 = vmatprep.subr.bf16.mxu0 %v13976_v61  ;;  %v14055_v60 = vld [vmem:[%s15815_s6 + $0x1304] ss:$8 sps:$4 sm:$0xff]   ;;  %v14050_v61 = vld [vmem:[%s15815_s6 + $0x1200] ss:$8 sps:$4 sm:$0xff]  }
 0x2a4   : > { %9864 = vmatprep.subr.bf16.mxu1 %v13979_v62  ;;  %v14053_v62 = vld [vmem:[%s15815_s6 + $0x1300] ss:$8 sps:$4 sm:$0xff]  }
 0x2a6   : > { %9824 = vmatpush1.bf16.msra.mxu0 %v13974_v0  ;;  %v11438_v0 = vcombine.low %v16483_v27, %v16483_v27 }
 0x2a7   : > { %9865 = vmatpush1.bf16.msra.mxu1 %v13977_v2  ;;  %9825 = vmatprep.subr.bf16.mxu0 %v13982_v45  ;;  %v11440_v2 = vcombine.low %v16486_v48, %v16486_v48  ;;  %v16567_v45 = vld [vmem:[%s15839_s18 + $0x90] sm:$0xff] }
 0x2a8   : > { %9866 = vmatprep.subr.bf16.mxu1 %v13985_v3  ;;  %v9521_v11 = vpop.f32.mrb[16].mxu0  ;;  %v16570_v3 = vld [vmem:[%s15839_s18 + $0x98] sm:$0xff]  ;;  %v11443_v27 = vcombine.high %v16567_v45, %v16567_v45 }
 0x2a9   : > { %v9562_v12 = vpop.f32.mrb[16].mxu1  ;;  %v9522_v13 = vadd.f32 %v9521_v11, %v16434_v63  ;;  %v9523_v14 = vpop.f32.mrb[17].mxu0  ;;  %v13994_v63 = vld [vmem:[%s15815_s6 + $0x1074] ss:$8 sps:$4 sm:$0xff]   ;;  %v11445_v48 = vcombine.high %v16570_v3, %v16570_v3  ;;  %v14064_v11 = vld [vmem:[%s15815_s6 + $0x1224] ss:$8 sps:$4 sm:$0xff]  }
 0x2aa   : > { %v9564_v15 = vpop.f32.mrb[17].mxu1  ;;  %v9524_v16 = vadd.f32 %v9523_v14, %v16438_v5  ;;  %v9525_v17 = vpop.f32.mrb[18].mxu0  ;;  %9826 = vmatpush1.bf16.msra.mxu0 %v13980_v49  ;;  %v13992_v5 = vld [vmem:[%s15815_s6 + $0x1070] ss:$8 sps:$4 sm:$0xff]   ;;  %v14058_v49 = vld [vmem:[%s15815_s6 + $0x1214] ss:$8 sps:$4 sm:$0xff]  }
 0x2ab   : > { %v9566_v18 = vpop.f32.mrb[18].mxu1  ;;  %9867 = vmatpush1.bf16.msra.mxu1 %v13983_v6  ;;  %v16518_v19 = vadd.f32 %v9562_v12, %v9522_v13  ;;  %v9526_v20 = vpop.f32.mrb[19].mxu0  ;;  %9827 = vmatprep.subr.bf16.mxu0 %v13988_v7  ;;  %v14061_v6 = vld [vmem:[%s15815_s6 + $0x1314] ss:$8 sps:$4 sm:$0xff]   ;;  %v14056_v7 = vld [vmem:[%s15815_s6 + $0x1210] ss:$8 sps:$4 sm:$0xff]  }
 0x2ac   : > { %v9567_v21 = vpop.f32.mrb[19].mxu1  ;;  %9868 = vmatprep.subr.bf16.mxu1 %v13991_v8  ;;  %v16522_v23 = vadd.f32 %v9564_v15, %v9524_v16  ;;  %v14059_v8 = vld [vmem:[%s15815_s6 + $0x1310] ss:$8 sps:$4 sm:$0xff]   ;;  %v14067_v12 = vld [vmem:[%s15815_s6 + $0x1324] ss:$8 sps:$4 sm:$0xff]  }
 0x2ad   : > { %v14070_v13 = vld [vmem:[%s15815_s6 + $0x1234] ss:$8 sps:$4 sm:$0xff]   ;;  %v14068_v15 = vld [vmem:[%s15815_s6 + $0x1230] ss:$8 sps:$4 sm:$0xff]   ;;  %v14076_v17 = vld [vmem:[%s15815_s6 + $0x1244] ss:$8 sps:$4 sm:$0xff]  }
 0x2ae   : > { %9828 = vmatpush1.bf16.msra.mxu0 %v13986_v53  ;;  %v14062_v53 = vld [vmem:[%s15815_s6 + $0x1220] ss:$8 sps:$4 sm:$0xff]   ;;  %v14073_v14 = vld [vmem:[%s15815_s6 + $0x1334] ss:$8 sps:$4 sm:$0xff]   ;;  %v14071_v16 = vld [vmem:[%s15815_s6 + $0x1330] ss:$8 sps:$4 sm:$0xff]  }
 0x2af   : > { %9869 = vmatpush1.bf16.msra.mxu1 %v13989_v54  ;;  %9829 = vmatprep.subr.bf16.mxu0 %v13994_v63  ;;  %v14065_v54 = vld [vmem:[%s15815_s6 + $0x1320] ss:$8 sps:$4 sm:$0xff]   ;;  %v14079_v18 = vld [vmem:[%s15815_s6 + $0x1344] ss:$8 sps:$4 sm:$0xff]   ;;  %v14082_v63 = vld [vmem:[%s15815_s6 + $0x1254] ss:$8 sps:$4 sm:$0xff]  }
 0x2b0   : > { %9870 = vmatprep.subr.bf16.mxu1 %v13997_v22  ;;  %v14074_v20 = vld [vmem:[%s15815_s6 + $0x1240] ss:$8 sps:$4 sm:$0xff]   ;;  %v14085_v22 = vld [vmem:[%s15815_s6 + $0x1354] ss:$8 sps:$4 sm:$0xff]  }
 0x2b1   : > { %v14077_v21 = vld [vmem:[%s15815_s6 + $0x1340] ss:$8 sps:$4 sm:$0xff]  }
 0x2b2   : > { %9830 = vmatpush1.bf16.msra.mxu0 %v13992_v5  ;;  %v14080_v5 = vld [vmem:[%s15815_s6 + $0x1250] ss:$8 sps:$4 sm:$0xff]  }
 0x2b3   : > { %9871 = vmatpush1.bf16.msra.mxu1 %v13995_v24  ;;  %9831 = vmatprep.subr.bf16.mxu0 %v14000_v28  ;;  %v14083_v24 = vld [vmem:[%s15815_s6 + $0x1350] ss:$8 sps:$4 sm:$0xff]   ;;  %v14088_v28 = vld [vmem:[%s15815_s6 + $0x1264] ss:$8 sps:$4 sm:$0xff]  }
 0x2b4   : > { %9872 = vmatprep.subr.bf16.mxu1 %v14003_v29  ;;  %v14091_v29 = vld [vmem:[%s15815_s6 + $0x1364] ss:$8 sps:$4 sm:$0xff]  }
 0x2b6   : > { %9832 = vmatpush1.bf16.msra.mxu0 %v13998_v4 }
 0x2b7   : > { %9873 = vmatpush1.bf16.msra.mxu1 %v14001_v34  ;;  %9833 = vmatprep.subr.bf16.mxu0 %v14006_v9  ;;  %v14086_v9 = vld [vmem:[%s15815_s6 + $0x1260] ss:$8 sps:$4 sm:$0xff]  }
 0x2b8   : > { %9874 = vmatprep.subr.bf16.mxu1 %v14009_v10  ;;  %v14089_v10 = vld [vmem:[%s15815_s6 + $0x1360] ss:$8 sps:$4 sm:$0xff]  }
 0x2ba   : > { %9834 = vmatpush1.bf16.msra.mxu0 %v14004_v26 }
 0x2bb   : > { %9875 = vmatpush1.bf16.msra.mxu1 %v14007_v35  ;;  %9835 = vmatprep.subr.bf16.mxu0 %v14012_v37 }
 0x2bc   : > { %9876 = vmatprep.subr.bf16.mxu1 %v14015_v38 }
 0x2be   : > { %9836 = vmatpush1.bf16.msra.mxu0 %v14010_v39 }
 0x2bf   : > { %9877 = vmatpush1.bf16.msra.mxu1 %v14013_v40  ;;  %9837 = vmatprep.subr.bf16.mxu0 %v14018_v31 }
 0x2c0   : > { %9878 = vmatprep.subr.bf16.mxu1 %v14021_v32 }
 0x2c2   : > { %9838 = vmatpush1.bf16.msra.mxu0 %v14016_v41 }
 0x2c3   : > { %9879 = vmatpush1.bf16.msra.mxu1 %v14019_v42  ;;  %9839 = vmatprep.subr.bf16.mxu0 %v14024_v43  ;;  %v14097_v42 = vld [vmem:[%s15815_s6 + $0x1374] ss:$8 sps:$4 sm:$0xff]  }
 0x2c4   : > { %9880 = vmatprep.subr.bf16.mxu1 %v14027_v44  ;;  %v14095_v44 = vld [vmem:[%s15815_s6 + $0x1370] ss:$8 sps:$4 sm:$0xff]  }
 0x2c6   : > { %9840 = vmatpush1.bf16.msra.mxu0 %v14022_v46  ;;  %v14100_v46 = vld [vmem:[%s15815_s6 + $0x1284] ss:$8 sps:$4 sm:$0xff]  }
 0x2c7   : > { %9881 = vmatpush1.bf16.msra.mxu1 %v14025_v47  ;;  %9841 = vmatprep.subr.bf16.mxu0 %v14030_v33  ;;  %v14103_v47 = vld [vmem:[%s15815_s6 + $0x1384] ss:$8 sps:$4 sm:$0xff]   ;;  %v14098_v33 = vld [vmem:[%s15815_s6 + $0x1280] ss:$8 sps:$4 sm:$0xff]  }
 0x2c8   : > { %9882 = vmatprep.subr.bf16.mxu1 %v14033_v50  ;;  %v14101_v50 = vld [vmem:[%s15815_s6 + $0x1380] ss:$8 sps:$4 sm:$0xff]  }
 0x2ca   : > { %9842 = vmatpush1.bf16.msra.mxu0 %v14028_v1  ;;  %v14106_v1 = vld [vmem:[%s15815_s6 + $0x1294] ss:$8 sps:$4 sm:$0xff]  }
 0x2cb   : > { %9883 = vmatpush1.bf16.msra.mxu1 %v14031_v30  ;;  %9843 = vmatprep.subr.bf16.mxu0 %v14036_v51  ;;  %v14109_v30 = vld [vmem:[%s15815_s6 + $0x1394] ss:$8 sps:$4 sm:$0xff]   ;;  %v14104_v51 = vld [vmem:[%s15815_s6 + $0x1290] ss:$8 sps:$4 sm:$0xff]  }
 0x2cc   : > { %9884 = vmatprep.subr.bf16.mxu1 %v14039_v52  ;;  %v14107_v52 = vld [vmem:[%s15815_s6 + $0x1390] ss:$8 sps:$4 sm:$0xff]  }
 0x2ce   : > { %9844 = vmatpush1.bf16.msra.mxu0 %v14034_v55  ;;  %v14112_v55 = vld [vmem:[%s15815_s6 + $0x12a4] ss:$8 sps:$4 sm:$0xff]  }
 0x2cf   : > { %9885 = vmatpush1.bf16.msra.mxu1 %v14037_v56  ;;  %9845 = vmatprep.subr.bf16.mxu0 %v14042_v25  ;;  %v14115_v56 = vld [vmem:[%s15815_s6 + $0x13a4] ss:$8 sps:$4 sm:$0xff]   ;;  %v14110_v25 = vld [vmem:[%s15815_s6 + $0x12a0] ss:$8 sps:$4 sm:$0xff]  }
 0x2d0   : > { %9886 = vmatprep.subr.bf16.mxu1 %v14045_v36  ;;  %v14113_v36 = vld [vmem:[%s15815_s6 + $0x13a0] ss:$8 sps:$4 sm:$0xff]  }
 0x2d2   : > { %9846 = vmatpush1.bf16.msra.mxu0 %v14040_v57  ;;  %v14118_v57 = vld [vmem:[%s15815_s6 + $0x12b4] ss:$8 sps:$4 sm:$0xff]  }
 0x2d3   : > { %9887 = vmatpush1.bf16.msra.mxu1 %v14043_v58  ;;  %9897 = vmatprep.subr.bf16.mxu0 %v14052_v59  ;;  %v14121_v58 = vld [vmem:[%s15815_s6 + $0x13b4] ss:$8 sps:$4 sm:$0xff]   ;;  %v14116_v59 = vld [vmem:[%s15815_s6 + $0x12b0] ss:$8 sps:$4 sm:$0xff]  }
 0x2d4   : > { %9938 = vmatprep.subr.bf16.mxu1 %v14055_v60  ;;  %v14119_v60 = vld [vmem:[%s15815_s6 + $0x13b0] ss:$8 sps:$4 sm:$0xff]  }
 0x2d5   : > { %9848 = vmatmul.mubr.bf16.vlgmr.msra.gmra.mrb[32].mxu0 %v11438_v0  ;;  %v14122_v0 = vld [vmem:[%s15815_s6 + $0x12c0] ss:$8 sps:$4 sm:$0xff]  }
 0x2d6   : > { %9889 = vmatmul.mubr.bf16.vlgmr.msra.gmra.mrb[32].mxu1 %v11440_v2  ;;  %9898 = vmatpush1.bf16.msra.mxu0 %v14050_v61  ;;  %v14124_v61 = vld [vmem:[%s15815_s6 + $0x12c4] ss:$8 sps:$4 sm:$0xff]   ;;  %v14125_v2 = vld [vmem:[%s15815_s6 + $0x13c0] ss:$8 sps:$4 sm:$0xff]  }
 0x2d7   : > { %9939 = vmatpush1.bf16.msra.mxu1 %v14053_v62  ;;  %9899 = vmatprep.subr.bf16.mxu0 %v14058_v49  ;;  %v14127_v62 = vld [vmem:[%s15815_s6 + $0x13c4] ss:$8 sps:$4 sm:$0xff]   ;;  %v14130_v49 = vld [vmem:[%s15815_s6 + $0x12d4] ss:$8 sps:$4 sm:$0xff]  }
 0x2d8   : > { %9940 = vmatprep.subr.bf16.mxu1 %v14061_v6  ;;  %9929 = vmatprep.mubr.bf16.mxu0 %v11443_v27  ;;  %v14133_v6 = vld [vmem:[%s15815_s6 + $0x13d4] ss:$8 sps:$4 sm:$0xff]   ;;  %v14128_v27 = vld [vmem:[%s15815_s6 + $0x12d0] ss:$8 sps:$4 sm:$0xff]  }
 0x2d9   : > { %9970 = vmatprep.mubr.bf16.mxu1 %v11445_v48  ;;  %v14131_v48 = vld [vmem:[%s15815_s6 + $0x13d0] ss:$8 sps:$4 sm:$0xff]  }
 0x2da   : > { %9900 = vmatpush1.bf16.msra.mxu0 %v14056_v7  ;;  %v14136_v7 = vld [vmem:[%s15815_s6 + $0x12e4] ss:$8 sps:$4 sm:$0xff]  }
 0x2db   : > { %9941 = vmatpush1.bf16.msra.mxu1 %v14059_v8  ;;  %9901 = vmatprep.subr.bf16.mxu0 %v14064_v11  ;;  %v14139_v8 = vld [vmem:[%s15815_s6 + $0x13e4] ss:$8 sps:$4 sm:$0xff]   ;;  %v14134_v11 = vld [vmem:[%s15815_s6 + $0x12e0] ss:$8 sps:$4 sm:$0xff]  }
 0x2dc   : > { %9942 = vmatprep.subr.bf16.mxu1 %v14067_v12  ;;  %v14137_v12 = vld [vmem:[%s15815_s6 + $0x13e0] ss:$8 sps:$4 sm:$0xff]  }
 0x2de   : > { %9902 = vmatpush1.bf16.msra.mxu0 %v14062_v53  ;;  %v14142_v53 = vld [vmem:[%s15815_s6 + $0x12f4] ss:$8 sps:$4 sm:$0xff]  }
 0x2df   : > { %9943 = vmatpush1.bf16.msra.mxu1 %v14065_v54  ;;  %9903 = vmatprep.subr.bf16.mxu0 %v14070_v13  ;;  %v14145_v54 = vld [vmem:[%s15815_s6 + $0x13f4] ss:$8 sps:$4 sm:$0xff]   ;;  %v14140_v13 = vld [vmem:[%s15815_s6 + $0x12f0] ss:$8 sps:$4 sm:$0xff]  }
 0x2e0   : > { %9944 = vmatprep.subr.bf16.mxu1 %v14073_v14  ;;  %v14143_v14 = vld [vmem:[%s15815_s6 + $0x13f0] ss:$8 sps:$4 sm:$0xff]  }
 0x2e2   : > { %9904 = vmatpush1.bf16.msra.mxu0 %v14068_v15  ;;  %v14152_v15 = vld [vmem:[%s15815_s6 + $0x1404] ss:$8 sps:$4 sm:$0xff]  }
 0x2e3   : > { %9945 = vmatpush1.bf16.msra.mxu1 %v14071_v16  ;;  %9905 = vmatprep.subr.bf16.mxu0 %v14076_v17  ;;  %v14155_v16 = vld [vmem:[%s15815_s6 + $0x1504] ss:$8 sps:$4 sm:$0xff]   ;;  %v14150_v17 = vld [vmem:[%s15815_s6 + $0x1400] ss:$8 sps:$4 sm:$0xff]  }
 0x2e4   : > { %9946 = vmatprep.subr.bf16.mxu1 %v14079_v18  ;;  %v14153_v18 = vld [vmem:[%s15815_s6 + $0x1500] ss:$8 sps:$4 sm:$0xff]  }
 0x2e6   : > { %9906 = vmatpush1.bf16.msra.mxu0 %v14074_v20  ;;  %v11442_v20 = vcombine.low %v16567_v45, %v16567_v45 }
 0x2e7   : > { %9947 = vmatpush1.bf16.msra.mxu1 %v14077_v21  ;;  %9907 = vmatprep.subr.bf16.mxu0 %v14082_v63  ;;  %v11444_v21 = vcombine.low %v16570_v3, %v16570_v3  ;;  %v16651_v63 = vld [vmem:[%s15839_s18 + $0xa0] sm:$0xff] }
 0x2e8   : > { %9948 = vmatprep.subr.bf16.mxu1 %v14085_v22  ;;  %v9603_v4 = vpop.f32.mrb[20].mxu0  ;;  %v16654_v22 = vld [vmem:[%s15839_s18 + $0xa8] sm:$0xff]  ;;  %v11447_v45 = vcombine.high %v16651_v63, %v16651_v63 }
 0x2e9   : > { %v9644_v34 = vpop.f32.mrb[20].mxu1  ;;  %v9604_v26 = vadd.f32 %v9603_v4, %v16518_v19  ;;  %v9605_v35 = vpop.f32.mrb[21].mxu0  ;;  %v14094_v19 = vld [vmem:[%s15815_s6 + $0x1274] ss:$8 sps:$4 sm:$0xff]   ;;  %v11449_v3 = vcombine.high %v16654_v22, %v16654_v22  ;;  %v14164_v4 = vld [vmem:[%s15815_s6 + $0x1424] ss:$8 sps:$4 sm:$0xff]  }
 0x2ea   : > { %v9646_v37 = vpop.f32.mrb[21].mxu1  ;;  %v9606_v38 = vadd.f32 %v9605_v35, %v16522_v23  ;;  %v9607_v39 = vpop.f32.mrb[22].mxu0  ;;  %9908 = vmatpush1.bf16.msra.mxu0 %v14080_v5  ;;  %v14092_v23 = vld [vmem:[%s15815_s6 + $0x1270] ss:$8 sps:$4 sm:$0xff]   ;;  %v14158_v5 = vld [vmem:[%s15815_s6 + $0x1414] ss:$8 sps:$4 sm:$0xff]  }
 0x2eb   : > { %v9648_v40 = vpop.f32.mrb[22].mxu1  ;;  %9949 = vmatpush1.bf16.msra.mxu1 %v14083_v24  ;;  %v16602_v31 = vadd.f32 %v9644_v34, %v9604_v26  ;;  %v9608_v32 = vpop.f32.mrb[23].mxu0  ;;  %9909 = vmatprep.subr.bf16.mxu0 %v14088_v28  ;;  %v14161_v24 = vld [vmem:[%s15815_s6 + $0x1514] ss:$8 sps:$4 sm:$0xff]   ;;  %v14156_v28 = vld [vmem:[%s15815_s6 + $0x1410] ss:$8 sps:$4 sm:$0xff]  }
 0x2ec   : > { %v9649_v41 = vpop.f32.mrb[23].mxu1  ;;  %9950 = vmatprep.subr.bf16.mxu1 %v14091_v29  ;;  %v16606_v43 = vadd.f32 %v9646_v37, %v9606_v38  ;;  %v14159_v29 = vld [vmem:[%s15815_s6 + $0x1510] ss:$8 sps:$4 sm:$0xff]   ;;  %v14167_v34 = vld [vmem:[%s15815_s6 + $0x1524] ss:$8 sps:$4 sm:$0xff]  }
 0x2ed   : > { %v14170_v26 = vld [vmem:[%s15815_s6 + $0x1434] ss:$8 sps:$4 sm:$0xff]   ;;  %v14168_v37 = vld [vmem:[%s15815_s6 + $0x1430] ss:$8 sps:$4 sm:$0xff]   ;;  %v14176_v39 = vld [vmem:[%s15815_s6 + $0x1444] ss:$8 sps:$4 sm:$0xff]  }
 0x2ee   : > { %9910 = vmatpush1.bf16.msra.mxu0 %v14086_v9  ;;  %v14162_v9 = vld [vmem:[%s15815_s6 + $0x1420] ss:$8 sps:$4 sm:$0xff]   ;;  %v14173_v35 = vld [vmem:[%s15815_s6 + $0x1534] ss:$8 sps:$4 sm:$0xff]   ;;  %v14171_v38 = vld [vmem:[%s15815_s6 + $0x1530] ss:$8 sps:$4 sm:$0xff]  }
 0x2ef   : > { %9951 = vmatpush1.bf16.msra.mxu1 %v14089_v10  ;;  %9911 = vmatprep.subr.bf16.mxu0 %v14094_v19  ;;  %v14165_v10 = vld [vmem:[%s15815_s6 + $0x1520] ss:$8 sps:$4 sm:$0xff]   ;;  %v14179_v40 = vld [vmem:[%s15815_s6 + $0x1544] ss:$8 sps:$4 sm:$0xff]   ;;  %v14182_v19 = vld [vmem:[%s15815_s6 + $0x1454] ss:$8 sps:$4 sm:$0xff]  }
 0x2f0   : > { %9952 = vmatprep.subr.bf16.mxu1 %v14097_v42  ;;  %v14174_v32 = vld [vmem:[%s15815_s6 + $0x1440] ss:$8 sps:$4 sm:$0xff]   ;;  %v14185_v42 = vld [vmem:[%s15815_s6 + $0x1554] ss:$8 sps:$4 sm:$0xff]  }
 0x2f1   : > { %v14177_v41 = vld [vmem:[%s15815_s6 + $0x1540] ss:$8 sps:$4 sm:$0xff]  }
 0x2f2   : > { %9912 = vmatpush1.bf16.msra.mxu0 %v14092_v23  ;;  %v14180_v23 = vld [vmem:[%s15815_s6 + $0x1450] ss:$8 sps:$4 sm:$0xff]  }
 0x2f3   : > { %9953 = vmatpush1.bf16.msra.mxu1 %v14095_v44  ;;  %9913 = vmatprep.subr.bf16.mxu0 %v14100_v46  ;;  %v14183_v44 = vld [vmem:[%s15815_s6 + $0x1550] ss:$8 sps:$4 sm:$0xff]   ;;  %v14188_v46 = vld [vmem:[%s15815_s6 + $0x1464] ss:$8 sps:$4 sm:$0xff]  }
 0x2f4   : > { %9954 = vmatprep.subr.bf16.mxu1 %v14103_v47  ;;  %v14191_v47 = vld [vmem:[%s15815_s6 + $0x1564] ss:$8 sps:$4 sm:$0xff]  }
 0x2f6   : > { %9914 = vmatpush1.bf16.msra.mxu0 %v14098_v33 }
 0x2f7   : > { %9955 = vmatpush1.bf16.msra.mxu1 %v14101_v50  ;;  %9915 = vmatprep.subr.bf16.mxu0 %v14106_v1  ;;  %v14186_v1 = vld [vmem:[%s15815_s6 + $0x1460] ss:$8 sps:$4 sm:$0xff]  }
 0x2f8   : > { %9956 = vmatprep.subr.bf16.mxu1 %v14109_v30  ;;  %v14189_v30 = vld [vmem:[%s15815_s6 + $0x1560] ss:$8 sps:$4 sm:$0xff]  }
 0x2fa   : > { %9916 = vmatpush1.bf16.msra.mxu0 %v14104_v51 }
 0x2fb   : > { %9957 = vmatpush1.bf16.msra.mxu1 %v14107_v52  ;;  %9917 = vmatprep.subr.bf16.mxu0 %v14112_v55 }
 0x2fc   : > { %9958 = vmatprep.subr.bf16.mxu1 %v14115_v56 }
 0x2fe   : > { %9918 = vmatpush1.bf16.msra.mxu0 %v14110_v25 }
 0x2ff   : > { %9959 = vmatpush1.bf16.msra.mxu1 %v14113_v36  ;;  %9919 = vmatprep.subr.bf16.mxu0 %v14118_v57 }
 0x300   : > { %9960 = vmatprep.subr.bf16.mxu1 %v14121_v58 }
 0x302   : > { %9920 = vmatpush1.bf16.msra.mxu0 %v14116_v59 }
 0x303   : > { %9961 = vmatpush1.bf16.msra.mxu1 %v14119_v60  ;;  %9921 = vmatprep.subr.bf16.mxu0 %v14124_v61  ;;  %v14197_v60 = vld [vmem:[%s15815_s6 + $0x1574] ss:$8 sps:$4 sm:$0xff]  }
 0x304   : > { %9962 = vmatprep.subr.bf16.mxu1 %v14127_v62  ;;  %v14195_v62 = vld [vmem:[%s15815_s6 + $0x1570] ss:$8 sps:$4 sm:$0xff]  }
 0x306   : > { %9922 = vmatpush1.bf16.msra.mxu0 %v14122_v0  ;;  %v14200_v0 = vld [vmem:[%s15815_s6 + $0x1484] ss:$8 sps:$4 sm:$0xff]  }
 0x307   : > { %9963 = vmatpush1.bf16.msra.mxu1 %v14125_v2  ;;  %9923 = vmatprep.subr.bf16.mxu0 %v14130_v49  ;;  %v14203_v2 = vld [vmem:[%s15815_s6 + $0x1584] ss:$8 sps:$4 sm:$0xff]   ;;  %v14198_v49 = vld [vmem:[%s15815_s6 + $0x1480] ss:$8 sps:$4 sm:$0xff]  }
 0x308   : > { %9964 = vmatprep.subr.bf16.mxu1 %v14133_v6  ;;  %v14201_v6 = vld [vmem:[%s15815_s6 + $0x1580] ss:$8 sps:$4 sm:$0xff]  }
 0x30a   : > { %9924 = vmatpush1.bf16.msra.mxu0 %v14128_v27  ;;  %v14206_v27 = vld [vmem:[%s15815_s6 + $0x1494] ss:$8 sps:$4 sm:$0xff]  }
 0x30b   : > { %9965 = vmatpush1.bf16.msra.mxu1 %v14131_v48  ;;  %9925 = vmatprep.subr.bf16.mxu0 %v14136_v7  ;;  %v14209_v48 = vld [vmem:[%s15815_s6 + $0x1594] ss:$8 sps:$4 sm:$0xff]   ;;  %v14204_v7 = vld [vmem:[%s15815_s6 + $0x1490] ss:$8 sps:$4 sm:$0xff]  }
 0x30c   : > { %9966 = vmatprep.subr.bf16.mxu1 %v14139_v8  ;;  %v14207_v8 = vld [vmem:[%s15815_s6 + $0x1590] ss:$8 sps:$4 sm:$0xff]  }
 0x30e   : > { %9926 = vmatpush1.bf16.msra.mxu0 %v14134_v11  ;;  %v14212_v11 = vld [vmem:[%s15815_s6 + $0x14a4] ss:$8 sps:$4 sm:$0xff]  }
 0x30f   : > { %9967 = vmatpush1.bf16.msra.mxu1 %v14137_v12  ;;  %9927 = vmatprep.subr.bf16.mxu0 %v14142_v53  ;;  %v14215_v12 = vld [vmem:[%s15815_s6 + $0x15a4] ss:$8 sps:$4 sm:$0xff]   ;;  %v14210_v53 = vld [vmem:[%s15815_s6 + $0x14a0] ss:$8 sps:$4 sm:$0xff]  }
 0x310   : > { %9968 = vmatprep.subr.bf16.mxu1 %v14145_v54  ;;  %v14213_v54 = vld [vmem:[%s15815_s6 + $0x15a0] ss:$8 sps:$4 sm:$0xff]  }
 0x312   : > { %9928 = vmatpush1.bf16.msra.mxu0 %v14140_v13  ;;  %v14218_v13 = vld [vmem:[%s15815_s6 + $0x14b4] ss:$8 sps:$4 sm:$0xff]  }
 0x313   : > { %9969 = vmatpush1.bf16.msra.mxu1 %v14143_v14  ;;  %9979 = vmatprep.subr.bf16.mxu0 %v14152_v15  ;;  %v14221_v14 = vld [vmem:[%s15815_s6 + $0x15b4] ss:$8 sps:$4 sm:$0xff]   ;;  %v14216_v15 = vld [vmem:[%s15815_s6 + $0x14b0] ss:$8 sps:$4 sm:$0xff]  }
 0x314   : > { %10020 = vmatprep.subr.bf16.mxu1 %v14155_v16  ;;  %v14219_v16 = vld [vmem:[%s15815_s6 + $0x15b0] ss:$8 sps:$4 sm:$0xff]  }
 0x315   : > { %9930 = vmatmul.mubr.bf16.vlgmr.msra.gmra.mrb[36].mxu0 %v11442_v20  ;;  %v14222_v20 = vld [vmem:[%s15815_s6 + $0x14c0] ss:$8 sps:$4 sm:$0xff]  }
 0x316   : > { %9971 = vmatmul.mubr.bf16.vlgmr.msra.gmra.mrb[36].mxu1 %v11444_v21  ;;  %9980 = vmatpush1.bf16.msra.mxu0 %v14150_v17  ;;  %v14224_v17 = vld [vmem:[%s15815_s6 + $0x14c4] ss:$8 sps:$4 sm:$0xff]   ;;  %v14225_v21 = vld [vmem:[%s15815_s6 + $0x15c0] ss:$8 sps:$4 sm:$0xff]  }
 0x317   : > { %10021 = vmatpush1.bf16.msra.mxu1 %v14153_v18  ;;  %9981 = vmatprep.subr.bf16.mxu0 %v14158_v5  ;;  %v14227_v18 = vld [vmem:[%s15815_s6 + $0x15c4] ss:$8 sps:$4 sm:$0xff]   ;;  %v14230_v5 = vld [vmem:[%s15815_s6 + $0x14d4] ss:$8 sps:$4 sm:$0xff]  }
 0x318   : > { %10022 = vmatprep.subr.bf16.mxu1 %v14161_v24  ;;  %10011 = vmatprep.mubr.bf16.mxu0 %v11447_v45  ;;  %v14233_v24 = vld [vmem:[%s15815_s6 + $0x15d4] ss:$8 sps:$4 sm:$0xff]   ;;  %v14228_v45 = vld [vmem:[%s15815_s6 + $0x14d0] ss:$8 sps:$4 sm:$0xff]  }
 0x319   : > { %10052 = vmatprep.mubr.bf16.mxu1 %v11449_v3  ;;  %v14231_v3 = vld [vmem:[%s15815_s6 + $0x15d0] ss:$8 sps:$4 sm:$0xff]  }
 0x31a   : > { %9982 = vmatpush1.bf16.msra.mxu0 %v14156_v28  ;;  %v14236_v28 = vld [vmem:[%s15815_s6 + $0x14e4] ss:$8 sps:$4 sm:$0xff]  }
 0x31b   : > { %10023 = vmatpush1.bf16.msra.mxu1 %v14159_v29  ;;  %9983 = vmatprep.subr.bf16.mxu0 %v14164_v4  ;;  %v14239_v29 = vld [vmem:[%s15815_s6 + $0x15e4] ss:$8 sps:$4 sm:$0xff]   ;;  %v14234_v4 = vld [vmem:[%s15815_s6 + $0x14e0] ss:$8 sps:$4 sm:$0xff]  }
 0x31c   : > { %10024 = vmatprep.subr.bf16.mxu1 %v14167_v34  ;;  %v14237_v34 = vld [vmem:[%s15815_s6 + $0x15e0] ss:$8 sps:$4 sm:$0xff]  }
 0x31e   : > { %9984 = vmatpush1.bf16.msra.mxu0 %v14162_v9  ;;  %v14242_v9 = vld [vmem:[%s15815_s6 + $0x14f4] ss:$8 sps:$4 sm:$0xff]  }
 0x31f   : > { %10025 = vmatpush1.bf16.msra.mxu1 %v14165_v10  ;;  %9985 = vmatprep.subr.bf16.mxu0 %v14170_v26  ;;  %v14245_v10 = vld [vmem:[%s15815_s6 + $0x15f4] ss:$8 sps:$4 sm:$0xff]   ;;  %v14240_v26 = vld [vmem:[%s15815_s6 + $0x14f0] ss:$8 sps:$4 sm:$0xff]  }
 0x320   : > { %10026 = vmatprep.subr.bf16.mxu1 %v14173_v35  ;;  %v14243_v35 = vld [vmem:[%s15815_s6 + $0x15f0] ss:$8 sps:$4 sm:$0xff]  }
 0x322   : > { %9986 = vmatpush1.bf16.msra.mxu0 %v14168_v37  ;;  %v14252_v37 = vld [vmem:[%s15815_s6 + $0x1604] ss:$8 sps:$4 sm:$0xff]  }
 0x323   : > { %10027 = vmatpush1.bf16.msra.mxu1 %v14171_v38  ;;  %9987 = vmatprep.subr.bf16.mxu0 %v14176_v39  ;;  %v14255_v38 = vld [vmem:[%s15815_s6 + $0x1704] ss:$8 sps:$4 sm:$0xff]   ;;  %v14250_v39 = vld [vmem:[%s15815_s6 + $0x1600] ss:$8 sps:$4 sm:$0xff]  }
 0x324   : > { %10028 = vmatprep.subr.bf16.mxu1 %v14179_v40  ;;  %v14253_v40 = vld [vmem:[%s15815_s6 + $0x1700] ss:$8 sps:$4 sm:$0xff]  }
 0x326   : > { %9988 = vmatpush1.bf16.msra.mxu0 %v14174_v32  ;;  %v11446_v32 = vcombine.low %v16651_v63, %v16651_v63 }
 0x327   : > { %10029 = vmatpush1.bf16.msra.mxu1 %v14177_v41  ;;  %9989 = vmatprep.subr.bf16.mxu0 %v14182_v19  ;;  %v11448_v41 = vcombine.low %v16654_v22, %v16654_v22  ;;  %v16735_v19 = vld [vmem:[%s15839_s18 + $0xb0] sm:$0xff] }
 0x328   : > { %10030 = vmatprep.subr.bf16.mxu1 %v14185_v42  ;;  %v9685_v33 = vpop.f32.mrb[24].mxu0  ;;  %v16738_v42 = vld [vmem:[%s15839_s18 + $0xb8] sm:$0xff]  ;;  %v11451_v63 = vcombine.high %v16735_v19, %v16735_v19 }
 0x329   : > { %v9726_v50 = vpop.f32.mrb[24].mxu1  ;;  %v9686_v51 = vadd.f32 %v9685_v33, %v16602_v31  ;;  %v9687_v52 = vpop.f32.mrb[25].mxu0  ;;  %v14194_v31 = vld [vmem:[%s15815_s6 + $0x1474] ss:$8 sps:$4 sm:$0xff]   ;;  %v11453_v22 = vcombine.high %v16738_v42, %v16738_v42  ;;  %v14264_v33 = vld [vmem:[%s15815_s6 + $0x1624] ss:$8 sps:$4 sm:$0xff]  }
 0x32a   : > { %v9728_v55 = vpop.f32.mrb[25].mxu1  ;;  %v9688_v56 = vadd.f32 %v9687_v52, %v16606_v43  ;;  %v9689_v25 = vpop.f32.mrb[26].mxu0  ;;  %9990 = vmatpush1.bf16.msra.mxu0 %v14180_v23  ;;  %v14192_v43 = vld [vmem:[%s15815_s6 + $0x1470] ss:$8 sps:$4 sm:$0xff]   ;;  %v14258_v23 = vld [vmem:[%s15815_s6 + $0x1614] ss:$8 sps:$4 sm:$0xff]  }
 0x32b   : > { %v9730_v36 = vpop.f32.mrb[26].mxu1  ;;  %10031 = vmatpush1.bf16.msra.mxu1 %v14183_v44  ;;  %v16686_v57 = vadd.f32 %v9726_v50, %v9686_v51  ;;  %v9690_v58 = vpop.f32.mrb[27].mxu0  ;;  %9991 = vmatprep.subr.bf16.mxu0 %v14188_v46  ;;  %v14261_v44 = vld [vmem:[%s15815_s6 + $0x1714] ss:$8 sps:$4 sm:$0xff]   ;;  %v14256_v46 = vld [vmem:[%s15815_s6 + $0x1610] ss:$8 sps:$4 sm:$0xff]  }
 0x32c   : > { %v9731_v59 = vpop.f32.mrb[27].mxu1  ;;  %10032 = vmatprep.subr.bf16.mxu1 %v14191_v47  ;;  %v16690_v61 = vadd.f32 %v9728_v55, %v9688_v56  ;;  %v14259_v47 = vld [vmem:[%s15815_s6 + $0x1710] ss:$8 sps:$4 sm:$0xff]   ;;  %v14267_v50 = vld [vmem:[%s15815_s6 + $0x1724] ss:$8 sps:$4 sm:$0xff]  }
 0x32d   : > { %v14270_v51 = vld [vmem:[%s15815_s6 + $0x1634] ss:$8 sps:$4 sm:$0xff]   ;;  %v14268_v55 = vld [vmem:[%s15815_s6 + $0x1630] ss:$8 sps:$4 sm:$0xff]   ;;  %v14276_v25 = vld [vmem:[%s15815_s6 + $0x1644] ss:$8 sps:$4 sm:$0xff]  }
 0x32e   : > { %9992 = vmatpush1.bf16.msra.mxu0 %v14186_v1  ;;  %v14262_v1 = vld [vmem:[%s15815_s6 + $0x1620] ss:$8 sps:$4 sm:$0xff]   ;;  %v14273_v52 = vld [vmem:[%s15815_s6 + $0x1734] ss:$8 sps:$4 sm:$0xff]   ;;  %v14271_v56 = vld [vmem:[%s15815_s6 + $0x1730] ss:$8 sps:$4 sm:$0xff]  }
 0x32f   : > { %10033 = vmatpush1.bf16.msra.mxu1 %v14189_v30  ;;  %9993 = vmatprep.subr.bf16.mxu0 %v14194_v31  ;;  %v14265_v30 = vld [vmem:[%s15815_s6 + $0x1720] ss:$8 sps:$4 sm:$0xff]   ;;  %v14279_v36 = vld [vmem:[%s15815_s6 + $0x1744] ss:$8 sps:$4 sm:$0xff]   ;;  %v14282_v31 = vld [vmem:[%s15815_s6 + $0x1654] ss:$8 sps:$4 sm:$0xff]  }
 0x330   : > { %10034 = vmatprep.subr.bf16.mxu1 %v14197_v60  ;;  %v14274_v58 = vld [vmem:[%s15815_s6 + $0x1640] ss:$8 sps:$4 sm:$0xff]   ;;  %v14285_v60 = vld [vmem:[%s15815_s6 + $0x1754] ss:$8 sps:$4 sm:$0xff]  }
 0x331   : > { %v14277_v59 = vld [vmem:[%s15815_s6 + $0x1740] ss:$8 sps:$4 sm:$0xff]  }
 0x332   : > { %9994 = vmatpush1.bf16.msra.mxu0 %v14192_v43  ;;  %v14280_v43 = vld [vmem:[%s15815_s6 + $0x1650] ss:$8 sps:$4 sm:$0xff]  }
 0x333   : > { %10035 = vmatpush1.bf16.msra.mxu1 %v14195_v62  ;;  %9995 = vmatprep.subr.bf16.mxu0 %v14200_v0  ;;  %v14283_v62 = vld [vmem:[%s15815_s6 + $0x1750] ss:$8 sps:$4 sm:$0xff]   ;;  %v14288_v0 = vld [vmem:[%s15815_s6 + $0x1664] ss:$8 sps:$4 sm:$0xff]  }
 0x334   : > { %10036 = vmatprep.subr.bf16.mxu1 %v14203_v2  ;;  %v14291_v2 = vld [vmem:[%s15815_s6 + $0x1764] ss:$8 sps:$4 sm:$0xff]  }
 0x336   : > { %9996 = vmatpush1.bf16.msra.mxu0 %v14198_v49 }
 0x337   : > { %10037 = vmatpush1.bf16.msra.mxu1 %v14201_v6  ;;  %9997 = vmatprep.subr.bf16.mxu0 %v14206_v27  ;;  %v14286_v27 = vld [vmem:[%s15815_s6 + $0x1660] ss:$8 sps:$4 sm:$0xff]  }
 0x338   : > { %10038 = vmatprep.subr.bf16.mxu1 %v14209_v48  ;;  %v14289_v48 = vld [vmem:[%s15815_s6 + $0x1760] ss:$8 sps:$4 sm:$0xff]  }
 0x33a   : > { %9998 = vmatpush1.bf16.msra.mxu0 %v14204_v7 }
 0x33b   : > { %10039 = vmatpush1.bf16.msra.mxu1 %v14207_v8  ;;  %9999 = vmatprep.subr.bf16.mxu0 %v14212_v11 }
 0x33c   : > { %10040 = vmatprep.subr.bf16.mxu1 %v14215_v12 }
 0x33e   : > { %10000 = vmatpush1.bf16.msra.mxu0 %v14210_v53 }
 0x33f   : > { %10041 = vmatpush1.bf16.msra.mxu1 %v14213_v54  ;;  %10001 = vmatprep.subr.bf16.mxu0 %v14218_v13 }
 0x340   : > { %10042 = vmatprep.subr.bf16.mxu1 %v14221_v14 }
 0x342   : > { %10002 = vmatpush1.bf16.msra.mxu0 %v14216_v15 }
 0x343   : > { %10043 = vmatpush1.bf16.msra.mxu1 %v14219_v16  ;;  %10003 = vmatprep.subr.bf16.mxu0 %v14224_v17  ;;  %v14297_v16 = vld [vmem:[%s15815_s6 + $0x1774] ss:$8 sps:$4 sm:$0xff]  }
 0x344   : > { %10044 = vmatprep.subr.bf16.mxu1 %v14227_v18  ;;  %v14295_v18 = vld [vmem:[%s15815_s6 + $0x1770] ss:$8 sps:$4 sm:$0xff]  }
 0x346   : > { %10004 = vmatpush1.bf16.msra.mxu0 %v14222_v20  ;;  %v14300_v20 = vld [vmem:[%s15815_s6 + $0x1684] ss:$8 sps:$4 sm:$0xff]  }
 0x347   : > { %10045 = vmatpush1.bf16.msra.mxu1 %v14225_v21  ;;  %10005 = vmatprep.subr.bf16.mxu0 %v14230_v5  ;;  %v14303_v21 = vld [vmem:[%s15815_s6 + $0x1784] ss:$8 sps:$4 sm:$0xff]   ;;  %v14298_v5 = vld [vmem:[%s15815_s6 + $0x1680] ss:$8 sps:$4 sm:$0xff]  }
 0x348   : > { %10046 = vmatprep.subr.bf16.mxu1 %v14233_v24  ;;  %v14301_v24 = vld [vmem:[%s15815_s6 + $0x1780] ss:$8 sps:$4 sm:$0xff]  }
 0x34a   : > { %10006 = vmatpush1.bf16.msra.mxu0 %v14228_v45  ;;  %v14306_v45 = vld [vmem:[%s15815_s6 + $0x1694] ss:$8 sps:$4 sm:$0xff]  }
 0x34b   : > { %10047 = vmatpush1.bf16.msra.mxu1 %v14231_v3  ;;  %10007 = vmatprep.subr.bf16.mxu0 %v14236_v28  ;;  %v14309_v3 = vld [vmem:[%s15815_s6 + $0x1794] ss:$8 sps:$4 sm:$0xff]   ;;  %v14304_v28 = vld [vmem:[%s15815_s6 + $0x1690] ss:$8 sps:$4 sm:$0xff]  }
 0x34c   : > { %10048 = vmatprep.subr.bf16.mxu1 %v14239_v29  ;;  %v14307_v29 = vld [vmem:[%s15815_s6 + $0x1790] ss:$8 sps:$4 sm:$0xff]  }
 0x34e   : > { %10008 = vmatpush1.bf16.msra.mxu0 %v14234_v4  ;;  %v14312_v4 = vld [vmem:[%s15815_s6 + $0x16a4] ss:$8 sps:$4 sm:$0xff]  }
 0x34f   : > { %10049 = vmatpush1.bf16.msra.mxu1 %v14237_v34  ;;  %10009 = vmatprep.subr.bf16.mxu0 %v14242_v9  ;;  %v14315_v34 = vld [vmem:[%s15815_s6 + $0x17a4] ss:$8 sps:$4 sm:$0xff]   ;;  %v14310_v9 = vld [vmem:[%s15815_s6 + $0x16a0] ss:$8 sps:$4 sm:$0xff]  }
 0x350   : > { %10050 = vmatprep.subr.bf16.mxu1 %v14245_v10  ;;  %v14313_v10 = vld [vmem:[%s15815_s6 + $0x17a0] ss:$8 sps:$4 sm:$0xff]  }
 0x352   : > { %10010 = vmatpush1.bf16.msra.mxu0 %v14240_v26  ;;  %v14318_v26 = vld [vmem:[%s15815_s6 + $0x16b4] ss:$8 sps:$4 sm:$0xff]  }
 0x353   : > { %10051 = vmatpush1.bf16.msra.mxu1 %v14243_v35  ;;  %10061 = vmatprep.subr.bf16.mxu0 %v14252_v37  ;;  %v14321_v35 = vld [vmem:[%s15815_s6 + $0x17b4] ss:$8 sps:$4 sm:$0xff]   ;;  %v14316_v37 = vld [vmem:[%s15815_s6 + $0x16b0] ss:$8 sps:$4 sm:$0xff]  }
 0x354   : > { %10102 = vmatprep.subr.bf16.mxu1 %v14255_v38  ;;  %v14319_v38 = vld [vmem:[%s15815_s6 + $0x17b0] ss:$8 sps:$4 sm:$0xff]  }
 0x355   : > { %10012 = vmatmul.mubr.bf16.vlgmr.msra.gmra.mrb[40].mxu0 %v11446_v32  ;;  %v14322_v32 = vld [vmem:[%s15815_s6 + $0x16c0] ss:$8 sps:$4 sm:$0xff]  }
 0x356   : > { %10053 = vmatmul.mubr.bf16.vlgmr.msra.gmra.mrb[40].mxu1 %v11448_v41  ;;  %10062 = vmatpush1.bf16.msra.mxu0 %v14250_v39  ;;  %v14324_v39 = vld [vmem:[%s15815_s6 + $0x16c4] ss:$8 sps:$4 sm:$0xff]   ;;  %v14325_v41 = vld [vmem:[%s15815_s6 + $0x17c0] ss:$8 sps:$4 sm:$0xff]  }
 0x357   : > { %10103 = vmatpush1.bf16.msra.mxu1 %v14253_v40  ;;  %10063 = vmatprep.subr.bf16.mxu0 %v14258_v23  ;;  %v14327_v40 = vld [vmem:[%s15815_s6 + $0x17c4] ss:$8 sps:$4 sm:$0xff]   ;;  %v14330_v23 = vld [vmem:[%s15815_s6 + $0x16d4] ss:$8 sps:$4 sm:$0xff]  }
 0x358   : > { %10104 = vmatprep.subr.bf16.mxu1 %v14261_v44  ;;  %10093 = vmatprep.mubr.bf16.mxu0 %v11451_v63  ;;  %v14333_v44 = vld [vmem:[%s15815_s6 + $0x17d4] ss:$8 sps:$4 sm:$0xff]   ;;  %v14328_v63 = vld [vmem:[%s15815_s6 + $0x16d0] ss:$8 sps:$4 sm:$0xff]  }
 0x359   : > { %10134 = vmatprep.mubr.bf16.mxu1 %v11453_v22  ;;  %v14331_v22 = vld [vmem:[%s15815_s6 + $0x17d0] ss:$8 sps:$4 sm:$0xff]  }
 0x35a   : > { %10064 = vmatpush1.bf16.msra.mxu0 %v14256_v46  ;;  %v14336_v46 = vld [vmem:[%s15815_s6 + $0x16e4] ss:$8 sps:$4 sm:$0xff]  }
 0x35b   : > { %10105 = vmatpush1.bf16.msra.mxu1 %v14259_v47  ;;  %10065 = vmatprep.subr.bf16.mxu0 %v14264_v33  ;;  %v14339_v47 = vld [vmem:[%s15815_s6 + $0x17e4] ss:$8 sps:$4 sm:$0xff]   ;;  %v14334_v33 = vld [vmem:[%s15815_s6 + $0x16e0] ss:$8 sps:$4 sm:$0xff]  }
 0x35c   : > { %10106 = vmatprep.subr.bf16.mxu1 %v14267_v50  ;;  %v14337_v50 = vld [vmem:[%s15815_s6 + $0x17e0] ss:$8 sps:$4 sm:$0xff]  }
 0x35e   : > { %10066 = vmatpush1.bf16.msra.mxu0 %v14262_v1  ;;  %v14342_v1 = vld [vmem:[%s15815_s6 + $0x16f4] ss:$8 sps:$4 sm:$0xff]  }
 0x35f   : > { %10107 = vmatpush1.bf16.msra.mxu1 %v14265_v30  ;;  %10067 = vmatprep.subr.bf16.mxu0 %v14270_v51  ;;  %v14345_v30 = vld [vmem:[%s15815_s6 + $0x17f4] ss:$8 sps:$4 sm:$0xff]   ;;  %v14340_v51 = vld [vmem:[%s15815_s6 + $0x16f0] ss:$8 sps:$4 sm:$0xff]  }
 0x360   : > { %10108 = vmatprep.subr.bf16.mxu1 %v14273_v52  ;;  %v14343_v52 = vld [vmem:[%s15815_s6 + $0x17f0] ss:$8 sps:$4 sm:$0xff]  }
 0x362   : > { %10068 = vmatpush1.bf16.msra.mxu0 %v14268_v55  ;;  %v14352_v55 = vld [vmem:[%s15815_s6 + $0x1804] ss:$8 sps:$4 sm:$0xff]  }
 0x363   : > { %10109 = vmatpush1.bf16.msra.mxu1 %v14271_v56  ;;  %10069 = vmatprep.subr.bf16.mxu0 %v14276_v25  ;;  %v14355_v56 = vld [vmem:[%s15815_s6 + $0x1904] ss:$8 sps:$4 sm:$0xff]   ;;  %v14350_v25 = vld [vmem:[%s15815_s6 + $0x1800] ss:$8 sps:$4 sm:$0xff]  }
 0x364   : > { %10110 = vmatprep.subr.bf16.mxu1 %v14279_v36  ;;  %v14353_v36 = vld [vmem:[%s15815_s6 + $0x1900] ss:$8 sps:$4 sm:$0xff]  }
 0x366   : > { %10070 = vmatpush1.bf16.msra.mxu0 %v14274_v58  ;;  %v11450_v58 = vcombine.low %v16735_v19, %v16735_v19 }
 0x367   : > { %10111 = vmatpush1.bf16.msra.mxu1 %v14277_v59  ;;  %10071 = vmatprep.subr.bf16.mxu0 %v14282_v31  ;;  %v11452_v59 = vcombine.low %v16738_v42, %v16738_v42  ;;  %v16819_v31 = vld [vmem:[%s15839_s18 + $0xc0] sm:$0xff] }
 0x368   : > { %10112 = vmatprep.subr.bf16.mxu1 %v14285_v60  ;;  %v9767_v49 = vpop.f32.mrb[28].mxu0  ;;  %v16822_v60 = vld [vmem:[%s15839_s18 + $0xc8] sm:$0xff]  ;;  %v11455_v19 = vcombine.high %v16819_v31, %v16819_v31 }
 0x369   : > { %v9808_v6 = vpop.f32.mrb[28].mxu1  ;;  %v9768_v7 = vadd.f32 %v9767_v49, %v16686_v57  ;;  %v9769_v8 = vpop.f32.mrb[29].mxu0  ;;  %v14294_v57 = vld [vmem:[%s15815_s6 + $0x1674] ss:$8 sps:$4 sm:$0xff]   ;;  %v11457_v42 = vcombine.high %v16822_v60, %v16822_v60  ;;  %v14364_v49 = vld [vmem:[%s15815_s6 + $0x1824] ss:$8 sps:$4 sm:$0xff]  }
 0x36a   : > { %v9810_v11 = vpop.f32.mrb[29].mxu1  ;;  %v9770_v12 = vadd.f32 %v9769_v8, %v16690_v61  ;;  %v9771_v53 = vpop.f32.mrb[30].mxu0  ;;  %10072 = vmatpush1.bf16.msra.mxu0 %v14280_v43  ;;  %v14292_v61 = vld [vmem:[%s15815_s6 + $0x1670] ss:$8 sps:$4 sm:$0xff]   ;;  %v14358_v43 = vld [vmem:[%s15815_s6 + $0x1814] ss:$8 sps:$4 sm:$0xff]  }
 0x36b   : > { %v9812_v54 = vpop.f32.mrb[30].mxu1  ;;  %10113 = vmatpush1.bf16.msra.mxu1 %v14283_v62  ;;  %v16770_v13 = vadd.f32 %v9808_v6, %v9768_v7  ;;  %v9772_v14 = vpop.f32.mrb[31].mxu0  ;;  %10073 = vmatprep.subr.bf16.mxu0 %v14288_v0  ;;  %v14361_v62 = vld [vmem:[%s15815_s6 + $0x1914] ss:$8 sps:$4 sm:$0xff]   ;;  %v14356_v0 = vld [vmem:[%s15815_s6 + $0x1810] ss:$8 sps:$4 sm:$0xff]  }
 0x36c   : > { %v9813_v15 = vpop.f32.mrb[31].mxu1  ;;  %10114 = vmatprep.subr.bf16.mxu1 %v14291_v2  ;;  %v16774_v17 = vadd.f32 %v9810_v11, %v9770_v12  ;;  %v14359_v2 = vld [vmem:[%s15815_s6 + $0x1910] ss:$8 sps:$4 sm:$0xff]   ;;  %v14367_v6 = vld [vmem:[%s15815_s6 + $0x1924] ss:$8 sps:$4 sm:$0xff]  }
 0x36d   : > { %v14370_v7 = vld [vmem:[%s15815_s6 + $0x1834] ss:$8 sps:$4 sm:$0xff]   ;;  %v14368_v11 = vld [vmem:[%s15815_s6 + $0x1830] ss:$8 sps:$4 sm:$0xff]   ;;  %v14376_v53 = vld [vmem:[%s15815_s6 + $0x1844] ss:$8 sps:$4 sm:$0xff]  }
 0x36e   : > { %10074 = vmatpush1.bf16.msra.mxu0 %v14286_v27  ;;  %v14362_v27 = vld [vmem:[%s15815_s6 + $0x1820] ss:$8 sps:$4 sm:$0xff]   ;;  %v14373_v8 = vld [vmem:[%s15815_s6 + $0x1934] ss:$8 sps:$4 sm:$0xff]   ;;  %v14371_v12 = vld [vmem:[%s15815_s6 + $0x1930] ss:$8 sps:$4 sm:$0xff]  }
 0x36f   : > { %10115 = vmatpush1.bf16.msra.mxu1 %v14289_v48  ;;  %10075 = vmatprep.subr.bf16.mxu0 %v14294_v57  ;;  %v14365_v48 = vld [vmem:[%s15815_s6 + $0x1920] ss:$8 sps:$4 sm:$0xff]   ;;  %v14379_v54 = vld [vmem:[%s15815_s6 + $0x1944] ss:$8 sps:$4 sm:$0xff]   ;;  %v14382_v57 = vld [vmem:[%s15815_s6 + $0x1854] ss:$8 sps:$4 sm:$0xff]  }
 0x370   : > { %10116 = vmatprep.subr.bf16.mxu1 %v14297_v16  ;;  %v14374_v14 = vld [vmem:[%s15815_s6 + $0x1840] ss:$8 sps:$4 sm:$0xff]   ;;  %v14385_v16 = vld [vmem:[%s15815_s6 + $0x1954] ss:$8 sps:$4 sm:$0xff]  }
 0x371   : > { %v14377_v15 = vld [vmem:[%s15815_s6 + $0x1940] ss:$8 sps:$4 sm:$0xff]  }
 0x372   : > { %10076 = vmatpush1.bf16.msra.mxu0 %v14292_v61  ;;  %v14380_v61 = vld [vmem:[%s15815_s6 + $0x1850] ss:$8 sps:$4 sm:$0xff]  }
 0x373   : > { %10117 = vmatpush1.bf16.msra.mxu1 %v14295_v18  ;;  %10077 = vmatprep.subr.bf16.mxu0 %v14300_v20  ;;  %v14383_v18 = vld [vmem:[%s15815_s6 + $0x1950] ss:$8 sps:$4 sm:$0xff]   ;;  %v14388_v20 = vld [vmem:[%s15815_s6 + $0x1864] ss:$8 sps:$4 sm:$0xff]  }
 0x374   : > { %10118 = vmatprep.subr.bf16.mxu1 %v14303_v21  ;;  %v14391_v21 = vld [vmem:[%s15815_s6 + $0x1964] ss:$8 sps:$4 sm:$0xff]  }
 0x376   : > { %10078 = vmatpush1.bf16.msra.mxu0 %v14298_v5 }
 0x377   : > { %10119 = vmatpush1.bf16.msra.mxu1 %v14301_v24  ;;  %10079 = vmatprep.subr.bf16.mxu0 %v14306_v45 }
 0x378   : > { %10120 = vmatprep.subr.bf16.mxu1 %v14309_v3 }
 0x37a   : > { %10080 = vmatpush1.bf16.msra.mxu0 %v14304_v28 }
 0x37b   : > { %10121 = vmatpush1.bf16.msra.mxu1 %v14307_v29  ;;  %10081 = vmatprep.subr.bf16.mxu0 %v14312_v4 }
 0x37c   : > { %10122 = vmatprep.subr.bf16.mxu1 %v14315_v34 }
 0x37e   : > { %10082 = vmatpush1.bf16.msra.mxu0 %v14310_v9  ;;  %v14386_v9 = vld [vmem:[%s15815_s6 + $0x1860] ss:$8 sps:$4 sm:$0xff]  }
 0x37f   : > { %10123 = vmatpush1.bf16.msra.mxu1 %v14313_v10  ;;  %10083 = vmatprep.subr.bf16.mxu0 %v14318_v26  ;;  %v14389_v10 = vld [vmem:[%s15815_s6 + $0x1960] ss:$8 sps:$4 sm:$0xff]  }
 0x380   : > { %10124 = vmatprep.subr.bf16.mxu1 %v14321_v35 }
 0x382   : > { %10084 = vmatpush1.bf16.msra.mxu0 %v14316_v37 }
 0x383   : > { %10125 = vmatpush1.bf16.msra.mxu1 %v14319_v38  ;;  %10085 = vmatprep.subr.bf16.mxu0 %v14324_v39  ;;  %v14392_v39 = vld [vmem:[%s15815_s6 + $0x1870] ss:$8 sps:$4 sm:$0xff]  }
 0x384   : > { %10126 = vmatprep.subr.bf16.mxu1 %v14327_v40  ;;  %v14395_v40 = vld [vmem:[%s15815_s6 + $0x1970] ss:$8 sps:$4 sm:$0xff]  }
 0x386   : > { %10086 = vmatpush1.bf16.msra.mxu0 %v14322_v32  ;;  %v14400_v32 = vld [vmem:[%s15815_s6 + $0x1884] ss:$8 sps:$4 sm:$0xff]  }
 0x387   : > { %10127 = vmatpush1.bf16.msra.mxu1 %v14325_v41  ;;  %10087 = vmatprep.subr.bf16.mxu0 %v14330_v23  ;;  %v14403_v41 = vld [vmem:[%s15815_s6 + $0x1984] ss:$8 sps:$4 sm:$0xff]   ;;  %v14398_v23 = vld [vmem:[%s15815_s6 + $0x1880] ss:$8 sps:$4 sm:$0xff]  }
 0x388   : > { %10128 = vmatprep.subr.bf16.mxu1 %v14333_v44  ;;  %v14401_v44 = vld [vmem:[%s15815_s6 + $0x1980] ss:$8 sps:$4 sm:$0xff]  }
 0x38a   : > { %10088 = vmatpush1.bf16.msra.mxu0 %v14328_v63  ;;  %v14406_v63 = vld [vmem:[%s15815_s6 + $0x1894] ss:$8 sps:$4 sm:$0xff]  }
 0x38b   : > { %10129 = vmatpush1.bf16.msra.mxu1 %v14331_v22  ;;  %10089 = vmatprep.subr.bf16.mxu0 %v14336_v46  ;;  %v14409_v22 = vld [vmem:[%s15815_s6 + $0x1994] ss:$8 sps:$4 sm:$0xff]   ;;  %v14404_v46 = vld [vmem:[%s15815_s6 + $0x1890] ss:$8 sps:$4 sm:$0xff]  }
 0x38c   : > { %10130 = vmatprep.subr.bf16.mxu1 %v14339_v47  ;;  %v14407_v47 = vld [vmem:[%s15815_s6 + $0x1990] ss:$8 sps:$4 sm:$0xff]  }
 0x38e   : > { %10090 = vmatpush1.bf16.msra.mxu0 %v14334_v33  ;;  %v14412_v33 = vld [vmem:[%s15815_s6 + $0x18a4] ss:$8 sps:$4 sm:$0xff]  }
 0x38f   : > { %10131 = vmatpush1.bf16.msra.mxu1 %v14337_v50  ;;  %10091 = vmatprep.subr.bf16.mxu0 %v14342_v1  ;;  %v14415_v50 = vld [vmem:[%s15815_s6 + $0x19a4] ss:$8 sps:$4 sm:$0xff]   ;;  %v14410_v1 = vld [vmem:[%s15815_s6 + $0x18a0] ss:$8 sps:$4 sm:$0xff]  }
 0x390   : > { %10132 = vmatprep.subr.bf16.mxu1 %v14345_v30  ;;  %v14413_v30 = vld [vmem:[%s15815_s6 + $0x19a0] ss:$8 sps:$4 sm:$0xff]  }
 0x392   : > { %10092 = vmatpush1.bf16.msra.mxu0 %v14340_v51  ;;  %v14418_v51 = vld [vmem:[%s15815_s6 + $0x18b4] ss:$8 sps:$4 sm:$0xff]  }
 0x393   : > { %10133 = vmatpush1.bf16.msra.mxu1 %v14343_v52  ;;  %10143 = vmatprep.subr.bf16.mxu0 %v14352_v55  ;;  %v14421_v52 = vld [vmem:[%s15815_s6 + $0x19b4] ss:$8 sps:$4 sm:$0xff]   ;;  %v14416_v55 = vld [vmem:[%s15815_s6 + $0x18b0] ss:$8 sps:$4 sm:$0xff]  }
 0x394   : > { %10184 = vmatprep.subr.bf16.mxu1 %v14355_v56  ;;  %v14419_v56 = vld [vmem:[%s15815_s6 + $0x19b0] ss:$8 sps:$4 sm:$0xff]  }
 0x395   : > { %10094 = vmatmul.mubr.bf16.vlgmr.msra.gmra.mrb[44].mxu0 %v11450_v58  ;;  %v14422_v58 = vld [vmem:[%s15815_s6 + $0x18c0] ss:$8 sps:$4 sm:$0xff]  }
 0x396   : > { %10135 = vmatmul.mubr.bf16.vlgmr.msra.gmra.mrb[44].mxu1 %v11452_v59  ;;  %10144 = vmatpush1.bf16.msra.mxu0 %v14350_v25  ;;  %v14424_v25 = vld [vmem:[%s15815_s6 + $0x18c4] ss:$8 sps:$4 sm:$0xff]   ;;  %v14425_v59 = vld [vmem:[%s15815_s6 + $0x19c0] ss:$8 sps:$4 sm:$0xff]  }
 0x397   : > { %10185 = vmatpush1.bf16.msra.mxu1 %v14353_v36  ;;  %10145 = vmatprep.subr.bf16.mxu0 %v14358_v43  ;;  %v14427_v36 = vld [vmem:[%s15815_s6 + $0x19c4] ss:$8 sps:$4 sm:$0xff]   ;;  %v14430_v43 = vld [vmem:[%s15815_s6 + $0x18d4] ss:$8 sps:$4 sm:$0xff]  }
 0x398   : > { %10186 = vmatprep.subr.bf16.mxu1 %v14361_v62  ;;  %10175 = vmatprep.mubr.bf16.mxu0 %v11455_v19  ;;  %v14433_v62 = vld [vmem:[%s15815_s6 + $0x19d4] ss:$8 sps:$4 sm:$0xff]   ;;  %v14428_v19 = vld [vmem:[%s15815_s6 + $0x18d0] ss:$8 sps:$4 sm:$0xff]  }
 0x399   : > { %10216 = vmatprep.mubr.bf16.mxu1 %v11457_v42  ;;  %v14431_v42 = vld [vmem:[%s15815_s6 + $0x19d0] ss:$8 sps:$4 sm:$0xff]  }
 0x39a   : > { %10146 = vmatpush1.bf16.msra.mxu0 %v14356_v0  ;;  %v14436_v0 = vld [vmem:[%s15815_s6 + $0x18e4] ss:$8 sps:$4 sm:$0xff]  }
 0x39b   : > { %10187 = vmatpush1.bf16.msra.mxu1 %v14359_v2  ;;  %10147 = vmatprep.subr.bf16.mxu0 %v14364_v49  ;;  %v14439_v2 = vld [vmem:[%s15815_s6 + $0x19e4] ss:$8 sps:$4 sm:$0xff]   ;;  %v14434_v49 = vld [vmem:[%s15815_s6 + $0x18e0] ss:$8 sps:$4 sm:$0xff]  }
 0x39c   : > { %10188 = vmatprep.subr.bf16.mxu1 %v14367_v6  ;;  %v14437_v6 = vld [vmem:[%s15815_s6 + $0x19e0] ss:$8 sps:$4 sm:$0xff]  }
 0x39e   : > { %10148 = vmatpush1.bf16.msra.mxu0 %v14362_v27  ;;  %v14442_v27 = vld [vmem:[%s15815_s6 + $0x18f4] ss:$8 sps:$4 sm:$0xff]  }
 0x39f   : > { %10189 = vmatpush1.bf16.msra.mxu1 %v14365_v48  ;;  %10149 = vmatprep.subr.bf16.mxu0 %v14370_v7  ;;  %v14445_v48 = vld [vmem:[%s15815_s6 + $0x19f4] ss:$8 sps:$4 sm:$0xff]   ;;  %v14440_v7 = vld [vmem:[%s15815_s6 + $0x18f0] ss:$8 sps:$4 sm:$0xff]  }
 0x3a0   : > { %10190 = vmatprep.subr.bf16.mxu1 %v14373_v8  ;;  %v14443_v8 = vld [vmem:[%s15815_s6 + $0x19f0] ss:$8 sps:$4 sm:$0xff]  }
 0x3a2   : > { %10150 = vmatpush1.bf16.msra.mxu0 %v14368_v11  ;;  %v14452_v11 = vld [vmem:[%s15815_s6 + $0x1a04] ss:$8 sps:$4 sm:$0xff]  }
 0x3a3   : > { %10191 = vmatpush1.bf16.msra.mxu1 %v14371_v12  ;;  %10151 = vmatprep.subr.bf16.mxu0 %v14376_v53  ;;  %v14455_v12 = vld [vmem:[%s15815_s6 + $0x1b04] ss:$8 sps:$4 sm:$0xff]   ;;  %v11454_v53 = vcombine.low %v16819_v31, %v16819_v31 }
 0x3a4   : > { %10192 = vmatprep.subr.bf16.mxu1 %v14379_v54  ;;  %v11456_v54 = vcombine.low %v16822_v60, %v16822_v60 }
 0x3a6   : > { %10152 = vmatpush1.bf16.msra.mxu0 %v14374_v14  ;;  %v16901_v14 = vld [vmem:[%s15839_s18 + $0xd0] sm:$0xff] }
 0x3a7   : > { %10193 = vmatpush1.bf16.msra.mxu1 %v14377_v15  ;;  %10153 = vmatprep.subr.bf16.mxu0 %v14382_v57  ;;  %v16904_v15 = vld [vmem:[%s15839_s18 + $0xd8] sm:$0xff]  ;;  %v11459_v31 = vcombine.high %v16901_v14, %v16901_v14 }
 0x3a8   : > { %10194 = vmatprep.subr.bf16.mxu1 %v14385_v16  ;;  %v9849_v5 = vpop.f32.mrb[32].mxu0  ;;  %v14450_v57 = vld [vmem:[%s15815_s6 + $0x1a00] ss:$8 sps:$4 sm:$0xff]   ;;  %v11461_v60 = vcombine.high %v16904_v15, %v16904_v15 }
 0x3a9   : > { %v9890_v24 = vpop.f32.mrb[32].mxu1  ;;  %v9850_v45 = vadd.f32 %v9849_v5, %v16770_v13  ;;  %v9851_v3 = vpop.f32.mrb[33].mxu0  ;;  %v14394_v13 = vld [vmem:[%s15815_s6 + $0x1874] ss:$8 sps:$4 sm:$0xff]   ;;  %v14453_v16 = vld [vmem:[%s15815_s6 + $0x1b00] ss:$8 sps:$4 sm:$0xff]  }
 0x3aa   : > { %v9892_v28 = vpop.f32.mrb[33].mxu1  ;;  %v9852_v29 = vadd.f32 %v9851_v3, %v16774_v17  ;;  %v9853_v4 = vpop.f32.mrb[34].mxu0  ;;  %10154 = vmatpush1.bf16.msra.mxu0 %v14380_v61  ;;  %v14397_v17 = vld [vmem:[%s15815_s6 + $0x1974] ss:$8 sps:$4 sm:$0xff]   ;;  %v14464_v5 = vld [vmem:[%s15815_s6 + $0x1a24] ss:$8 sps:$4 sm:$0xff]  }
 0x3ab   : > { %v9894_v34 = vpop.f32.mrb[34].mxu1  ;;  %10195 = vmatpush1.bf16.msra.mxu1 %v14383_v18  ;;  %v16854_v26 = vadd.f32 %v9890_v24, %v9850_v45  ;;  %v9854_v35 = vpop.f32.mrb[35].mxu0  ;;  %10155 = vmatprep.subr.bf16.mxu0 %v14388_v20  ;;  %v14458_v61 = vld [vmem:[%s15815_s6 + $0x1a14] ss:$8 sps:$4 sm:$0xff]   ;;  %v14456_v20 = vld [vmem:[%s15815_s6 + $0x1a10] ss:$8 sps:$4 sm:$0xff]  }
 0x3ac   : > { %v9895_v37 = vpop.f32.mrb[35].mxu1  ;;  %10196 = vmatprep.subr.bf16.mxu1 %v14391_v21  ;;  %v16858_v38 = vadd.f32 %v9892_v28, %v9852_v29  ;;  %v14461_v18 = vld [vmem:[%s15815_s6 + $0x1b14] ss:$8 sps:$4 sm:$0xff]   ;;  %v14459_v21 = vld [vmem:[%s15815_s6 + $0x1b10] ss:$8 sps:$4 sm:$0xff]  }
 0x3ad   : > { %v14467_v24 = vld [vmem:[%s15815_s6 + $0x1b24] ss:$8 sps:$4 sm:$0xff]   ;;  %v14462_v45 = vld [vmem:[%s15815_s6 + $0x1a20] ss:$8 sps:$4 sm:$0xff]   ;;  %v14470_v28 = vld [vmem:[%s15815_s6 + $0x1a34] ss:$8 sps:$4 sm:$0xff]  }
 0x3ae   : > { %10156 = vmatpush1.bf16.msra.mxu0 %v14386_v9  ;;  %v14465_v3 = vld [vmem:[%s15815_s6 + $0x1b20] ss:$8 sps:$4 sm:$0xff]   ;;  %v14473_v29 = vld [vmem:[%s15815_s6 + $0x1b34] ss:$8 sps:$4 sm:$0xff]   ;;  %v14468_v4 = vld [vmem:[%s15815_s6 + $0x1a30] ss:$8 sps:$4 sm:$0xff]  }
 0x3af   : > { %10197 = vmatpush1.bf16.msra.mxu1 %v14389_v10  ;;  %10157 = vmatprep.subr.bf16.mxu0 %v14394_v13  ;;  %v14471_v34 = vld [vmem:[%s15815_s6 + $0x1b30] ss:$8 sps:$4 sm:$0xff]   ;;  %v14476_v9 = vld [vmem:[%s15815_s6 + $0x1a44] ss:$8 sps:$4 sm:$0xff]   ;;  %v14474_v35 = vld [vmem:[%s15815_s6 + $0x1a40] ss:$8 sps:$4 sm:$0xff]  }
 0x3b0   : > { %10198 = vmatprep.subr.bf16.mxu1 %v14397_v17  ;;  %v14479_v10 = vld [vmem:[%s15815_s6 + $0x1b44] ss:$8 sps:$4 sm:$0xff]   ;;  %v14477_v37 = vld [vmem:[%s15815_s6 + $0x1b40] ss:$8 sps:$4 sm:$0xff]   ;;  %v14482_v13 = vld [vmem:[%s15815_s6 + $0x1a54] ss:$8 sps:$4 sm:$0xff]  }
 0x3b1   : > { %v14485_v17 = vld [vmem:[%s15815_s6 + $0x1b54] ss:$8 sps:$4 sm:$0xff]  }
 0x3b2   : > { %10158 = vmatpush1.bf16.msra.mxu0 %v14392_v39  ;;  %v14480_v39 = vld [vmem:[%s15815_s6 + $0x1a50] ss:$8 sps:$4 sm:$0xff]  }
 0x3b3   : > { %10199 = vmatpush1.bf16.msra.mxu1 %v14395_v40  ;;  %10159 = vmatprep.subr.bf16.mxu0 %v14400_v32  ;;  %v14483_v40 = vld [vmem:[%s15815_s6 + $0x1b50] ss:$8 sps:$4 sm:$0xff]   ;;  %v14488_v32 = vld [vmem:[%s15815_s6 + $0x1a64] ss:$8 sps:$4 sm:$0xff]  }
 0x3b4   : > { %10200 = vmatprep.subr.bf16.mxu1 %v14403_v41  ;;  %v14491_v41 = vld [vmem:[%s15815_s6 + $0x1b64] ss:$8 sps:$4 sm:$0xff]  }
 0x3b6   : > { %10160 = vmatpush1.bf16.msra.mxu0 %v14398_v23 }
 0x3b7   : > { %10201 = vmatpush1.bf16.msra.mxu1 %v14401_v44  ;;  %10161 = vmatprep.subr.bf16.mxu0 %v14406_v63 }
 0x3b8   : > { %10202 = vmatprep.subr.bf16.mxu1 %v14409_v22 }
 0x3ba   : > { %10162 = vmatpush1.bf16.msra.mxu0 %v14404_v46 }
 0x3bb   : > { %10203 = vmatpush1.bf16.msra.mxu1 %v14407_v47  ;;  %10163 = vmatprep.subr.bf16.mxu0 %v14412_v33 }
 0x3bc   : > { %10204 = vmatprep.subr.bf16.mxu1 %v14415_v50 }
 0x3be   : > { %10164 = vmatpush1.bf16.msra.mxu0 %v14410_v1  ;;  %v14486_v1 = vld [vmem:[%s15815_s6 + $0x1a60] ss:$8 sps:$4 sm:$0xff]  }
 0x3bf   : > { %10205 = vmatpush1.bf16.msra.mxu1 %v14413_v30  ;;  %10165 = vmatprep.subr.bf16.mxu0 %v14418_v51  ;;  %v14489_v30 = vld [vmem:[%s15815_s6 + $0x1b60] ss:$8 sps:$4 sm:$0xff]  }
 0x3c0   : > { %10206 = vmatprep.subr.bf16.mxu1 %v14421_v52 }
 0x3c2   : > { %10166 = vmatpush1.bf16.msra.mxu0 %v14416_v55 }
 0x3c3   : > { %10207 = vmatpush1.bf16.msra.mxu1 %v14419_v56  ;;  %10167 = vmatprep.subr.bf16.mxu0 %v14424_v25  ;;  %v14492_v25 = vld [vmem:[%s15815_s6 + $0x1a70] ss:$8 sps:$4 sm:$0xff]  }
 0x3c4   : > { %10208 = vmatprep.subr.bf16.mxu1 %v14427_v36  ;;  %v14495_v36 = vld [vmem:[%s15815_s6 + $0x1b70] ss:$8 sps:$4 sm:$0xff]  }
 0x3c6   : > { %10168 = vmatpush1.bf16.msra.mxu0 %v14422_v58  ;;  %v14500_v58 = vld [vmem:[%s15815_s6 + $0x1a84] ss:$8 sps:$4 sm:$0xff]  }
 0x3c7   : > { %10209 = vmatpush1.bf16.msra.mxu1 %v14425_v59  ;;  %10169 = vmatprep.subr.bf16.mxu0 %v14430_v43  ;;  %v14503_v59 = vld [vmem:[%s15815_s6 + $0x1b84] ss:$8 sps:$4 sm:$0xff]   ;;  %v14498_v43 = vld [vmem:[%s15815_s6 + $0x1a80] ss:$8 sps:$4 sm:$0xff]  }
 0x3c8   : > { %10210 = vmatprep.subr.bf16.mxu1 %v14433_v62  ;;  %v14501_v62 = vld [vmem:[%s15815_s6 + $0x1b80] ss:$8 sps:$4 sm:$0xff]  }
 0x3ca   : > { %10170 = vmatpush1.bf16.msra.mxu0 %v14428_v19  ;;  %v14506_v19 = vld [vmem:[%s15815_s6 + $0x1a94] ss:$8 sps:$4 sm:$0xff]  }
 0x3cb   : > { %10211 = vmatpush1.bf16.msra.mxu1 %v14431_v42  ;;  %10171 = vmatprep.subr.bf16.mxu0 %v14436_v0  ;;  %v14509_v42 = vld [vmem:[%s15815_s6 + $0x1b94] ss:$8 sps:$4 sm:$0xff]   ;;  %v14504_v0 = vld [vmem:[%s15815_s6 + $0x1a90] ss:$8 sps:$4 sm:$0xff]  }
 0x3cc   : > { %10212 = vmatprep.subr.bf16.mxu1 %v14439_v2  ;;  %v14507_v2 = vld [vmem:[%s15815_s6 + $0x1b90] ss:$8 sps:$4 sm:$0xff]  }
 0x3ce   : > { %10172 = vmatpush1.bf16.msra.mxu0 %v14434_v49  ;;  %v14512_v49 = vld [vmem:[%s15815_s6 + $0x1aa4] ss:$8 sps:$4 sm:$0xff]  }
 0x3cf   : > { %10213 = vmatpush1.bf16.msra.mxu1 %v14437_v6  ;;  %10173 = vmatprep.subr.bf16.mxu0 %v14442_v27  ;;  %v14515_v6 = vld [vmem:[%s15815_s6 + $0x1ba4] ss:$8 sps:$4 sm:$0xff]   ;;  %v14510_v27 = vld [vmem:[%s15815_s6 + $0x1aa0] ss:$8 sps:$4 sm:$0xff]  }
 0x3d0   : > { %10214 = vmatprep.subr.bf16.mxu1 %v14445_v48  ;;  %v14513_v48 = vld [vmem:[%s15815_s6 + $0x1ba0] ss:$8 sps:$4 sm:$0xff]  }
 0x3d2   : > { %10174 = vmatpush1.bf16.msra.mxu0 %v14440_v7  ;;  %v14518_v7 = vld [vmem:[%s15815_s6 + $0x1ab4] ss:$8 sps:$4 sm:$0xff]  }
 0x3d3   : > { %10215 = vmatpush1.bf16.msra.mxu1 %v14443_v8  ;;  %10225 = vmatprep.subr.bf16.mxu0 %v14452_v11  ;;  %v14521_v8 = vld [vmem:[%s15815_s6 + $0x1bb4] ss:$8 sps:$4 sm:$0xff]   ;;  %v14516_v11 = vld [vmem:[%s15815_s6 + $0x1ab0] ss:$8 sps:$4 sm:$0xff]  }
 0x3d4   : > { %10266 = vmatprep.subr.bf16.mxu1 %v14455_v12  ;;  %v14519_v12 = vld [vmem:[%s15815_s6 + $0x1bb0] ss:$8 sps:$4 sm:$0xff]  }
 0x3d5   : > { %10176 = vmatmul.mubr.bf16.vlgmr.msra.gmra.mrb[48].mxu0 %v11454_v53  ;;  %v14524_v53 = vld [vmem:[%s15815_s6 + $0x1ac4] ss:$8 sps:$4 sm:$0xff]  }
 0x3d6   : > { %10217 = vmatmul.mubr.bf16.vlgmr.msra.gmra.mrb[48].mxu1 %v11456_v54  ;;  %10226 = vmatpush1.bf16.msra.mxu0 %v14450_v57  ;;  %v14527_v54 = vld [vmem:[%s15815_s6 + $0x1bc4] ss:$8 sps:$4 sm:$0xff]   ;;  %v14522_v57 = vld [vmem:[%s15815_s6 + $0x1ac0] ss:$8 sps:$4 sm:$0xff]  }
 0x3d7   : > { %10267 = vmatpush1.bf16.msra.mxu1 %v14453_v16  ;;  %10227 = vmatprep.subr.bf16.mxu0 %v14458_v61  ;;  %v14525_v16 = vld [vmem:[%s15815_s6 + $0x1bc0] ss:$8 sps:$4 sm:$0xff]   ;;  %v14530_v61 = vld [vmem:[%s15815_s6 + $0x1ad4] ss:$8 sps:$4 sm:$0xff]  }
 0x3d8   : > { %10268 = vmatprep.subr.bf16.mxu1 %v14461_v18  ;;  %10257 = vmatprep.mubr.bf16.mxu0 %v11459_v31  ;;  %v14533_v18 = vld [vmem:[%s15815_s6 + $0x1bd4] ss:$8 sps:$4 sm:$0xff]   ;;  %v14528_v31 = vld [vmem:[%s15815_s6 + $0x1ad0] ss:$8 sps:$4 sm:$0xff]  }
 0x3d9   : > { %10298 = vmatprep.mubr.bf16.mxu1 %v11461_v60  ;;  %v14531_v60 = vld [vmem:[%s15815_s6 + $0x1bd0] ss:$8 sps:$4 sm:$0xff]  }
 0x3da   : > { %10228 = vmatpush1.bf16.msra.mxu0 %v14456_v20  ;;  %v14536_v20 = vld [vmem:[%s15815_s6 + $0x1ae4] ss:$8 sps:$4 sm:$0xff]  }
 0x3db   : > { %10269 = vmatpush1.bf16.msra.mxu1 %v14459_v21  ;;  %10229 = vmatprep.subr.bf16.mxu0 %v14464_v5  ;;  %v14539_v21 = vld [vmem:[%s15815_s6 + $0x1be4] ss:$8 sps:$4 sm:$0xff]   ;;  %v14534_v5 = vld [vmem:[%s15815_s6 + $0x1ae0] ss:$8 sps:$4 sm:$0xff]  }
 0x3dc   : > { %10270 = vmatprep.subr.bf16.mxu1 %v14467_v24  ;;  %v14537_v24 = vld [vmem:[%s15815_s6 + $0x1be0] ss:$8 sps:$4 sm:$0xff]  }
 0x3de   : > { %10230 = vmatpush1.bf16.msra.mxu0 %v14462_v45  ;;  %v14542_v45 = vld [vmem:[%s15815_s6 + $0x1af4] ss:$8 sps:$4 sm:$0xff]  }
 0x3df   : > { %10271 = vmatpush1.bf16.msra.mxu1 %v14465_v3  ;;  %10231 = vmatprep.subr.bf16.mxu0 %v14470_v28  ;;  %v14545_v3 = vld [vmem:[%s15815_s6 + $0x1bf4] ss:$8 sps:$4 sm:$0xff]   ;;  %v14540_v28 = vld [vmem:[%s15815_s6 + $0x1af0] ss:$8 sps:$4 sm:$0xff]  }
 0x3e0   : > { %10272 = vmatprep.subr.bf16.mxu1 %v14473_v29  ;;  %v14543_v29 = vld [vmem:[%s15815_s6 + $0x1bf0] ss:$8 sps:$4 sm:$0xff]  }
 0x3e2   : > { %10232 = vmatpush1.bf16.msra.mxu0 %v14468_v4  ;;  %v14552_v4 = vld [vmem:[%s15815_s6 + $0x1c04] ss:$8 sps:$4 sm:$0xff]  }
 0x3e3   : > { %10273 = vmatpush1.bf16.msra.mxu1 %v14471_v34  ;;  %10233 = vmatprep.subr.bf16.mxu0 %v14476_v9  ;;  %v14555_v34 = vld [vmem:[%s15815_s6 + $0x1d04] ss:$8 sps:$4 sm:$0xff]   ;;  %v11458_v9 = vcombine.low %v16901_v14, %v16901_v14 }
 0x3e4   : > { %10274 = vmatprep.subr.bf16.mxu1 %v14479_v10  ;;  %v11460_v10 = vcombine.low %v16904_v15, %v16904_v15 }
 0x3e6   : > { %10234 = vmatpush1.bf16.msra.mxu0 %v14474_v35  ;;  %v16985_v35 = vld [vmem:[%s15839_s18 + $0xe0] sm:$0xff] }
 0x3e7   : > { %10275 = vmatpush1.bf16.msra.mxu1 %v14477_v37  ;;  %10235 = vmatprep.subr.bf16.mxu0 %v14482_v13  ;;  %v16988_v37 = vld [vmem:[%s15839_s18 + $0xe8] sm:$0xff]  ;;  %v14550_v13 = vld [vmem:[%s15815_s6 + $0x1c00] ss:$8 sps:$4 sm:$0xff]   ;;  %v11463_v14 = vcombine.high %v16985_v35, %v16985_v35 }
 0x3e8   : > { %10276 = vmatprep.subr.bf16.mxu1 %v14485_v17  ;;  %v9931_v23 = vpop.f32.mrb[36].mxu0  ;;  %v14553_v17 = vld [vmem:[%s15815_s6 + $0x1d00] ss:$8 sps:$4 sm:$0xff]   ;;  %v11465_v15 = vcombine.high %v16988_v37, %v16988_v37 }
 0x3e9   : > { %v9972_v44 = vpop.f32.mrb[36].mxu1  ;;  %v9932_v63 = vadd.f32 %v9931_v23, %v16854_v26  ;;  %v9933_v22 = vpop.f32.mrb[37].mxu0  ;;  %v14494_v26 = vld [vmem:[%s15815_s6 + $0x1a74] ss:$8 sps:$4 sm:$0xff]   ;;  %v14564_v23 = vld [vmem:[%s15815_s6 + $0x1c24] ss:$8 sps:$4 sm:$0xff]  }
 0x3ea   : > { %v9974_v46 = vpop.f32.mrb[37].mxu1  ;;  %v9934_v47 = vadd.f32 %v9933_v22, %v16858_v38  ;;  %v9935_v33 = vpop.f32.mrb[38].mxu0  ;;  %10236 = vmatpush1.bf16.msra.mxu0 %v14480_v39  ;;  %v14497_v38 = vld [vmem:[%s15815_s6 + $0x1b74] ss:$8 sps:$4 sm:$0xff]   ;;  %v14565_v22 = vld [vmem:[%s15815_s6 + $0x1d20] ss:$8 sps:$4 sm:$0xff]  }
 0x3eb   : > { %v9976_v50 = vpop.f32.mrb[38].mxu1  ;;  %10277 = vmatpush1.bf16.msra.mxu1 %v14483_v40  ;;  %v16938_v51 = vadd.f32 %v9972_v44, %v9932_v63  ;;  %v9936_v52 = vpop.f32.mrb[39].mxu0  ;;  %10237 = vmatprep.subr.bf16.mxu0 %v14488_v32  ;;  %v14558_v39 = vld [vmem:[%s15815_s6 + $0x1c14] ss:$8 sps:$4 sm:$0xff]   ;;  %v14556_v32 = vld [vmem:[%s15815_s6 + $0x1c10] ss:$8 sps:$4 sm:$0xff]  }
 0x3ec   : > { %v9977_v55 = vpop.f32.mrb[39].mxu1  ;;  %10278 = vmatprep.subr.bf16.mxu1 %v14491_v41  ;;  %v16942_v56 = vadd.f32 %v9974_v46, %v9934_v47  ;;  %v14561_v40 = vld [vmem:[%s15815_s6 + $0x1d14] ss:$8 sps:$4 sm:$0xff]   ;;  %v14559_v41 = vld [vmem:[%s15815_s6 + $0x1d10] ss:$8 sps:$4 sm:$0xff]  }
 0x3ed   : > { %v14567_v44 = vld [vmem:[%s15815_s6 + $0x1d24] ss:$8 sps:$4 sm:$0xff]   ;;  %v14562_v63 = vld [vmem:[%s15815_s6 + $0x1c20] ss:$8 sps:$4 sm:$0xff]   ;;  %v14570_v46 = vld [vmem:[%s15815_s6 + $0x1c34] ss:$8 sps:$4 sm:$0xff]  }
 0x3ee   : > { %10238 = vmatpush1.bf16.msra.mxu0 %v14486_v1  ;;  %v14573_v47 = vld [vmem:[%s15815_s6 + $0x1d34] ss:$8 sps:$4 sm:$0xff]   ;;  %v14568_v33 = vld [vmem:[%s15815_s6 + $0x1c30] ss:$8 sps:$4 sm:$0xff]   ;;  %v14576_v1 = vld [vmem:[%s15815_s6 + $0x1c44] ss:$8 sps:$4 sm:$0xff]  }
 0x3ef   : > { %10279 = vmatpush1.bf16.msra.mxu1 %v14489_v30  ;;  %10239 = vmatprep.subr.bf16.mxu0 %v14494_v26  ;;  %v14571_v50 = vld [vmem:[%s15815_s6 + $0x1d30] ss:$8 sps:$4 sm:$0xff]   ;;  %v14579_v30 = vld [vmem:[%s15815_s6 + $0x1d44] ss:$8 sps:$4 sm:$0xff]   ;;  %v14574_v52 = vld [vmem:[%s15815_s6 + $0x1c40] ss:$8 sps:$4 sm:$0xff]  }
 0x3f0   : > { %10280 = vmatprep.subr.bf16.mxu1 %v14497_v38  ;;  %v14577_v55 = vld [vmem:[%s15815_s6 + $0x1d40] ss:$8 sps:$4 sm:$0xff]   ;;  %v14582_v26 = vld [vmem:[%s15815_s6 + $0x1c54] ss:$8 sps:$4 sm:$0xff]  }
 0x3f1   : > { %v14585_v38 = vld [vmem:[%s15815_s6 + $0x1d54] ss:$8 sps:$4 sm:$0xff]  }
 0x3f2   : > { %10240 = vmatpush1.bf16.msra.mxu0 %v14492_v25  ;;  %v14580_v25 = vld [vmem:[%s15815_s6 + $0x1c50] ss:$8 sps:$4 sm:$0xff]  }
 0x3f3   : > { %10281 = vmatpush1.bf16.msra.mxu1 %v14495_v36  ;;  %10241 = vmatprep.subr.bf16.mxu0 %v14500_v58  ;;  %v14583_v36 = vld [vmem:[%s15815_s6 + $0x1d50] ss:$8 sps:$4 sm:$0xff]   ;;  %v14588_v58 = vld [vmem:[%s15815_s6 + $0x1c64] ss:$8 sps:$4 sm:$0xff]  }
 0x3f4   : > { %10282 = vmatprep.subr.bf16.mxu1 %v14503_v59  ;;  %v14591_v59 = vld [vmem:[%s15815_s6 + $0x1d64] ss:$8 sps:$4 sm:$0xff]  }
 0x3f6   : > { %10242 = vmatpush1.bf16.msra.mxu0 %v14498_v43 }
 0x3f7   : > { %10283 = vmatpush1.bf16.msra.mxu1 %v14501_v62  ;;  %10243 = vmatprep.subr.bf16.mxu0 %v14506_v19 }
 0x3f8   : > { %10284 = vmatprep.subr.bf16.mxu1 %v14509_v42 }
 0x3fa   : > { %10244 = vmatpush1.bf16.msra.mxu0 %v14504_v0 }
 0x3fb   : > { %10285 = vmatpush1.bf16.msra.mxu1 %v14507_v2  ;;  %10245 = vmatprep.subr.bf16.mxu0 %v14512_v49 }
 0x3fc   : > { %10286 = vmatprep.subr.bf16.mxu1 %v14515_v6 }
 0x3fe   : > { %10246 = vmatpush1.bf16.msra.mxu0 %v14510_v27  ;;  %v14586_v27 = vld [vmem:[%s15815_s6 + $0x1c60] ss:$8 sps:$4 sm:$0xff]  }
 0x3ff   : > { %10287 = vmatpush1.bf16.msra.mxu1 %v14513_v48  ;;  %10247 = vmatprep.subr.bf16.mxu0 %v14518_v7  ;;  %v14589_v48 = vld [vmem:[%s15815_s6 + $0x1d60] ss:$8 sps:$4 sm:$0xff]  }
 0x400   : > { %10288 = vmatprep.subr.bf16.mxu1 %v14521_v8 }
 0x402   : > { %10248 = vmatpush1.bf16.msra.mxu0 %v14516_v11 }
 0x403   : > { %10289 = vmatpush1.bf16.msra.mxu1 %v14519_v12  ;;  %10249 = vmatprep.subr.bf16.mxu0 %v14524_v53  ;;  %v14592_v53 = vld [vmem:[%s15815_s6 + $0x1c70] ss:$8 sps:$4 sm:$0xff]  }
 0x404   : > { %10290 = vmatprep.subr.bf16.mxu1 %v14527_v54  ;;  %v14595_v54 = vld [vmem:[%s15815_s6 + $0x1d70] ss:$8 sps:$4 sm:$0xff]  }
 0x406   : > { %10250 = vmatpush1.bf16.msra.mxu0 %v14522_v57  ;;  %v14600_v57 = vld [vmem:[%s15815_s6 + $0x1c84] ss:$8 sps:$4 sm:$0xff]  }
 0x407   : > { %10291 = vmatpush1.bf16.msra.mxu1 %v14525_v16  ;;  %10251 = vmatprep.subr.bf16.mxu0 %v14530_v61  ;;  %v14603_v16 = vld [vmem:[%s15815_s6 + $0x1d84] ss:$8 sps:$4 sm:$0xff]   ;;  %v14598_v61 = vld [vmem:[%s15815_s6 + $0x1c80] ss:$8 sps:$4 sm:$0xff]  }
 0x408   : > { %10292 = vmatprep.subr.bf16.mxu1 %v14533_v18  ;;  %v14601_v18 = vld [vmem:[%s15815_s6 + $0x1d80] ss:$8 sps:$4 sm:$0xff]  }
 0x40a   : > { %10252 = vmatpush1.bf16.msra.mxu0 %v14528_v31  ;;  %v14606_v31 = vld [vmem:[%s15815_s6 + $0x1c94] ss:$8 sps:$4 sm:$0xff]  }
 0x40b   : > { %10293 = vmatpush1.bf16.msra.mxu1 %v14531_v60  ;;  %10253 = vmatprep.subr.bf16.mxu0 %v14536_v20  ;;  %v14609_v60 = vld [vmem:[%s15815_s6 + $0x1d94] ss:$8 sps:$4 sm:$0xff]   ;;  %v14604_v20 = vld [vmem:[%s15815_s6 + $0x1c90] ss:$8 sps:$4 sm:$0xff]  }
 0x40c   : > { %10294 = vmatprep.subr.bf16.mxu1 %v14539_v21  ;;  %v14607_v21 = vld [vmem:[%s15815_s6 + $0x1d90] ss:$8 sps:$4 sm:$0xff]  }
 0x40e   : > { %10254 = vmatpush1.bf16.msra.mxu0 %v14534_v5  ;;  %v14612_v5 = vld [vmem:[%s15815_s6 + $0x1ca4] ss:$8 sps:$4 sm:$0xff]  }
 0x40f   : > { %10295 = vmatpush1.bf16.msra.mxu1 %v14537_v24  ;;  %10255 = vmatprep.subr.bf16.mxu0 %v14542_v45  ;;  %v14615_v24 = vld [vmem:[%s15815_s6 + $0x1da4] ss:$8 sps:$4 sm:$0xff]   ;;  %v14610_v45 = vld [vmem:[%s15815_s6 + $0x1ca0] ss:$8 sps:$4 sm:$0xff]  }
 0x410   : > { %10296 = vmatprep.subr.bf16.mxu1 %v14545_v3  ;;  %v14613_v3 = vld [vmem:[%s15815_s6 + $0x1da0] ss:$8 sps:$4 sm:$0xff]  }
 0x412   : > { %10256 = vmatpush1.bf16.msra.mxu0 %v14540_v28  ;;  %v14618_v28 = vld [vmem:[%s15815_s6 + $0x1cb4] ss:$8 sps:$4 sm:$0xff]  }
 0x413   : > { %10297 = vmatpush1.bf16.msra.mxu1 %v14543_v29  ;;  %10307 = vmatprep.subr.bf16.mxu0 %v14552_v4  ;;  %v14621_v29 = vld [vmem:[%s15815_s6 + $0x1db4] ss:$8 sps:$4 sm:$0xff]   ;;  %v14616_v4 = vld [vmem:[%s15815_s6 + $0x1cb0] ss:$8 sps:$4 sm:$0xff]  }
 0x414   : > { %10348 = vmatprep.subr.bf16.mxu1 %v14555_v34  ;;  %v14619_v34 = vld [vmem:[%s15815_s6 + $0x1db0] ss:$8 sps:$4 sm:$0xff]  }
 0x415   : > { %10258 = vmatmul.mubr.bf16.vlgmr.msra.gmra.mrb[52].mxu0 %v11458_v9  ;;  %v14624_v9 = vld [vmem:[%s15815_s6 + $0x1cc4] ss:$8 sps:$4 sm:$0xff]  }
 0x416   : > { %10299 = vmatmul.mubr.bf16.vlgmr.msra.gmra.mrb[52].mxu1 %v11460_v10  ;;  %10308 = vmatpush1.bf16.msra.mxu0 %v14550_v13  ;;  %v14627_v10 = vld [vmem:[%s15815_s6 + $0x1dc4] ss:$8 sps:$4 sm:$0xff]   ;;  %v14622_v13 = vld [vmem:[%s15815_s6 + $0x1cc0] ss:$8 sps:$4 sm:$0xff]  }
 0x417   : > { %10349 = vmatpush1.bf16.msra.mxu1 %v14553_v17  ;;  %10309 = vmatprep.subr.bf16.mxu0 %v14558_v39  ;;  %v14625_v17 = vld [vmem:[%s15815_s6 + $0x1dc0] ss:$8 sps:$4 sm:$0xff]   ;;  %v14630_v39 = vld [vmem:[%s15815_s6 + $0x1cd4] ss:$8 sps:$4 sm:$0xff]  }
 0x418   : > { %10350 = vmatprep.subr.bf16.mxu1 %v14561_v40  ;;  %10339 = vmatprep.mubr.bf16.mxu0 %v11463_v14  ;;  %v14633_v40 = vld [vmem:[%s15815_s6 + $0x1dd4] ss:$8 sps:$4 sm:$0xff]   ;;  %v14628_v14 = vld [vmem:[%s15815_s6 + $0x1cd0] ss:$8 sps:$4 sm:$0xff]  }
 0x419   : > { %10380 = vmatprep.mubr.bf16.mxu1 %v11465_v15  ;;  %v14631_v15 = vld [vmem:[%s15815_s6 + $0x1dd0] ss:$8 sps:$4 sm:$0xff]  }
 0x41a   : > { %10310 = vmatpush1.bf16.msra.mxu0 %v14556_v32  ;;  %v14636_v32 = vld [vmem:[%s15815_s6 + $0x1ce4] ss:$8 sps:$4 sm:$0xff]  }
 0x41b   : > { %10351 = vmatpush1.bf16.msra.mxu1 %v14559_v41  ;;  %10311 = vmatprep.subr.bf16.mxu0 %v14564_v23  ;;  %v14639_v41 = vld [vmem:[%s15815_s6 + $0x1de4] ss:$8 sps:$4 sm:$0xff]   ;;  %v14634_v23 = vld [vmem:[%s15815_s6 + $0x1ce0] ss:$8 sps:$4 sm:$0xff]  }
 0x41c   : > { %10352 = vmatprep.subr.bf16.mxu1 %v14567_v44  ;;  %v14637_v44 = vld [vmem:[%s15815_s6 + $0x1de0] ss:$8 sps:$4 sm:$0xff]  }
 0x41e   : > { %10312 = vmatpush1.bf16.msra.mxu0 %v14562_v63  ;;  %v14642_v63 = vld [vmem:[%s15815_s6 + $0x1cf4] ss:$8 sps:$4 sm:$0xff]  }
 0x41f   : > { %10353 = vmatpush1.bf16.msra.mxu1 %v14565_v22  ;;  %10313 = vmatprep.subr.bf16.mxu0 %v14570_v46  ;;  %v14645_v22 = vld [vmem:[%s15815_s6 + $0x1df4] ss:$8 sps:$4 sm:$0xff]   ;;  %v14640_v46 = vld [vmem:[%s15815_s6 + $0x1cf0] ss:$8 sps:$4 sm:$0xff]  }
 0x420   : > { %10354 = vmatprep.subr.bf16.mxu1 %v14573_v47  ;;  %v14643_v47 = vld [vmem:[%s15815_s6 + $0x1df0] ss:$8 sps:$4 sm:$0xff]  }
 0x422   : > { %10314 = vmatpush1.bf16.msra.mxu0 %v14568_v33  ;;  %v14652_v33 = vld [vmem:[%s15815_s6 + $0x1e04] ss:$8 sps:$4 sm:$0xff]  }
 0x423   : > { %10355 = vmatpush1.bf16.msra.mxu1 %v14571_v50  ;;  %10315 = vmatprep.subr.bf16.mxu0 %v14576_v1  ;;  %v14655_v50 = vld [vmem:[%s15815_s6 + $0x1f04] ss:$8 sps:$4 sm:$0xff]   ;;  %v11462_v1 = vcombine.low %v16985_v35, %v16985_v35 }
 0x424   : > { %10356 = vmatprep.subr.bf16.mxu1 %v14579_v30  ;;  %v11464_v30 = vcombine.low %v16988_v37, %v16988_v37 }
 0x426   : > { %10316 = vmatpush1.bf16.msra.mxu0 %v14574_v52  ;;  %v17069_v52 = vld [vmem:[%s15839_s18 + $0xf0] sm:$0xff] }
 0x427   : > { %10357 = vmatpush1.bf16.msra.mxu1 %v14577_v55  ;;  %10317 = vmatprep.subr.bf16.mxu0 %v14582_v26  ;;  %v17072_v55 = vld [vmem:[%s15839_s18 + $0xf8] sm:$0xff]  ;;  %v11467_v35 = vcombine.high %v17069_v52, %v17069_v52 }
 0x428   : > { %10358 = vmatprep.subr.bf16.mxu1 %v14585_v38  ;;  %v10013_v43 = vpop.f32.mrb[40].mxu0  ;;  %v14650_v26 = vld [vmem:[%s15815_s6 + $0x1e00] ss:$8 sps:$4 sm:$0xff]   ;;  %v11469_v37 = vcombine.high %v17072_v55, %v17072_v55 }
 0x429   : > { %v10054_v62 = vpop.f32.mrb[40].mxu1  ;;  %v10014_v19 = vadd.f32 %v10013_v43, %v16938_v51  ;;  %v10015_v42 = vpop.f32.mrb[41].mxu0  ;;  %v14594_v51 = vld [vmem:[%s15815_s6 + $0x1c74] ss:$8 sps:$4 sm:$0xff]   ;;  %v14653_v38 = vld [vmem:[%s15815_s6 + $0x1f00] ss:$8 sps:$4 sm:$0xff]  }
 0x42a   : > { %v10056_v0 = vpop.f32.mrb[41].mxu1  ;;  %v10016_v2 = vadd.f32 %v10015_v42, %v16942_v56  ;;  %v10017_v49 = vpop.f32.mrb[42].mxu0  ;;  %10318 = vmatpush1.bf16.msra.mxu0 %v14580_v25  ;;  %v14597_v56 = vld [vmem:[%s15815_s6 + $0x1d74] ss:$8 sps:$4 sm:$0xff]   ;;  %v14664_v43 = vld [vmem:[%s15815_s6 + $0x1e24] ss:$8 sps:$4 sm:$0xff]  }
 0x42b   : > { %v10058_v6 = vpop.f32.mrb[42].mxu1  ;;  %10359 = vmatpush1.bf16.msra.mxu1 %v14583_v36  ;;  %v17022_v7 = vadd.f32 %v10054_v62, %v10014_v19  ;;  %v10018_v8 = vpop.f32.mrb[43].mxu0  ;;  %10319 = vmatprep.subr.bf16.mxu0 %v14588_v58  ;;  %v14658_v25 = vld [vmem:[%s15815_s6 + $0x1e14] ss:$8 sps:$4 sm:$0xff]   ;;  %v14656_v58 = vld [vmem:[%s15815_s6 + $0x1e10] ss:$8 sps:$4 sm:$0xff]  }
 0x42c   : > { %v10059_v11 = vpop.f32.mrb[43].mxu1  ;;  %10360 = vmatprep.subr.bf16.mxu1 %v14591_v59  ;;  %v17026_v12 = vadd.f32 %v10056_v0, %v10016_v2  ;;  %v14661_v36 = vld [vmem:[%s15815_s6 + $0x1f14] ss:$8 sps:$4 sm:$0xff]   ;;  %v14659_v59 = vld [vmem:[%s15815_s6 + $0x1f10] ss:$8 sps:$4 sm:$0xff]  }
 0x42d   : > { %v14667_v62 = vld [vmem:[%s15815_s6 + $0x1f24] ss:$8 sps:$4 sm:$0xff]   ;;  %v14662_v19 = vld [vmem:[%s15815_s6 + $0x1e20] ss:$8 sps:$4 sm:$0xff]   ;;  %v14670_v0 = vld [vmem:[%s15815_s6 + $0x1e34] ss:$8 sps:$4 sm:$0xff]  }
 0x42e   : > { %10320 = vmatpush1.bf16.msra.mxu0 %v14586_v27  ;;  %v14665_v42 = vld [vmem:[%s15815_s6 + $0x1f20] ss:$8 sps:$4 sm:$0xff]   ;;  %v14673_v2 = vld [vmem:[%s15815_s6 + $0x1f34] ss:$8 sps:$4 sm:$0xff]   ;;  %v14668_v49 = vld [vmem:[%s15815_s6 + $0x1e30] ss:$8 sps:$4 sm:$0xff]  }
 0x42f   : > { %10361 = vmatpush1.bf16.msra.mxu1 %v14589_v48  ;;  %10321 = vmatprep.subr.bf16.mxu0 %v14594_v51  ;;  %v14671_v6 = vld [vmem:[%s15815_s6 + $0x1f30] ss:$8 sps:$4 sm:$0xff]   ;;  %v14676_v27 = vld [vmem:[%s15815_s6 + $0x1e44] ss:$8 sps:$4 sm:$0xff]   ;;  %v14674_v8 = vld [vmem:[%s15815_s6 + $0x1e40] ss:$8 sps:$4 sm:$0xff]  }
 0x430   : > { %10362 = vmatprep.subr.bf16.mxu1 %v14597_v56  ;;  %v14679_v48 = vld [vmem:[%s15815_s6 + $0x1f44] ss:$8 sps:$4 sm:$0xff]   ;;  %v14677_v11 = vld [vmem:[%s15815_s6 + $0x1f40] ss:$8 sps:$4 sm:$0xff]   ;;  %v14682_v51 = vld [vmem:[%s15815_s6 + $0x1e54] ss:$8 sps:$4 sm:$0xff]  }
 0x431   : > { %v14685_v56 = vld [vmem:[%s15815_s6 + $0x1f54] ss:$8 sps:$4 sm:$0xff]  }
 0x432   : > { %10322 = vmatpush1.bf16.msra.mxu0 %v14592_v53  ;;  %v14680_v53 = vld [vmem:[%s15815_s6 + $0x1e50] ss:$8 sps:$4 sm:$0xff]  }
 0x433   : > { %10363 = vmatpush1.bf16.msra.mxu1 %v14595_v54  ;;  %10323 = vmatprep.subr.bf16.mxu0 %v14600_v57  ;;  %v14683_v54 = vld [vmem:[%s15815_s6 + $0x1f50] ss:$8 sps:$4 sm:$0xff]   ;;  %v14688_v57 = vld [vmem:[%s15815_s6 + $0x1e64] ss:$8 sps:$4 sm:$0xff]  }
 0x434   : > { %10364 = vmatprep.subr.bf16.mxu1 %v14603_v16  ;;  %v14691_v16 = vld [vmem:[%s15815_s6 + $0x1f64] ss:$8 sps:$4 sm:$0xff]  }
 0x436   : > { %10324 = vmatpush1.bf16.msra.mxu0 %v14598_v61 }
 0x437   : > { %10365 = vmatpush1.bf16.msra.mxu1 %v14601_v18  ;;  %10325 = vmatprep.subr.bf16.mxu0 %v14606_v31 }
 0x438   : > { %10366 = vmatprep.subr.bf16.mxu1 %v14609_v60 }
 0x43a   : > { %10326 = vmatpush1.bf16.msra.mxu0 %v14604_v20 }
 0x43b   : > { %10367 = vmatpush1.bf16.msra.mxu1 %v14607_v21  ;;  %10327 = vmatprep.subr.bf16.mxu0 %v14612_v5 }
 0x43c   : > { %10368 = vmatprep.subr.bf16.mxu1 %v14615_v24 }
 0x43e   : > { %10328 = vmatpush1.bf16.msra.mxu0 %v14610_v45  ;;  %v14686_v45 = vld [vmem:[%s15815_s6 + $0x1e60] ss:$8 sps:$4 sm:$0xff]  }
 0x43f   : > { %10369 = vmatpush1.bf16.msra.mxu1 %v14613_v3  ;;  %10329 = vmatprep.subr.bf16.mxu0 %v14618_v28  ;;  %v14689_v3 = vld [vmem:[%s15815_s6 + $0x1f60] ss:$8 sps:$4 sm:$0xff]  }
 0x440   : > { %10370 = vmatprep.subr.bf16.mxu1 %v14621_v29 }
 0x442   : > { %10330 = vmatpush1.bf16.msra.mxu0 %v14616_v4 }
 0x443   : > { %10371 = vmatpush1.bf16.msra.mxu1 %v14619_v34  ;;  %10331 = vmatprep.subr.bf16.mxu0 %v14624_v9  ;;  %v14692_v9 = vld [vmem:[%s15815_s6 + $0x1e70] ss:$8 sps:$4 sm:$0xff]  }
 0x444   : > { %10372 = vmatprep.subr.bf16.mxu1 %v14627_v10  ;;  %v14695_v10 = vld [vmem:[%s15815_s6 + $0x1f70] ss:$8 sps:$4 sm:$0xff]  }
 0x446   : > { %10332 = vmatpush1.bf16.msra.mxu0 %v14622_v13  ;;  %v14700_v13 = vld [vmem:[%s15815_s6 + $0x1e84] ss:$8 sps:$4 sm:$0xff]  }
 0x447   : > { %10373 = vmatpush1.bf16.msra.mxu1 %v14625_v17  ;;  %10333 = vmatprep.subr.bf16.mxu0 %v14630_v39  ;;  %v14703_v17 = vld [vmem:[%s15815_s6 + $0x1f84] ss:$8 sps:$4 sm:$0xff]   ;;  %v14698_v39 = vld [vmem:[%s15815_s6 + $0x1e80] ss:$8 sps:$4 sm:$0xff]  }
 0x448   : > { %10374 = vmatprep.subr.bf16.mxu1 %v14633_v40  ;;  %v14701_v40 = vld [vmem:[%s15815_s6 + $0x1f80] ss:$8 sps:$4 sm:$0xff]  }
 0x44a   : > { %10334 = vmatpush1.bf16.msra.mxu0 %v14628_v14  ;;  %v14706_v14 = vld [vmem:[%s15815_s6 + $0x1e94] ss:$8 sps:$4 sm:$0xff]  }
 0x44b   : > { %10375 = vmatpush1.bf16.msra.mxu1 %v14631_v15  ;;  %10335 = vmatprep.subr.bf16.mxu0 %v14636_v32  ;;  %v14709_v15 = vld [vmem:[%s15815_s6 + $0x1f94] ss:$8 sps:$4 sm:$0xff]   ;;  %v14704_v32 = vld [vmem:[%s15815_s6 + $0x1e90] ss:$8 sps:$4 sm:$0xff]  }
 0x44c   : > { %10376 = vmatprep.subr.bf16.mxu1 %v14639_v41  ;;  %v14707_v41 = vld [vmem:[%s15815_s6 + $0x1f90] ss:$8 sps:$4 sm:$0xff]  }
 0x44e   : > { %10336 = vmatpush1.bf16.msra.mxu0 %v14634_v23  ;;  %v14712_v23 = vld [vmem:[%s15815_s6 + $0x1ea4] ss:$8 sps:$4 sm:$0xff]  }
 0x44f   : > { %10377 = vmatpush1.bf16.msra.mxu1 %v14637_v44  ;;  %10337 = vmatprep.subr.bf16.mxu0 %v14642_v63  ;;  %v14715_v44 = vld [vmem:[%s15815_s6 + $0x1fa4] ss:$8 sps:$4 sm:$0xff]   ;;  %v14710_v63 = vld [vmem:[%s15815_s6 + $0x1ea0] ss:$8 sps:$4 sm:$0xff]  }
 0x450   : > { %10378 = vmatprep.subr.bf16.mxu1 %v14645_v22  ;;  %v14713_v22 = vld [vmem:[%s15815_s6 + $0x1fa0] ss:$8 sps:$4 sm:$0xff]  }
 0x452   : > { %10338 = vmatpush1.bf16.msra.mxu0 %v14640_v46  ;;  %v14718_v46 = vld [vmem:[%s15815_s6 + $0x1eb4] ss:$8 sps:$4 sm:$0xff]  }
 0x453   : > { %10379 = vmatpush1.bf16.msra.mxu1 %v14643_v47  ;;  %10389 = vmatprep.subr.bf16.mxu0 %v14652_v33  ;;  %v14721_v47 = vld [vmem:[%s15815_s6 + $0x1fb4] ss:$8 sps:$4 sm:$0xff]   ;;  %v14716_v33 = vld [vmem:[%s15815_s6 + $0x1eb0] ss:$8 sps:$4 sm:$0xff]  }
 0x454   : > { %10430 = vmatprep.subr.bf16.mxu1 %v14655_v50  ;;  %v14719_v50 = vld [vmem:[%s15815_s6 + $0x1fb0] ss:$8 sps:$4 sm:$0xff]  }
 0x455   : > { %10340 = vmatmul.mubr.bf16.vlgmr.msra.gmra.mrb[56].mxu0 %v11462_v1  ;;  %v14724_v1 = vld [vmem:[%s15815_s6 + $0x1ec4] ss:$8 sps:$4 sm:$0xff]  }
 0x456   : > { %10381 = vmatmul.mubr.bf16.vlgmr.msra.gmra.mrb[56].mxu1 %v11464_v30  ;;  %10390 = vmatpush1.bf16.msra.mxu0 %v14650_v26  ;;  %v14727_v30 = vld [vmem:[%s15815_s6 + $0x1fc4] ss:$8 sps:$4 sm:$0xff]   ;;  %v14722_v26 = vld [vmem:[%s15815_s6 + $0x1ec0] ss:$8 sps:$4 sm:$0xff]  }
 0x457   : > { %10431 = vmatpush1.bf16.msra.mxu1 %v14653_v38  ;;  %10391 = vmatprep.subr.bf16.mxu0 %v14658_v25  ;;  %v14725_v38 = vld [vmem:[%s15815_s6 + $0x1fc0] ss:$8 sps:$4 sm:$0xff]   ;;  %v14730_v25 = vld [vmem:[%s15815_s6 + $0x1ed4] ss:$8 sps:$4 sm:$0xff]  }
 0x458   : > { %10432 = vmatprep.subr.bf16.mxu1 %v14661_v36  ;;  %10421 = vmatprep.mubr.bf16.mxu0 %v11467_v35  ;;  %v14733_v36 = vld [vmem:[%s15815_s6 + $0x1fd4] ss:$8 sps:$4 sm:$0xff]   ;;  %v14728_v35 = vld [vmem:[%s15815_s6 + $0x1ed0] ss:$8 sps:$4 sm:$0xff]  }
 0x459   : > { %10462 = vmatprep.mubr.bf16.mxu1 %v11469_v37  ;;  %v14731_v37 = vld [vmem:[%s15815_s6 + $0x1fd0] ss:$8 sps:$4 sm:$0xff]  }
 0x45a   : > { %10392 = vmatpush1.bf16.msra.mxu0 %v14656_v58  ;;  %v14736_v58 = vld [vmem:[%s15815_s6 + $0x1ee4] ss:$8 sps:$4 sm:$0xff]  }
 0x45b   : > { %10433 = vmatpush1.bf16.msra.mxu1 %v14659_v59  ;;  %10393 = vmatprep.subr.bf16.mxu0 %v14664_v43  ;;  %v14739_v59 = vld [vmem:[%s15815_s6 + $0x1fe4] ss:$8 sps:$4 sm:$0xff]   ;;  %v14734_v43 = vld [vmem:[%s15815_s6 + $0x1ee0] ss:$8 sps:$4 sm:$0xff]  }
 0x45c   : > { %10434 = vmatprep.subr.bf16.mxu1 %v14667_v62  ;;  %v14737_v62 = vld [vmem:[%s15815_s6 + $0x1fe0] ss:$8 sps:$4 sm:$0xff]  }
 0x45e   : > { %10394 = vmatpush1.bf16.msra.mxu0 %v14662_v19  ;;  %v14742_v19 = vld [vmem:[%s15815_s6 + $0x1ef4] ss:$8 sps:$4 sm:$0xff]  }
 0x45f   : > { %10435 = vmatpush1.bf16.msra.mxu1 %v14665_v42  ;;  %10395 = vmatprep.subr.bf16.mxu0 %v14670_v0  ;;  %v14745_v42 = vld [vmem:[%s15815_s6 + $0x1ff4] ss:$8 sps:$4 sm:$0xff]   ;;  %v14740_v0 = vld [vmem:[%s15815_s6 + $0x1ef0] ss:$8 sps:$4 sm:$0xff]  }
 0x460   : > { %10436 = vmatprep.subr.bf16.mxu1 %v14673_v2  ;;  %v14743_v2 = vld [vmem:[%s15815_s6 + $0x1ff0] ss:$8 sps:$4 sm:$0xff]  }
 0x462   : > { %10396 = vmatpush1.bf16.msra.mxu0 %v14668_v49  ;;  %v14752_v49 = vld [vmem:[%s15815_s6 + $0x2004] ss:$8 sps:$4 sm:$0xff]  }
 0x463   : > { %10437 = vmatpush1.bf16.msra.mxu1 %v14671_v6  ;;  %10397 = vmatprep.subr.bf16.mxu0 %v14676_v27  ;;  %v14755_v6 = vld [vmem:[%s15815_s6 + $0x2104] ss:$8 sps:$4 sm:$0xff]   ;;  %v11466_v27 = vcombine.low %v17069_v52, %v17069_v52 }
 0x464   : > { %10438 = vmatprep.subr.bf16.mxu1 %v14679_v48  ;;  %v11468_v48 = vcombine.low %v17072_v55, %v17072_v55 }
 0x466   : > { %10398 = vmatpush1.bf16.msra.mxu0 %v14674_v8  ;;  %v17153_v8 = vld [vmem:[%s15839_s18 + $0x100] sm:$0xff] }
 0x467   : > { %10439 = vmatpush1.bf16.msra.mxu1 %v14677_v11  ;;  %10399 = vmatprep.subr.bf16.mxu0 %v14682_v51  ;;  %v17156_v11 = vld [vmem:[%s15839_s18 + $0x108] sm:$0xff]  ;;  %v14750_v51 = vld [vmem:[%s15815_s6 + $0x2000] ss:$8 sps:$4 sm:$0xff]   ;;  %v11471_v52 = vcombine.high %v17153_v8, %v17153_v8 }
 0x468   : > { %10440 = vmatprep.subr.bf16.mxu1 %v14685_v56  ;;  %v10095_v61 = vpop.f32.mrb[44].mxu0  ;;  %v14753_v56 = vld [vmem:[%s15815_s6 + $0x2100] ss:$8 sps:$4 sm:$0xff]   ;;  %v11473_v55 = vcombine.high %v17156_v11, %v17156_v11 }
 0x469   : > { %v10136_v18 = vpop.f32.mrb[44].mxu1  ;;  %v10096_v31 = vadd.f32 %v10095_v61, %v17022_v7  ;;  %v10097_v60 = vpop.f32.mrb[45].mxu0  ;;  %v14694_v7 = vld [vmem:[%s15815_s6 + $0x1e74] ss:$8 sps:$4 sm:$0xff]   ;;  %v14764_v61 = vld [vmem:[%s15815_s6 + $0x2024] ss:$8 sps:$4 sm:$0xff]  }
 0x46a   : > { %v10138_v20 = vpop.f32.mrb[45].mxu1  ;;  %v10098_v21 = vadd.f32 %v10097_v60, %v17026_v12  ;;  %v10099_v5 = vpop.f32.mrb[46].mxu0  ;;  %10400 = vmatpush1.bf16.msra.mxu0 %v14680_v53  ;;  %v14697_v12 = vld [vmem:[%s15815_s6 + $0x1f74] ss:$8 sps:$4 sm:$0xff]   ;;  %v14765_v60 = vld [vmem:[%s15815_s6 + $0x2120] ss:$8 sps:$4 sm:$0xff]  }
 0x46b   : > { %v10140_v24 = vpop.f32.mrb[46].mxu1  ;;  %10441 = vmatpush1.bf16.msra.mxu1 %v14683_v54  ;;  %v17106_v28 = vadd.f32 %v10136_v18, %v10096_v31  ;;  %v10100_v29 = vpop.f32.mrb[47].mxu0  ;;  %10401 = vmatprep.subr.bf16.mxu0 %v14688_v57  ;;  %v14758_v53 = vld [vmem:[%s15815_s6 + $0x2014] ss:$8 sps:$4 sm:$0xff]   ;;  %v14756_v57 = vld [vmem:[%s15815_s6 + $0x2010] ss:$8 sps:$4 sm:$0xff]  }
 0x46c   : > { %v10141_v4 = vpop.f32.mrb[47].mxu1  ;;  %10442 = vmatprep.subr.bf16.mxu1 %v14691_v16  ;;  %v17110_v34 = vadd.f32 %v10138_v20, %v10098_v21  ;;  %v14761_v54 = vld [vmem:[%s15815_s6 + $0x2114] ss:$8 sps:$4 sm:$0xff]   ;;  %v14759_v16 = vld [vmem:[%s15815_s6 + $0x2110] ss:$8 sps:$4 sm:$0xff]  }
 0x46d   : > { %v14767_v18 = vld [vmem:[%s15815_s6 + $0x2124] ss:$8 sps:$4 sm:$0xff]   ;;  %v14762_v31 = vld [vmem:[%s15815_s6 + $0x2020] ss:$8 sps:$4 sm:$0xff]   ;;  %v14770_v20 = vld [vmem:[%s15815_s6 + $0x2034] ss:$8 sps:$4 sm:$0xff]  }
 0x46e   : > { %10402 = vmatpush1.bf16.msra.mxu0 %v14686_v45  ;;  %v14773_v21 = vld [vmem:[%s15815_s6 + $0x2134] ss:$8 sps:$4 sm:$0xff]   ;;  %v14768_v5 = vld [vmem:[%s15815_s6 + $0x2030] ss:$8 sps:$4 sm:$0xff]   ;;  %v14776_v45 = vld [vmem:[%s15815_s6 + $0x2044] ss:$8 sps:$4 sm:$0xff]  }
 0x46f   : > { %10443 = vmatpush1.bf16.msra.mxu1 %v14689_v3  ;;  %10403 = vmatprep.subr.bf16.mxu0 %v14694_v7  ;;  %v14771_v24 = vld [vmem:[%s15815_s6 + $0x2130] ss:$8 sps:$4 sm:$0xff]   ;;  %v14779_v3 = vld [vmem:[%s15815_s6 + $0x2144] ss:$8 sps:$4 sm:$0xff]   ;;  %v14774_v29 = vld [vmem:[%s15815_s6 + $0x2040] ss:$8 sps:$4 sm:$0xff]  }
 0x470   : > { %10444 = vmatprep.subr.bf16.mxu1 %v14697_v12  ;;  %v14777_v4 = vld [vmem:[%s15815_s6 + $0x2140] ss:$8 sps:$4 sm:$0xff]   ;;  %v14782_v7 = vld [vmem:[%s15815_s6 + $0x2054] ss:$8 sps:$4 sm:$0xff]  }
 0x471   : > { %v14785_v12 = vld [vmem:[%s15815_s6 + $0x2154] ss:$8 sps:$4 sm:$0xff]  }
 0x472   : > { %10404 = vmatpush1.bf16.msra.mxu0 %v14692_v9  ;;  %v14780_v9 = vld [vmem:[%s15815_s6 + $0x2050] ss:$8 sps:$4 sm:$0xff]  }
 0x473   : > { %10445 = vmatpush1.bf16.msra.mxu1 %v14695_v10  ;;  %10405 = vmatprep.subr.bf16.mxu0 %v14700_v13  ;;  %v14783_v10 = vld [vmem:[%s15815_s6 + $0x2150] ss:$8 sps:$4 sm:$0xff]   ;;  %v14788_v13 = vld [vmem:[%s15815_s6 + $0x2064] ss:$8 sps:$4 sm:$0xff]  }
 0x474   : > { %10446 = vmatprep.subr.bf16.mxu1 %v14703_v17  ;;  %v14791_v17 = vld [vmem:[%s15815_s6 + $0x2164] ss:$8 sps:$4 sm:$0xff]  }
 0x476   : > { %10406 = vmatpush1.bf16.msra.mxu0 %v14698_v39 }
 0x477   : > { %10447 = vmatpush1.bf16.msra.mxu1 %v14701_v40  ;;  %10407 = vmatprep.subr.bf16.mxu0 %v14706_v14 }
 0x478   : > { %10448 = vmatprep.subr.bf16.mxu1 %v14709_v15 }
 0x47a   : > { %10408 = vmatpush1.bf16.msra.mxu0 %v14704_v32 }
 0x47b   : > { %10449 = vmatpush1.bf16.msra.mxu1 %v14707_v41  ;;  %10409 = vmatprep.subr.bf16.mxu0 %v14712_v23 }
 0x47c   : > { %10450 = vmatprep.subr.bf16.mxu1 %v14715_v44 }
 0x47e   : > { %10410 = vmatpush1.bf16.msra.mxu0 %v14710_v63  ;;  %v14786_v63 = vld [vmem:[%s15815_s6 + $0x2060] ss:$8 sps:$4 sm:$0xff]  }
 0x47f   : > { %10451 = vmatpush1.bf16.msra.mxu1 %v14713_v22  ;;  %10411 = vmatprep.subr.bf16.mxu0 %v14718_v46  ;;  %v14789_v22 = vld [vmem:[%s15815_s6 + $0x2160] ss:$8 sps:$4 sm:$0xff]  }
 0x480   : > { %10452 = vmatprep.subr.bf16.mxu1 %v14721_v47 }
 0x482   : > { %10412 = vmatpush1.bf16.msra.mxu0 %v14716_v33 }
 0x483   : > { %10453 = vmatpush1.bf16.msra.mxu1 %v14719_v50  ;;  %10413 = vmatprep.subr.bf16.mxu0 %v14724_v1  ;;  %v14792_v1 = vld [vmem:[%s15815_s6 + $0x2070] ss:$8 sps:$4 sm:$0xff]  }
 0x484   : > { %10454 = vmatprep.subr.bf16.mxu1 %v14727_v30  ;;  %v14795_v30 = vld [vmem:[%s15815_s6 + $0x2170] ss:$8 sps:$4 sm:$0xff]  }
 0x486   : > { %10414 = vmatpush1.bf16.msra.mxu0 %v14722_v26  ;;  %v14800_v26 = vld [vmem:[%s15815_s6 + $0x2084] ss:$8 sps:$4 sm:$0xff]  }
 0x487   : > { %10455 = vmatpush1.bf16.msra.mxu1 %v14725_v38  ;;  %10415 = vmatprep.subr.bf16.mxu0 %v14730_v25  ;;  %v14803_v38 = vld [vmem:[%s15815_s6 + $0x2184] ss:$8 sps:$4 sm:$0xff]   ;;  %v14798_v25 = vld [vmem:[%s15815_s6 + $0x2080] ss:$8 sps:$4 sm:$0xff]  }
 0x488   : > { %10456 = vmatprep.subr.bf16.mxu1 %v14733_v36  ;;  %v14801_v36 = vld [vmem:[%s15815_s6 + $0x2180] ss:$8 sps:$4 sm:$0xff]  }
 0x48a   : > { %10416 = vmatpush1.bf16.msra.mxu0 %v14728_v35  ;;  %v14806_v35 = vld [vmem:[%s15815_s6 + $0x2094] ss:$8 sps:$4 sm:$0xff]  }
 0x48b   : > { %10457 = vmatpush1.bf16.msra.mxu1 %v14731_v37  ;;  %10417 = vmatprep.subr.bf16.mxu0 %v14736_v58  ;;  %v14809_v37 = vld [vmem:[%s15815_s6 + $0x2194] ss:$8 sps:$4 sm:$0xff]   ;;  %v14804_v58 = vld [vmem:[%s15815_s6 + $0x2090] ss:$8 sps:$4 sm:$0xff]  }
 0x48c   : > { %10458 = vmatprep.subr.bf16.mxu1 %v14739_v59  ;;  %v14807_v59 = vld [vmem:[%s15815_s6 + $0x2190] ss:$8 sps:$4 sm:$0xff]  }
 0x48e   : > { %10418 = vmatpush1.bf16.msra.mxu0 %v14734_v43  ;;  %v14812_v43 = vld [vmem:[%s15815_s6 + $0x20a4] ss:$8 sps:$4 sm:$0xff]  }
 0x48f   : > { %10459 = vmatpush1.bf16.msra.mxu1 %v14737_v62  ;;  %10419 = vmatprep.subr.bf16.mxu0 %v14742_v19  ;;  %v14815_v62 = vld [vmem:[%s15815_s6 + $0x21a4] ss:$8 sps:$4 sm:$0xff]   ;;  %v14810_v19 = vld [vmem:[%s15815_s6 + $0x20a0] ss:$8 sps:$4 sm:$0xff]  }
 0x490   : > { %10460 = vmatprep.subr.bf16.mxu1 %v14745_v42  ;;  %v14813_v42 = vld [vmem:[%s15815_s6 + $0x21a0] ss:$8 sps:$4 sm:$0xff]  }
 0x492   : > { %10420 = vmatpush1.bf16.msra.mxu0 %v14740_v0  ;;  %v14818_v0 = vld [vmem:[%s15815_s6 + $0x20b4] ss:$8 sps:$4 sm:$0xff]  }
 0x493   : > { %10461 = vmatpush1.bf16.msra.mxu1 %v14743_v2  ;;  %10471 = vmatprep.subr.bf16.mxu0 %v14752_v49  ;;  %v14821_v2 = vld [vmem:[%s15815_s6 + $0x21b4] ss:$8 sps:$4 sm:$0xff]   ;;  %v14816_v49 = vld [vmem:[%s15815_s6 + $0x20b0] ss:$8 sps:$4 sm:$0xff]  }
 0x494   : > { %10512 = vmatprep.subr.bf16.mxu1 %v14755_v6  ;;  %v14819_v6 = vld [vmem:[%s15815_s6 + $0x21b0] ss:$8 sps:$4 sm:$0xff]  }
 0x495   : > { %10422 = vmatmul.mubr.bf16.vlgmr.msra.gmra.mrb[60].mxu0 %v11466_v27  ;;  %v14824_v27 = vld [vmem:[%s15815_s6 + $0x20c4] ss:$8 sps:$4 sm:$0xff]  }
 0x496   : > { %10463 = vmatmul.mubr.bf16.vlgmr.msra.gmra.mrb[60].mxu1 %v11468_v48  ;;  %10472 = vmatpush1.bf16.msra.mxu0 %v14750_v51  ;;  %v14827_v48 = vld [vmem:[%s15815_s6 + $0x21c4] ss:$8 sps:$4 sm:$0xff]   ;;  %v14822_v51 = vld [vmem:[%s15815_s6 + $0x20c0] ss:$8 sps:$4 sm:$0xff]  }
 0x497   : > { %10513 = vmatpush1.bf16.msra.mxu1 %v14753_v56  ;;  %10473 = vmatprep.subr.bf16.mxu0 %v14758_v53  ;;  %v14825_v56 = vld [vmem:[%s15815_s6 + $0x21c0] ss:$8 sps:$4 sm:$0xff]   ;;  %v14830_v53 = vld [vmem:[%s15815_s6 + $0x20d4] ss:$8 sps:$4 sm:$0xff]  }
 0x498   : > { %10514 = vmatprep.subr.bf16.mxu1 %v14761_v54  ;;  %10503 = vmatprep.mubr.bf16.mxu0 %v11471_v52  ;;  %v14833_v54 = vld [vmem:[%s15815_s6 + $0x21d4] ss:$8 sps:$4 sm:$0xff]   ;;  %v14828_v52 = vld [vmem:[%s15815_s6 + $0x20d0] ss:$8 sps:$4 sm:$0xff]  }
 0x499   : > { %10544 = vmatprep.mubr.bf16.mxu1 %v11473_v55  ;;  %v14831_v55 = vld [vmem:[%s15815_s6 + $0x21d0] ss:$8 sps:$4 sm:$0xff]  }
 0x49a   : > { %10474 = vmatpush1.bf16.msra.mxu0 %v14756_v57  ;;  %v14836_v57 = vld [vmem:[%s15815_s6 + $0x20e4] ss:$8 sps:$4 sm:$0xff]  }
 0x49b   : > { %10515 = vmatpush1.bf16.msra.mxu1 %v14759_v16  ;;  %10475 = vmatprep.subr.bf16.mxu0 %v14764_v61  ;;  %v14839_v16 = vld [vmem:[%s15815_s6 + $0x21e4] ss:$8 sps:$4 sm:$0xff]   ;;  %v14834_v61 = vld [vmem:[%s15815_s6 + $0x20e0] ss:$8 sps:$4 sm:$0xff]  }
 0x49c   : > { %10516 = vmatprep.subr.bf16.mxu1 %v14767_v18  ;;  %v14837_v18 = vld [vmem:[%s15815_s6 + $0x21e0] ss:$8 sps:$4 sm:$0xff]  }
 0x49e   : > { %10476 = vmatpush1.bf16.msra.mxu0 %v14762_v31  ;;  %v14842_v31 = vld [vmem:[%s15815_s6 + $0x20f4] ss:$8 sps:$4 sm:$0xff]  }
 0x49f   : > { %10517 = vmatpush1.bf16.msra.mxu1 %v14765_v60  ;;  %10477 = vmatprep.subr.bf16.mxu0 %v14770_v20  ;;  %v14845_v60 = vld [vmem:[%s15815_s6 + $0x21f4] ss:$8 sps:$4 sm:$0xff]   ;;  %v14840_v20 = vld [vmem:[%s15815_s6 + $0x20f0] ss:$8 sps:$4 sm:$0xff]  }
 0x4a0   : > { %10518 = vmatprep.subr.bf16.mxu1 %v14773_v21  ;;  %v14843_v21 = vld [vmem:[%s15815_s6 + $0x21f0] ss:$8 sps:$4 sm:$0xff]  }
 0x4a2   : > { %10478 = vmatpush1.bf16.msra.mxu0 %v14768_v5  ;;  %v14852_v5 = vld [vmem:[%s15815_s6 + $0x2204] ss:$8 sps:$4 sm:$0xff]  }
 0x4a3   : > { %10519 = vmatpush1.bf16.msra.mxu1 %v14771_v24  ;;  %10479 = vmatprep.subr.bf16.mxu0 %v14776_v45  ;;  %v14855_v24 = vld [vmem:[%s15815_s6 + $0x2304] ss:$8 sps:$4 sm:$0xff]   ;;  %v11470_v45 = vcombine.low %v17153_v8, %v17153_v8 }
 0x4a4   : > { %10520 = vmatprep.subr.bf16.mxu1 %v14779_v3  ;;  %v11472_v3 = vcombine.low %v17156_v11, %v17156_v11 }
 0x4a6   : > { %10480 = vmatpush1.bf16.msra.mxu0 %v14774_v29  ;;  %v17237_v29 = vld [vmem:[%s15839_s18 + $0x110] sm:$0xff] }
 0x4a7   : > { %10521 = vmatpush1.bf16.msra.mxu1 %v14777_v4  ;;  %10481 = vmatprep.subr.bf16.mxu0 %v14782_v7  ;;  %v17240_v4 = vld [vmem:[%s15839_s18 + $0x118] sm:$0xff]  ;;  %v11475_v8 = vcombine.high %v17237_v29, %v17237_v29 }
 0x4a8   : > { %10522 = vmatprep.subr.bf16.mxu1 %v14785_v12  ;;  %v10177_v39 = vpop.f32.mrb[48].mxu0  ;;  %v14850_v7 = vld [vmem:[%s15815_s6 + $0x2200] ss:$8 sps:$4 sm:$0xff]   ;;  %v11477_v11 = vcombine.high %v17240_v4, %v17240_v4 }
 0x4a9   : > { %v10218_v40 = vpop.f32.mrb[48].mxu1  ;;  %v10178_v14 = vadd.f32 %v10177_v39, %v17106_v28  ;;  %v10179_v15 = vpop.f32.mrb[49].mxu0  ;;  %v14794_v28 = vld [vmem:[%s15815_s6 + $0x2074] ss:$8 sps:$4 sm:$0xff]   ;;  %v14853_v12 = vld [vmem:[%s15815_s6 + $0x2300] ss:$8 sps:$4 sm:$0xff]  }
 0x4aa   : > { %v10220_v32 = vpop.f32.mrb[49].mxu1  ;;  %v10180_v41 = vadd.f32 %v10179_v15, %v17110_v34  ;;  %v10181_v23 = vpop.f32.mrb[50].mxu0  ;;  %10482 = vmatpush1.bf16.msra.mxu0 %v14780_v9  ;;  %v14797_v34 = vld [vmem:[%s15815_s6 + $0x2174] ss:$8 sps:$4 sm:$0xff]   ;;  %v14864_v39 = vld [vmem:[%s15815_s6 + $0x2224] ss:$8 sps:$4 sm:$0xff]  }
 0x4ab   : > { %v10222_v44 = vpop.f32.mrb[50].mxu1  ;;  %10523 = vmatpush1.bf16.msra.mxu1 %v14783_v10  ;;  %v17190_v46 = vadd.f32 %v10218_v40, %v10178_v14  ;;  %v10182_v47 = vpop.f32.mrb[51].mxu0  ;;  %10483 = vmatprep.subr.bf16.mxu0 %v14788_v13  ;;  %v14858_v9 = vld [vmem:[%s15815_s6 + $0x2214] ss:$8 sps:$4 sm:$0xff]   ;;  %v14856_v13 = vld [vmem:[%s15815_s6 + $0x2210] ss:$8 sps:$4 sm:$0xff]  }
 0x4ac   : > { %v10223_v33 = vpop.f32.mrb[51].mxu1  ;;  %10524 = vmatprep.subr.bf16.mxu1 %v14791_v17  ;;  %v17194_v50 = vadd.f32 %v10220_v32, %v10180_v41  ;;  %v14861_v10 = vld [vmem:[%s15815_s6 + $0x2314] ss:$8 sps:$4 sm:$0xff]   ;;  %v14859_v17 = vld [vmem:[%s15815_s6 + $0x2310] ss:$8 sps:$4 sm:$0xff]  }
 0x4ad   : > { %v14867_v40 = vld [vmem:[%s15815_s6 + $0x2324] ss:$8 sps:$4 sm:$0xff]   ;;  %v14862_v14 = vld [vmem:[%s15815_s6 + $0x2220] ss:$8 sps:$4 sm:$0xff]   ;;  %v14870_v32 = vld [vmem:[%s15815_s6 + $0x2234] ss:$8 sps:$4 sm:$0xff]  }
 0x4ae   : > { %10484 = vmatpush1.bf16.msra.mxu0 %v14786_v63  ;;  %v14865_v15 = vld [vmem:[%s15815_s6 + $0x2320] ss:$8 sps:$4 sm:$0xff]   ;;  %v14873_v41 = vld [vmem:[%s15815_s6 + $0x2334] ss:$8 sps:$4 sm:$0xff]   ;;  %v14868_v23 = vld [vmem:[%s15815_s6 + $0x2230] ss:$8 sps:$4 sm:$0xff]  }
 0x4af   : > { %10525 = vmatpush1.bf16.msra.mxu1 %v14789_v22  ;;  %10485 = vmatprep.subr.bf16.mxu0 %v14794_v28  ;;  %v14871_v44 = vld [vmem:[%s15815_s6 + $0x2330] ss:$8 sps:$4 sm:$0xff]   ;;  %v14876_v63 = vld [vmem:[%s15815_s6 + $0x2244] ss:$8 sps:$4 sm:$0xff]   ;;  %v14874_v47 = vld [vmem:[%s15815_s6 + $0x2240] ss:$8 sps:$4 sm:$0xff]  }
 0x4b0   : > { %10526 = vmatprep.subr.bf16.mxu1 %v14797_v34  ;;  %v14879_v22 = vld [vmem:[%s15815_s6 + $0x2344] ss:$8 sps:$4 sm:$0xff]   ;;  %v14877_v33 = vld [vmem:[%s15815_s6 + $0x2340] ss:$8 sps:$4 sm:$0xff]   ;;  %v14882_v28 = vld [vmem:[%s15815_s6 + $0x2254] ss:$8 sps:$4 sm:$0xff]  }
 0x4b1   : > { %v14885_v34 = vld [vmem:[%s15815_s6 + $0x2354] ss:$8 sps:$4 sm:$0xff]  }
 0x4b2   : > { %10486 = vmatpush1.bf16.msra.mxu0 %v14792_v1  ;;  %v14880_v1 = vld [vmem:[%s15815_s6 + $0x2250] ss:$8 sps:$4 sm:$0xff]  }
 0x4b3   : > { %10527 = vmatpush1.bf16.msra.mxu1 %v14795_v30  ;;  %10487 = vmatprep.subr.bf16.mxu0 %v14800_v26  ;;  %v14883_v30 = vld [vmem:[%s15815_s6 + $0x2350] ss:$8 sps:$4 sm:$0xff]   ;;  %v14888_v26 = vld [vmem:[%s15815_s6 + $0x2264] ss:$8 sps:$4 sm:$0xff]  }
 0x4b4   : > { %10528 = vmatprep.subr.bf16.mxu1 %v14803_v38  ;;  %v14891_v38 = vld [vmem:[%s15815_s6 + $0x2364] ss:$8 sps:$4 sm:$0xff]  }
 0x4b6   : > { %10488 = vmatpush1.bf16.msra.mxu0 %v14798_v25 }
 0x4b7   : > { %10529 = vmatpush1.bf16.msra.mxu1 %v14801_v36  ;;  %10489 = vmatprep.subr.bf16.mxu0 %v14806_v35 }
 0x4b8   : > { %10530 = vmatprep.subr.bf16.mxu1 %v14809_v37 }
 0x4ba   : > { %10490 = vmatpush1.bf16.msra.mxu0 %v14804_v58 }
 0x4bb   : > { %10531 = vmatpush1.bf16.msra.mxu1 %v14807_v59  ;;  %10491 = vmatprep.subr.bf16.mxu0 %v14812_v43 }
 0x4bc   : > { %10532 = vmatprep.subr.bf16.mxu1 %v14815_v62 }
 0x4be   : > { %10492 = vmatpush1.bf16.msra.mxu0 %v14810_v19  ;;  %v14886_v19 = vld [vmem:[%s15815_s6 + $0x2260] ss:$8 sps:$4 sm:$0xff]  }
 0x4bf   : > { %10533 = vmatpush1.bf16.msra.mxu1 %v14813_v42  ;;  %10493 = vmatprep.subr.bf16.mxu0 %v14818_v0  ;;  %v14889_v42 = vld [vmem:[%s15815_s6 + $0x2360] ss:$8 sps:$4 sm:$0xff]  }
 0x4c0   : > { %10534 = vmatprep.subr.bf16.mxu1 %v14821_v2 }
 0x4c2   : > { %10494 = vmatpush1.bf16.msra.mxu0 %v14816_v49 }
 0x4c3   : > { %10535 = vmatpush1.bf16.msra.mxu1 %v14819_v6  ;;  %10495 = vmatprep.subr.bf16.mxu0 %v14824_v27  ;;  %v14892_v27 = vld [vmem:[%s15815_s6 + $0x2270] ss:$8 sps:$4 sm:$0xff]  }
 0x4c4   : > { %10536 = vmatprep.subr.bf16.mxu1 %v14827_v48  ;;  %v14895_v48 = vld [vmem:[%s15815_s6 + $0x2370] ss:$8 sps:$4 sm:$0xff]  }
 0x4c6   : > { %10496 = vmatpush1.bf16.msra.mxu0 %v14822_v51  ;;  %v14900_v51 = vld [vmem:[%s15815_s6 + $0x2284] ss:$8 sps:$4 sm:$0xff]  }
 0x4c7   : > { %10537 = vmatpush1.bf16.msra.mxu1 %v14825_v56  ;;  %10497 = vmatprep.subr.bf16.mxu0 %v14830_v53  ;;  %v14903_v56 = vld [vmem:[%s15815_s6 + $0x2384] ss:$8 sps:$4 sm:$0xff]   ;;  %v14898_v53 = vld [vmem:[%s15815_s6 + $0x2280] ss:$8 sps:$4 sm:$0xff]  }
 0x4c8   : > { %10538 = vmatprep.subr.bf16.mxu1 %v14833_v54  ;;  %v14901_v54 = vld [vmem:[%s15815_s6 + $0x2380] ss:$8 sps:$4 sm:$0xff]  }
 0x4ca   : > { %10498 = vmatpush1.bf16.msra.mxu0 %v14828_v52  ;;  %v14906_v52 = vld [vmem:[%s15815_s6 + $0x2294] ss:$8 sps:$4 sm:$0xff]  }
 0x4cb   : > { %10539 = vmatpush1.bf16.msra.mxu1 %v14831_v55  ;;  %10499 = vmatprep.subr.bf16.mxu0 %v14836_v57  ;;  %v14909_v55 = vld [vmem:[%s15815_s6 + $0x2394] ss:$8 sps:$4 sm:$0xff]   ;;  %v14904_v57 = vld [vmem:[%s15815_s6 + $0x2290] ss:$8 sps:$4 sm:$0xff]  }
 0x4cc   : > { %10540 = vmatprep.subr.bf16.mxu1 %v14839_v16  ;;  %v14907_v16 = vld [vmem:[%s15815_s6 + $0x2390] ss:$8 sps:$4 sm:$0xff]  }
 0x4ce   : > { %10500 = vmatpush1.bf16.msra.mxu0 %v14834_v61  ;;  %v14912_v61 = vld [vmem:[%s15815_s6 + $0x22a4] ss:$8 sps:$4 sm:$0xff]  }
 0x4cf   : > { %10541 = vmatpush1.bf16.msra.mxu1 %v14837_v18  ;;  %10501 = vmatprep.subr.bf16.mxu0 %v14842_v31  ;;  %v14915_v18 = vld [vmem:[%s15815_s6 + $0x23a4] ss:$8 sps:$4 sm:$0xff]   ;;  %v14910_v31 = vld [vmem:[%s15815_s6 + $0x22a0] ss:$8 sps:$4 sm:$0xff]  }
 0x4d0   : > { %10542 = vmatprep.subr.bf16.mxu1 %v14845_v60  ;;  %v14913_v60 = vld [vmem:[%s15815_s6 + $0x23a0] ss:$8 sps:$4 sm:$0xff]  }
 0x4d2   : > { %10502 = vmatpush1.bf16.msra.mxu0 %v14840_v20  ;;  %v14918_v20 = vld [vmem:[%s15815_s6 + $0x22b4] ss:$8 sps:$4 sm:$0xff]  }
 0x4d3   : > { %10543 = vmatpush1.bf16.msra.mxu1 %v14843_v21  ;;  %10553 = vmatprep.subr.bf16.mxu0 %v14852_v5  ;;  %v14921_v21 = vld [vmem:[%s15815_s6 + $0x23b4] ss:$8 sps:$4 sm:$0xff]   ;;  %v14916_v5 = vld [vmem:[%s15815_s6 + $0x22b0] ss:$8 sps:$4 sm:$0xff]  }
 0x4d4   : > { %10594 = vmatprep.subr.bf16.mxu1 %v14855_v24  ;;  %v14919_v24 = vld [vmem:[%s15815_s6 + $0x23b0] ss:$8 sps:$4 sm:$0xff]  }
 0x4d5   : > { %10504 = vmatmul.mubr.bf16.vlgmr.msra.gmra.mrb[64].mxu0 %v11470_v45  ;;  %v14924_v45 = vld [vmem:[%s15815_s6 + $0x22c4] ss:$8 sps:$4 sm:$0xff]  }
 0x4d6   : > { %10545 = vmatmul.mubr.bf16.vlgmr.msra.gmra.mrb[64].mxu1 %v11472_v3  ;;  %10554 = vmatpush1.bf16.msra.mxu0 %v14850_v7  ;;  %v14927_v3 = vld [vmem:[%s15815_s6 + $0x23c4] ss:$8 sps:$4 sm:$0xff]   ;;  %v14922_v7 = vld [vmem:[%s15815_s6 + $0x22c0] ss:$8 sps:$4 sm:$0xff]  }
 0x4d7   : > { %10595 = vmatpush1.bf16.msra.mxu1 %v14853_v12  ;;  %10555 = vmatprep.subr.bf16.mxu0 %v14858_v9  ;;  %v14925_v12 = vld [vmem:[%s15815_s6 + $0x23c0] ss:$8 sps:$4 sm:$0xff]   ;;  %v14930_v9 = vld [vmem:[%s15815_s6 + $0x22d4] ss:$8 sps:$4 sm:$0xff]  }
 0x4d8   : > { %10596 = vmatprep.subr.bf16.mxu1 %v14861_v10  ;;  %10585 = vmatprep.mubr.bf16.mxu0 %v11475_v8  ;;  %v14933_v10 = vld [vmem:[%s15815_s6 + $0x23d4] ss:$8 sps:$4 sm:$0xff]   ;;  %v14928_v8 = vld [vmem:[%s15815_s6 + $0x22d0] ss:$8 sps:$4 sm:$0xff]  }
 0x4d9   : > { %10626 = vmatprep.mubr.bf16.mxu1 %v11477_v11  ;;  %v14931_v11 = vld [vmem:[%s15815_s6 + $0x23d0] ss:$8 sps:$4 sm:$0xff]  }
 0x4da   : > { %10556 = vmatpush1.bf16.msra.mxu0 %v14856_v13  ;;  %v14936_v13 = vld [vmem:[%s15815_s6 + $0x22e4] ss:$8 sps:$4 sm:$0xff]  }
 0x4db   : > { %10597 = vmatpush1.bf16.msra.mxu1 %v14859_v17  ;;  %10557 = vmatprep.subr.bf16.mxu0 %v14864_v39  ;;  %v14939_v17 = vld [vmem:[%s15815_s6 + $0x23e4] ss:$8 sps:$4 sm:$0xff]   ;;  %v14934_v39 = vld [vmem:[%s15815_s6 + $0x22e0] ss:$8 sps:$4 sm:$0xff]  }
 0x4dc   : > { %10598 = vmatprep.subr.bf16.mxu1 %v14867_v40  ;;  %v14937_v40 = vld [vmem:[%s15815_s6 + $0x23e0] ss:$8 sps:$4 sm:$0xff]  }
 0x4de   : > { %10558 = vmatpush1.bf16.msra.mxu0 %v14862_v14  ;;  %v14942_v14 = vld [vmem:[%s15815_s6 + $0x22f4] ss:$8 sps:$4 sm:$0xff]  }
 0x4df   : > { %10599 = vmatpush1.bf16.msra.mxu1 %v14865_v15  ;;  %10559 = vmatprep.subr.bf16.mxu0 %v14870_v32  ;;  %v14945_v15 = vld [vmem:[%s15815_s6 + $0x23f4] ss:$8 sps:$4 sm:$0xff]   ;;  %v14940_v32 = vld [vmem:[%s15815_s6 + $0x22f0] ss:$8 sps:$4 sm:$0xff]  }
 0x4e0   : > { %10600 = vmatprep.subr.bf16.mxu1 %v14873_v41  ;;  %v14943_v41 = vld [vmem:[%s15815_s6 + $0x23f0] ss:$8 sps:$4 sm:$0xff]  }
 0x4e2   : > { %10560 = vmatpush1.bf16.msra.mxu0 %v14868_v23  ;;  %v14952_v23 = vld [vmem:[%s15815_s6 + $0x2404] ss:$8 sps:$4 sm:$0xff]  }
 0x4e3   : > { %10601 = vmatpush1.bf16.msra.mxu1 %v14871_v44  ;;  %10561 = vmatprep.subr.bf16.mxu0 %v14876_v63  ;;  %v14955_v44 = vld [vmem:[%s15815_s6 + $0x2504] ss:$8 sps:$4 sm:$0xff]   ;;  %v11474_v63 = vcombine.low %v17237_v29, %v17237_v29 }
 0x4e4   : > { %10602 = vmatprep.subr.bf16.mxu1 %v14879_v22  ;;  %v11476_v22 = vcombine.low %v17240_v4, %v17240_v4 }
 0x4e6   : > { %10562 = vmatpush1.bf16.msra.mxu0 %v14874_v47  ;;  %v17321_v47 = vld [vmem:[%s15839_s18 + $0x120] sm:$0xff] }
 0x4e7   : > { %10603 = vmatpush1.bf16.msra.mxu1 %v14877_v33  ;;  %10563 = vmatprep.subr.bf16.mxu0 %v14882_v28  ;;  %v17324_v33 = vld [vmem:[%s15839_s18 + $0x128] sm:$0xff]  ;;  %v14950_v28 = vld [vmem:[%s15815_s6 + $0x2400] ss:$8 sps:$4 sm:$0xff]   ;;  %v11479_v29 = vcombine.high %v17321_v47, %v17321_v47 }
 0x4e8   : > { %10604 = vmatprep.subr.bf16.mxu1 %v14885_v34  ;;  %v10259_v25 = vpop.f32.mrb[52].mxu0  ;;  %v14953_v34 = vld [vmem:[%s15815_s6 + $0x2500] ss:$8 sps:$4 sm:$0xff]   ;;  %v11481_v4 = vcombine.high %v17324_v33, %v17324_v33 }
 0x4e9   : > { %v10300_v36 = vpop.f32.mrb[52].mxu1  ;;  %v10260_v35 = vadd.f32 %v10259_v25, %v17190_v46  ;;  %v10261_v37 = vpop.f32.mrb[53].mxu0  ;;  %v14894_v46 = vld [vmem:[%s15815_s6 + $0x2274] ss:$8 sps:$4 sm:$0xff]   ;;  %v14964_v25 = vld [vmem:[%s15815_s6 + $0x2424] ss:$8 sps:$4 sm:$0xff]  }
 0x4ea   : > { %v10302_v58 = vpop.f32.mrb[53].mxu1  ;;  %v10262_v59 = vadd.f32 %v10261_v37, %v17194_v50  ;;  %v10263_v43 = vpop.f32.mrb[54].mxu0  ;;  %10564 = vmatpush1.bf16.msra.mxu0 %v14880_v1  ;;  %v14897_v50 = vld [vmem:[%s15815_s6 + $0x2374] ss:$8 sps:$4 sm:$0xff]   ;;  %v14965_v37 = vld [vmem:[%s15815_s6 + $0x2520] ss:$8 sps:$4 sm:$0xff]  }
 0x4eb   : > { %v10304_v62 = vpop.f32.mrb[54].mxu1  ;;  %10605 = vmatpush1.bf16.msra.mxu1 %v14883_v30  ;;  %v17274_v0 = vadd.f32 %v10300_v36, %v10260_v35  ;;  %v10264_v2 = vpop.f32.mrb[55].mxu0  ;;  %10565 = vmatprep.subr.bf16.mxu0 %v14888_v26  ;;  %v14958_v1 = vld [vmem:[%s15815_s6 + $0x2414] ss:$8 sps:$4 sm:$0xff]   ;;  %v14956_v26 = vld [vmem:[%s15815_s6 + $0x2410] ss:$8 sps:$4 sm:$0xff]  }
 0x4ec   : > { %v10305_v49 = vpop.f32.mrb[55].mxu1  ;;  %10606 = vmatprep.subr.bf16.mxu1 %v14891_v38  ;;  %v17278_v6 = vadd.f32 %v10302_v58, %v10262_v59  ;;  %v14961_v30 = vld [vmem:[%s15815_s6 + $0x2514] ss:$8 sps:$4 sm:$0xff]   ;;  %v14959_v38 = vld [vmem:[%s15815_s6 + $0x2510] ss:$8 sps:$4 sm:$0xff]  }
 0x4ed   : > { %v14967_v36 = vld [vmem:[%s15815_s6 + $0x2524] ss:$8 sps:$4 sm:$0xff]   ;;  %v14962_v35 = vld [vmem:[%s15815_s6 + $0x2420] ss:$8 sps:$4 sm:$0xff]   ;;  %v14970_v58 = vld [vmem:[%s15815_s6 + $0x2434] ss:$8 sps:$4 sm:$0xff]  }
 0x4ee   : > { %10566 = vmatpush1.bf16.msra.mxu0 %v14886_v19  ;;  %v14973_v59 = vld [vmem:[%s15815_s6 + $0x2534] ss:$8 sps:$4 sm:$0xff]   ;;  %v14968_v43 = vld [vmem:[%s15815_s6 + $0x2430] ss:$8 sps:$4 sm:$0xff]   ;;  %v14976_v19 = vld [vmem:[%s15815_s6 + $0x2444] ss:$8 sps:$4 sm:$0xff]  }
 0x4ef   : > { %10607 = vmatpush1.bf16.msra.mxu1 %v14889_v42  ;;  %10567 = vmatprep.subr.bf16.mxu0 %v14894_v46  ;;  %v14971_v62 = vld [vmem:[%s15815_s6 + $0x2530] ss:$8 sps:$4 sm:$0xff]   ;;  %v14979_v42 = vld [vmem:[%s15815_s6 + $0x2544] ss:$8 sps:$4 sm:$0xff]   ;;  %v14974_v2 = vld [vmem:[%s15815_s6 + $0x2440] ss:$8 sps:$4 sm:$0xff]  }
 0x4f0   : > { %10608 = vmatprep.subr.bf16.mxu1 %v14897_v50  ;;  %v14977_v49 = vld [vmem:[%s15815_s6 + $0x2540] ss:$8 sps:$4 sm:$0xff]   ;;  %v14982_v46 = vld [vmem:[%s15815_s6 + $0x2454] ss:$8 sps:$4 sm:$0xff]  }
 0x4f1   : > { %v14985_v50 = vld [vmem:[%s15815_s6 + $0x2554] ss:$8 sps:$4 sm:$0xff]  }
 0x4f2   : > { %10568 = vmatpush1.bf16.msra.mxu0 %v14892_v27  ;;  %v14980_v27 = vld [vmem:[%s15815_s6 + $0x2450] ss:$8 sps:$4 sm:$0xff]  }
 0x4f3   : > { %10609 = vmatpush1.bf16.msra.mxu1 %v14895_v48  ;;  %10569 = vmatprep.subr.bf16.mxu0 %v14900_v51  ;;  %v14983_v48 = vld [vmem:[%s15815_s6 + $0x2550] ss:$8 sps:$4 sm:$0xff]   ;;  %v14988_v51 = vld [vmem:[%s15815_s6 + $0x2464] ss:$8 sps:$4 sm:$0xff]  }
 0x4f4   : > { %10610 = vmatprep.subr.bf16.mxu1 %v14903_v56  ;;  %v14991_v56 = vld [vmem:[%s15815_s6 + $0x2564] ss:$8 sps:$4 sm:$0xff]  }
 0x4f6   : > { %10570 = vmatpush1.bf16.msra.mxu0 %v14898_v53 }
 0x4f7   : > { %10611 = vmatpush1.bf16.msra.mxu1 %v14901_v54  ;;  %10571 = vmatprep.subr.bf16.mxu0 %v14906_v52 }
 0x4f8   : > { %10612 = vmatprep.subr.bf16.mxu1 %v14909_v55 }
 0x4fa   : > { %10572 = vmatpush1.bf16.msra.mxu0 %v14904_v57 }
 0x4fb   : > { %10613 = vmatpush1.bf16.msra.mxu1 %v14907_v16  ;;  %10573 = vmatprep.subr.bf16.mxu0 %v14912_v61 }
 0x4fc   : > { %10614 = vmatprep.subr.bf16.mxu1 %v14915_v18 }
 0x4fe   : > { %10574 = vmatpush1.bf16.msra.mxu0 %v14910_v31  ;;  %v14986_v31 = vld [vmem:[%s15815_s6 + $0x2460] ss:$8 sps:$4 sm:$0xff]  }
 0x4ff   : > { %10615 = vmatpush1.bf16.msra.mxu1 %v14913_v60  ;;  %10575 = vmatprep.subr.bf16.mxu0 %v14918_v20  ;;  %v14989_v60 = vld [vmem:[%s15815_s6 + $0x2560] ss:$8 sps:$4 sm:$0xff]  }
 0x500   : > { %10616 = vmatprep.subr.bf16.mxu1 %v14921_v21 }
 0x502   : > { %10576 = vmatpush1.bf16.msra.mxu0 %v14916_v5 }
 0x503   : > { %10617 = vmatpush1.bf16.msra.mxu1 %v14919_v24  ;;  %10577 = vmatprep.subr.bf16.mxu0 %v14924_v45  ;;  %v14992_v45 = vld [vmem:[%s15815_s6 + $0x2470] ss:$8 sps:$4 sm:$0xff]  }
 0x504   : > { %10618 = vmatprep.subr.bf16.mxu1 %v14927_v3  ;;  %v14995_v3 = vld [vmem:[%s15815_s6 + $0x2570] ss:$8 sps:$4 sm:$0xff]  }
 0x506   : > { %10578 = vmatpush1.bf16.msra.mxu0 %v14922_v7  ;;  %v15000_v7 = vld [vmem:[%s15815_s6 + $0x2484] ss:$8 sps:$4 sm:$0xff]  }
 0x507   : > { %10619 = vmatpush1.bf16.msra.mxu1 %v14925_v12  ;;  %10579 = vmatprep.subr.bf16.mxu0 %v14930_v9  ;;  %v15003_v12 = vld [vmem:[%s15815_s6 + $0x2584] ss:$8 sps:$4 sm:$0xff]   ;;  %v14998_v9 = vld [vmem:[%s15815_s6 + $0x2480] ss:$8 sps:$4 sm:$0xff]  }
 0x508   : > { %10620 = vmatprep.subr.bf16.mxu1 %v14933_v10  ;;  %v15001_v10 = vld [vmem:[%s15815_s6 + $0x2580] ss:$8 sps:$4 sm:$0xff]  }
 0x50a   : > { %10580 = vmatpush1.bf16.msra.mxu0 %v14928_v8  ;;  %v15006_v8 = vld [vmem:[%s15815_s6 + $0x2494] ss:$8 sps:$4 sm:$0xff]  }
 0x50b   : > { %10621 = vmatpush1.bf16.msra.mxu1 %v14931_v11  ;;  %10581 = vmatprep.subr.bf16.mxu0 %v14936_v13  ;;  %v15009_v11 = vld [vmem:[%s15815_s6 + $0x2594] ss:$8 sps:$4 sm:$0xff]   ;;  %v15004_v13 = vld [vmem:[%s15815_s6 + $0x2490] ss:$8 sps:$4 sm:$0xff]  }
 0x50c   : > { %10622 = vmatprep.subr.bf16.mxu1 %v14939_v17  ;;  %v15007_v17 = vld [vmem:[%s15815_s6 + $0x2590] ss:$8 sps:$4 sm:$0xff]  }
 0x50e   : > { %10582 = vmatpush1.bf16.msra.mxu0 %v14934_v39  ;;  %v15012_v39 = vld [vmem:[%s15815_s6 + $0x24a4] ss:$8 sps:$4 sm:$0xff]  }
 0x50f   : > { %10623 = vmatpush1.bf16.msra.mxu1 %v14937_v40  ;;  %10583 = vmatprep.subr.bf16.mxu0 %v14942_v14  ;;  %v15015_v40 = vld [vmem:[%s15815_s6 + $0x25a4] ss:$8 sps:$4 sm:$0xff]   ;;  %v15010_v14 = vld [vmem:[%s15815_s6 + $0x24a0] ss:$8 sps:$4 sm:$0xff]  }
 0x510   : > { %10624 = vmatprep.subr.bf16.mxu1 %v14945_v15  ;;  %v15013_v15 = vld [vmem:[%s15815_s6 + $0x25a0] ss:$8 sps:$4 sm:$0xff]  }
 0x512   : > { %10584 = vmatpush1.bf16.msra.mxu0 %v14940_v32  ;;  %v15018_v32 = vld [vmem:[%s15815_s6 + $0x24b4] ss:$8 sps:$4 sm:$0xff]  }
 0x513   : > { %10625 = vmatpush1.bf16.msra.mxu1 %v14943_v41  ;;  %10635 = vmatprep.subr.bf16.mxu0 %v14952_v23  ;;  %v15021_v41 = vld [vmem:[%s15815_s6 + $0x25b4] ss:$8 sps:$4 sm:$0xff]   ;;  %v15016_v23 = vld [vmem:[%s15815_s6 + $0x24b0] ss:$8 sps:$4 sm:$0xff]  }
 0x514   : > { %10676 = vmatprep.subr.bf16.mxu1 %v14955_v44  ;;  %v15019_v44 = vld [vmem:[%s15815_s6 + $0x25b0] ss:$8 sps:$4 sm:$0xff]  }
 0x515   : > { %10586 = vmatmul.mubr.bf16.vlgmr.msra.gmra.mrb[68].mxu0 %v11474_v63  ;;  %v15024_v63 = vld [vmem:[%s15815_s6 + $0x24c4] ss:$8 sps:$4 sm:$0xff]  }
 0x516   : > { %10627 = vmatmul.mubr.bf16.vlgmr.msra.gmra.mrb[68].mxu1 %v11476_v22  ;;  %10636 = vmatpush1.bf16.msra.mxu0 %v14950_v28  ;;  %v15027_v22 = vld [vmem:[%s15815_s6 + $0x25c4] ss:$8 sps:$4 sm:$0xff]   ;;  %v15022_v28 = vld [vmem:[%s15815_s6 + $0x24c0] ss:$8 sps:$4 sm:$0xff]  }
 0x517   : > { %10677 = vmatpush1.bf16.msra.mxu1 %v14953_v34  ;;  %10637 = vmatprep.subr.bf16.mxu0 %v14958_v1  ;;  %v15025_v34 = vld [vmem:[%s15815_s6 + $0x25c0] ss:$8 sps:$4 sm:$0xff]   ;;  %v15030_v1 = vld [vmem:[%s15815_s6 + $0x24d4] ss:$8 sps:$4 sm:$0xff]  }
 0x518   : > { %10678 = vmatprep.subr.bf16.mxu1 %v14961_v30  ;;  %10667 = vmatprep.mubr.bf16.mxu0 %v11479_v29  ;;  %v15033_v30 = vld [vmem:[%s15815_s6 + $0x25d4] ss:$8 sps:$4 sm:$0xff]   ;;  %v15028_v29 = vld [vmem:[%s15815_s6 + $0x24d0] ss:$8 sps:$4 sm:$0xff]  }
 0x519   : > { %10708 = vmatprep.mubr.bf16.mxu1 %v11481_v4  ;;  %v15031_v4 = vld [vmem:[%s15815_s6 + $0x25d0] ss:$8 sps:$4 sm:$0xff]  }
 0x51a   : > { %10638 = vmatpush1.bf16.msra.mxu0 %v14956_v26  ;;  %v15036_v26 = vld [vmem:[%s15815_s6 + $0x24e4] ss:$8 sps:$4 sm:$0xff]  }
 0x51b   : > { %10679 = vmatpush1.bf16.msra.mxu1 %v14959_v38  ;;  %10639 = vmatprep.subr.bf16.mxu0 %v14964_v25  ;;  %v15039_v38 = vld [vmem:[%s15815_s6 + $0x25e4] ss:$8 sps:$4 sm:$0xff]   ;;  %v15034_v25 = vld [vmem:[%s15815_s6 + $0x24e0] ss:$8 sps:$4 sm:$0xff]  }
 0x51c   : > { %10680 = vmatprep.subr.bf16.mxu1 %v14967_v36  ;;  %v15037_v36 = vld [vmem:[%s15815_s6 + $0x25e0] ss:$8 sps:$4 sm:$0xff]  }
 0x51e   : > { %10640 = vmatpush1.bf16.msra.mxu0 %v14962_v35  ;;  %v15042_v35 = vld [vmem:[%s15815_s6 + $0x24f4] ss:$8 sps:$4 sm:$0xff]  }
 0x51f   : > { %10681 = vmatpush1.bf16.msra.mxu1 %v14965_v37  ;;  %10641 = vmatprep.subr.bf16.mxu0 %v14970_v58  ;;  %v15045_v37 = vld [vmem:[%s15815_s6 + $0x25f4] ss:$8 sps:$4 sm:$0xff]   ;;  %v15040_v58 = vld [vmem:[%s15815_s6 + $0x24f0] ss:$8 sps:$4 sm:$0xff]  }
 0x520   : > { %10682 = vmatprep.subr.bf16.mxu1 %v14973_v59  ;;  %v15043_v59 = vld [vmem:[%s15815_s6 + $0x25f0] ss:$8 sps:$4 sm:$0xff]  }
 0x522   : > { %10642 = vmatpush1.bf16.msra.mxu0 %v14968_v43  ;;  %v15052_v43 = vld [vmem:[%s15815_s6 + $0x2604] ss:$8 sps:$4 sm:$0xff]  }
 0x523   : > { %10683 = vmatpush1.bf16.msra.mxu1 %v14971_v62  ;;  %10643 = vmatprep.subr.bf16.mxu0 %v14976_v19  ;;  %v15055_v62 = vld [vmem:[%s15815_s6 + $0x2704] ss:$8 sps:$4 sm:$0xff]   ;;  %v11478_v19 = vcombine.low %v17321_v47, %v17321_v47 }
 0x524   : > { %10684 = vmatprep.subr.bf16.mxu1 %v14979_v42  ;;  %v11480_v42 = vcombine.low %v17324_v33, %v17324_v33 }
 0x526   : > { %10644 = vmatpush1.bf16.msra.mxu0 %v14974_v2  ;;  %v17405_v2 = vld [vmem:[%s15839_s18 + $0x130] sm:$0xff] }
 0x527   : > { %10685 = vmatpush1.bf16.msra.mxu1 %v14977_v49  ;;  %10645 = vmatprep.subr.bf16.mxu0 %v14982_v46  ;;  %v17408_v49 = vld [vmem:[%s15839_s18 + $0x138] sm:$0xff]  ;;  %v11483_v47 = vcombine.high %v17405_v2, %v17405_v2 }
 0x528   : > { %10686 = vmatprep.subr.bf16.mxu1 %v14985_v50  ;;  %v10341_v53 = vpop.f32.mrb[56].mxu0  ;;  %v15050_v46 = vld [vmem:[%s15815_s6 + $0x2600] ss:$8 sps:$4 sm:$0xff]   ;;  %v11485_v33 = vcombine.high %v17408_v49, %v17408_v49 }
 0x529   : > { %v10382_v54 = vpop.f32.mrb[56].mxu1  ;;  %v10342_v52 = vadd.f32 %v10341_v53, %v17274_v0  ;;  %v10343_v55 = vpop.f32.mrb[57].mxu0  ;;  %v14994_v0 = vld [vmem:[%s15815_s6 + $0x2474] ss:$8 sps:$4 sm:$0xff]   ;;  %v15053_v50 = vld [vmem:[%s15815_s6 + $0x2700] ss:$8 sps:$4 sm:$0xff]  }
 0x52a   : > { %v10384_v57 = vpop.f32.mrb[57].mxu1  ;;  %v10344_v16 = vadd.f32 %v10343_v55, %v17278_v6  ;;  %v10345_v61 = vpop.f32.mrb[58].mxu0  ;;  %10646 = vmatpush1.bf16.msra.mxu0 %v14980_v27  ;;  %v14997_v6 = vld [vmem:[%s15815_s6 + $0x2574] ss:$8 sps:$4 sm:$0xff]   ;;  %v15064_v53 = vld [vmem:[%s15815_s6 + $0x2624] ss:$8 sps:$4 sm:$0xff]  }
 0x52b   : > { %v10386_v18 = vpop.f32.mrb[58].mxu1  ;;  %10687 = vmatpush1.bf16.msra.mxu1 %v14983_v48  ;;  %v17358_v20 = vadd.f32 %v10382_v54, %v10342_v52  ;;  %v10346_v21 = vpop.f32.mrb[59].mxu0  ;;  %10647 = vmatprep.subr.bf16.mxu0 %v14988_v51  ;;  %v15058_v27 = vld [vmem:[%s15815_s6 + $0x2614] ss:$8 sps:$4 sm:$0xff]   ;;  %v15056_v51 = vld [vmem:[%s15815_s6 + $0x2610] ss:$8 sps:$4 sm:$0xff]  }
 0x52c   : > { %v10387_v5 = vpop.f32.mrb[59].mxu1  ;;  %10688 = vmatprep.subr.bf16.mxu1 %v14991_v56  ;;  %v17362_v24 = vadd.f32 %v10384_v57, %v10344_v16  ;;  %v15061_v48 = vld [vmem:[%s15815_s6 + $0x2714] ss:$8 sps:$4 sm:$0xff]   ;;  %v15059_v56 = vld [vmem:[%s15815_s6 + $0x2710] ss:$8 sps:$4 sm:$0xff]  }
 0x52d   : > { %v15067_v54 = vld [vmem:[%s15815_s6 + $0x2724] ss:$8 sps:$4 sm:$0xff]   ;;  %v15062_v52 = vld [vmem:[%s15815_s6 + $0x2620] ss:$8 sps:$4 sm:$0xff]   ;;  %v15070_v57 = vld [vmem:[%s15815_s6 + $0x2634] ss:$8 sps:$4 sm:$0xff]  }
 0x52e   : > { %10648 = vmatpush1.bf16.msra.mxu0 %v14986_v31  ;;  %v15065_v55 = vld [vmem:[%s15815_s6 + $0x2720] ss:$8 sps:$4 sm:$0xff]   ;;  %v15073_v16 = vld [vmem:[%s15815_s6 + $0x2734] ss:$8 sps:$4 sm:$0xff]   ;;  %v15068_v61 = vld [vmem:[%s15815_s6 + $0x2630] ss:$8 sps:$4 sm:$0xff]  }
 0x52f   : > { %10689 = vmatpush1.bf16.msra.mxu1 %v14989_v60  ;;  %10649 = vmatprep.subr.bf16.mxu0 %v14994_v0  ;;  %v15071_v18 = vld [vmem:[%s15815_s6 + $0x2730] ss:$8 sps:$4 sm:$0xff]   ;;  %v15076_v31 = vld [vmem:[%s15815_s6 + $0x2644] ss:$8 sps:$4 sm:$0xff]   ;;  %v15074_v21 = vld [vmem:[%s15815_s6 + $0x2640] ss:$8 sps:$4 sm:$0xff]  }
 0x530   : > { %10690 = vmatprep.subr.bf16.mxu1 %v14997_v6  ;;  %v15079_v60 = vld [vmem:[%s15815_s6 + $0x2744] ss:$8 sps:$4 sm:$0xff]   ;;  %v15077_v5 = vld [vmem:[%s15815_s6 + $0x2740] ss:$8 sps:$4 sm:$0xff]   ;;  %v15082_v0 = vld [vmem:[%s15815_s6 + $0x2654] ss:$8 sps:$4 sm:$0xff]  }
 0x531   : > { %v15085_v6 = vld [vmem:[%s15815_s6 + $0x2754] ss:$8 sps:$4 sm:$0xff]  }
 0x532   : > { %10650 = vmatpush1.bf16.msra.mxu0 %v14992_v45  ;;  %v15080_v45 = vld [vmem:[%s15815_s6 + $0x2650] ss:$8 sps:$4 sm:$0xff]  }
 0x533   : > { %10691 = vmatpush1.bf16.msra.mxu1 %v14995_v3  ;;  %10651 = vmatprep.subr.bf16.mxu0 %v15000_v7  ;;  %v15083_v3 = vld [vmem:[%s15815_s6 + $0x2750] ss:$8 sps:$4 sm:$0xff]   ;;  %v15088_v7 = vld [vmem:[%s15815_s6 + $0x2664] ss:$8 sps:$4 sm:$0xff]  }
 0x534   : > { %10692 = vmatprep.subr.bf16.mxu1 %v15003_v12  ;;  %v15091_v12 = vld [vmem:[%s15815_s6 + $0x2764] ss:$8 sps:$4 sm:$0xff]  }
 0x536   : > { %10652 = vmatpush1.bf16.msra.mxu0 %v14998_v9 }
 0x537   : > { %10693 = vmatpush1.bf16.msra.mxu1 %v15001_v10  ;;  %10653 = vmatprep.subr.bf16.mxu0 %v15006_v8 }
 0x538   : > { %10694 = vmatprep.subr.bf16.mxu1 %v15009_v11 }
 0x53a   : > { %10654 = vmatpush1.bf16.msra.mxu0 %v15004_v13 }
 0x53b   : > { %10695 = vmatpush1.bf16.msra.mxu1 %v15007_v17  ;;  %10655 = vmatprep.subr.bf16.mxu0 %v15012_v39 }
 0x53c   : > { %10696 = vmatprep.subr.bf16.mxu1 %v15015_v40 }
 0x53e   : > { %10656 = vmatpush1.bf16.msra.mxu0 %v15010_v14  ;;  %v15086_v14 = vld [vmem:[%s15815_s6 + $0x2660] ss:$8 sps:$4 sm:$0xff]  }
 0x53f   : > { %10697 = vmatpush1.bf16.msra.mxu1 %v15013_v15  ;;  %10657 = vmatprep.subr.bf16.mxu0 %v15018_v32  ;;  %v15089_v15 = vld [vmem:[%s15815_s6 + $0x2760] ss:$8 sps:$4 sm:$0xff]  }
 0x540   : > { %10698 = vmatprep.subr.bf16.mxu1 %v15021_v41 }
 0x542   : > { %10658 = vmatpush1.bf16.msra.mxu0 %v15016_v23 }
 0x543   : > { %10699 = vmatpush1.bf16.msra.mxu1 %v15019_v44  ;;  %10659 = vmatprep.subr.bf16.mxu0 %v15024_v63  ;;  %v15092_v63 = vld [vmem:[%s15815_s6 + $0x2670] ss:$8 sps:$4 sm:$0xff]  }
 0x544   : > { %10700 = vmatprep.subr.bf16.mxu1 %v15027_v22  ;;  %v15095_v22 = vld [vmem:[%s15815_s6 + $0x2770] ss:$8 sps:$4 sm:$0xff]  }
 0x546   : > { %10660 = vmatpush1.bf16.msra.mxu0 %v15022_v28  ;;  %v15100_v28 = vld [vmem:[%s15815_s6 + $0x2684] ss:$8 sps:$4 sm:$0xff]  }
 0x547   : > { %10701 = vmatpush1.bf16.msra.mxu1 %v15025_v34  ;;  %10661 = vmatprep.subr.bf16.mxu0 %v15030_v1  ;;  %v15103_v34 = vld [vmem:[%s15815_s6 + $0x2784] ss:$8 sps:$4 sm:$0xff]   ;;  %v15098_v1 = vld [vmem:[%s15815_s6 + $0x2680] ss:$8 sps:$4 sm:$0xff]  }
 0x548   : > { %10702 = vmatprep.subr.bf16.mxu1 %v15033_v30  ;;  %v15101_v30 = vld [vmem:[%s15815_s6 + $0x2780] ss:$8 sps:$4 sm:$0xff]  }
 0x54a   : > { %10662 = vmatpush1.bf16.msra.mxu0 %v15028_v29  ;;  %v15106_v29 = vld [vmem:[%s15815_s6 + $0x2694] ss:$8 sps:$4 sm:$0xff]  }
 0x54b   : > { %10703 = vmatpush1.bf16.msra.mxu1 %v15031_v4  ;;  %10663 = vmatprep.subr.bf16.mxu0 %v15036_v26  ;;  %v15109_v4 = vld [vmem:[%s15815_s6 + $0x2794] ss:$8 sps:$4 sm:$0xff]   ;;  %v15104_v26 = vld [vmem:[%s15815_s6 + $0x2690] ss:$8 sps:$4 sm:$0xff]  }
 0x54c   : > { %10704 = vmatprep.subr.bf16.mxu1 %v15039_v38  ;;  %v15107_v38 = vld [vmem:[%s15815_s6 + $0x2790] ss:$8 sps:$4 sm:$0xff]  }
 0x54e   : > { %10664 = vmatpush1.bf16.msra.mxu0 %v15034_v25  ;;  %v15112_v25 = vld [vmem:[%s15815_s6 + $0x26a4] ss:$8 sps:$4 sm:$0xff]  }
 0x54f   : > { %10705 = vmatpush1.bf16.msra.mxu1 %v15037_v36  ;;  %10665 = vmatprep.subr.bf16.mxu0 %v15042_v35  ;;  %v15115_v36 = vld [vmem:[%s15815_s6 + $0x27a4] ss:$8 sps:$4 sm:$0xff]   ;;  %v15110_v35 = vld [vmem:[%s15815_s6 + $0x26a0] ss:$8 sps:$4 sm:$0xff]  }
 0x550   : > { %10706 = vmatprep.subr.bf16.mxu1 %v15045_v37  ;;  %v15113_v37 = vld [vmem:[%s15815_s6 + $0x27a0] ss:$8 sps:$4 sm:$0xff]  }
 0x552   : > { %10666 = vmatpush1.bf16.msra.mxu0 %v15040_v58  ;;  %v15118_v58 = vld [vmem:[%s15815_s6 + $0x26b4] ss:$8 sps:$4 sm:$0xff]  }
 0x553   : > { %10707 = vmatpush1.bf16.msra.mxu1 %v15043_v59  ;;  %10717 = vmatprep.subr.bf16.mxu0 %v15052_v43  ;;  %v15121_v59 = vld [vmem:[%s15815_s6 + $0x27b4] ss:$8 sps:$4 sm:$0xff]   ;;  %v15116_v43 = vld [vmem:[%s15815_s6 + $0x26b0] ss:$8 sps:$4 sm:$0xff]  }
 0x554   : > { %10758 = vmatprep.subr.bf16.mxu1 %v15055_v62  ;;  %v15119_v62 = vld [vmem:[%s15815_s6 + $0x27b0] ss:$8 sps:$4 sm:$0xff]  }
 0x555   : > { %10668 = vmatmul.mubr.bf16.vlgmr.msra.gmra.mrb[72].mxu0 %v11478_v19  ;;  %v15124_v19 = vld [vmem:[%s15815_s6 + $0x26c4] ss:$8 sps:$4 sm:$0xff]  }
 0x556   : > { %10709 = vmatmul.mubr.bf16.vlgmr.msra.gmra.mrb[72].mxu1 %v11480_v42  ;;  %10718 = vmatpush1.bf16.msra.mxu0 %v15050_v46  ;;  %v15127_v42 = vld [vmem:[%s15815_s6 + $0x27c4] ss:$8 sps:$4 sm:$0xff]   ;;  %v15122_v46 = vld [vmem:[%s15815_s6 + $0x26c0] ss:$8 sps:$4 sm:$0xff]  }
 0x557   : > { %10759 = vmatpush1.bf16.msra.mxu1 %v15053_v50  ;;  %10719 = vmatprep.subr.bf16.mxu0 %v15058_v27  ;;  %v15125_v50 = vld [vmem:[%s15815_s6 + $0x27c0] ss:$8 sps:$4 sm:$0xff]   ;;  %v15130_v27 = vld [vmem:[%s15815_s6 + $0x26d4] ss:$8 sps:$4 sm:$0xff]  }
 0x558   : > { %10760 = vmatprep.subr.bf16.mxu1 %v15061_v48  ;;  %10749 = vmatprep.mubr.bf16.mxu0 %v11483_v47  ;;  %v15133_v48 = vld [vmem:[%s15815_s6 + $0x27d4] ss:$8 sps:$4 sm:$0xff]   ;;  %v15128_v47 = vld [vmem:[%s15815_s6 + $0x26d0] ss:$8 sps:$4 sm:$0xff]  }
 0x559   : > { %10790 = vmatprep.mubr.bf16.mxu1 %v11485_v33  ;;  %v15131_v33 = vld [vmem:[%s15815_s6 + $0x27d0] ss:$8 sps:$4 sm:$0xff]  }
 0x55a   : > { %10720 = vmatpush1.bf16.msra.mxu0 %v15056_v51  ;;  %v15136_v51 = vld [vmem:[%s15815_s6 + $0x26e4] ss:$8 sps:$4 sm:$0xff]  }
 0x55b   : > { %10761 = vmatpush1.bf16.msra.mxu1 %v15059_v56  ;;  %10721 = vmatprep.subr.bf16.mxu0 %v15064_v53  ;;  %v15139_v56 = vld [vmem:[%s15815_s6 + $0x27e4] ss:$8 sps:$4 sm:$0xff]   ;;  %v15134_v53 = vld [vmem:[%s15815_s6 + $0x26e0] ss:$8 sps:$4 sm:$0xff]  }
 0x55c   : > { %10762 = vmatprep.subr.bf16.mxu1 %v15067_v54  ;;  %v15137_v54 = vld [vmem:[%s15815_s6 + $0x27e0] ss:$8 sps:$4 sm:$0xff]  }
 0x55e   : > { %10722 = vmatpush1.bf16.msra.mxu0 %v15062_v52  ;;  %v15142_v52 = vld [vmem:[%s15815_s6 + $0x26f4] ss:$8 sps:$4 sm:$0xff]  }
 0x55f   : > { %10763 = vmatpush1.bf16.msra.mxu1 %v15065_v55  ;;  %10723 = vmatprep.subr.bf16.mxu0 %v15070_v57  ;;  %v15145_v55 = vld [vmem:[%s15815_s6 + $0x27f4] ss:$8 sps:$4 sm:$0xff]   ;;  %v15140_v57 = vld [vmem:[%s15815_s6 + $0x26f0] ss:$8 sps:$4 sm:$0xff]  }
 0x560   : > { %10764 = vmatprep.subr.bf16.mxu1 %v15073_v16  ;;  %v15143_v16 = vld [vmem:[%s15815_s6 + $0x27f0] ss:$8 sps:$4 sm:$0xff]  }
 0x562   : > { %10724 = vmatpush1.bf16.msra.mxu0 %v15068_v61  ;;  %v15152_v61 = vld [vmem:[%s15815_s6 + $0x2804] ss:$8 sps:$4 sm:$0xff]  }
 0x563   : > { %10765 = vmatpush1.bf16.msra.mxu1 %v15071_v18  ;;  %10725 = vmatprep.subr.bf16.mxu0 %v15076_v31  ;;  %v15155_v18 = vld [vmem:[%s15815_s6 + $0x2904] ss:$8 sps:$4 sm:$0xff]   ;;  %v11482_v31 = vcombine.low %v17405_v2, %v17405_v2 }
 0x564   : > { %10766 = vmatprep.subr.bf16.mxu1 %v15079_v60  ;;  %v11484_v60 = vcombine.low %v17408_v49, %v17408_v49 }
 0x566   : > { %10726 = vmatpush1.bf16.msra.mxu0 %v15074_v21  ;;  %v17489_v21 = vld [vmem:[%s15839_s18 + $0x140] sm:$0xff] }
 0x567   : > { %10767 = vmatpush1.bf16.msra.mxu1 %v15077_v5  ;;  %10727 = vmatprep.subr.bf16.mxu0 %v15082_v0  ;;  %v17492_v5 = vld [vmem:[%s15839_s18 + $0x148] sm:$0xff]  ;;  %v15150_v0 = vld [vmem:[%s15815_s6 + $0x2800] ss:$8 sps:$4 sm:$0xff]   ;;  %v11487_v2 = vcombine.high %v17489_v21, %v17489_v21 }
 0x568   : > { %10768 = vmatprep.subr.bf16.mxu1 %v15085_v6  ;;  %v10423_v9 = vpop.f32.mrb[60].mxu0  ;;  %v15153_v6 = vld [vmem:[%s15815_s6 + $0x2900] ss:$8 sps:$4 sm:$0xff]   ;;  %v11489_v49 = vcombine.high %v17492_v5, %v17492_v5 }
 0x569   : > { %v10464_v10 = vpop.f32.mrb[60].mxu1  ;;  %v10424_v8 = vadd.f32 %v10423_v9, %v17358_v20  ;;  %v10425_v11 = vpop.f32.mrb[61].mxu0  ;;  %v15094_v20 = vld [vmem:[%s15815_s6 + $0x2674] ss:$8 sps:$4 sm:$0xff]   ;;  %v15164_v9 = vld [vmem:[%s15815_s6 + $0x2824] ss:$8 sps:$4 sm:$0xff]  }
 0x56a   : > { %v10466_v13 = vpop.f32.mrb[61].mxu1  ;;  %v10426_v17 = vadd.f32 %v10425_v11, %v17362_v24  ;;  %v10427_v39 = vpop.f32.mrb[62].mxu0  ;;  %10728 = vmatpush1.bf16.msra.mxu0 %v15080_v45  ;;  %v15097_v24 = vld [vmem:[%s15815_s6 + $0x2774] ss:$8 sps:$4 sm:$0xff]   ;;  %v15165_v11 = vld [vmem:[%s15815_s6 + $0x2920] ss:$8 sps:$4 sm:$0xff]  }
 0x56b   : > { %v10468_v40 = vpop.f32.mrb[62].mxu1  ;;  %10769 = vmatpush1.bf16.msra.mxu1 %v15083_v3  ;;  %v17442_v32 = vadd.f32 %v10464_v10, %v10424_v8  ;;  %v10428_v41 = vpop.f32.mrb[63].mxu0  ;;  %10729 = vmatprep.subr.bf16.mxu0 %v15088_v7  ;;  %v15158_v45 = vld [vmem:[%s15815_s6 + $0x2814] ss:$8 sps:$4 sm:$0xff]   ;;  %v15156_v7 = vld [vmem:[%s15815_s6 + $0x2810] ss:$8 sps:$4 sm:$0xff]  }
 0x56c   : > { %v10469_v23 = vpop.f32.mrb[63].mxu1  ;;  %10770 = vmatprep.subr.bf16.mxu1 %v15091_v12  ;;  %v17446_v44 = vadd.f32 %v10466_v13, %v10426_v17  ;;  %v15161_v3 = vld [vmem:[%s15815_s6 + $0x2914] ss:$8 sps:$4 sm:$0xff]   ;;  %v15159_v12 = vld [vmem:[%s15815_s6 + $0x2910] ss:$8 sps:$4 sm:$0xff]  }
 0x56d   : > { %v15167_v10 = vld [vmem:[%s15815_s6 + $0x2924] ss:$8 sps:$4 sm:$0xff]   ;;  %v15162_v8 = vld [vmem:[%s15815_s6 + $0x2820] ss:$8 sps:$4 sm:$0xff]   ;;  %v15170_v13 = vld [vmem:[%s15815_s6 + $0x2834] ss:$8 sps:$4 sm:$0xff]  }
 0x56e   : > { %10730 = vmatpush1.bf16.msra.mxu0 %v15086_v14  ;;  %v15173_v17 = vld [vmem:[%s15815_s6 + $0x2934] ss:$8 sps:$4 sm:$0xff]   ;;  %v15168_v39 = vld [vmem:[%s15815_s6 + $0x2830] ss:$8 sps:$4 sm:$0xff]   ;;  %v15176_v14 = vld [vmem:[%s15815_s6 + $0x2844] ss:$8 sps:$4 sm:$0xff]  }
 0x56f   : > { %10771 = vmatpush1.bf16.msra.mxu1 %v15089_v15  ;;  %10731 = vmatprep.subr.bf16.mxu0 %v15094_v20  ;;  %v15171_v40 = vld [vmem:[%s15815_s6 + $0x2930] ss:$8 sps:$4 sm:$0xff]   ;;  %v15179_v15 = vld [vmem:[%s15815_s6 + $0x2944] ss:$8 sps:$4 sm:$0xff]   ;;  %v15174_v41 = vld [vmem:[%s15815_s6 + $0x2840] ss:$8 sps:$4 sm:$0xff]  }
 0x570   : > { %10772 = vmatprep.subr.bf16.mxu1 %v15097_v24  ;;  %v15177_v23 = vld [vmem:[%s15815_s6 + $0x2940] ss:$8 sps:$4 sm:$0xff]   ;;  %v15182_v20 = vld [vmem:[%s15815_s6 + $0x2854] ss:$8 sps:$4 sm:$0xff]  }
 0x571   : > { %v15185_v24 = vld [vmem:[%s15815_s6 + $0x2954] ss:$8 sps:$4 sm:$0xff]  }
 0x572   : > { %10732 = vmatpush1.bf16.msra.mxu0 %v15092_v63  ;;  %v15180_v63 = vld [vmem:[%s15815_s6 + $0x2850] ss:$8 sps:$4 sm:$0xff]  }
 0x573   : > { %10773 = vmatpush1.bf16.msra.mxu1 %v15095_v22  ;;  %10733 = vmatprep.subr.bf16.mxu0 %v15100_v28  ;;  %v15183_v22 = vld [vmem:[%s15815_s6 + $0x2950] ss:$8 sps:$4 sm:$0xff]   ;;  %v15188_v28 = vld [vmem:[%s15815_s6 + $0x2864] ss:$8 sps:$4 sm:$0xff]  }
 0x574   : > { %10774 = vmatprep.subr.bf16.mxu1 %v15103_v34  ;;  %v15191_v34 = vld [vmem:[%s15815_s6 + $0x2964] ss:$8 sps:$4 sm:$0xff]  }
 0x576   : > { %10734 = vmatpush1.bf16.msra.mxu0 %v15098_v1 }
 0x577   : > { %10775 = vmatpush1.bf16.msra.mxu1 %v15101_v30  ;;  %10735 = vmatprep.subr.bf16.mxu0 %v15106_v29 }
 0x578   : > { %10776 = vmatprep.subr.bf16.mxu1 %v15109_v4 }
 0x57a   : > { %10736 = vmatpush1.bf16.msra.mxu0 %v15104_v26 }
 0x57b   : > { %10777 = vmatpush1.bf16.msra.mxu1 %v15107_v38  ;;  %10737 = vmatprep.subr.bf16.mxu0 %v15112_v25 }
 0x57c   : > { %10778 = vmatprep.subr.bf16.mxu1 %v15115_v36 }
 0x57e   : > { %10738 = vmatpush1.bf16.msra.mxu0 %v15110_v35  ;;  %v15186_v35 = vld [vmem:[%s15815_s6 + $0x2860] ss:$8 sps:$4 sm:$0xff]  }
 0x57f   : > { %10779 = vmatpush1.bf16.msra.mxu1 %v15113_v37  ;;  %10739 = vmatprep.subr.bf16.mxu0 %v15118_v58  ;;  %v15189_v37 = vld [vmem:[%s15815_s6 + $0x2960] ss:$8 sps:$4 sm:$0xff]  }
 0x580   : > { %10780 = vmatprep.subr.bf16.mxu1 %v15121_v59 }
 0x582   : > { %10740 = vmatpush1.bf16.msra.mxu0 %v15116_v43 }
 0x583   : > { %10781 = vmatpush1.bf16.msra.mxu1 %v15119_v62  ;;  %10741 = vmatprep.subr.bf16.mxu0 %v15124_v19  ;;  %v15192_v19 = vld [vmem:[%s15815_s6 + $0x2870] ss:$8 sps:$4 sm:$0xff]  }
 0x584   : > { %10782 = vmatprep.subr.bf16.mxu1 %v15127_v42  ;;  %v15195_v42 = vld [vmem:[%s15815_s6 + $0x2970] ss:$8 sps:$4 sm:$0xff]  }
 0x586   : > { %10742 = vmatpush1.bf16.msra.mxu0 %v15122_v46  ;;  %v15200_v46 = vld [vmem:[%s15815_s6 + $0x2884] ss:$8 sps:$4 sm:$0xff]  }
 0x587   : > { %10783 = vmatpush1.bf16.msra.mxu1 %v15125_v50  ;;  %10743 = vmatprep.subr.bf16.mxu0 %v15130_v27  ;;  %v15203_v50 = vld [vmem:[%s15815_s6 + $0x2984] ss:$8 sps:$4 sm:$0xff]   ;;  %v15198_v27 = vld [vmem:[%s15815_s6 + $0x2880] ss:$8 sps:$4 sm:$0xff]  }
 0x588   : > { %10784 = vmatprep.subr.bf16.mxu1 %v15133_v48  ;;  %v15201_v48 = vld [vmem:[%s15815_s6 + $0x2980] ss:$8 sps:$4 sm:$0xff]  }
 0x58a   : > { %10744 = vmatpush1.bf16.msra.mxu0 %v15128_v47  ;;  %v15206_v47 = vld [vmem:[%s15815_s6 + $0x2894] ss:$8 sps:$4 sm:$0xff]  }
 0x58b   : > { %10785 = vmatpush1.bf16.msra.mxu1 %v15131_v33  ;;  %10745 = vmatprep.subr.bf16.mxu0 %v15136_v51  ;;  %v15209_v33 = vld [vmem:[%s15815_s6 + $0x2994] ss:$8 sps:$4 sm:$0xff]   ;;  %v15204_v51 = vld [vmem:[%s15815_s6 + $0x2890] ss:$8 sps:$4 sm:$0xff]  }
 0x58c   : > { %10786 = vmatprep.subr.bf16.mxu1 %v15139_v56  ;;  %v15207_v56 = vld [vmem:[%s15815_s6 + $0x2990] ss:$8 sps:$4 sm:$0xff]  }
 0x58e   : > { %10746 = vmatpush1.bf16.msra.mxu0 %v15134_v53  ;;  %v15212_v53 = vld [vmem:[%s15815_s6 + $0x28a4] ss:$8 sps:$4 sm:$0xff]  }
 0x58f   : > { %10787 = vmatpush1.bf16.msra.mxu1 %v15137_v54  ;;  %10747 = vmatprep.subr.bf16.mxu0 %v15142_v52  ;;  %v15215_v54 = vld [vmem:[%s15815_s6 + $0x29a4] ss:$8 sps:$4 sm:$0xff]   ;;  %v15210_v52 = vld [vmem:[%s15815_s6 + $0x28a0] ss:$8 sps:$4 sm:$0xff]  }
 0x590   : > { %10788 = vmatprep.subr.bf16.mxu1 %v15145_v55  ;;  %v15213_v55 = vld [vmem:[%s15815_s6 + $0x29a0] ss:$8 sps:$4 sm:$0xff]  }
 0x592   : > { %10748 = vmatpush1.bf16.msra.mxu0 %v15140_v57  ;;  %v15218_v57 = vld [vmem:[%s15815_s6 + $0x28b4] ss:$8 sps:$4 sm:$0xff]  }
 0x593   : > { %10789 = vmatpush1.bf16.msra.mxu1 %v15143_v16  ;;  %10799 = vmatprep.subr.bf16.mxu0 %v15152_v61  ;;  %v15221_v16 = vld [vmem:[%s15815_s6 + $0x29b4] ss:$8 sps:$4 sm:$0xff]   ;;  %v15216_v61 = vld [vmem:[%s15815_s6 + $0x28b0] ss:$8 sps:$4 sm:$0xff]  }
 0x594   : > { %10840 = vmatprep.subr.bf16.mxu1 %v15155_v18  ;;  %v15219_v18 = vld [vmem:[%s15815_s6 + $0x29b0] ss:$8 sps:$4 sm:$0xff]  }
 0x595   : > { %10750 = vmatmul.mubr.bf16.vlgmr.msra.gmra.mrb[76].mxu0 %v11482_v31  ;;  %v15224_v31 = vld [vmem:[%s15815_s6 + $0x28c4] ss:$8 sps:$4 sm:$0xff]  }
 0x596   : > { %10791 = vmatmul.mubr.bf16.vlgmr.msra.gmra.mrb[76].mxu1 %v11484_v60  ;;  %10800 = vmatpush1.bf16.msra.mxu0 %v15150_v0  ;;  %v15227_v60 = vld [vmem:[%s15815_s6 + $0x29c4] ss:$8 sps:$4 sm:$0xff]   ;;  %v15222_v0 = vld [vmem:[%s15815_s6 + $0x28c0] ss:$8 sps:$4 sm:$0xff]  }
 0x597   : > { %10841 = vmatpush1.bf16.msra.mxu1 %v15153_v6  ;;  %10801 = vmatprep.subr.bf16.mxu0 %v15158_v45  ;;  %v15225_v6 = vld [vmem:[%s15815_s6 + $0x29c0] ss:$8 sps:$4 sm:$0xff]   ;;  %v15230_v45 = vld [vmem:[%s15815_s6 + $0x28d4] ss:$8 sps:$4 sm:$0xff]  }
 0x598   : > { %10842 = vmatprep.subr.bf16.mxu1 %v15161_v3  ;;  %10831 = vmatprep.mubr.bf16.mxu0 %v11487_v2  ;;  %v15233_v3 = vld [vmem:[%s15815_s6 + $0x29d4] ss:$8 sps:$4 sm:$0xff]   ;;  %v15228_v2 = vld [vmem:[%s15815_s6 + $0x28d0] ss:$8 sps:$4 sm:$0xff]  }
 0x599   : > { %10872 = vmatprep.mubr.bf16.mxu1 %v11489_v49  ;;  %v15231_v49 = vld [vmem:[%s15815_s6 + $0x29d0] ss:$8 sps:$4 sm:$0xff]  }
 0x59a   : > { %10802 = vmatpush1.bf16.msra.mxu0 %v15156_v7  ;;  %v15236_v7 = vld [vmem:[%s15815_s6 + $0x28e4] ss:$8 sps:$4 sm:$0xff]  }
 0x59b   : > { %10843 = vmatpush1.bf16.msra.mxu1 %v15159_v12  ;;  %10803 = vmatprep.subr.bf16.mxu0 %v15164_v9  ;;  %v15239_v12 = vld [vmem:[%s15815_s6 + $0x29e4] ss:$8 sps:$4 sm:$0xff]   ;;  %v15234_v9 = vld [vmem:[%s15815_s6 + $0x28e0] ss:$8 sps:$4 sm:$0xff]  }
 0x59c   : > { %10844 = vmatprep.subr.bf16.mxu1 %v15167_v10  ;;  %v15237_v10 = vld [vmem:[%s15815_s6 + $0x29e0] ss:$8 sps:$4 sm:$0xff]  }
 0x59e   : > { %10804 = vmatpush1.bf16.msra.mxu0 %v15162_v8  ;;  %v15242_v8 = vld [vmem:[%s15815_s6 + $0x28f4] ss:$8 sps:$4 sm:$0xff]  }
 0x59f   : > { %10845 = vmatpush1.bf16.msra.mxu1 %v15165_v11  ;;  %10805 = vmatprep.subr.bf16.mxu0 %v15170_v13  ;;  %v15245_v11 = vld [vmem:[%s15815_s6 + $0x29f4] ss:$8 sps:$4 sm:$0xff]   ;;  %v15240_v13 = vld [vmem:[%s15815_s6 + $0x28f0] ss:$8 sps:$4 sm:$0xff]  }
 0x5a0   : > { %10846 = vmatprep.subr.bf16.mxu1 %v15173_v17  ;;  %v15243_v17 = vld [vmem:[%s15815_s6 + $0x29f0] ss:$8 sps:$4 sm:$0xff]  }
 0x5a2   : > { %10806 = vmatpush1.bf16.msra.mxu0 %v15168_v39  ;;  %v15252_v39 = vld [vmem:[%s15815_s6 + $0x2a04] ss:$8 sps:$4 sm:$0xff]  }
 0x5a3   : > { %10847 = vmatpush1.bf16.msra.mxu1 %v15171_v40  ;;  %10807 = vmatprep.subr.bf16.mxu0 %v15176_v14  ;;  %v15255_v40 = vld [vmem:[%s15815_s6 + $0x2b04] ss:$8 sps:$4 sm:$0xff]   ;;  %v11486_v14 = vcombine.low %v17489_v21, %v17489_v21 }
 0x5a4   : > { %10848 = vmatprep.subr.bf16.mxu1 %v15179_v15  ;;  %v11488_v15 = vcombine.low %v17492_v5, %v17492_v5 }
 0x5a6   : > { %10808 = vmatpush1.bf16.msra.mxu0 %v15174_v41  ;;  %v17573_v41 = vld [vmem:[%s15839_s18 + $0x150] sm:$0xff] }
 0x5a7   : > { %10849 = vmatpush1.bf16.msra.mxu1 %v15177_v23  ;;  %10809 = vmatprep.subr.bf16.mxu0 %v15182_v20  ;;  %v17576_v23 = vld [vmem:[%s15839_s18 + $0x158] sm:$0xff]  ;;  %v11491_v21 = vcombine.high %v17573_v41, %v17573_v41 }
 0x5a8   : > { %10850 = vmatprep.subr.bf16.mxu1 %v15185_v24  ;;  %v10505_v1 = vpop.f32.mrb[64].mxu0  ;;  %v15250_v20 = vld [vmem:[%s15815_s6 + $0x2a00] ss:$8 sps:$4 sm:$0xff]   ;;  %v11493_v5 = vcombine.high %v17576_v23, %v17576_v23 }
 0x5a9   : > { %v10546_v30 = vpop.f32.mrb[64].mxu1  ;;  %v10506_v29 = vadd.f32 %v10505_v1, %v17442_v32  ;;  %v10507_v4 = vpop.f32.mrb[65].mxu0  ;;  %v15194_v32 = vld [vmem:[%s15815_s6 + $0x2874] ss:$8 sps:$4 sm:$0xff]   ;;  %v15253_v24 = vld [vmem:[%s15815_s6 + $0x2b00] ss:$8 sps:$4 sm:$0xff]  }
 0x5aa   : > { %v10548_v26 = vpop.f32.mrb[65].mxu1  ;;  %v10508_v38 = vadd.f32 %v10507_v4, %v17446_v44  ;;  %v10509_v25 = vpop.f32.mrb[66].mxu0  ;;  %10810 = vmatpush1.bf16.msra.mxu0 %v15180_v63  ;;  %v15197_v44 = vld [vmem:[%s15815_s6 + $0x2974] ss:$8 sps:$4 sm:$0xff]   ;;  %v15264_v1 = vld [vmem:[%s15815_s6 + $0x2a24] ss:$8 sps:$4 sm:$0xff]  }
 0x5ab   : > { %v10550_v36 = vpop.f32.mrb[66].mxu1  ;;  %10851 = vmatpush1.bf16.msra.mxu1 %v15183_v22  ;;  %v17526_v58 = vadd.f32 %v10546_v30, %v10506_v29  ;;  %v10510_v59 = vpop.f32.mrb[67].mxu0  ;;  %10811 = vmatprep.subr.bf16.mxu0 %v15188_v28  ;;  %v15258_v63 = vld [vmem:[%s15815_s6 + $0x2a14] ss:$8 sps:$4 sm:$0xff]   ;;  %v15256_v28 = vld [vmem:[%s15815_s6 + $0x2a10] ss:$8 sps:$4 sm:$0xff]  }
 0x5ac   : > { %v10551_v43 = vpop.f32.mrb[67].mxu1  ;;  %10852 = vmatprep.subr.bf16.mxu1 %v15191_v34  ;;  %v17530_v62 = vadd.f32 %v10548_v26, %v10508_v38  ;;  %v15261_v22 = vld [vmem:[%s15815_s6 + $0x2b14] ss:$8 sps:$4 sm:$0xff]   ;;  %v15259_v34 = vld [vmem:[%s15815_s6 + $0x2b10] ss:$8 sps:$4 sm:$0xff]  }
 0x5ad   : > { %v15267_v30 = vld [vmem:[%s15815_s6 + $0x2b24] ss:$8 sps:$4 sm:$0xff]   ;;  %v15262_v29 = vld [vmem:[%s15815_s6 + $0x2a20] ss:$8 sps:$4 sm:$0xff]   ;;  %v15270_v26 = vld [vmem:[%s15815_s6 + $0x2a34] ss:$8 sps:$4 sm:$0xff]  }
 0x5ae   : > { %10812 = vmatpush1.bf16.msra.mxu0 %v15186_v35  ;;  %v15265_v4 = vld [vmem:[%s15815_s6 + $0x2b20] ss:$8 sps:$4 sm:$0xff]   ;;  %v15273_v38 = vld [vmem:[%s15815_s6 + $0x2b34] ss:$8 sps:$4 sm:$0xff]   ;;  %v15268_v25 = vld [vmem:[%s15815_s6 + $0x2a30] ss:$8 sps:$4 sm:$0xff]  }
 0x5af   : > { %10853 = vmatpush1.bf16.msra.mxu1 %v15189_v37  ;;  %10813 = vmatprep.subr.bf16.mxu0 %v15194_v32  ;;  %v15271_v36 = vld [vmem:[%s15815_s6 + $0x2b30] ss:$8 sps:$4 sm:$0xff]   ;;  %v15276_v35 = vld [vmem:[%s15815_s6 + $0x2a44] ss:$8 sps:$4 sm:$0xff]   ;;  %v15274_v59 = vld [vmem:[%s15815_s6 + $0x2a40] ss:$8 sps:$4 sm:$0xff]  }
 0x5b0   : > { %10854 = vmatprep.subr.bf16.mxu1 %v15197_v44  ;;  %v15279_v37 = vld [vmem:[%s15815_s6 + $0x2b44] ss:$8 sps:$4 sm:$0xff]   ;;  %v15277_v43 = vld [vmem:[%s15815_s6 + $0x2b40] ss:$8 sps:$4 sm:$0xff]   ;;  %v15282_v32 = vld [vmem:[%s15815_s6 + $0x2a54] ss:$8 sps:$4 sm:$0xff]  }
 0x5b1   : > { %v15285_v44 = vld [vmem:[%s15815_s6 + $0x2b54] ss:$8 sps:$4 sm:$0xff]  }
 0x5b2   : > { %10814 = vmatpush1.bf16.msra.mxu0 %v15192_v19  ;;  %v15280_v19 = vld [vmem:[%s15815_s6 + $0x2a50] ss:$8 sps:$4 sm:$0xff]  }
 0x5b3   : > { %10855 = vmatpush1.bf16.msra.mxu1 %v15195_v42  ;;  %10815 = vmatprep.subr.bf16.mxu0 %v15200_v46  ;;  %v15283_v42 = vld [vmem:[%s15815_s6 + $0x2b50] ss:$8 sps:$4 sm:$0xff]   ;;  %v15288_v46 = vld [vmem:[%s15815_s6 + $0x2a64] ss:$8 sps:$4 sm:$0xff]  }
 0x5b4   : > { %10856 = vmatprep.subr.bf16.mxu1 %v15203_v50  ;;  %v15291_v50 = vld [vmem:[%s15815_s6 + $0x2b64] ss:$8 sps:$4 sm:$0xff]  }
 0x5b6   : > { %10816 = vmatpush1.bf16.msra.mxu0 %v15198_v27 }
 0x5b7   : > { %10857 = vmatpush1.bf16.msra.mxu1 %v15201_v48  ;;  %10817 = vmatprep.subr.bf16.mxu0 %v15206_v47 }
 0x5b8   : > { %10858 = vmatprep.subr.bf16.mxu1 %v15209_v33 }
 0x5ba   : > { %10818 = vmatpush1.bf16.msra.mxu0 %v15204_v51 }
 0x5bb   : > { %10859 = vmatpush1.bf16.msra.mxu1 %v15207_v56  ;;  %10819 = vmatprep.subr.bf16.mxu0 %v15212_v53 }
 0x5bc   : > { %10860 = vmatprep.subr.bf16.mxu1 %v15215_v54 }
 0x5be   : > { %10820 = vmatpush1.bf16.msra.mxu0 %v15210_v52  ;;  %v15286_v52 = vld [vmem:[%s15815_s6 + $0x2a60] ss:$8 sps:$4 sm:$0xff]  }
 0x5bf   : > { %10861 = vmatpush1.bf16.msra.mxu1 %v15213_v55  ;;  %10821 = vmatprep.subr.bf16.mxu0 %v15218_v57  ;;  %v15289_v55 = vld [vmem:[%s15815_s6 + $0x2b60] ss:$8 sps:$4 sm:$0xff]  }
 0x5c0   : > { %10862 = vmatprep.subr.bf16.mxu1 %v15221_v16 }
 0x5c2   : > { %10822 = vmatpush1.bf16.msra.mxu0 %v15216_v61 }
 0x5c3   : > { %10863 = vmatpush1.bf16.msra.mxu1 %v15219_v18  ;;  %10823 = vmatprep.subr.bf16.mxu0 %v15224_v31  ;;  %v15292_v31 = vld [vmem:[%s15815_s6 + $0x2a70] ss:$8 sps:$4 sm:$0xff]  }
 0x5c4   : > { %10864 = vmatprep.subr.bf16.mxu1 %v15227_v60  ;;  %v15295_v60 = vld [vmem:[%s15815_s6 + $0x2b70] ss:$8 sps:$4 sm:$0xff]  }
 0x5c6   : > { %10824 = vmatpush1.bf16.msra.mxu0 %v15222_v0  ;;  %v15300_v0 = vld [vmem:[%s15815_s6 + $0x2a84] ss:$8 sps:$4 sm:$0xff]  }
 0x5c7   : > { %10865 = vmatpush1.bf16.msra.mxu1 %v15225_v6  ;;  %10825 = vmatprep.subr.bf16.mxu0 %v15230_v45  ;;  %v15303_v6 = vld [vmem:[%s15815_s6 + $0x2b84] ss:$8 sps:$4 sm:$0xff]   ;;  %v15298_v45 = vld [vmem:[%s15815_s6 + $0x2a80] ss:$8 sps:$4 sm:$0xff]  }
 0x5c8   : > { %10866 = vmatprep.subr.bf16.mxu1 %v15233_v3  ;;  %v15301_v3 = vld [vmem:[%s15815_s6 + $0x2b80] ss:$8 sps:$4 sm:$0xff]  }
 0x5ca   : > { %10826 = vmatpush1.bf16.msra.mxu0 %v15228_v2  ;;  %v15306_v2 = vld [vmem:[%s15815_s6 + $0x2a94] ss:$8 sps:$4 sm:$0xff]  }
 0x5cb   : > { %10867 = vmatpush1.bf16.msra.mxu1 %v15231_v49  ;;  %10827 = vmatprep.subr.bf16.mxu0 %v15236_v7  ;;  %v15309_v49 = vld [vmem:[%s15815_s6 + $0x2b94] ss:$8 sps:$4 sm:$0xff]   ;;  %v15304_v7 = vld [vmem:[%s15815_s6 + $0x2a90] ss:$8 sps:$4 sm:$0xff]  }
 0x5cc   : > { %10868 = vmatprep.subr.bf16.mxu1 %v15239_v12  ;;  %v15307_v12 = vld [vmem:[%s15815_s6 + $0x2b90] ss:$8 sps:$4 sm:$0xff]  }
 0x5ce   : > { %10828 = vmatpush1.bf16.msra.mxu0 %v15234_v9  ;;  %v15312_v9 = vld [vmem:[%s15815_s6 + $0x2aa4] ss:$8 sps:$4 sm:$0xff]  }
 0x5cf   : > { %10869 = vmatpush1.bf16.msra.mxu1 %v15237_v10  ;;  %10829 = vmatprep.subr.bf16.mxu0 %v15242_v8  ;;  %v15315_v10 = vld [vmem:[%s15815_s6 + $0x2ba4] ss:$8 sps:$4 sm:$0xff]   ;;  %v15310_v8 = vld [vmem:[%s15815_s6 + $0x2aa0] ss:$8 sps:$4 sm:$0xff]  }
 0x5d0   : > { %10870 = vmatprep.subr.bf16.mxu1 %v15245_v11  ;;  %v15313_v11 = vld [vmem:[%s15815_s6 + $0x2ba0] ss:$8 sps:$4 sm:$0xff]  }
 0x5d2   : > { %10830 = vmatpush1.bf16.msra.mxu0 %v15240_v13  ;;  %v15318_v13 = vld [vmem:[%s15815_s6 + $0x2ab4] ss:$8 sps:$4 sm:$0xff]  }
 0x5d3   : > { %10871 = vmatpush1.bf16.msra.mxu1 %v15243_v17  ;;  %10881 = vmatprep.subr.bf16.mxu0 %v15252_v39  ;;  %v15321_v17 = vld [vmem:[%s15815_s6 + $0x2bb4] ss:$8 sps:$4 sm:$0xff]   ;;  %v15316_v39 = vld [vmem:[%s15815_s6 + $0x2ab0] ss:$8 sps:$4 sm:$0xff]  }
 0x5d4   : > { %10922 = vmatprep.subr.bf16.mxu1 %v15255_v40  ;;  %v15319_v40 = vld [vmem:[%s15815_s6 + $0x2bb0] ss:$8 sps:$4 sm:$0xff]  }
 0x5d5   : > { %10832 = vmatmul.mubr.bf16.vlgmr.msra.gmra.mrb[80].mxu0 %v11486_v14  ;;  %v15324_v14 = vld [vmem:[%s15815_s6 + $0x2ac4] ss:$8 sps:$4 sm:$0xff]  }
 0x5d6   : > { %10873 = vmatmul.mubr.bf16.vlgmr.msra.gmra.mrb[80].mxu1 %v11488_v15  ;;  %10882 = vmatpush1.bf16.msra.mxu0 %v15250_v20  ;;  %v15327_v15 = vld [vmem:[%s15815_s6 + $0x2bc4] ss:$8 sps:$4 sm:$0xff]   ;;  %v15322_v20 = vld [vmem:[%s15815_s6 + $0x2ac0] ss:$8 sps:$4 sm:$0xff]  }
 0x5d7   : > { %10923 = vmatpush1.bf16.msra.mxu1 %v15253_v24  ;;  %10883 = vmatprep.subr.bf16.mxu0 %v15258_v63  ;;  %v15325_v24 = vld [vmem:[%s15815_s6 + $0x2bc0] ss:$8 sps:$4 sm:$0xff]   ;;  %v15330_v63 = vld [vmem:[%s15815_s6 + $0x2ad4] ss:$8 sps:$4 sm:$0xff]  }
 0x5d8   : > { %10924 = vmatprep.subr.bf16.mxu1 %v15261_v22  ;;  %10913 = vmatprep.mubr.bf16.mxu0 %v11491_v21  ;;  %v15333_v22 = vld [vmem:[%s15815_s6 + $0x2bd4] ss:$8 sps:$4 sm:$0xff]   ;;  %v15328_v21 = vld [vmem:[%s15815_s6 + $0x2ad0] ss:$8 sps:$4 sm:$0xff]  }
 0x5d9   : > { %10954 = vmatprep.mubr.bf16.mxu1 %v11493_v5  ;;  %v15331_v5 = vld [vmem:[%s15815_s6 + $0x2bd0] ss:$8 sps:$4 sm:$0xff]  }
 0x5da   : > { %10884 = vmatpush1.bf16.msra.mxu0 %v15256_v28  ;;  %v15336_v28 = vld [vmem:[%s15815_s6 + $0x2ae4] ss:$8 sps:$4 sm:$0xff]  }
 0x5db   : > { %10925 = vmatpush1.bf16.msra.mxu1 %v15259_v34  ;;  %10885 = vmatprep.subr.bf16.mxu0 %v15264_v1  ;;  %v15339_v34 = vld [vmem:[%s15815_s6 + $0x2be4] ss:$8 sps:$4 sm:$0xff]   ;;  %v15334_v1 = vld [vmem:[%s15815_s6 + $0x2ae0] ss:$8 sps:$4 sm:$0xff]  }
 0x5dc   : > { %10926 = vmatprep.subr.bf16.mxu1 %v15267_v30  ;;  %v15337_v30 = vld [vmem:[%s15815_s6 + $0x2be0] ss:$8 sps:$4 sm:$0xff]  }
 0x5de   : > { %10886 = vmatpush1.bf16.msra.mxu0 %v15262_v29  ;;  %v15342_v29 = vld [vmem:[%s15815_s6 + $0x2af4] ss:$8 sps:$4 sm:$0xff]  }
 0x5df   : > { %10927 = vmatpush1.bf16.msra.mxu1 %v15265_v4  ;;  %10887 = vmatprep.subr.bf16.mxu0 %v15270_v26  ;;  %v15345_v4 = vld [vmem:[%s15815_s6 + $0x2bf4] ss:$8 sps:$4 sm:$0xff]   ;;  %v15340_v26 = vld [vmem:[%s15815_s6 + $0x2af0] ss:$8 sps:$4 sm:$0xff]  }
 0x5e0   : > { %10928 = vmatprep.subr.bf16.mxu1 %v15273_v38  ;;  %v15343_v38 = vld [vmem:[%s15815_s6 + $0x2bf0] ss:$8 sps:$4 sm:$0xff]  }
 0x5e2   : > { %10888 = vmatpush1.bf16.msra.mxu0 %v15268_v25  ;;  %v11490_v25 = vcombine.low %v17573_v41, %v17573_v41 }
 0x5e3   : > { %10929 = vmatpush1.bf16.msra.mxu1 %v15271_v36  ;;  %10889 = vmatprep.subr.bf16.mxu0 %v15276_v35  ;;  %v11492_v36 = vcombine.low %v17576_v23, %v17576_v23 }
 0x5e4   : > { %10930 = vmatprep.subr.bf16.mxu1 %v15279_v37 }
 0x5e6   : > { %10890 = vmatpush1.bf16.msra.mxu0 %v15274_v59 }
 0x5e7   : > { %10931 = vmatpush1.bf16.msra.mxu1 %v15277_v43  ;;  %10891 = vmatprep.subr.bf16.mxu0 %v15282_v32 }
 0x5e8   : > { %10932 = vmatprep.subr.bf16.mxu1 %v15285_v44  ;;  %v10587_v27 = vpop.f32.mrb[68].mxu0 }
 0x5e9   : > { %v10628_v48 = vpop.f32.mrb[68].mxu1  ;;  %v10588_v47 = vadd.f32 %v10587_v27, %v17526_v58  ;;  %v10589_v33 = vpop.f32.mrb[69].mxu0  ;;  %v15294_v58 = vld [vmem:[%s15815_s6 + $0x2a74] ss:$8 sps:$4 sm:$0xff]  }
 0x5ea   : > { %v10630_v51 = vpop.f32.mrb[69].mxu1  ;;  %v10590_v56 = vadd.f32 %v10589_v33, %v17530_v62  ;;  %v10591_v53 = vpop.f32.mrb[70].mxu0  ;;  %10892 = vmatpush1.bf16.msra.mxu0 %v15280_v19  ;;  %v15297_v62 = vld [vmem:[%s15815_s6 + $0x2b74] ss:$8 sps:$4 sm:$0xff]  }
 0x5eb   : > { %v10632_v54 = vpop.f32.mrb[70].mxu1  ;;  %10933 = vmatpush1.bf16.msra.mxu1 %v15283_v42  ;;  %v17610_v57 = vadd.f32 %v10628_v48, %v10588_v47  ;;  %v10592_v16 = vpop.f32.mrb[71].mxu0  ;;  %10893 = vmatprep.subr.bf16.mxu0 %v15288_v46 }
 0x5ec   : > { %v10633_v61 = vpop.f32.mrb[71].mxu1  ;;  %10934 = vmatprep.subr.bf16.mxu1 %v15291_v50  ;;  %v17614_v18 = vadd.f32 %v10630_v51, %v10590_v56 }
 0x5ee   : > { %10894 = vmatpush1.bf16.msra.mxu0 %v15286_v52 }
 0x5ef   : > { %10935 = vmatpush1.bf16.msra.mxu1 %v15289_v55  ;;  %10895 = vmatprep.subr.bf16.mxu0 %v15294_v58 }
 0x5f0   : > { %10936 = vmatprep.subr.bf16.mxu1 %v15297_v62 }
 0x5f2   : > { %10896 = vmatpush1.bf16.msra.mxu0 %v15292_v31 }
 0x5f3   : > { %10937 = vmatpush1.bf16.msra.mxu1 %v15295_v60  ;;  %10897 = vmatprep.subr.bf16.mxu0 %v15300_v0 }
 0x5f4   : > { %10938 = vmatprep.subr.bf16.mxu1 %v15303_v6 }
 0x5f6   : > { %10898 = vmatpush1.bf16.msra.mxu0 %v15298_v45 }
 0x5f7   : > { %10939 = vmatpush1.bf16.msra.mxu1 %v15301_v3  ;;  %10899 = vmatprep.subr.bf16.mxu0 %v15306_v2 }
 0x5f8   : > { %10940 = vmatprep.subr.bf16.mxu1 %v15309_v49 }
 0x5fa   : > { %10900 = vmatpush1.bf16.msra.mxu0 %v15304_v7 }
 0x5fb   : > { %10941 = vmatpush1.bf16.msra.mxu1 %v15307_v12  ;;  %10901 = vmatprep.subr.bf16.mxu0 %v15312_v9 }
 0x5fc   : > { %10942 = vmatprep.subr.bf16.mxu1 %v15315_v10 }
 0x5fe   : > { %10902 = vmatpush1.bf16.msra.mxu0 %v15310_v8 }
 0x5ff   : > { %10943 = vmatpush1.bf16.msra.mxu1 %v15313_v11  ;;  %10903 = vmatprep.subr.bf16.mxu0 %v15318_v13  ;;  %v357_v11 = vld [vmem:[#allocation2] sm:$0xff] }
 0x600   : > { %10944 = vmatprep.subr.bf16.mxu1 %v15321_v17 }
 0x602   : > { %10904 = vmatpush1.bf16.msra.mxu0 %v15316_v39 }
 0x603   : > { %10945 = vmatpush1.bf16.msra.mxu1 %v15319_v40  ;;  %10905 = vmatprep.subr.bf16.mxu0 %v15324_v14  ;;  %v358_v14 = vld [vmem:[#allocation2 + $0x8] sm:$0xff] }
 0x604   : > { %10946 = vmatprep.subr.bf16.mxu1 %v15327_v15 }
 0x606   : > { %10906 = vmatpush1.bf16.msra.mxu0 %v15322_v20 }
 0x607   : > { %10947 = vmatpush1.bf16.msra.mxu1 %v15325_v24  ;;  %10907 = vmatprep.subr.bf16.mxu0 %v15330_v63 }
 0x608   : > { %10948 = vmatprep.subr.bf16.mxu1 %v15333_v22 }
 0x60a   : > { %10908 = vmatpush1.bf16.msra.mxu0 %v15328_v21  ;;  %v10976_v21 = vld [vmem:[%s15841_s13 + $0x8] sm:$0xff] (!%p12902_p6) }
 0x60b   : > { %10949 = vmatpush1.bf16.msra.mxu1 %v15331_v5  ;;  %10909 = vmatprep.subr.bf16.mxu0 %v15336_v28  ;;  %v10980_v5 = vld [vmem:[%s15841_s13 + $0x28] sm:$0xff] (!%p12902_p6)  ;;  %v10978_v28 = vld [vmem:[%s15841_s13 + $0x18] sm:$0xff] (!%p12902_p6) }
 0x60c   : > { %10950 = vmatprep.subr.bf16.mxu1 %v15339_v34  ;;  %v12910_v34 = vpack.c.bf16 (!%p12902_p6), %v10980_v5, %v10976_v21  ;;  %v11015_v5 = vld [vmem:[%s15841_s13 + $0x140] sm:$0xff] (!%p12902_p6) }
 0x60e   : > { %10910 = vmatpush1.bf16.msra.mxu0 %v15334_v1  ;;  %v10982_v1 = vld [vmem:[%s15841_s13 + $0x38] sm:$0xff] (!%p12902_p6) }
 0x60f   : > { %10951 = vmatpush1.bf16.msra.mxu1 %v15337_v30  ;;  %10911 = vmatprep.subr.bf16.mxu0 %v15342_v29  ;;  %v10975_v30 = vld [vmem:[%s15841_s13] sm:$0xff] (!%p12902_p6) }
 0x610   : > { %10952 = vmatprep.subr.bf16.mxu1 %v15345_v4  ;;  %v10979_v29 = vld [vmem:[%s15841_s13 + $0x20] sm:$0xff] (!%p12902_p6)  ;;  %v12974_v4 = vpack.c.bf16 (!%p12902_p6), %v10982_v1, %v10978_v28 }
 0x611   : > { %v11019_v28 = vld [vmem:[%s15841_s13 + $0x160] sm:$0xff] (!%p12902_p6) }
 0x612   : > { %10912 = vmatpush1.bf16.msra.mxu0 %v15340_v26  ;;  %v12912_v26 = vpack.c.bf16 (!%p12902_p6), %v10979_v29, %v10975_v30  ;;  %v11021_v30 = vld [vmem:[%s15841_s13 + $0x170] sm:$0xff] (!%p12902_p6)  ;;  %v11024_v29 = vld [vmem:[%s15841_s13 + $0x188] sm:$0xff] (!%p12902_p6) }
 0x613   : > { %10953 = vmatpush1.bf16.msra.mxu1 %v15343_v38  ;;  %v10977_v38 = vld [vmem:[%s15841_s13 + $0x10] sm:$0xff] (!%p12902_p6)  ;;  %12911 = vmatprep.subr.bf16.mxu0 (!%p12902_p6), %v12910_v34 }
 0x614   : > { %12975 = vmatprep.subr.bf16.mxu1 (!%p12902_p6), %v12974_v4  ;;  %v11017_v34 = vld [vmem:[%s15841_s13 + $0x150] sm:$0xff] (!%p12902_p6)  ;;  %v11028_v4 = vld [vmem:[%s15841_s13 + $0x1a8] sm:$0xff] (!%p12902_p6) }
 0x615   : > { %10914 = vmatmul.mubr.bf16.vlgmr.msra.gmra.mrb[84].mxu0 %v11490_v25  ;;  %v10981_v25 = vld [vmem:[%s15841_s13 + $0x30] sm:$0xff] (!%p12902_p6) }
 0x616   : > { %10955 = vmatmul.mubr.bf16.vlgmr.msra.gmra.mrb[84].mxu1 %v11492_v36  ;;  %v10984_v36 = vld [vmem:[%s15841_s13 + $0x48] sm:$0xff] (!%p12902_p6)  ;;  %12913 = vmatpush1.bf16.msra.mxu0 (!%p12902_p6), %v12912_v26  ;;  %v11026_v26 = vld [vmem:[%s15841_s13 + $0x198] sm:$0xff] (!%p12902_p6) }
 0x628   : > { %v10669_v35 = vpop.f32.mrb[72].mxu0 }
 0x629   : > { %v10710_v37 = vpop.f32.mrb[72].mxu1  ;;  %v10670_v59 = vadd.f32 %v10669_v35, %v17610_v57  ;;  %v10671_v43 = vpop.f32.mrb[73].mxu0  ;;  %v12976_v35 = vpack.c.bf16 (!%p12902_p6), %v10981_v25, %v10977_v38  ;;  %v11030_v38 = vld [vmem:[%s15841_s13 + $0x1b8] sm:$0xff] (!%p12902_p6)  ;;  %v12932_v25 = vpack.c.bf16 (!%p12902_p6), %v11019_v28, %v11015_v5  ;;  %v11061_v5 = vld [vmem:[%s15841_s13 + $0x2b0] sm:$0xff] (!%p12902_p6)  ;;  %v11064_v28 = vld [vmem:[%s15841_s13 + $0x2c8] sm:$0xff] (!%p12902_p6) }
 0x62a   : > { %v10712_v32 = vpop.f32.mrb[73].mxu1  ;;  %v10672_v44 = vadd.f32 %v10671_v43, %v17614_v18  ;;  %v10673_v19 = vpop.f32.mrb[74].mxu0  ;;  %v10990_v43 = vld [vmem:[%s15841_s13 + $0x78] sm:$0xff] (!%p12902_p6) }
 0x62b   : > { %v10714_v42 = vpop.f32.mrb[74].mxu1  ;;  %v10711_v46 = vadd.f32 %v10710_v37, %v10670_v59  ;;  %v10674_v50 = vpop.f32.mrb[75].mxu0  ;;  %v10988_v37 = vld [vmem:[%s15841_s13 + $0x68] sm:$0xff] (!%p12902_p6)  ;;  %v10986_v59 = vld [vmem:[%s15841_s13 + $0x58] sm:$0xff] (!%p12902_p6)  ;;  %v10983_v19 = vld [vmem:[%s15841_s13 + $0x40] sm:$0xff] (!%p12902_p6)  ;;  %12977 = vmatpush1.bf16.msra.mxu1 (!%p12902_p6), %v12976_v35  ;;  %v12934_v35 = vpack.c.bf16 (!%p12902_p6), %v11028_v4, %v11024_v29 }
 0x62c   : > { %v10715_v41 = vpop.f32.mrb[75].mxu1  ;;  %v10713_v27 = vadd.f32 %v10712_v32, %v10672_v44  ;;  %v12914_v32 = vpack.c.bf16 (!%p12902_p6), %v10988_v37, %v10984_v36  ;;  %v12978_v44 = vpack.c.bf16 (!%p12902_p6), %v10990_v43, %v10986_v59  ;;  %v10987_v42 = vld [vmem:[%s15841_s13 + $0x60] sm:$0xff] (!%p12902_p6)  ;;  %v12996_v36 = vpack.c.bf16 (!%p12902_p6), %v11021_v30, %v11017_v34  ;;  %v11025_v43 = vld [vmem:[%s15841_s13 + $0x190] sm:$0xff] (!%p12902_p6)  ;;  %v11068_v34 = vld [vmem:[%s15841_s13 + $0x2e8] sm:$0xff] (!%p12902_p6) }
 0x62d   : > { %v12916_v50 = vpack.c.bf16 (!%p12902_p6), %v10987_v42, %v10983_v19  ;;  %v10989_v41 = vld [vmem:[%s15841_s13 + $0x70] sm:$0xff] (!%p12902_p6)  ;;  %v11023_v37 = vld [vmem:[%s15841_s13 + $0x180] sm:$0xff] (!%p12902_p6)  ;;  %v11032_v19 = vld [vmem:[%s15841_s13 + $0x1c8] sm:$0xff] (!%p12902_p6) }
 0x62e   : > { %12915 = vmatprep.subr.bf16.mxu0 (!%p12902_p6), %v12914_v32  ;;  %12979 = vmatprep.subr.bf16.mxu1 (!%p12902_p6), %v12978_v44  ;;  %v11027_v59 = vld [vmem:[%s15841_s13 + $0x1a0] sm:$0xff] (!%p12902_p6)  ;;  %v12998_v32 = vpack.c.bf16 (!%p12902_p6), %v11030_v38, %v11026_v26  ;;  %v11029_v44 = vld [vmem:[%s15841_s13 + $0x1b0] sm:$0xff] (!%p12902_p6)  ;;  %v11036_v42 = vld [vmem:[%s15841_s13 + $0x1e8] sm:$0xff] (!%p12902_p6)  ;;  %v12954_v38 = vpack.c.bf16 (!%p12902_p6), %v11068_v34, %v11064_v28 }
 0x62f   : > { %12917 = vmatpush1.bf16.msra.mxu0 (!%p12902_p6), %v12916_v50  ;;  %v11038_v50 = vld [vmem:[%s15841_s13 + $0x1f8] sm:$0xff] (!%p12902_p6)  ;;  %v11063_v4 = vld [vmem:[%s15841_s13 + $0x2c0] sm:$0xff] (!%p12902_p6) }
 0x630   : > { %v11070_v30 = vld [vmem:[%s15841_s13 + $0x2f8] sm:$0xff] (!%p12902_p6) }
 0x668   : > { %v10751_v48 = vpop.f32.mrb[76].mxu0 }
 0x669   : > { %v10792_v23 = vpop.f32.mrb[76].mxu1  ;;  %v10752_v47 = vadd.f32 %v10751_v48, %v10711_v46  ;;  %v10753_v33 = vpop.f32.mrb[77].mxu0  ;;  %v10985_v46 = vld [vmem:[%s15841_s13 + $0x50] sm:$0xff] (!%p12902_p6)  ;;  %v10996_v48 = vld [vmem:[%s15841_s13 + $0xa8] sm:$0xff] (!%p12902_p6) }
 0x66a   : > { %v10794_v51 = vpop.f32.mrb[77].mxu1  ;;  %v10754_v56 = vadd.f32 %v10753_v33, %v10713_v27  ;;  %v10755_v53 = vpop.f32.mrb[78].mxu0  ;;  %v10992_v27 = vld [vmem:[%s15841_s13 + $0x88] sm:$0xff] (!%p12902_p6)  ;;  %v10994_v33 = vld [vmem:[%s15841_s13 + $0x98] sm:$0xff] (!%p12902_p6) }
 0x66b   : > { %v10796_v54 = vpop.f32.mrb[78].mxu1  ;;  %v10793_v52 = vadd.f32 %v10792_v23, %v10752_v47  ;;  %v10756_v55 = vpop.f32.mrb[79].mxu0  ;;  %v12980_v23 = vpack.c.bf16 (!%p12902_p6), %v10989_v41, %v10985_v46  ;;  %v12918_v47 = vpack.c.bf16 (!%p12902_p6), %v10996_v48, %v10992_v27  ;;  %v11034_v46 = vld [vmem:[%s15841_s13 + $0x1d8] sm:$0xff] (!%p12902_p6)  ;;  %v12936_v41 = vpack.c.bf16 (!%p12902_p6), %v11027_v59, %v11023_v37  ;;  %v11072_v59 = vld [vmem:[%s15841_s13 + $0x308] sm:$0xff] (!%p12902_p6) }
 0x66c   : > { %v10797_v57 = vpop.f32.mrb[79].mxu1  ;;  %v10795_v16 = vadd.f32 %v10794_v51, %v10754_v56  ;;  %v10998_v51 = vld [vmem:[%s15841_s13 + $0xb8] sm:$0xff] (!%p12902_p6)  ;;  %v10991_v56 = vld [vmem:[%s15841_s13 + $0x80] sm:$0xff] (!%p12902_p6)  ;;  %v10997_v55 = vld [vmem:[%s15841_s13 + $0xb0] sm:$0xff] (!%p12902_p6)  ;;  %v13000_v27 = vpack.c.bf16 (!%p12902_p6), %v11029_v44, %v11025_v43  ;;  %v12938_v48 = vpack.c.bf16 (!%p12902_p6), %v11036_v42, %v11032_v19 }
 0x66d   : > { %v12982_v53 = vpack.c.bf16 (!%p12902_p6), %v10998_v51, %v10994_v33  ;;  %v10995_v54 = vld [vmem:[%s15841_s13 + $0xa0] sm:$0xff] (!%p12902_p6)  ;;  %12981 = vmatpush1.bf16.msra.mxu1 (!%p12902_p6), %v12980_v23  ;;  %12919 = vmatprep.subr.bf16.mxu0 (!%p12902_p6), %v12918_v47  ;;  %v11033_v33 = vld [vmem:[%s15841_s13 + $0x1d0] sm:$0xff] (!%p12902_p6)  ;;  %v13002_v51 = vpack.c.bf16 (!%p12902_p6), %v11038_v50, %v11034_v46  ;;  %v11076_v43 = vld [vmem:[%s15841_s13 + $0x328] sm:$0xff] (!%p12902_p6) }
 0x66e   : > { %v12920_v57 = vpack.c.bf16 (!%p12902_p6), %v10995_v54, %v10991_v56  ;;  %v11031_v23 = vld [vmem:[%s15841_s13 + $0x1c0] sm:$0xff] (!%p12902_p6)  ;;  %v11037_v56 = vld [vmem:[%s15841_s13 + $0x1f0] sm:$0xff] (!%p12902_p6)  ;;  %v11044_v54 = vld [vmem:[%s15841_s13 + $0x228] sm:$0xff] (!%p12902_p6) }
 0x66f   : > { %12983 = vmatprep.subr.bf16.mxu1 (!%p12902_p6), %v12982_v53  ;;  %v11035_v47 = vld [vmem:[%s15841_s13 + $0x1e0] sm:$0xff] (!%p12902_p6)  ;;  %v11040_v53 = vld [vmem:[%s15841_s13 + $0x208] sm:$0xff] (!%p12902_p6)  ;;  %v11074_v44 = vld [vmem:[%s15841_s13 + $0x318] sm:$0xff] (!%p12902_p6) }
 0x670   : > { %12921 = vmatpush1.bf16.msra.mxu0 (!%p12902_p6), %v12920_v57  ;;  %v12940_v57 = vpack.c.bf16 (!%p12902_p6), %v11035_v47, %v11031_v23  ;;  %v11078_v19 = vld [vmem:[%s15841_s13 + $0x338] sm:$0xff] (!%p12902_p6)  ;;  %v11073_v23 = vld [vmem:[%s15841_s13 + $0x310] sm:$0xff] (!%p12902_p6) }
 0x671   : > { %v13022_v47 = vpack.c.bf16 (!%p12902_p6), %v11078_v19, %v11074_v44 }
 0x6a8   : > { %v10833_v61 = vpop.f32.mrb[80].mxu0 }
 0x6a9   : > { %v10874_v58 = vpop.f32.mrb[80].mxu1  ;;  %v10834_v62 = vadd.f32 %v10833_v61, %v10793_v52  ;;  %v10835_v18 = vpop.f32.mrb[81].mxu0  ;;  %v10993_v52 = vld [vmem:[%s15841_s13 + $0x90] sm:$0xff] (!%p12902_p6)  ;;  %v11004_v61 = vld [vmem:[%s15841_s13 + $0xe8] sm:$0xff] (!%p12902_p6) }
 0x6aa   : > { %v10876_v31 = vpop.f32.mrb[81].mxu1  ;;  %v10836_v60 = vadd.f32 %v10835_v18, %v10795_v16  ;;  %v10837_v0 = vpop.f32.mrb[82].mxu0  ;;  %v11000_v16 = vld [vmem:[%s15841_s13 + $0xc8] sm:$0xff] (!%p12902_p6) }
 0x6ab   : > { %v10878_v6 = vpop.f32.mrb[82].mxu1  ;;  %v10875_v45 = vadd.f32 %v10874_v58, %v10834_v62  ;;  %v10838_v3 = vpop.f32.mrb[83].mxu0  ;;  %v11002_v58 = vld [vmem:[%s15841_s13 + $0xd8] sm:$0xff] (!%p12902_p6)  ;;  %v12984_v62 = vpack.c.bf16 (!%p12902_p6), %v10997_v55, %v10993_v52  ;;  %v12922_v18 = vpack.c.bf16 (!%p12902_p6), %v11004_v61, %v11000_v16  ;;  %v11003_v0 = vld [vmem:[%s15841_s13 + $0xe0] sm:$0xff] (!%p12902_p6)  ;;  %v13004_v16 = vpack.c.bf16 (!%p12902_p6), %v11037_v56, %v11033_v33  ;;  %v11077_v33 = vld [vmem:[%s15841_s13 + $0x330] sm:$0xff] (!%p12902_p6) }
 0x6ac   : > { %v10879_v2 = vpop.f32.mrb[83].mxu1  ;;  %v10877_v49 = vadd.f32 %v10876_v31, %v10836_v60  ;;  %v11006_v31 = vld [vmem:[%s15841_s13 + $0xf8] sm:$0xff] (!%p12902_p6)  ;;  %v10999_v60 = vld [vmem:[%s15841_s13 + $0xc0] sm:$0xff] (!%p12902_p6)  ;;  %v11005_v3 = vld [vmem:[%s15841_s13 + $0xf0] sm:$0xff] (!%p12902_p6)  ;;  %v12942_v61 = vpack.c.bf16 (!%p12902_p6), %v11044_v54, %v11040_v53 }
 0x6ad   : > { %v12986_v6 = vpack.c.bf16 (!%p12902_p6), %v11006_v31, %v11002_v58  ;;  %v11008_v2 = vld [vmem:[%s15841_s13 + $0x108] sm:$0xff] (!%p12902_p6)  ;;  %12985 = vmatpush1.bf16.msra.mxu1 (!%p12902_p6), %v12984_v62  ;;  %12923 = vmatprep.subr.bf16.mxu0 (!%p12902_p6), %v12922_v18  ;;  %v11042_v52 = vld [vmem:[%s15841_s13 + $0x218] sm:$0xff] (!%p12902_p6)  ;;  %v11039_v58 = vld [vmem:[%s15841_s13 + $0x200] sm:$0xff] (!%p12902_p6) }
 0x6ae   : > { %v11046_v55 = vld [vmem:[%s15841_s13 + $0x238] sm:$0xff] (!%p12902_p6)  ;;  %v11043_v62 = vld [vmem:[%s15841_s13 + $0x220] sm:$0xff] (!%p12902_p6)  ;;  %v11041_v18 = vld [vmem:[%s15841_s13 + $0x210] sm:$0xff] (!%p12902_p6) }
 0x6af   : > { %12987 = vmatprep.subr.bf16.mxu1 (!%p12902_p6), %v12986_v6  ;;  %v13006_v31 = vpack.c.bf16 (!%p12902_p6), %v11046_v55, %v11042_v52  ;;  %v11052_v6 = vld [vmem:[%s15841_s13 + $0x268] sm:$0xff] (!%p12902_p6)  ;;  %v11082_v53 = vld [vmem:[%s15841_s13 + $0x358] sm:$0xff] (!%p12902_p6)  ;;  %v13024_v55 = vpack.c.bf16 (!%p12902_p6), %v11077_v33, %v11073_v23 }
 0x6b0   : > { %v11084_v56 = vld [vmem:[%s15841_s13 + $0x368] sm:$0xff] (!%p12902_p6)  ;;  %v11086_v54 = vld [vmem:[%s15841_s13 + $0x378] sm:$0xff] (!%p12902_p6) }
 0x6e8   : > { %v10915_v7 = vpop.f32.mrb[84].mxu0 }
 0x6e9   : > { %v10956_v12 = vpop.f32.mrb[84].mxu1  ;;  %v10916_v9 = vadd.f32 %v10915_v7, %v10875_v45  ;;  %v10917_v10 = vpop.f32.mrb[85].mxu0  ;;  %v11001_v45 = vld [vmem:[%s15841_s13 + $0xd0] sm:$0xff] (!%p12902_p6)  ;;  %v11010_v7 = vld [vmem:[%s15841_s13 + $0x118] sm:$0xff] (!%p12902_p6) }
 0x6ea   : > { %v10958_v8 = vpop.f32.mrb[85].mxu1  ;;  %v10918_v13 = vadd.f32 %v10917_v10, %v10877_v49  ;;  %v10919_v17 = vpop.f32.mrb[86].mxu0  ;;  %10970 = sbr.rel (%p12902_p6) target bundleno = 2039 (0x7f7), region = 56  ;;  %v11012_v49 = vld [vmem:[%s15841_s13 + $0x128] sm:$0xff] (!%p12902_p6)  ;;  %v12988_v10 = vpack.c.bf16 (!%p12902_p6), %v11005_v3, %v11001_v45  ;;  %v11050_v45 = vld [vmem:[%s15841_s13 + $0x258] sm:$0xff] (!%p12902_p6) }
 0x6eb   : > { %v10960_v39 = vpop.f32.mrb[86].mxu1  ;;  %v10957_v40 = vadd.f32 %v10956_v12, %v10916_v9  ;;  %v10920_v15 = vpop.f32.mrb[87].mxu0  ;;  %v11014_v12 = vld [vmem:[%s15841_s13 + $0x138] sm:$0xff] (!%p12902_p6)  ;;  %v12924_v9 = vpack.c.bf16 (!%p12902_p6), %v11003_v0, %v10999_v60  ;;  %v11009_v17 = vld [vmem:[%s15841_s13 + $0x110] sm:$0xff] (!%p12902_p6)  ;;  %v11048_v0 = vld [vmem:[%s15841_s13 + $0x248] sm:$0xff] (!%p12902_p6) }
 0x6ec   : > { %v10961_v20 = vpop.f32.mrb[87].mxu1  ;;  %v10959_v24 = vadd.f32 %v10958_v8, %v10918_v13  ;;  %v12926_v8 = vpack.c.bf16 (!%p12902_p6), %v11012_v49, %v11008_v2  ;;  %v11011_v13 = vld [vmem:[%s15841_s13 + $0x120] sm:$0xff] (!%p12902_p6)  ;;  %v12990_v39 = vpack.c.bf16 (!%p12902_p6), %v11014_v12, %v11010_v7  ;;  %v11020_v15 = vld [vmem:[%s15841_s13 + $0x168] sm:$0xff] (!%p12902_p6)  ;;  %12989 = vmatpush1.bf16.msra.mxu1 (!%p12902_p6), %v12988_v10  ;;  %v11045_v60 = vld [vmem:[%s15841_s13 + $0x230] sm:$0xff] (!%p12902_p6)  ;;  %v12944_v2 = vpack.c.bf16 (!%p12902_p6), %v11043_v62, %v11039_v58 }
 0x6ed   : > { %v10963_v63 = vadd.f32 %v10957_v40, %v357_v11  ;;  %v11007_v11 = vld [vmem:[%s15841_s13 + $0x100] sm:$0xff] (!%p12902_p6)  ;;  %v11013_v40 = vld [vmem:[%s15841_s13 + $0x130] sm:$0xff] (!%p12902_p6)  ;;  %v11018_v20 = vld [vmem:[%s15841_s13 + $0x158] sm:$0xff] (!%p12902_p6)  ;;  %12925 = vmatpush1.bf16.msra.mxu0 (!%p12902_p6), %v12924_v9  ;;  %v13008_v49 = vpack.c.bf16 (!%p12902_p6), %v11045_v60, %v11041_v18  ;;  %v12946_v7 = vpack.c.bf16 (!%p12902_p6), %v11052_v6, %v11048_v0  ;;  %v13026_v62 = vpack.c.bf16 (!%p12902_p6), %v11086_v54, %v11082_v53 }
 0x6ee   : > { %v10964_v22 = vadd.f32 %v10959_v24, %v358_v14  ;;  %v11016_v14 = vld [vmem:[%s15841_s13 + $0x148] sm:$0xff] (!%p12902_p6)  ;;  %v11022_v24 = vld [vmem:[%s15841_s13 + $0x178] sm:$0xff] (!%p12902_p6)  ;;  %12927 = vmatprep.subr.bf16.mxu0 (!%p12902_p6), %v12926_v8  ;;  %12991 = vmatprep.subr.bf16.mxu1 (!%p12902_p6), %v12990_v39  ;;  %v11047_v12 = vld [vmem:[%s15841_s13 + $0x240] sm:$0xff] (!%p12902_p6) }
 0x6ef   : > { %10965 = vst [vmem:[#allocation2] sm:$0xff] %v10963_v63  ;;  %v12928_v63 = vpack.c.bf16 (!%p12902_p6), %v11011_v13, %v11007_v11  ;;  %v12930_v21 = vpack.c.bf16 (!%p12902_p6), %v11020_v15, %v11016_v14  ;;  %v12994_v1 = vpack.c.bf16 (!%p12902_p6), %v11022_v24, %v11018_v20  ;;  %v11054_v3 = vld [vmem:[%s15841_s13 + $0x278] sm:$0xff] (!%p12902_p6)  ;;  %v11051_v9 = vld [vmem:[%s15841_s13 + $0x260] sm:$0xff] (!%p12902_p6)  ;;  %v11049_v10 = vld [vmem:[%s15841_s13 + $0x250] sm:$0xff] (!%p12902_p6) }
 0x6f0   : > { %10966 = vst [vmem:[#allocation2 + $0x8] sm:$0xff] %v10964_v22  ;;  %v12992_v22 = vpack.c.bf16 (!%p12902_p6), %v11013_v40, %v11009_v17  ;;  %v13010_v8 = vpack.c.bf16 (!%p12902_p6), %v11054_v3, %v11050_v45  ;;  %v11053_v11 = vld [vmem:[%s15841_s13 + $0x270] sm:$0xff] (!%p12902_p6)  ;;  %v11056_v13 = vld [vmem:[%s15841_s13 + $0x288] sm:$0xff] (!%p12902_p6)  ;;  %v11058_v39 = vld [vmem:[%s15841_s13 + $0x298] sm:$0xff] (!%p12902_p6)  ;;  %v12948_v14 = vpack.c.bf16 (!%p12902_p6), %v11051_v9, %v11047_v12 }
 0x6f1   : > { %12929 = vmatpush1.bf16.msra.mxu0 %v12928_v63  ;;  %v11060_v17 = vld [vmem:[%s15841_s13 + $0x2a8] sm:$0xff]  ;;  %v11062_v40 = vld [vmem:[%s15841_s13 + $0x2b8] sm:$0xff]  ;;  %v13012_v15 = vpack.c.bf16 %v11053_v11, %v11049_v10  ;;  %v11055_v24 = vld [vmem:[%s15841_s13 + $0x280] sm:$0xff] }
 0x6f2   : > { %12993 = vmatpush1.bf16.msra.mxu1 %v12992_v22  ;;  %12931 = vmatprep.subr.bf16.mxu0 %v12930_v21  ;;  %v12950_v20 = vpack.c.bf16 %v11060_v17, %v11056_v13  ;;  %v11059_v63 = vld [vmem:[%s15841_s13 + $0x2a0] sm:$0xff]  ;;  %v11057_v22 = vld [vmem:[%s15841_s13 + $0x290] sm:$0xff]  ;;  %v13014_v21 = vpack.c.bf16 %v11062_v40, %v11058_v39  ;;  %v11092_v60 = vld [vmem:[%s15841_s13 + $0x3a8] sm:$0xff] }
 0x6f3   : > { %12995 = vmatprep.subr.bf16.mxu1 %v12994_v1  ;;  %v11066_v1 = vld [vmem:[%s15841_s13 + $0x2d8] sm:$0xff]  ;;  %v12952_v29 = vpack.c.bf16 %v11059_v63, %v11055_v24  ;;  %v13016_v26 = vpack.c.bf16 %v11061_v5, %v11057_v22  ;;  %v11081_v58 = vld [vmem:[%s15841_s13 + $0x350] sm:$0xff]  ;;  %v11100_v11 = vld [vmem:[%s15841_s13 + $0x3e8] sm:$0xff] }
 0x6f4   : > { %v13018_v37 = vpack.c.bf16 %v11070_v30, %v11066_v1  ;;  %v11085_v18 = vld [vmem:[%s15841_s13 + $0x370] sm:$0xff]  ;;  %v11090_v0 = vld [vmem:[%s15841_s13 + $0x398] sm:$0xff] }
 0x6f5   : > { %12933 = vmatpush1.bf16.msra.mxu0 %v12932_v25  ;;  %v11067_v25 = vld [vmem:[%s15841_s13 + $0x2e0] sm:$0xff]  ;;  %v11094_v6 = vld [vmem:[%s15841_s13 + $0x3b8] sm:$0xff]  ;;  %v13028_v3 = vpack.c.bf16 %v11085_v18, %v11081_v58  ;;  %v11089_v12 = vld [vmem:[%s15841_s13 + $0x390] sm:$0xff] }
 0x6f6   : > { %12997 = vmatpush1.bf16.msra.mxu1 %v12996_v36  ;;  %12935 = vmatprep.subr.bf16.mxu0 %v12934_v35  ;;  %v11065_v36 = vld [vmem:[%s15841_s13 + $0x2d0] sm:$0xff]  ;;  %v12956_v46 = vpack.c.bf16 %v11067_v25, %v11063_v4  ;;  %v13030_v9 = vpack.c.bf16 %v11094_v6, %v11090_v0  ;;  %v11098_v13 = vld [vmem:[%s15841_s13 + $0x3d8] sm:$0xff] }
 0x6f7   : > { %12999 = vmatprep.subr.bf16.mxu1 %v12998_v32  ;;  %v11069_v35 = vld [vmem:[%s15841_s13 + $0x2f0] sm:$0xff]  ;;  %v11102_v17 = vld [vmem:[%s15841_s13 + $0x3f8] sm:$0xff] }
 0x6f8   : > { %v10972_v32 = vld [vmem:[#allocation2 + $0x8] sm:$0xff]  ;;  %v13020_v50 = vpack.c.bf16 %v11069_v35, %v11065_v36  ;;  %v13034_v24 = vpack.c.bf16 %v11102_v17, %v11098_v13  ;;  %v10971_v5 = vld [vmem:[#allocation2] sm:$0xff] }
 0x6f9   : > { %12937 = vmatpush1.bf16.msra.mxu0 %v12936_v41  ;;  %v10974_v42 = vmax.f32 %v10972_v32, 0.0  ;;  %v12958_v41 = vpack.c.bf16 %v11076_v43, %v11072_v59  ;;  %v11093_v10 = vld [vmem:[%s15841_s13 + $0x3b0] sm:$0xff]  ;;  %v10973_v34 = vmax.f32 %v10971_v5, 0.0 }
 0x6fa   : > { %13001 = vmatpush1.bf16.msra.mxu1 %v13000_v27  ;;  %12939 = vmatprep.subr.bf16.mxu0 %v12938_v48  ;;  %v11071_v27 = vld [vmem:[%s15841_s13 + $0x300] sm:$0xff]  ;;  %v13032_v40 = vpack.c.bf16 %v11093_v10, %v11089_v12  ;;  %v11097_v63 = vld [vmem:[%s15841_s13 + $0x3d0] sm:$0xff] }
 0x6fb   : > { %13003 = vmatprep.subr.bf16.mxu1 %v13002_v51  ;;  %v11075_v48 = vld [vmem:[%s15841_s13 + $0x320] sm:$0xff]  ;;  %v11080_v51 = vld [vmem:[%s15841_s13 + $0x348] sm:$0xff]  ;;  %11167 = vmatprep.mubr.f32.mxu0 %v10974_v42  ;;  %v11101_v22 = vld [vmem:[%s15841_s13 + $0x3f0] sm:$0xff] }
 0x6fc   : > { %11238 = vmatprep.mubr.f32.mxu1 %v10974_v42  ;;  %v12960_v52 = vpack.c.bf16 %v11075_v48, %v11071_v27  ;;  %v13036_v28 = vpack.c.bf16 %v11101_v22, %v11097_v63 }
 0x6fd   : > { %12941 = vmatpush1.bf16.msra.mxu0 %v12940_v57  ;;  %v12962_v57 = vpack.c.bf16 %v11084_v56, %v11080_v51 }
 0x6fe   : > { %13005 = vmatpush1.bf16.msra.mxu1 %v13004_v16  ;;  %12943 = vmatprep.subr.bf16.mxu0 %v12942_v61  ;;  %v11079_v16 = vld [vmem:[%s15841_s13 + $0x340] sm:$0xff] }
 0x6ff   : > { %13007 = vmatprep.subr.bf16.mxu1 %v13006_v31  ;;  %v11083_v61 = vld [vmem:[%s15841_s13 + $0x360] sm:$0xff]  ;;  %v11088_v31 = vld [vmem:[%s15841_s13 + $0x388] sm:$0xff] }
 0x700   : > { %v12964_v45 = vpack.c.bf16 %v11083_v61, %v11079_v16 }
 0x701   : > { %12945 = vmatpush1.bf16.msra.mxu0 %v12944_v2  ;;  %v12966_v2 = vpack.c.bf16 %v11092_v60, %v11088_v31 }
 0x702   : > { %13009 = vmatpush1.bf16.msra.mxu1 %v13008_v49  ;;  %12947 = vmatprep.subr.bf16.mxu0 %v12946_v7  ;;  %v11087_v49 = vld [vmem:[%s15841_s13 + $0x380] sm:$0xff] }
 0x703   : > { %13011 = vmatprep.subr.bf16.mxu1 %v13010_v8  ;;  %v11091_v7 = vld [vmem:[%s15841_s13 + $0x3a0] sm:$0xff]  ;;  %v11096_v8 = vld [vmem:[%s15841_s13 + $0x3c8] sm:$0xff] }
 0x704   : > { %v12968_v39 = vpack.c.bf16 %v11091_v7, %v11087_v49 }
 0x705   : > { %12949 = vmatpush1.bf16.msra.mxu0 %v12948_v14  ;;  %v12970_v14 = vpack.c.bf16 %v11100_v11, %v11096_v8 }
 0x706   : > { %13013 = vmatpush1.bf16.msra.mxu1 %v13012_v15  ;;  %12951 = vmatprep.subr.bf16.mxu0 %v12950_v20  ;;  %v11095_v15 = vld [vmem:[%s15841_s13 + $0x3c0] sm:$0xff] }
 0x707   : > { %13015 = vmatprep.subr.bf16.mxu1 %v13014_v21  ;;  %v11099_v20 = vld [vmem:[%s15841_s13 + $0x3e0] sm:$0xff] }
 0x708   : > { %v12972_v21 = vpack.c.bf16 %v11099_v20, %v11095_v15 }
 0x709   : > { %12953 = vmatpush1.bf16.msra.mxu0 %v12952_v29 }
 0x70a   : > { %13017 = vmatpush1.bf16.msra.mxu1 %v13016_v26  ;;  %12955 = vmatprep.subr.bf16.mxu0 %v12954_v38 }
 0x70b   : > { %13019 = vmatprep.subr.bf16.mxu1 %v13018_v37 }
 0x70d   : > { %12957 = vmatpush1.bf16.msra.mxu0 %v12956_v46 }
 0x70e   : > { %13021 = vmatpush1.bf16.msra.mxu1 %v13020_v50  ;;  %12959 = vmatprep.subr.bf16.mxu0 %v12958_v41 }
 0x70f   : > { %13023 = vmatprep.subr.bf16.mxu1 %v13022_v47 }
 0x711   : > { %12961 = vmatpush1.bf16.msra.mxu0 %v12960_v52 }
 0x712   : > { %13025 = vmatpush1.bf16.msra.mxu1 %v13024_v55  ;;  %12963 = vmatprep.subr.bf16.mxu0 %v12962_v57 }
 0x713   : > { %13027 = vmatprep.subr.bf16.mxu1 %v13026_v62 }
 0x715   : > { %12965 = vmatpush1.bf16.msra.mxu0 %v12964_v45 }
 0x716   : > { %13029 = vmatpush1.bf16.msra.mxu1 %v13028_v3  ;;  %12967 = vmatprep.subr.bf16.mxu0 %v12966_v2 }
 0x717   : > { %13031 = vmatprep.subr.bf16.mxu1 %v13030_v9 }
 0x719   : > { %12969 = vmatpush1.bf16.msra.mxu0 %v12968_v39 }
 0x71a   : > { %13033 = vmatpush1.bf16.msra.mxu1 %v13032_v40  ;;  %12971 = vmatprep.subr.bf16.mxu0 %v12970_v14 }
 0x71b   : > { %13035 = vmatprep.subr.bf16.mxu1 %v13034_v24 }
 0x71d   : > { %12973 = vmatpush1.bf16.msra.mxu0 %v12972_v21 }
 0x71e   : > { %13037 = vmatpush1.bf16.msra.mxu1 %v13036_v28 }
 0x720   : > { %11168 = vmatmul.mubr.f32.vlgmr.msra.gmra.mrb[0].mxu0 %v10973_v34 }
 0x721   : > { %11239 = vmatmul.mubr.f32.vlgmr.msra.gmra.mrb[0].mxu1 %v10973_v34 }
 0x7f3   : > { %v11169_v1 = vpop.f32.mrb[0].mxu0 }
 0x7f4   : > { %11245 = vst [vmem:[%s15834_s14] sm:$0xff] %v11169_v1  ;;  %v11240_v30 = vpop.f32.mrb[0].mxu1  ;;  %v11171_v29 = vpop.f32.mrb[1].mxu0 }
 0x7f5   : > { %11247 = vst [vmem:[%s15834_s14 + $0x10] sm:$0xff] %v11240_v30  ;;  %11246 = vst [vmem:[%s15834_s14 + $0x8] sm:$0xff] %v11171_v29  ;;  %v11242_v4 = vpop.f32.mrb[1].mxu1 }
 0x7f6   : > { %11248 = vst [vmem:[%s15834_s14 + $0x18] sm:$0xff] %v11242_v4 }
 0x7f7 PF: > { %s20_s25 = sadd.s32 1, %s15534_s25   ;;  %s17858_s21 = sld [smem:[#allocation10_spill]] }
 0x7f8   : > { %p17_p9 = scmp.ge.s32.totalorder %s20_s25, 6   ;;  %s17859_s17 = sld [smem:[#allocation14_spill]] }
 0x7f9   : > { %s17860_s22 = sld [smem:[#allocation11_spill]]  ;;  %s17861_s20 = sld [smem:[#allocation15_spill]] }
 0x7fa   : > { %s17862_s27 = sld [smem:[#allocation12_spill]]  ;;  %s17863_s6 = sld [smem:[#allocation13_spill]] }
 0x7fb   : > { %s17864_s15 = smov %s15498_s16  ;;  %s17866_s18 = smov %s15510_s19 }
 0x7fc   :  { %19 = sbr.rel (!%p17_p9) target bundleno = 11 (0xb), region = 111 }
 0x7fd   : > { %s17865_s16 = smov %s17858_s21  ;;  %s17868_s21 = smov %s15526_s23 }
 0x7ff   : > { %s17867_s19 = smov %s17860_s22  ;;  %s17869_s22 = smov %s15530_s24 }
 0x800   : > { %s17870_s23 = smov %s17862_s27  ;;  %s17871_s24 = smov %s17863_s6 }
 0x803   :  { %11270 = vsyncpa [#allocation4], 1 }
 0x804   :  { %11272 = vsyncpa [#allocation4 + $0x1], 1 }
 0x805   :  { %11273 = vsyncpa [#allocation6], 1 }
 0x806   :  { %11275 = vsyncpa [#allocation6 + $0x1], 1 }

</bundles_post_ra>
